<compile_context>
chip_gen: v7x
topology: tpu7x:2x2x1
jax: 0.10.0
libtpu: 0.0.40
codegen_flags: <defaults>
</compile_context>

<pallas_src>
import functools

import numpy as np
import jax
import jax.numpy as jnp
from jax.experimental import pallas as pl
from jax.experimental.pallas import tpu as pltpu

# ----------------------------------------------------------------------------
# Model dimensions (fixed by the PyTorch module)
# ----------------------------------------------------------------------------
FEAT = 5          # inputFeat_dim
L_IN = 120        # input_frameLeng
L_ENC = 15        # encode_frameLeng = 120 / 8
C1, C2, C3 = 10, 20, 40
LIN1 = 100
FLAT = 600        # feature count at every conv level (5*120 = 10*60 = ... = 40*15)
BN_EPS = 1e-5


# ----------------------------------------------------------------------------
# Fused kernel: whole forward pass for one batch block, everything in VMEM
# ----------------------------------------------------------------------------
def _vae_kernel(x_ref, w6_ref, aux6_ref, el1_w_ref, el2_w_ref, el2_b_ref,
                dl1_w_ref, dl2_w_ref, aux1_ref, recon_ref, ml_ref, *, latent):
    def gemm(h, w):
        # bf16 MXU operands, f32 accumulation.
        return jnp.dot(h.astype(jnp.bfloat16), w,
                       preferred_element_type=jnp.float32)

    def bias_relu_bn(y, ref, row):
        # Conv/Linear -> bias -> ReLU -> folded (eval-mode) BatchNorm, all f32.
        return (jnp.maximum(y + ref[row:row + 1, :], 0.0)
                * ref[row + 1:row + 2, :] + ref[row + 2:row + 3, :])

    # ---- encoder convs: each is a dense 600x600 operator on the channel-major
    #      flattened activation ----
    h = x_ref[...]
    h = bias_relu_bn(gemm(h, w6_ref[0]), aux6_ref, 0)
    h = bias_relu_bn(gemm(h, w6_ref[1]), aux6_ref, 3)
    h = bias_relu_bn(gemm(h, w6_ref[2]), aux6_ref, 6)   # == torch x.view(B, 600)

    # ---- encoder linear 1 ----
    h = bias_relu_bn(gemm(h, el1_w_ref[...]), aux1_ref, 0)

    # ---- mu || logvar in one fused GEMM ----
    ml = gemm(h, el2_w_ref[...]) + el2_b_ref[...]
    ml_ref[...] = ml
    z = ml[:, :latent]        # eval-mode reparameterize(mu, logvar) == mu
    # TODO(synk): training-mode stochastic reparameterization and
    # batch-statistic BatchNorm are not implemented (eval semantics only).

    # ---- decoder linears ----
    d = bias_relu_bn(gemm(z, dl1_w_ref[...]), aux1_ref, 3)
    d = bias_relu_bn(gemm(d, dl2_w_ref[...]), aux6_ref, 9)   # == torch .view

    # ---- decoder transposed convs (bias only), also dense 600x600 ----
    d = gemm(d, w6_ref[3]) + aux6_ref[12:13, :]
    d = gemm(d, w6_ref[4]) + aux6_ref[13:14, :]
    d = gemm(d, w6_ref[5]) + aux6_ref[14:15, :]
    recon_ref[...] = d


# ----------------------------------------------------------------------------
# One-time parameter packing (outside jit): fold each conv into a dense matrix
# acting on the channel-major flat layout  idx = c * L + l.
# ----------------------------------------------------------------------------
def _dense_conv(w, lin):
    """Conv1d(K=5, stride=2, padding=2), torch weight layout (Cout, Cin, K)."""
    cout, cin, K = w.shape
    lout = lin // 2
    m = np.zeros((cin * lin, cout * lout), np.float32)
    for lo in range(lout):
        for t in range(K):
            li = 2 * lo + t - 2
            if 0 <= li < lin:
                m[li:cin * lin:lin, lo:cout * lout:lout] += w[:, :, t].T
    return m


def _dense_deconv(w, lin):
    """ConvTranspose1d(K=5, s=2, p=2, output_padding=1), weight (Cin, Cout, K)."""
    cin, cout, K = w.shape
    lout = 2 * lin
    m = np.zeros((cin * lin, cout * lout), np.float32)
    for li in range(lin):
        for t in range(K):
            lo = 2 * li + t - 2
            if 0 <= lo < lout:
                m[li:cin * lin:lin, lo:cout * lout:lout] += w[:, :, t]
    return m


def _fold_bn(p, prefix):
    g = np.asarray(p[prefix + "_bn_gamma"], np.float32)
    b = np.asarray(p[prefix + "_bn_beta"], np.float32)
    m = np.asarray(p[prefix + "_bn_mean"], np.float32)
    v = np.asarray(p[prefix + "_bn_var"], np.float32)
    scale = g / np.sqrt(v + BN_EPS)
    shift = b - m * scale
    return scale, shift


def prepare_params(p):
    f = lambda a: np.asarray(a, np.float32)

    dense, aux600 = [], []
    # encoder convs (bias / BN scale / BN shift tiled per position)
    for name, lin in (("ec1", L_IN), ("ec2", 60), ("ec3", 30)):
        w = f(p[name + "_w"])
        lout = lin // 2
        dense.append(_dense_conv(w, lin))
        s, sh = _fold_bn(p, name)
        aux600 += [np.repeat(f(p[name + "_b"]), lout),
                   np.repeat(s, lout), np.repeat(sh, lout)]
    # decoder_lin2 bias / BN (already 600-wide)
    s, sh = _fold_bn(p, "dl2")
    aux600 += [f(p["dl2_b"]), s, sh]
    # decoder transposed convs (bias only)
    for name, lin in (("dc1", L_ENC), ("dc2", 30), ("dc3", 60)):
        w = f(p[name + "_w"])
        lout = 2 * lin
        dense.append(_dense_deconv(w, lin))
        aux600.append(np.repeat(f(p[name + "_b"]), lout))

    el1_s, el1_sh = _fold_bn(p, "el1")
    dl1_s, dl1_sh = _fold_bn(p, "dl1")
    aux100 = np.stack([f(p["el1_b"]), el1_s, el1_sh,
                       f(p["dl1_b"]), dl1_s, dl1_sh])

    return {
        "w6": jnp.asarray(np.stack(dense), jnp.bfloat16),          # (6, 600, 600)
        "aux600": jnp.asarray(np.stack(aux600), jnp.float32),      # (15, 600)
        "el1_w": jnp.asarray(f(p["el1_w"]).T, jnp.bfloat16),       # (600, 100)
        "el2_w": jnp.asarray(
            np.concatenate([f(p["el21_w"]).T, f(p["el22_w"]).T], axis=1),
            jnp.bfloat16),                                         # (100, 2L)
        "el2_b": jnp.asarray(
            np.concatenate([f(p["el21_b"]), f(p["el22_b"])])[None, :],
            jnp.float32),                                          # (1, 2L)
        "dl1_w": jnp.asarray(f(p["dl1_w"]).T, jnp.bfloat16),       # (L, 100)
        "dl2_w": jnp.asarray(f(p["dl2_w"]).T, jnp.bfloat16),       # (100, 600)
        "aux100": jnp.asarray(aux100, jnp.float32),                # (6, 100)
    }


# ----------------------------------------------------------------------------
# Raw parameters — torch layouts (Conv1d (Cout,Cin,K), ConvTranspose1d
# (Cin,Cout,K), Linear.weight (out,in)), deterministic init, non-trivial
# BatchNorm running statistics so the folding is actually exercised.
# ----------------------------------------------------------------------------
def init_params(key, latent_dim):
    keys = iter(jax.random.split(key, 64))
    p = {}

    def u(shape, fan_in):
        bound = 1.0 / np.sqrt(float(fan_in))
        return jax.random.uniform(next(keys), shape, jnp.float32, -bound, bound)

    def bn_p(prefix, n):
        p[prefix + "_bn_gamma"] = 1.0 + 0.2 * jax.random.uniform(next(keys), (n,), jnp.float32, -1., 1.)
        p[prefix + "_bn_beta"] = 0.1 * jax.random.uniform(next(keys), (n,), jnp.float32, -1., 1.)
        p[prefix + "_bn_mean"] = 0.2 * jax.random.uniform(next(keys), (n,), jnp.float32, -1., 1.)
        p[prefix + "_bn_var"] = 1.0 + 0.5 * jax.random.uniform(next(keys), (n,), jnp.float32, -1., 1.)

    def conv_p(prefix, cin, cout, bn=True):
        p[prefix + "_w"] = u((cout, cin, 5), cin * 5)
        p[prefix + "_b"] = u((cout,), cin * 5)
        if bn:
            bn_p(prefix, cout)

    def deconv_p(prefix, cin, cout):
        p[prefix + "_w"] = u((cin, cout, 5), cout * 5)
        p[prefix + "_b"] = u((cout,), cout * 5)

    def lin_p(prefix, fin, fout, bn=False):
        p[prefix + "_w"] = u((fout, fin), fin)       # torch layout (out, in)
        p[prefix + "_b"] = u((fout,), fin)
        if bn:
            bn_p(prefix, fout)

    conv_p("ec1", FEAT, C1)
    conv_p("ec2", C1, C2)
    conv_p("ec3", C2, C3)
    lin_p("el1", FLAT, LIN1, bn=True)
    lin_p("el21", LIN1, latent_dim)
    lin_p("el22", LIN1, latent_dim)
    lin_p("dl1", latent_dim, LIN1, bn=True)
    lin_p("dl2", LIN1, FLAT, bn=True)
    deconv_p("dc1", C3, C2)
    deconv_p("dc2", C2, C1)
    deconv_p("dc3", C1, FEAT)
    return p


# ----------------------------------------------------------------------------
# Forward pass: one fused pallas_call
# ----------------------------------------------------------------------------
def _pick_batch_block(batch):
    for blk in (512, 256, 128, 64, 32, 16, 8):
        if batch % blk == 0:
            return blk
    return batch


def _pallas_forward(packed, x):
    B = x.shape[0]
    latent = packed["el2_w"].shape[1] // 2
    x_flat = x.reshape(B, FLAT).astype(jnp.float32)   # channel-major: c*120 + l

    blk = _pick_batch_block(B)
    grid = (B // blk,)

    def full_spec(arr):
        nd = arr.ndim
        return pl.BlockSpec(arr.shape, lambda i, _nd=nd: (0,) * _nd)

    recon_flat, ml = pl.pallas_call(
        functools.partial(_vae_kernel, latent=latent),
        grid=grid,
        out_shape=(jax.ShapeDtypeStruct((B, FLAT), jnp.float32),
                   jax.ShapeDtypeStruct((B, 2 * latent), jnp.float32)),
        in_specs=[pl.BlockSpec((blk, FLAT), lambda i: (i, 0)),
                  full_spec(packed["w6"]),
                  full_spec(packed["aux600"]),
                  full_spec(packed["el1_w"]),
                  full_spec(packed["el2_w"]),
                  full_spec(packed["el2_b"]),
                  full_spec(packed["dl1_w"]),
                  full_spec(packed["dl2_w"]),
                  full_spec(packed["aux100"])],
        out_specs=(pl.BlockSpec((blk, FLAT), lambda i: (i, 0)),
                   pl.BlockSpec((blk, 2 * latent), lambda i: (i, 0))),
        compiler_params=pltpu.CompilerParams(
            dimension_semantics=("parallel",),
            vmem_limit_bytes=64 * 1024 * 1024),
    )(x_flat, packed["w6"], packed["aux600"], packed["el1_w"], packed["el2_w"],
      packed["el2_b"], packed["dl1_w"], packed["dl2_w"], packed["aux100"])

    recon = recon_flat.reshape(B, FEAT, L_IN)
    return recon, ml[:, :latent], ml[:, latent:]


forward = jax.jit(_pallas_forward)


# ----------------------------------------------------------------------------
# Pure-numpy reference of the PyTorch module (eval mode) for validation
# ----------------------------------------------------------------------------
def _ref_conv1d(x, w, b):                 # Conv1d(k=5, s=2, p=2)
    B, cin, lin = x.shape
    cout, _, K = w.shape
    lout = lin // 2
    y = np.zeros((B, cout, lout), np.float32)
    for lo in range(lout):
        for t in range(K):
            li = 2 * lo + t - 2
            if 0 <= li < lin:
                y[:, :, lo] += x[:, :, li] @ w[:, :, t].T
    return y + b[None, :, None]


def _ref_deconv1d(x, w, b):               # ConvTranspose1d(k=5, s=2, p=2, op=1)
    B, cin, lin = x.shape
    _, cout, K = w.shape
    lout = 2 * lin
    y = np.zeros((B, cout, lout), np.float32)
    for li in range(lin):
        for t in range(K):
            lo = 2 * li + t - 2
            if 0 <= lo < lout:
                y[:, :, lo] += x[:, :, li] @ w[:, :, t]
    return y + b[None, :, None]


def ref_forward(p, x):
    f = lambda a: np.asarray(a, np.float32)

    def bn(y, prefix):
        s, sh = _fold_bn(p, prefix)
        if y.ndim == 3:
            return y * s[None, :, None] + sh[None, :, None]
        return y * s[None, :] + sh[None, :]

    relu = lambda y: np.maximum(y, 0.0)

    h = bn(relu(_ref_conv1d(x, f(p["ec1_w"]), f(p["ec1_b"]))), "ec1")
    h = bn(relu(_ref_conv1d(h, f(p["ec2_w"]), f(p["ec2_b"]))), "ec2")
    h = bn(relu(_ref_conv1d(h, f(p["ec3_w"]), f(p["ec3_b"]))), "ec3")
    h = h.reshape(h.shape[0], -1)
    h = bn(relu(h @ f(p["el1_w"]).T + f(p["el1_b"])), "el1")
    mu = h @ f(p["el21_w"]).T + f(p["el21_b"])
    logvar = h @ f(p["el22_w"]).T + f(p["el22_b"])
    z = mu                                              # eval-mode reparameterize
    d = bn(relu(z @ f(p["dl1_w"]).T + f(p["dl1_b"])), "dl1")
    d = bn(relu(d @ f(p["dl2_w"]).T + f(p["dl2_b"])), "dl2")
    d = d.reshape(d.shape[0], C3, L_ENC)
    d = _ref_deconv1d(d, f(p["dc1_w"]), f(p["dc1_b"]))
    d = _ref_deconv1d(d, f(p["dc2_w"]), f(p["dc2_b"]))
    d = _ref_deconv1d(d, f(p["dc3_w"]), f(p["dc3_b"]))
    return d, mu, logvar


# ----------------------------------------------------------------------------
if __name__ == "__main__":
    LATENT = 16
    BATCH = 2

    key = jax.random.PRNGKey(0)
    kx, kp = jax.random.split(key)
    x = jax.random.normal(kx, (BATCH, FEAT, L_IN), jnp.float32)

    raw_params = init_params(kp, LATENT)
    packed_params = prepare_params(raw_params)          # one-time, outside jit

    recon, mu, logvar = forward(packed_params, x)
    jax.block_until_ready((recon, mu, logvar))

    assert recon.shape == (BATCH, FEAT, L_IN), recon.shape
    assert mu.shape == (BATCH, LATENT), mu.shape
    assert logvar.shape == (BATCH, LATENT), logvar.shape
    assert bool(jnp.all(jnp.isfinite(recon)))
    assert bool(jnp.all(jnp.isfinite(mu))) and bool(jnp.all(jnp.isfinite(logvar)))

    # Numerical check against a float32 numpy reference of the torch module
    # (kernel uses bf16 MXU operands -> loose tolerances).
    r_ref, mu_ref, lv_ref = ref_forward(raw_params, np.asarray(x, np.float32))
    np.testing.assert_allclose(np.asarray(mu), mu_ref, atol=0.1, rtol=0.1)
    np.testing.assert_allclose(np.asarray(logvar), lv_ref, atol=0.1, rtol=0.1)
    np.testing.assert_allclose(np.asarray(recon), r_ref, atol=0.1, rtol=0.1)

    print("KERNEL_OK")
</pallas_src>

<mosaic_0001>
module attributes {stable_mosaic.version = 11 : i64} {
  func.func @_vae_kernel(%arg0: i32, %arg1: memref<2x600xf32, #tpu.memory_space<vmem>>, %arg2: memref<6x600x600xbf16, #tpu.memory_space<vmem>>, %arg3: memref<15x600xf32, #tpu.memory_space<vmem>>, %arg4: memref<600x100xbf16, #tpu.memory_space<vmem>>, %arg5: memref<100x32xbf16, #tpu.memory_space<vmem>>, %arg6: memref<1x32xf32, #tpu.memory_space<vmem>>, %arg7: memref<16x100xbf16, #tpu.memory_space<vmem>>, %arg8: memref<100x600xbf16, #tpu.memory_space<vmem>>, %arg9: memref<6x100xf32, #tpu.memory_space<vmem>>, %arg10: memref<2x600xf32, #tpu.memory_space<vmem>>, %arg11: memref<2x32xf32, #tpu.memory_space<vmem>>) attributes {dimension_semantics = [#tpu.dimension_semantics<parallel>], iteration_bounds = array<i64: 1>, scalar_prefetch = 0 : i64, scratch_operands = 0 : i64, tpu.core_type = #tpu.core_type<tc>, window_params = [{transform_indices = @transform_0, window_bounds = array<i64: 2, 600>}, {pipeline_mode = #tpu.pipeline_mode<synchronous>, transform_indices = @transform_1, window_bounds = array<i64: 6, 600, 600>}, {pipeline_mode = #tpu.pipeline_mode<synchronous>, transform_indices = @transform_2, window_bounds = array<i64: 15, 600>}, {pipeline_mode = #tpu.pipeline_mode<synchronous>, transform_indices = @transform_3, window_bounds = array<i64: 600, 100>}, {pipeline_mode = #tpu.pipeline_mode<synchronous>, transform_indices = @transform_4, window_bounds = array<i64: 100, 32>}, {pipeline_mode = #tpu.pipeline_mode<synchronous>, transform_indices = @transform_5, window_bounds = array<i64: 1, 32>}, {pipeline_mode = #tpu.pipeline_mode<synchronous>, transform_indices = @transform_6, window_bounds = array<i64: 16, 100>}, {pipeline_mode = #tpu.pipeline_mode<synchronous>, transform_indices = @transform_7, window_bounds = array<i64: 100, 600>}, {pipeline_mode = #tpu.pipeline_mode<synchronous>, transform_indices = @transform_8, window_bounds = array<i64: 6, 100>}, {transform_indices = @transform_9, window_bounds = array<i64: 2, 600>}, {transform_indices = @transform_10, window_bounds = array<i64: 2, 32>}]} {
    %c0 = arith.constant 0 : index
    %c0_0 = arith.constant 0 : index
    %0 = vector.load %arg1[%c0, %c0_0] : memref<2x600xf32, #tpu.memory_space<vmem>>, vector<2x600xf32>
    %c0_1 = arith.constant 0 : index
    %c0_2 = arith.constant 0 : index
    %c0_3 = arith.constant 0 : index
    %1 = vector.load %arg2[%c0_1, %c0_2, %c0_3] : memref<6x600x600xbf16, #tpu.memory_space<vmem>>, vector<1x600x600xbf16>
    %2 = vector.shape_cast %1 : vector<1x600x600xbf16> to vector<600x600xbf16>
    %3 = arith.truncf %0 : vector<2x600xf32> to vector<2x600xbf16>
    %cst = arith.constant dense<0.000000e+00> : vector<2x600xf32>
    %4 = tpu.matmul %3, %2, %cst {dimension_numbers = #tpu.dot_dimension_numbers<[1], [0], [0], [1], [0, 0, 1, 1], [], []>} : vector<2x600xbf16>, vector<600x600xbf16>, vector<2x600xf32> -> vector<2x600xf32>
    %c0_4 = arith.constant 0 : index
    %c0_5 = arith.constant 0 : index
    %5 = vector.load %arg3[%c0_4, %c0_5] : memref<15x600xf32, #tpu.memory_space<vmem>>, vector<1x600xf32>
    %6 = vector.broadcast %5 : vector<1x600xf32> to vector<2x600xf32>
    %7 = arith.addf %4, %6 : vector<2x600xf32>
    %cst_6 = arith.constant 0.000000e+00 : f32
    %8 = vector.broadcast %cst_6 : f32 to vector<2x600xf32>
    %9 = arith.maximumf %7, %8 : vector<2x600xf32>
    %c1 = arith.constant 1 : index
    %c0_7 = arith.constant 0 : index
    %10 = vector.load %arg3[%c1, %c0_7] : memref<15x600xf32, #tpu.memory_space<vmem>>, vector<1x600xf32>
    %11 = vector.broadcast %10 : vector<1x600xf32> to vector<2x600xf32>
    %12 = arith.mulf %9, %11 : vector<2x600xf32>
    %c2 = arith.constant 2 : index
    %c0_8 = arith.constant 0 : index
    %13 = vector.load %arg3[%c2, %c0_8] : memref<15x600xf32, #tpu.memory_space<vmem>>, vector<1x600xf32>
    %14 = vector.broadcast %13 : vector<1x600xf32> to vector<2x600xf32>
    %15 = arith.addf %12, %14 : vector<2x600xf32>
    %c1_9 = arith.constant 1 : index
    %c0_10 = arith.constant 0 : index
    %c0_11 = arith.constant 0 : index
    %16 = vector.load %arg2[%c1_9, %c0_10, %c0_11] : memref<6x600x600xbf16, #tpu.memory_space<vmem>>, vector<1x600x600xbf16>
    %17 = vector.shape_cast %16 : vector<1x600x600xbf16> to vector<600x600xbf16>
    %18 = arith.truncf %15 : vector<2x600xf32> to vector<2x600xbf16>
    %cst_12 = arith.constant dense<0.000000e+00> : vector<2x600xf32>
    %19 = tpu.matmul %18, %17, %cst_12 {dimension_numbers = #tpu.dot_dimension_numbers<[1], [0], [0], [1], [0, 0, 1, 1], [], []>} : vector<2x600xbf16>, vector<600x600xbf16>, vector<2x600xf32> -> vector<2x600xf32>
    %c3 = arith.constant 3 : index
    %c0_13 = arith.constant 0 : index
    %20 = vector.load %arg3[%c3, %c0_13] : memref<15x600xf32, #tpu.memory_space<vmem>>, vector<1x600xf32>
    %21 = vector.broadcast %20 : vector<1x600xf32> to vector<2x600xf32>
    %22 = arith.addf %19, %21 : vector<2x600xf32>
    %cst_14 = arith.constant 0.000000e+00 : f32
    %23 = vector.broadcast %cst_14 : f32 to vector<2x600xf32>
    %24 = arith.maximumf %22, %23 : vector<2x600xf32>
    %c4 = arith.constant 4 : index
    %c0_15 = arith.constant 0 : index
    %25 = vector.load %arg3[%c4, %c0_15] : memref<15x600xf32, #tpu.memory_space<vmem>>, vector<1x600xf32>
    %26 = vector.broadcast %25 : vector<1x600xf32> to vector<2x600xf32>
    %27 = arith.mulf %24, %26 : vector<2x600xf32>
    %c5 = arith.constant 5 : index
    %c0_16 = arith.constant 0 : index
    %28 = vector.load %arg3[%c5, %c0_16] : memref<15x600xf32, #tpu.memory_space<vmem>>, vector<1x600xf32>
    %29 = vector.broadcast %28 : vector<1x600xf32> to vector<2x600xf32>
    %30 = arith.addf %27, %29 : vector<2x600xf32>
    %c2_17 = arith.constant 2 : index
    %c0_18 = arith.constant 0 : index
    %c0_19 = arith.constant 0 : index
    %31 = vector.load %arg2[%c2_17, %c0_18, %c0_19] : memref<6x600x600xbf16, #tpu.memory_space<vmem>>, vector<1x600x600xbf16>
    %32 = vector.shape_cast %31 : vector<1x600x600xbf16> to vector<600x600xbf16>
    %33 = arith.truncf %30 : vector<2x600xf32> to vector<2x600xbf16>
    %cst_20 = arith.constant dense<0.000000e+00> : vector<2x600xf32>
    %34 = tpu.matmul %33, %32, %cst_20 {dimension_numbers = #tpu.dot_dimension_numbers<[1], [0], [0], [1], [0, 0, 1, 1], [], []>} : vector<2x600xbf16>, vector<600x600xbf16>, vector<2x600xf32> -> vector<2x600xf32>
    %c6 = arith.constant 6 : index
    %c0_21 = arith.constant 0 : index
    %35 = vector.load %arg3[%c6, %c0_21] : memref<15x600xf32, #tpu.memory_space<vmem>>, vector<1x600xf32>
    %36 = vector.broadcast %35 : vector<1x600xf32> to vector<2x600xf32>
    %37 = arith.addf %34, %36 : vector<2x600xf32>
    %cst_22 = arith.constant 0.000000e+00 : f32
    %38 = vector.broadcast %cst_22 : f32 to vector<2x600xf32>
    %39 = arith.maximumf %37, %38 : vector<2x600xf32>
    %c7 = arith.constant 7 : index
    %c0_23 = arith.constant 0 : index
    %40 = vector.load %arg3[%c7, %c0_23] : memref<15x600xf32, #tpu.memory_space<vmem>>, vector<1x600xf32>
    %41 = vector.broadcast %40 : vector<1x600xf32> to vector<2x600xf32>
    %42 = arith.mulf %39, %41 : vector<2x600xf32>
    %c8 = arith.constant 8 : index
    %c0_24 = arith.constant 0 : index
    %43 = vector.load %arg3[%c8, %c0_24] : memref<15x600xf32, #tpu.memory_space<vmem>>, vector<1x600xf32>
    %44 = vector.broadcast %43 : vector<1x600xf32> to vector<2x600xf32>
    %45 = arith.addf %42, %44 : vector<2x600xf32>
    %c0_25 = arith.constant 0 : index
    %c0_26 = arith.constant 0 : index
    %46 = vector.load %arg4[%c0_25, %c0_26] : memref<600x100xbf16, #tpu.memory_space<vmem>>, vector<600x100xbf16>
    %47 = arith.truncf %45 : vector<2x600xf32> to vector<2x600xbf16>
    %cst_27 = arith.constant dense<0.000000e+00> : vector<2x100xf32>
    %48 = tpu.matmul %47, %46, %cst_27 {dimension_numbers = #tpu.dot_dimension_numbers<[1], [0], [0], [1], [0, 0, 1, 1], [], []>} : vector<2x600xbf16>, vector<600x100xbf16>, vector<2x100xf32> -> vector<2x100xf32>
    %c0_28 = arith.constant 0 : index
    %c0_29 = arith.constant 0 : index
    %49 = vector.load %arg9[%c0_28, %c0_29] : memref<6x100xf32, #tpu.memory_space<vmem>>, vector<1x100xf32>
    %50 = vector.broadcast %49 : vector<1x100xf32> to vector<2x100xf32>
    %51 = arith.addf %48, %50 : vector<2x100xf32>
    %cst_30 = arith.constant 0.000000e+00 : f32
    %52 = vector.broadcast %cst_30 : f32 to vector<2x100xf32>
    %53 = arith.maximumf %51, %52 : vector<2x100xf32>
    %c1_31 = arith.constant 1 : index
    %c0_32 = arith.constant 0 : index
    %54 = vector.load %arg9[%c1_31, %c0_32] : memref<6x100xf32, #tpu.memory_space<vmem>>, vector<1x100xf32>
    %55 = vector.broadcast %54 : vector<1x100xf32> to vector<2x100xf32>
    %56 = arith.mulf %53, %55 : vector<2x100xf32>
    %c2_33 = arith.constant 2 : index
    %c0_34 = arith.constant 0 : index
    %57 = vector.load %arg9[%c2_33, %c0_34] : memref<6x100xf32, #tpu.memory_space<vmem>>, vector<1x100xf32>
    %58 = vector.broadcast %57 : vector<1x100xf32> to vector<2x100xf32>
    %59 = arith.addf %56, %58 : vector<2x100xf32>
    %c0_35 = arith.constant 0 : index
    %c0_36 = arith.constant 0 : index
    %60 = vector.load %arg5[%c0_35, %c0_36] : memref<100x32xbf16, #tpu.memory_space<vmem>>, vector<100x32xbf16>
    %61 = arith.truncf %59 : vector<2x100xf32> to vector<2x100xbf16>
    %cst_37 = arith.constant dense<0.000000e+00> : vector<2x32xf32>
    %62 = tpu.matmul %61, %60, %cst_37 {dimension_numbers = #tpu.dot_dimension_numbers<[1], [0], [0], [1], [0, 0, 1, 1], [], []>} : vector<2x100xbf16>, vector<100x32xbf16>, vector<2x32xf32> -> vector<2x32xf32>
    %c0_38 = arith.constant 0 : index
    %c0_39 = arith.constant 0 : index
    %63 = vector.load %arg6[%c0_38, %c0_39] : memref<1x32xf32, #tpu.memory_space<vmem>>, vector<1x32xf32>
    %64 = vector.broadcast %63 : vector<1x32xf32> to vector<2x32xf32>
    %65 = arith.addf %62, %64 : vector<2x32xf32>
    %c0_40 = arith.constant 0 : index
    %c0_41 = arith.constant 0 : index
    %66 = vector.load %arg11[%c0_40, %c0_41] : memref<2x32xf32, #tpu.memory_space<vmem>>, vector<2x32xf32>
    tpu.vector_store %arg11[%c0_40, %c0_41], %65 {strides = array<i32>} : memref<2x32xf32, #tpu.memory_space<vmem>>, vector<2x32xf32>,
    %67 = vector.extract_strided_slice %65 {offsets = [0, 0], sizes = [2, 16], strides = [1, 1]} : vector<2x32xf32> to vector<2x16xf32>
    %c0_42 = arith.constant 0 : index
    %c0_43 = arith.constant 0 : index
    %68 = vector.load %arg7[%c0_42, %c0_43] : memref<16x100xbf16, #tpu.memory_space<vmem>>, vector<16x100xbf16>
    %69 = arith.truncf %67 : vector<2x16xf32> to vector<2x16xbf16>
    %cst_44 = arith.constant dense<0.000000e+00> : vector<2x100xf32>
    %70 = tpu.matmul %69, %68, %cst_44 {dimension_numbers = #tpu.dot_dimension_numbers<[1], [0], [0], [1], [0, 0, 1, 1], [], []>} : vector<2x16xbf16>, vector<16x100xbf16>, vector<2x100xf32> -> vector<2x100xf32>
    %c3_45 = arith.constant 3 : index
    %c0_46 = arith.constant 0 : index
    %71 = vector.load %arg9[%c3_45, %c0_46] : memref<6x100xf32, #tpu.memory_space<vmem>>, vector<1x100xf32>
    %72 = vector.broadcast %71 : vector<1x100xf32> to vector<2x100xf32>
    %73 = arith.addf %70, %72 : vector<2x100xf32>
    %cst_47 = arith.constant 0.000000e+00 : f32
    %74 = vector.broadcast %cst_47 : f32 to vector<2x100xf32>
    %75 = arith.maximumf %73, %74 : vector<2x100xf32>
    %c4_48 = arith.constant 4 : index
    %c0_49 = arith.constant 0 : index
    %76 = vector.load %arg9[%c4_48, %c0_49] : memref<6x100xf32, #tpu.memory_space<vmem>>, vector<1x100xf32>
    %77 = vector.broadcast %76 : vector<1x100xf32> to vector<2x100xf32>
    %78 = arith.mulf %75, %77 : vector<2x100xf32>
    %c5_50 = arith.constant 5 : index
    %c0_51 = arith.constant 0 : index
    %79 = vector.load %arg9[%c5_50, %c0_51] : memref<6x100xf32, #tpu.memory_space<vmem>>, vector<1x100xf32>
    %80 = vector.broadcast %79 : vector<1x100xf32> to vector<2x100xf32>
    %81 = arith.addf %78, %80 : vector<2x100xf32>
    %c0_52 = arith.constant 0 : index
    %c0_53 = arith.constant 0 : index
    %82 = vector.load %arg8[%c0_52, %c0_53] : memref<100x600xbf16, #tpu.memory_space<vmem>>, vector<100x600xbf16>
    %83 = arith.truncf %81 : vector<2x100xf32> to vector<2x100xbf16>
    %cst_54 = arith.constant dense<0.000000e+00> : vector<2x600xf32>
    %84 = tpu.matmul %83, %82, %cst_54 {dimension_numbers = #tpu.dot_dimension_numbers<[1], [0], [0], [1], [0, 0, 1, 1], [], []>} : vector<2x100xbf16>, vector<100x600xbf16>, vector<2x600xf32> -> vector<2x600xf32>
    %c9 = arith.constant 9 : index
    %c0_55 = arith.constant 0 : index
    %85 = vector.load %arg3[%c9, %c0_55] : memref<15x600xf32, #tpu.memory_space<vmem>>, vector<1x600xf32>
    %86 = vector.broadcast %85 : vector<1x600xf32> to vector<2x600xf32>
    %87 = arith.addf %84, %86 : vector<2x600xf32>
    %cst_56 = arith.constant 0.000000e+00 : f32
    %88 = vector.broadcast %cst_56 : f32 to vector<2x600xf32>
    %89 = arith.maximumf %87, %88 : vector<2x600xf32>
    %c10 = arith.constant 10 : index
    %c0_57 = arith.constant 0 : index
    %90 = vector.load %arg3[%c10, %c0_57] : memref<15x600xf32, #tpu.memory_space<vmem>>, vector<1x600xf32>
    %91 = vector.broadcast %90 : vector<1x600xf32> to vector<2x600xf32>
    %92 = arith.mulf %89, %91 : vector<2x600xf32>
    %c11 = arith.constant 11 : index
    %c0_58 = arith.constant 0 : index
    %93 = vector.load %arg3[%c11, %c0_58] : memref<15x600xf32, #tpu.memory_space<vmem>>, vector<1x600xf32>
    %94 = vector.broadcast %93 : vector<1x600xf32> to vector<2x600xf32>
    %95 = arith.addf %92, %94 : vector<2x600xf32>
    %c3_59 = arith.constant 3 : index
    %c0_60 = arith.constant 0 : index
    %c0_61 = arith.constant 0 : index
    %96 = vector.load %arg2[%c3_59, %c0_60, %c0_61] : memref<6x600x600xbf16, #tpu.memory_space<vmem>>, vector<1x600x600xbf16>
    %97 = vector.shape_cast %96 : vector<1x600x600xbf16> to vector<600x600xbf16>
    %98 = arith.truncf %95 : vector<2x600xf32> to vector<2x600xbf16>
    %cst_62 = arith.constant dense<0.000000e+00> : vector<2x600xf32>
    %99 = tpu.matmul %98, %97, %cst_62 {dimension_numbers = #tpu.dot_dimension_numbers<[1], [0], [0], [1], [0, 0, 1, 1], [], []>} : vector<2x600xbf16>, vector<600x600xbf16>, vector<2x600xf32> -> vector<2x600xf32>
    %c12 = arith.constant 12 : index
    %c0_63 = arith.constant 0 : index
    %100 = vector.load %arg3[%c12, %c0_63] : memref<15x600xf32, #tpu.memory_space<vmem>>, vector<1x600xf32>
    %101 = vector.broadcast %100 : vector<1x600xf32> to vector<2x600xf32>
    %102 = arith.addf %99, %101 : vector<2x600xf32>
    %c4_64 = arith.constant 4 : index
    %c0_65 = arith.constant 0 : index
    %c0_66 = arith.constant 0 : index
    %103 = vector.load %arg2[%c4_64, %c0_65, %c0_66] : memref<6x600x600xbf16, #tpu.memory_space<vmem>>, vector<1x600x600xbf16>
    %104 = vector.shape_cast %103 : vector<1x600x600xbf16> to vector<600x600xbf16>
    %105 = arith.truncf %102 : vector<2x600xf32> to vector<2x600xbf16>
    %cst_67 = arith.constant dense<0.000000e+00> : vector<2x600xf32>
    %106 = tpu.matmul %105, %104, %cst_67 {dimension_numbers = #tpu.dot_dimension_numbers<[1], [0], [0], [1], [0, 0, 1, 1], [], []>} : vector<2x600xbf16>, vector<600x600xbf16>, vector<2x600xf32> -> vector<2x600xf32>
    %c13 = arith.constant 13 : index
    %c0_68 = arith.constant 0 : index
    %107 = vector.load %arg3[%c13, %c0_68] : memref<15x600xf32, #tpu.memory_space<vmem>>, vector<1x600xf32>
    %108 = vector.broadcast %107 : vector<1x600xf32> to vector<2x600xf32>
    %109 = arith.addf %106, %108 : vector<2x600xf32>
    %c5_69 = arith.constant 5 : index
    %c0_70 = arith.constant 0 : index
    %c0_71 = arith.constant 0 : index
    %110 = vector.load %arg2[%c5_69, %c0_70, %c0_71] : memref<6x600x600xbf16, #tpu.memory_space<vmem>>, vector<1x600x600xbf16>
    %111 = vector.shape_cast %110 : vector<1x600x600xbf16> to vector<600x600xbf16>
    %112 = arith.truncf %109 : vector<2x600xf32> to vector<2x600xbf16>
    %cst_72 = arith.constant dense<0.000000e+00> : vector<2x600xf32>
    %113 = tpu.matmul %112, %111, %cst_72 {dimension_numbers = #tpu.dot_dimension_numbers<[1], [0], [0], [1], [0, 0, 1, 1], [], []>} : vector<2x600xbf16>, vector<600x600xbf16>, vector<2x600xf32> -> vector<2x600xf32>
    %c14 = arith.constant 14 : index
    %c0_73 = arith.constant 0 : index
    %114 = vector.load %arg3[%c14, %c0_73] : memref<15x600xf32, #tpu.memory_space<vmem>>, vector<1x600xf32>
    %115 = vector.broadcast %114 : vector<1x600xf32> to vector<2x600xf32>
    %116 = arith.addf %113, %115 : vector<2x600xf32>
    %c0_74 = arith.constant 0 : index
    %c0_75 = arith.constant 0 : index
    %117 = vector.load %arg10[%c0_74, %c0_75] : memref<2x600xf32, #tpu.memory_space<vmem>>, vector<2x600xf32>
    tpu.vector_store %arg10[%c0_74, %c0_75], %116 {strides = array<i32>} : memref<2x600xf32, #tpu.memory_space<vmem>>, vector<2x600xf32>,
    return
  }
  func.func @transform_0(%arg0: i32) -> (i32, i32) {
    %c0_i32 = arith.constant 0 : i32
    %c0_i32_0 = arith.constant 0 : i32
    return %arg0, %c0_i32 : i32, i32
  }
  func.func @transform_1(%arg0: i32) -> (i32, i32, i32) {
    %c0_i32 = arith.constant 0 : i32
    %c0_i32_0 = arith.constant 0 : i32
    %c0_i32_1 = arith.constant 0 : i32
    %c0_i32_2 = arith.constant 0 : i32
    return %c0_i32, %c0_i32_0, %c0_i32_1 : i32, i32, i32
  }
  func.func @transform_2(%arg0: i32) -> (i32, i32) {
    %c0_i32 = arith.constant 0 : i32
    %c0_i32_0 = arith.constant 0 : i32
    %c0_i32_1 = arith.constant 0 : i32
    return %c0_i32, %c0_i32_0 : i32, i32
  }
  func.func @transform_3(%arg0: i32) -> (i32, i32) {
    %c0_i32 = arith.constant 0 : i32
    %c0_i32_0 = arith.constant 0 : i32
    %c0_i32_1 = arith.constant 0 : i32
    return %c0_i32, %c0_i32_0 : i32, i32
  }
  func.func @transform_4(%arg0: i32) -> (i32, i32) {
    %c0_i32 = arith.constant 0 : i32
    %c0_i32_0 = arith.constant 0 : i32
    %c0_i32_1 = arith.constant 0 : i32
    return %c0_i32, %c0_i32_0 : i32, i32
  }
  func.func @transform_5(%arg0: i32) -> (i32, i32) {
    %c0_i32 = arith.constant 0 : i32
    %c0_i32_0 = arith.constant 0 : i32
    %c0_i32_1 = arith.constant 0 : i32
    return %c0_i32, %c0_i32_0 : i32, i32
  }
  func.func @transform_6(%arg0: i32) -> (i32, i32) {
    %c0_i32 = arith.constant 0 : i32
    %c0_i32_0 = arith.constant 0 : i32
    %c0_i32_1 = arith.constant 0 : i32
    return %c0_i32, %c0_i32_0 : i32, i32
  }
  func.func @transform_7(%arg0: i32) -> (i32, i32) {
    %c0_i32 = arith.constant 0 : i32
    %c0_i32_0 = arith.constant 0 : i32
    %c0_i32_1 = arith.constant 0 : i32
    return %c0_i32, %c0_i32_0 : i32, i32
  }
  func.func @transform_8(%arg0: i32) -> (i32, i32) {
    %c0_i32 = arith.constant 0 : i32
    %c0_i32_0 = arith.constant 0 : i32
    %c0_i32_1 = arith.constant 0 : i32
    return %c0_i32, %c0_i32_0 : i32, i32
  }
  func.func @transform_9(%arg0: i32) -> (i32, i32) {
    %c0_i32 = arith.constant 0 : i32
    %c0_i32_0 = arith.constant 0 : i32
    return %arg0, %c0_i32 : i32, i32
  }
  func.func @transform_10(%arg0: i32) -> (i32, i32) {
    %c0_i32 = arith.constant 0 : i32
    %c0_i32_0 = arith.constant 0 : i32
    return %arg0, %c0_i32 : i32, i32
  }
}

</mosaic_0001>

<bundles_post_ra>
// kernel: _pallas_forward.1
= control target key start
LH: loop header
LB: loop body
LE: loop exit
PB: predicated region body
PF: predicated region fallthrough
CT: control target
= control target key end

     0   :  { %16 = vsyncpa [#allocation3], 0  ;;  %s15938_s0 = inlined_call_operand.hbm [shape: f32[2,600], index: 0, kind: input, shape index: {}]   ;;  %s15939_s1 = inlined_call_operand.hbm [shape: bf16[6,600,600], index: 1, kind: input, shape index: {}]   ;;  %s15940_s2 = inlined_call_operand.hbm [shape: f32[15,600], index: 2, kind: input, shape index: {}]   ;;  %s15941_s3 = inlined_call_operand.hbm [shape: bf16[600,100], index: 3, kind: input, shape index: {}]   ;;  %s15942_s4 = inlined_call_operand.hbm [shape: bf16[100,32], index: 4, kind: input, shape index: {}]   ;;  %s15943_s5 = inlined_call_operand.hbm [shape: f32[1,32], index: 5, kind: input, shape index: {}]   ;;  %s15944_s6 = inlined_call_operand.hbm [shape: bf16[16,100], index: 6, kind: input, shape index: {}]   ;;  %s15945_s7 = inlined_call_operand.hbm [shape: bf16[100,600], index: 7, kind: input, shape index: {}]   ;;  %s15946_s8 = inlined_call_operand.hbm [shape: f32[6,100], index: 8, kind: input, shape index: {}]   ;;  %s15947_s9 = inlined_call_operand.hbm [shape: f32[2,600], index: 9, kind: output, shape index: {0}]   ;;  %s15948_s10 = inlined_call_operand.hbm [shape: f32[2,32], index: 10, kind: output, shape index: {1}]  }
   0x1   :  { %17 = vsyncpa [#allocation6], 0 }
   0x2   :  { %18 = vsyncpa [#allocation9], 0 }
   0x3   :  { %19 = vsyncpa [#allocation12], 0 }
   0x4   :  { %20 = vsyncpa [#allocation15], 0 }
   0x5   :  { %21 = vsyncpa [#allocation4], 0 }
   0x6   :  { %22 = vsyncpa [#allocation19], 0  ;;  %s15153_s13 = smov [#allocation5]   ;;  %s14897_s17 = scalar_lea.hbm %s15939_s1, 144000 }
   0x7   :  { %s38_s14 = sshll.u32 %s15153_s13, 4  ;;  %p14898_p0 = scmp.ne.s32.totalorder %s15939_s1, %s14897_s17  ;;  %s39_s14 = int_to_ptr.vmem [resolvable:$true] %s38_s14 }
   0x8   :  { %p14901_p1 = scmp.lt.u32.totalorder %s14897_s17, %s15939_s1 }
   0xa   :  { %p14903_p2 = pnand %p14901_p1, %p14898_p0 }
   0xc   :  { %14906 = shalt.err (!%p14903_p2)
}
   0xd   :  { %s14907_s22 = scalar_lea.vmem %s39_s14, 144000  ;;  %p14912_p4 = scmp.lt.s32.totalorder %s39_s14, %s39_s14 }
   0xe   :  { %p14908_p3 = scmp.ne.s32.totalorder %s39_s14, %s14907_s22  ;;  %p14913_p5 = scmp.lt.s32.totalorder %s14907_s22, %s14907_s22 }
  0x10   :  { %p14914_p6 = por %p14913_p5, %p14912_p4 }
  0x12   :  { %p14915_p7 = pnand %p14914_p6, %p14908_p3 }
  0x14   :  { %14918 = shalt.err (!%p14915_p7)
}
  0x15   :  { %s15154_s23 = smov 320   ;;  %s15155_s24 = smov 20  }
  0x16   :  { %44 = dma.hbm_to_vmem [thread:$0]  %s15939_s1, 144000, %s39_s14, [#allocation6], %s15154_s23, %s15154_s23, %s15155_s24  }
  0x17   :  { %s15156_s27 = smov [#allocation8]   ;;  %s14919_s11 = scalar_lea.hbm %s15941_s3, 4800 }
  0x18   :  { %s62_s28 = sshll.u32 %s15156_s27, 4  ;;  %p14920_p8 = scmp.ne.s32.totalorder %s15941_s3, %s14919_s11  ;;  %s63_s28 = int_to_ptr.vmem [resolvable:$true] %s62_s28 }
  0x19   :  { %p14923_p9 = scmp.lt.u32.totalorder %s14919_s11, %s15941_s3 }
  0x1b   :  { %p14925_p10 = pnand %p14923_p9, %p14920_p8 }
  0x1d   :  { %14928 = shalt.err (!%p14925_p10)
}
  0x1e   :  { %s14929_s17 = scalar_lea.vmem %s63_s28, 4800  ;;  %p14934_p12 = scmp.lt.s32.totalorder %s63_s28, %s63_s28 }
  0x1f   :  { %p14930_p11 = scmp.ne.s32.totalorder %s63_s28, %s14929_s17  ;;  %p14935_p13 = scmp.lt.s32.totalorder %s14929_s17, %s14929_s17 }
  0x21   :  { %p14936_p0 = por %p14935_p13, %p14934_p12 }
  0x23   :  { %p14937_p1 = pnand %p14936_p0, %p14930_p11 }
  0x25   :  { %14940 = shalt.err (!%p14937_p1)
}
  0x26   :  { %s15157_s1 = smov 64   ;;  %s15158_s14 = smov 4  }
  0x27   :  { %68 = dma.hbm_to_vmem [thread:$0]  %s15941_s3, 4800, %s63_s28, [#allocation9], %s15157_s1, %s15157_s1, %s15158_s14  }
  0x28   :  { %s15159_s20 = smov [#allocation11]   ;;  %s15160_s22 = smov [#allocation14]  }
  0x29   :  { %s87_s21 = sshll.u32 %s15159_s20, 4  ;;  %s108_s25 = sshll.u32 %s15160_s22, 4  ;;  %s88_s21 = int_to_ptr.vmem [resolvable:$true] %s87_s21  ;;  %s15259_s25 = int_to_ptr.vmem [resolvable:$true] %s108_s25 }
  0x2a   :  { %s14941_s29 = scalar_lea.hbm %s15943_s5, 16 }
  0x2b   :  { %p14942_p2 = scmp.ne.s32.totalorder %s15943_s5, %s14941_s29  ;;  %p14945_p3 = scmp.lt.u32.totalorder %s14941_s29, %s15943_s5 }
  0x2d   :  { %p14947_p4 = pnand %p14945_p3, %p14942_p2 }
  0x2f   :  { %14950 = shalt.err (!%p14947_p4)
}
  0x30   :  { %s14951_s3 = scalar_lea.vmem %s88_s21, 16  ;;  %s14955_s28 = scalar_lea.vmem %s88_s21, 32 }
  0x31   :  { %p14952_p5 = scmp.ne.s32.totalorder %s88_s21, %s14951_s3  ;;  %p14956_p6 = scmp.lt.s32.totalorder %s88_s21, %s88_s21 }
  0x32   :  { %p14957_p7 = scmp.lt.s32.totalorder %s14955_s28, %s14951_s3 }
  0x34   :  { %p14958_p8 = por %p14957_p7, %p14956_p6 }
  0x36   :  { %p14959_p9 = pnand %p14958_p8, %p14952_p5 }
  0x38   :  { %14962 = shalt.err (!%p14959_p9)
}
  0x39   :  { %90 = dma.hbm_to_vmem [thread:$0]  %s15943_s5, 16, %s88_s21, [#allocation12]  }
  0x3a   :  { %s14963_s19 = scalar_lea.hbm %s15945_s7, 4160 }
  0x3b   :  { %p14964_p10 = scmp.ne.s32.totalorder %s15945_s7, %s14963_s19  ;;  %p14967_p11 = scmp.lt.u32.totalorder %s14963_s19, %s15945_s7 }
  0x3d   :  { %p14969_p12 = pnand %p14967_p11, %p14964_p10 }
  0x3f   :  { %14972 = shalt.err (!%p14969_p12)
}
  0x40   :  { %s14973_s29 = scalar_lea.vmem %s15259_s25, 4160  ;;  %p14978_p0 = scmp.lt.s32.totalorder %s15259_s25, %s15259_s25 }
  0x41   :  { %p14974_p13 = scmp.ne.s32.totalorder %s15259_s25, %s14973_s29  ;;  %p14979_p1 = scmp.lt.s32.totalorder %s14973_s29, %s14973_s29 }
  0x43   :  { %p14980_p2 = por %p14979_p1, %p14978_p0 }
  0x45   :  { %p14981_p3 = pnand %p14980_p2, %p14974_p13 }
  0x47   :  { %14984 = shalt.err (!%p14981_p3)
}
  0x48   :  { %114 = dma.hbm_to_vmem [thread:$0]  %s15945_s7, 4160, %s15259_s25, [#allocation15], %s15154_s23, %s15154_s23, %s15155_s24  }
  0x49   :  { %s15161_s30 = smov [#allocation2]   ;;  %s15162_s12 = smov [#allocation7]  }
  0x4a   :  { %s29_s11 = sshll.u32 %s15161_s30, 4  ;;  %s50_s13 = sshll.u32 %s15162_s12, 4  ;;  %s30_s11 = int_to_ptr.vmem [resolvable:$true] %s29_s11  ;;  %s15293_s13 = int_to_ptr.vmem [resolvable:$true] %s50_s13 }
  0x4b   :  { %s14985_s15 = scalar_lea.hbm %s15938_s0, 160 }
  0x4c   :  { %p14986_p4 = scmp.ne.s32.totalorder %s15938_s0, %s14985_s15  ;;  %p14989_p5 = scmp.lt.u32.totalorder %s14985_s15, %s15938_s0 }
  0x4e   :  { %p14991_p6 = pnand %p14989_p5, %p14986_p4 }
  0x50   :  { %14994 = shalt.err (!%p14991_p6)
}
  0x51   :  { %s14995_s7 = scalar_lea.vmem %s30_s11, 160  ;;  %p15000_p8 = scmp.lt.s32.totalorder %s30_s11, %s30_s11 }
  0x52   :  { %p14996_p7 = scmp.ne.s32.totalorder %s30_s11, %s14995_s7  ;;  %p15001_p9 = scmp.lt.s32.totalorder %s14995_s7, %s14995_s7 }
  0x54   :  { %p15002_p10 = por %p15001_p9, %p15000_p8 }
  0x56   :  { %p15003_p11 = pnand %p15002_p10, %p14996_p7 }
  0x58   :  { %15006 = shalt.err (!%p15003_p11)
}
  0x59   :  { %32 = dma.hbm_to_vmem [thread:$0]  %s15938_s0, 160, %s30_s11, [#allocation3]  }
  0x5a   :  { %s15007_s22 = scalar_lea.hbm %s15940_s2, 1280 }
  0x5b   :  { %p15008_p12 = scmp.ne.s32.totalorder %s15940_s2, %s15007_s22  ;;  %p15011_p13 = scmp.lt.u32.totalorder %s15007_s22, %s15940_s2 }
  0x5d   :  { %p15013_p0 = pnand %p15011_p13, %p15008_p12 }
  0x5f   :  { %15016 = shalt.err (!%p15013_p0)
}
  0x60   :  { %s15017_s21 = scalar_lea.vmem %s15293_s13, 1280  ;;  %p15022_p2 = scmp.lt.s32.totalorder %s15293_s13, %s15293_s13 }
  0x61   :  { %p15018_p1 = scmp.ne.s32.totalorder %s15293_s13, %s15017_s21  ;;  %p15023_p3 = scmp.lt.s32.totalorder %s15017_s21, %s15017_s21 }
  0x63   :  { %p15024_p4 = por %p15023_p3, %p15022_p2 }
  0x65   :  { %p15025_p5 = pnand %p15024_p4, %p15018_p1 }
  0x67   :  { %15028 = shalt.err (!%p15025_p5)
}
  0x68   :  { %s15163_s0 = smov 640   ;;  %s15164_s30 = smov 40  }
  0x69   :  { %56 = dma.hbm_to_vmem [thread:$0]  %s15940_s2, 1280, %s15293_s13, [#allocation6], %s15163_s0, %s15163_s0, %s15164_s30  }
  0x6a   :  { %s15165_s3 = smov [#allocation10]   ;;  %s15166_s15 = smov [#allocation13]  }
  0x6b   :  { %s74_s28 = sshll.u32 %s15165_s3, 4  ;;  %s96_s16 = sshll.u32 %s15166_s15, 4  ;;  %s75_s28 = int_to_ptr.vmem [resolvable:$true] %s74_s28  ;;  %s15324_s16 = int_to_ptr.vmem [resolvable:$true] %s96_s16 }
  0x6c   :  { %s15029_s19 = scalar_lea.hbm %s15942_s4, 832 }
  0x6d   :  { %p15030_p6 = scmp.ne.s32.totalorder %s15942_s4, %s15029_s19  ;;  %p15033_p7 = scmp.lt.u32.totalorder %s15029_s19, %s15942_s4 }
  0x6f   :  { %p15035_p8 = pnand %p15033_p7, %p15030_p6 }
  0x71   :  { %15038 = shalt.err (!%p15035_p8)
}
  0x72   :  { %s15039_s2 = scalar_lea.vmem %s75_s28, 832  ;;  %p15044_p10 = scmp.lt.s32.totalorder %s75_s28, %s75_s28 }
  0x73   :  { %p15040_p9 = scmp.ne.s32.totalorder %s75_s28, %s15039_s2  ;;  %p15045_p11 = scmp.lt.s32.totalorder %s15039_s2, %s15039_s2 }
  0x75   :  { %p15046_p12 = por %p15045_p11, %p15044_p10 }
  0x77   :  { %p15047_p13 = pnand %p15046_p12, %p15040_p9 }
  0x79   :  { %15050 = shalt.err (!%p15047_p13)
}
  0x7a   :  { %80 = dma.hbm_to_vmem [thread:$0]  %s15942_s4, 832, %s75_s28, [#allocation9], %s15157_s1, %s15157_s1, %s15158_s14  }
  0x7b   :  { %s15051_s27 = scalar_lea.hbm %s15944_s6, 128 }
  0x7c   :  { %p15052_p0 = scmp.ne.s32.totalorder %s15944_s6, %s15051_s27  ;;  %p15055_p1 = scmp.lt.u32.totalorder %s15051_s27, %s15944_s6 }
  0x7e   :  { %p15057_p2 = pnand %p15055_p1, %p15052_p0 }
  0x80   :  { %15060 = shalt.err (!%p15057_p2)
}
  0x81   :  { %s15061_s30 = scalar_lea.vmem %s15324_s16, 128  ;;  %p15066_p4 = scmp.lt.s32.totalorder %s15324_s16, %s15324_s16 }
  0x82   :  { %p15062_p3 = scmp.ne.s32.totalorder %s15324_s16, %s15061_s30  ;;  %p15067_p5 = scmp.lt.s32.totalorder %s15061_s30, %s15061_s30 }
  0x84   :  { %p15068_p6 = por %p15067_p5, %p15066_p4 }
  0x86   :  { %p15069_p7 = pnand %p15068_p6, %p15062_p3 }
  0x88   :  { %15072 = shalt.err (!%p15069_p7)
}
  0x89   :  { %102 = dma.hbm_to_vmem [thread:$0]  %s15944_s6, 128, %s15324_s16, [#allocation12], %s15157_s1, %s15157_s1, %s15158_s14  }
  0x8a   :  { %s15167_s12 = smov [#allocation16]   ;;  %s15073_s17 = scalar_lea.hbm %s15946_s8, 128 }
  0x8b   :  { %s121_s3 = sshll.u32 %s15167_s12, 4  ;;  %p15074_p8 = scmp.ne.s32.totalorder %s15946_s8, %s15073_s17  ;;  %s122_s3 = int_to_ptr.vmem [resolvable:$true] %s121_s3 }
  0x8c   :  { %p15077_p9 = scmp.lt.u32.totalorder %s15073_s17, %s15946_s8 }
  0x8e   :  { %p15079_p10 = pnand %p15077_p9, %p15074_p8 }
  0x90   :  { %15082 = shalt.err (!%p15079_p10)
}
  0x91   :  { %s15083_s24 = scalar_lea.vmem %s122_s3, 128  ;;  %p15088_p12 = scmp.lt.s32.totalorder %s122_s3, %s122_s3 }
  0x92   :  { %p15084_p11 = scmp.ne.s32.totalorder %s122_s3, %s15083_s24  ;;  %p15089_p13 = scmp.lt.s32.totalorder %s15083_s24, %s15083_s24 }
  0x94   :  { %p15090_p0 = por %p15089_p13, %p15088_p12 }
  0x96   :  { %p15091_p1 = pnand %p15090_p0, %p15084_p11 }
  0x98   :  { %15094 = shalt.err (!%p15091_p1)
}
  0x99   :  { %124 = dma.hbm_to_vmem [thread:$0]  %s15946_s8, 128, %s122_s3, [#allocation15]  }
  0x9a   :  { %15139 = dma.done.wait [#allocation3], 160  }
  0x9b   :  { %15140 = vsyncadd [#allocation3], 4294967136 }
  0x9c   :  { %15141 = dma.done.wait [#allocation6], 145280  }
  0x9d   :  { %15142 = vsyncadd [#allocation6], 4294822016 }
  0x9e   :  { %15143 = dma.done.wait [#allocation9], 5632  }
  0x9f   :  { %15144 = vsyncadd [#allocation9], 4294961664 }
  0xa0   :  { %15145 = dma.done.wait [#allocation12], 144  }
  0xa1   :  { %15146 = vsyncadd [#allocation12], 4294967152 }
  0xa2   :  { %15147 = dma.done.wait [#allocation15], 4288  }
  0xa3   :  { %15148 = vsyncadd [#allocation15], 4294963008  ;;  %v13219_v0 = vld [vmem:[#allocation5 + $0x4] ss:$20 sps:$4 sm:$0xff]   ;;  %v13221_v1 = vld [vmem:[#allocation5 + $0xc] ss:$20 sps:$4 sm:$0xff]   ;;  %v386_v38 = vlaneseq }
  0xa4   :  { %1440 = vmatprep.subr.bf16.mxu0 %v13219_v0  ;;  %v13223_v2 = vld [vmem:[#allocation5] ss:$20 sps:$4 sm:$0xff]   ;;  %v13224_v3 = vld [vmem:[#allocation5 + $0x8] ss:$20 sps:$4 sm:$0xff]   ;;  %1563 = vmatprep.subr.bf16.mxu1 %v13221_v1  ;;  %v13230_v7 = vld [vmem:[#allocation5 + $0x30] ss:$20 sps:$4 sm:$0xff]  }
  0xa5   :  { %v13225_v4 = vld [vmem:[#allocation5 + $0x2c] ss:$20 sps:$4 sm:$0xff]   ;;  %1441 = vmatpush1.bf16.msra.mxu0 %v13223_v2  ;;  %1564 = vmatpush1.bf16.msra.mxu1 %v13224_v3  ;;  %v13227_v5 = vld [vmem:[#allocation5 + $0x34] ss:$20 sps:$4 sm:$0xff]   ;;  %v13233_v9 = vld [vmem:[#allocation5 + $0x5c] ss:$20 sps:$4 sm:$0xff]  }
  0xa6   :  { %v13229_v6 = vld [vmem:[#allocation5 + $0x28] ss:$20 sps:$4 sm:$0xff]   ;;  %1442 = vmatprep.subr.bf16.mxu0 %v13225_v4  ;;  %1565 = vmatprep.subr.bf16.mxu1 %v13227_v5  ;;  %v13235_v10 = vld [vmem:[#allocation5 + $0x50] ss:$20 sps:$4 sm:$0xff]   ;;  %v13236_v11 = vld [vmem:[#allocation5 + $0x58] ss:$20 sps:$4 sm:$0xff]  }
  0xa7   :  { %v13231_v8 = vld [vmem:[#allocation5 + $0x54] ss:$20 sps:$4 sm:$0xff]   ;;  %v13237_v12 = vld [vmem:[#allocation5 + $0x7c] ss:$20 sps:$4 sm:$0xff]   ;;  %v13239_v13 = vld [vmem:[#allocation5 + $0x84] ss:$20 sps:$4 sm:$0xff]  }
  0xa8   :  { %v13241_v14 = vld [vmem:[#allocation5 + $0x78] ss:$20 sps:$4 sm:$0xff]   ;;  %v13242_v15 = vld [vmem:[#allocation5 + $0x80] ss:$20 sps:$4 sm:$0xff]   ;;  %v13248_v19 = vld [vmem:[#allocation5 + $0xa8] ss:$20 sps:$4 sm:$0xff]  }
  0xa9   :  { %1443 = vmatpush1.bf16.msra.mxu0 %v13229_v6  ;;  %1566 = vmatpush1.bf16.msra.mxu1 %v13230_v7  ;;  %v13243_v16 = vld [vmem:[#allocation5 + $0xa4] ss:$20 sps:$4 sm:$0xff]   ;;  %v13245_v17 = vld [vmem:[#allocation5 + $0xac] ss:$20 sps:$4 sm:$0xff]   ;;  %v13251_v21 = vld [vmem:[#allocation5 + $0xd4] ss:$20 sps:$4 sm:$0xff]  }
  0xaa   :  { %1444 = vmatprep.subr.bf16.mxu0 %v13231_v8  ;;  %1567 = vmatprep.subr.bf16.mxu1 %v13233_v9  ;;  %v13247_v18 = vld [vmem:[#allocation5 + $0xa0] ss:$20 sps:$4 sm:$0xff]   ;;  %v13253_v22 = vld [vmem:[#allocation5 + $0xc8] ss:$20 sps:$4 sm:$0xff]   ;;  %v13254_v23 = vld [vmem:[#allocation5 + $0xd0] ss:$20 sps:$4 sm:$0xff]  }
  0xab   :  { %v13249_v20 = vld [vmem:[#allocation5 + $0xcc] ss:$20 sps:$4 sm:$0xff]   ;;  %v13255_v24 = vld [vmem:[#allocation5 + $0xf4] ss:$20 sps:$4 sm:$0xff]   ;;  %v13257_v25 = vld [vmem:[#allocation5 + $0xfc] ss:$20 sps:$4 sm:$0xff]  }
  0xac   :  { %v13259_v26 = vld [vmem:[#allocation5 + $0xf0] ss:$20 sps:$4 sm:$0xff]   ;;  %v13260_v27 = vld [vmem:[#allocation5 + $0xf8] ss:$20 sps:$4 sm:$0xff]   ;;  %v13266_v31 = vld [vmem:[#allocation5 + $0x120] ss:$20 sps:$4 sm:$0xff]  }
  0xad   :  { %1445 = vmatpush1.bf16.msra.mxu0 %v13235_v10  ;;  %1568 = vmatpush1.bf16.msra.mxu1 %v13236_v11  ;;  %v13261_v28 = vld [vmem:[#allocation5 + $0x11c] ss:$20 sps:$4 sm:$0xff]   ;;  %v13263_v29 = vld [vmem:[#allocation5 + $0x124] ss:$20 sps:$4 sm:$0xff]   ;;  %v13269_v33 = vld [vmem:[#allocation5 + $0x14c] ss:$20 sps:$4 sm:$0xff]  }
  0xae   :  { %1446 = vmatprep.subr.bf16.mxu0 %v13237_v12  ;;  %1569 = vmatprep.subr.bf16.mxu1 %v13239_v13  ;;  %v13265_v30 = vld [vmem:[#allocation5 + $0x118] ss:$20 sps:$4 sm:$0xff]   ;;  %v13271_v34 = vld [vmem:[#allocation5 + $0x140] ss:$20 sps:$4 sm:$0xff]   ;;  %v13272_v35 = vld [vmem:[#allocation5 + $0x148] ss:$20 sps:$4 sm:$0xff]  }
  0xaf   :  { %v13267_v32 = vld [vmem:[#allocation5 + $0x144] ss:$20 sps:$4 sm:$0xff]   ;;  %v15168_v36 = vmov 1983009808   ;;  %v13273_v39 = vld [vmem:[#allocation5 + $0x16c] ss:$20 sps:$4 sm:$0xff]  }
  0xb0   :  { %v384_v37 = vunpack.c.l.s4 %v15168_v36  ;;  %v13275_v40 = vld [vmem:[#allocation5 + $0x174] ss:$20 sps:$4 sm:$0xff]   ;;  %v15373_v43 = vshrl.u32 %v386_v38, 7  ;;  %v13278_v44 = vld [vmem:[#allocation5 + $0x170] ss:$20 sps:$4 sm:$0xff]   ;;  %vm1424_vm0 = vcmask 1043456  }
  0xb1   :  { %1447 = vmatpush1.bf16.msra.mxu0 %v13241_v14  ;;  %1570 = vmatpush1.bf16.msra.mxu1 %v13242_v15  ;;  %v13277_v41 = vld [vmem:[#allocation5 + $0x168] ss:$20 sps:$4 sm:$0xff]   ;;  %v13283_v47 = vld [vmem:[#allocation5 + $0x190] ss:$20 sps:$4 sm:$0xff]   ;;  %v13284_v48 = vld [vmem:[#allocation5 + $0x198] ss:$20 sps:$4 sm:$0xff]  }
  0xb2   :  { %1448 = vmatprep.subr.bf16.mxu0 %v13243_v16  ;;  %1571 = vmatprep.subr.bf16.mxu1 %v13245_v17  ;;  %v385_v42 = vunpack.c.0.s8 %v384_v37  ;;  %v13279_v45 = vld [vmem:[#allocation5 + $0x194] ss:$20 sps:$4 sm:$0xff]   ;;  %v13281_v46 = vld [vmem:[#allocation5 + $0x19c] ss:$20 sps:$4 sm:$0xff]   ;;  %v13287_v51 = vld [vmem:[#allocation5 + $0x1c4] ss:$20 sps:$4 sm:$0xff]  }
  0xb3   :  { %v13285_v50 = vld [vmem:[#allocation5 + $0x1bc] ss:$20 sps:$4 sm:$0xff]   ;;  %v13289_v53 = vld [vmem:[#allocation5 + $0x1b8] ss:$20 sps:$4 sm:$0xff]   ;;  %v13290_v55 = vld [vmem:[#allocation5 + $0x1c0] ss:$20 sps:$4 sm:$0xff]  }
  0xb4   :  { %v15376_v49 = vsub.s32 %v385_v42, %v15373_v43  ;;  %v153_v52 = vld [vmem:[#allocation2] sm:$0xff]  ;;  %v13293_v57 = vld [vmem:[#allocation5 + $0x1ec] ss:$20 sps:$4 sm:$0xff]   ;;  %v13302_v1 = vld [vmem:[#allocation5 + $0x210] ss:$20 sps:$4 sm:$0xff]   ;;  %vm1420_vm1 = vcmask 719872  }
  0xb5   :  { %1449 = vmatpush1.bf16.msra.mxu0 %v13247_v18  ;;  %1572 = vmatpush1.bf16.msra.mxu1 %v13248_v19  ;;  %v13291_v56 = vld [vmem:[#allocation5 + $0x1e4] ss:$20 sps:$4 sm:$0xff]   ;;  %v13295_v59 = vld [vmem:[#allocation5 + $0x1e0] ss:$20 sps:$4 sm:$0xff]   ;;  %v13296_v61 = vld [vmem:[#allocation5 + $0x1e8] ss:$20 sps:$4 sm:$0xff]   ;;  %v382_v4 = vcombine.high %v153_v52, %v153_v52 }
  0xb6   :  { %1450 = vmatprep.subr.bf16.mxu0 %v13249_v20  ;;  %1573 = vmatprep.subr.bf16.mxu1 %v13251_v21  ;;  %v389_v54 = vrot.slane %v153_v52, %v15376_v49  ;;  %v13297_v62 = vld [vmem:[#allocation5 + $0x20c] ss:$20 sps:$4 sm:$0xff]   ;;  %v13299_v63 = vld [vmem:[#allocation5 + $0x214] ss:$20 sps:$4 sm:$0xff]   ;;  %v13305_v3 = vld [vmem:[#allocation5 + $0x23c] ss:$20 sps:$4 sm:$0xff]  }
  0xb7   :  { %v13301_v0 = vld [vmem:[#allocation5 + $0x208] ss:$20 sps:$4 sm:$0xff]   ;;  %v13307_v5 = vld [vmem:[#allocation5 + $0x230] ss:$20 sps:$4 sm:$0xff]   ;;  %v13308_v6 = vld [vmem:[#allocation5 + $0x238] ss:$20 sps:$4 sm:$0xff]   ;;  %v15384_v9 = vrot.slane %v382_v4, %v15376_v49 }
  0xb8   :  { %v397_v58 = vcombine.high %v389_v54, %v389_v54  ;;  %v13303_v2 = vld [vmem:[#allocation5 + $0x234] ss:$20 sps:$4 sm:$0xff]   ;;  %v13309_v7 = vld [vmem:[#allocation5 + $0x25c] ss:$20 sps:$4 sm:$0xff]   ;;  %v13311_v8 = vld [vmem:[#allocation5 + $0x264] ss:$20 sps:$4 sm:$0xff]   ;;  %v15388_v16 = vpack.c.bf16 %v389_v54, %v389_v54 }
  0xb9   :  { %1451 = vmatpush1.bf16.msra.mxu0 %v13253_v22  ;;  %1574 = vmatpush1.bf16.msra.mxu1 %v13254_v23  ;;  %v13313_v10 = vld [vmem:[#allocation5 + $0x258] ss:$20 sps:$4 sm:$0xff]   ;;  %v13314_v11 = vld [vmem:[#allocation5 + $0x260] ss:$20 sps:$4 sm:$0xff]   ;;  %v398_v14 = vcombine.high %v15384_v9, %v15384_v9  ;;  %v13318_v17 = vld [vmem:[#allocation5 + $0x288] ss:$20 sps:$4 sm:$0xff]  }
  0xba   :  { %1452 = vmatprep.subr.bf16.mxu0 %v13255_v24  ;;  %1575 = vmatprep.subr.bf16.mxu1 %v13257_v25  ;;  %v15379_v60 = vpack.c.bf16 %v397_v58, %v397_v58  ;;  %v13317_v12 = vld [vmem:[#allocation5 + $0x284] ss:$20 sps:$4 sm:$0xff]   ;;  %v13320_v13 = vld [vmem:[#allocation5 + $0x28c] ss:$20 sps:$4 sm:$0xff]   ;;  %v13326_v19 = vld [vmem:[#allocation5 + $0x2b4] ss:$20 sps:$4 sm:$0xff]  }
  0xbb   :  { %v13315_v15 = vld [vmem:[#allocation5 + $0x280] ss:$20 sps:$4 sm:$0xff]   ;;  %v15390_v20 = vpack.c.bf16 %v398_v14, %v398_v14  ;;  %v13321_v21 = vld [vmem:[#allocation5 + $0x2a8] ss:$20 sps:$4 sm:$0xff]   ;;  %v13324_v22 = vld [vmem:[#allocation5 + $0x2b0] ss:$20 sps:$4 sm:$0xff]  }
  0xbc   :  { %1472 = vmatprep.mubr.bf16.mxu0 %v15379_v60  ;;  %1595 = vmatprep.mubr.bf16.mxu1 %v15379_v60  ;;  %v13323_v18 = vld [vmem:[#allocation5 + $0x2ac] ss:$20 sps:$4 sm:$0xff]   ;;  %v13329_v23 = vld [vmem:[#allocation5 + $0x2d4] ss:$20 sps:$4 sm:$0xff]   ;;  %v13332_v24 = vld [vmem:[#allocation5 + $0x2dc] ss:$20 sps:$4 sm:$0xff]  }
  0xbd   :  { %1453 = vmatpush1.bf16.msra.mxu0 %v13259_v26  ;;  %1576 = vmatpush1.bf16.msra.mxu1 %v13260_v27  ;;  %v13327_v25 = vld [vmem:[#allocation5 + $0x2d0] ss:$20 sps:$4 sm:$0xff]   ;;  %v13330_v26 = vld [vmem:[#allocation5 + $0x2d8] ss:$20 sps:$4 sm:$0xff]   ;;  %v13350_v36 = vld [vmem:[#allocation5 + $0x354] ss:$20 sps:$4 sm:$0xff]  }
  0xbe   :  { %1454 = vmatprep.subr.bf16.mxu0 %v13261_v28  ;;  %1577 = vmatprep.subr.bf16.mxu1 %v13263_v29  ;;  %v13335_v27 = vld [vmem:[#allocation5 + $0x2fc] ss:$20 sps:$4 sm:$0xff]   ;;  %v13338_v28 = vld [vmem:[#allocation5 + $0x304] ss:$20 sps:$4 sm:$0xff]   ;;  %v13374_v54 = vld [vmem:[#allocation5 + $0x3f4] ss:$20 sps:$4 sm:$0xff]  }
  0xbf   :  { %v13333_v29 = vld [vmem:[#allocation5 + $0x2f8] ss:$20 sps:$4 sm:$0xff]   ;;  %v13345_v37 = vld [vmem:[#allocation5 + $0x348] ss:$20 sps:$4 sm:$0xff]   ;;  %v13348_v38 = vld [vmem:[#allocation5 + $0x350] ss:$20 sps:$4 sm:$0xff]  }
  0xc0   :  { %v13354_v42 = vld [vmem:[#allocation5 + $0x378] ss:$20 sps:$4 sm:$0xff]   ;;  %v13366_v52 = vld [vmem:[#allocation5 + $0x3c8] ss:$20 sps:$4 sm:$0xff]   ;;  %v13387_v4 = vld [vmem:[#allocation5 + $0x460] ss:$20 sps:$4 sm:$0xff]  }
  0xc1   :  { %1455 = vmatpush1.bf16.msra.mxu0 %v13265_v30  ;;  %1578 = vmatpush1.bf16.msra.mxu1 %v13266_v31  ;;  %v13336_v30 = vld [vmem:[#allocation5 + $0x300] ss:$20 sps:$4 sm:$0xff]   ;;  %v13341_v31 = vld [vmem:[#allocation5 + $0x324] ss:$20 sps:$4 sm:$0xff]   ;;  %v13380_v58 = vld [vmem:[#allocation5 + $0x41c] ss:$20 sps:$4 sm:$0xff]  }
  0xc2   :  { %1456 = vmatprep.subr.bf16.mxu0 %v13267_v32  ;;  %1579 = vmatprep.subr.bf16.mxu1 %v13269_v33  ;;  %v13344_v32 = vld [vmem:[#allocation5 + $0x32c] ss:$20 sps:$4 sm:$0xff]   ;;  %vm15171_vm2 = vmmov 0   ;;  %vm5784_vm3 = vcmask 1041408   ;;  %vm5780_vm4 = vcmask 818176   ;;  %vm5828_vm5 = vcmask 254976  }
  0xc3   :  { %v13339_v33 = vld [vmem:[#allocation5 + $0x320] ss:$20 sps:$4 sm:$0xff]   ;;  %v13402_v14 = vld [vmem:[#allocation5 + $0x4b8] ss:$20 sps:$4 sm:$0xff]   ;;  %vm5844_vm6 = vcmask 130048   ;;  %s15172_s8 = smov [#allocation18]  }
  0xc4   :  { %s11265_s14 = sshll.u32 %s15172_s8, 4  ;;  %s11266_s14 = int_to_ptr.vmem [resolvable:$true] %s11265_s14 }
  0xc5   :  { %1457 = vmatpush1.bf16.msra.mxu0 %v13271_v34  ;;  %1580 = vmatpush1.bf16.msra.mxu1 %v13272_v35  ;;  %v13342_v34 = vld [vmem:[#allocation5 + $0x328] ss:$20 sps:$4 sm:$0xff]   ;;  %v13347_v35 = vld [vmem:[#allocation5 + $0x34c] ss:$20 sps:$4 sm:$0xff]   ;;  %s15095_s16 = scalar_lea.vmem %s11266_s14, 32  ;;  %p15100_p3 = scmp.lt.s32.totalorder %s11266_s14, %s11266_s14 }
  0xc6   :  { %1458 = vmatprep.subr.bf16.mxu0 %v13273_v39  ;;  %1581 = vmatprep.subr.bf16.mxu1 %v13275_v40  ;;  %v13353_v39 = vld [vmem:[#allocation5 + $0x374] ss:$20 sps:$4 sm:$0xff]   ;;  %v13356_v40 = vld [vmem:[#allocation5 + $0x37c] ss:$20 sps:$4 sm:$0xff]   ;;  %p15096_p2 = scmp.ne.s32.totalorder %s11266_s14, %s15095_s16  ;;  %p15101_p4 = scmp.lt.s32.totalorder %s15095_s16, %s15095_s16 }
  0xc8   :  { %p15102_p5 = por %p15101_p4, %p15100_p3 }
  0xc9   :  { %1459 = vmatpush1.bf16.msra.mxu0 %v13277_v41  ;;  %1582 = vmatpush1.bf16.msra.mxu1 %v13278_v44  ;;  %v13351_v41 = vld [vmem:[#allocation5 + $0x370] ss:$20 sps:$4 sm:$0xff]  }
  0xca   :  { %1460 = vmatprep.subr.bf16.mxu0 %v13279_v45  ;;  %1583 = vmatprep.subr.bf16.mxu1 %v13281_v46  ;;  %v13359_v44 = vld [vmem:[#allocation5 + $0x39c] ss:$20 sps:$4 sm:$0xff]   ;;  %v13362_v45 = vld [vmem:[#allocation5 + $0x3a4] ss:$20 sps:$4 sm:$0xff]   ;;  %p15103_p6 = pnand %p15102_p5, %p15096_p2 }
  0xcb   :  { %v13357_v46 = vld [vmem:[#allocation5 + $0x398] ss:$20 sps:$4 sm:$0xff]  }
  0xcd   :  { %1461 = vmatpush1.bf16.msra.mxu0 %v13283_v47  ;;  %1584 = vmatpush1.bf16.msra.mxu1 %v13284_v48  ;;  %v13360_v47 = vld [vmem:[#allocation5 + $0x3a0] ss:$20 sps:$4 sm:$0xff]   ;;  %v13365_v48 = vld [vmem:[#allocation5 + $0x3c4] ss:$20 sps:$4 sm:$0xff]  }
  0xce   :  { %1462 = vmatprep.subr.bf16.mxu0 %v13285_v50  ;;  %1585 = vmatprep.subr.bf16.mxu1 %v13287_v51  ;;  %v13368_v50 = vld [vmem:[#allocation5 + $0x3cc] ss:$20 sps:$4 sm:$0xff]  }
  0xcf   :  { %v13363_v51 = vld [vmem:[#allocation5 + $0x3c0] ss:$20 sps:$4 sm:$0xff]  }
  0xd1   :  { %1463 = vmatpush1.bf16.msra.mxu0 %v13289_v53  ;;  %1586 = vmatpush1.bf16.msra.mxu1 %v13290_v55  ;;  %v13371_v53 = vld [vmem:[#allocation5 + $0x3ec] ss:$20 sps:$4 sm:$0xff]   ;;  %v13369_v55 = vld [vmem:[#allocation5 + $0x3e8] ss:$20 sps:$4 sm:$0xff]  }
  0xd2   :  { %1464 = vmatprep.subr.bf16.mxu0 %v13291_v56  ;;  %1587 = vmatprep.subr.bf16.mxu1 %v13293_v57  ;;  %v13372_v56 = vld [vmem:[#allocation5 + $0x3f0] ss:$20 sps:$4 sm:$0xff]   ;;  %v13377_v57 = vld [vmem:[#allocation5 + $0x414] ss:$20 sps:$4 sm:$0xff]  }
  0xd5   :  { %1465 = vmatpush1.bf16.msra.mxu0 %v13295_v59  ;;  %1588 = vmatpush1.bf16.msra.mxu1 %v13296_v61  ;;  %v13375_v59 = vld [vmem:[#allocation5 + $0x410] ss:$20 sps:$4 sm:$0xff]   ;;  %v13378_v61 = vld [vmem:[#allocation5 + $0x418] ss:$20 sps:$4 sm:$0xff]  }
  0xd6   :  { %1466 = vmatprep.subr.bf16.mxu0 %v13297_v62  ;;  %1589 = vmatprep.subr.bf16.mxu1 %v13299_v63  ;;  %v13383_v62 = vld [vmem:[#allocation5 + $0x43c] ss:$20 sps:$4 sm:$0xff]   ;;  %v13386_v63 = vld [vmem:[#allocation5 + $0x444] ss:$20 sps:$4 sm:$0xff]  }
  0xd9   :  { %1467 = vmatpush1.bf16.msra.mxu0 %v13301_v0  ;;  %1590 = vmatpush1.bf16.msra.mxu1 %v13302_v1  ;;  %v13381_v0 = vld [vmem:[#allocation5 + $0x438] ss:$20 sps:$4 sm:$0xff]   ;;  %v13384_v1 = vld [vmem:[#allocation5 + $0x440] ss:$20 sps:$4 sm:$0xff]  }
  0xda   :  { %1468 = vmatprep.subr.bf16.mxu0 %v13303_v2  ;;  %1591 = vmatprep.subr.bf16.mxu1 %v13305_v3  ;;  %v13389_v2 = vld [vmem:[#allocation5 + $0x464] ss:$20 sps:$4 sm:$0xff]   ;;  %v13392_v3 = vld [vmem:[#allocation5 + $0x46c] ss:$20 sps:$4 sm:$0xff]  }
  0xdd   :  { %1469 = vmatpush1.bf16.msra.mxu0 %v13307_v5  ;;  %1592 = vmatpush1.bf16.msra.mxu1 %v13308_v6  ;;  %v13390_v5 = vld [vmem:[#allocation5 + $0x468] ss:$20 sps:$4 sm:$0xff]   ;;  %v13395_v6 = vld [vmem:[#allocation5 + $0x48c] ss:$20 sps:$4 sm:$0xff]  }
  0xde   :  { %1470 = vmatprep.subr.bf16.mxu0 %v13309_v7  ;;  %1593 = vmatprep.subr.bf16.mxu1 %v13311_v8  ;;  %v13398_v7 = vld [vmem:[#allocation5 + $0x494] ss:$20 sps:$4 sm:$0xff]  }
  0xdf   :  { %v13393_v8 = vld [vmem:[#allocation5 + $0x488] ss:$20 sps:$4 sm:$0xff]  }
  0xe1   :  { %1471 = vmatpush1.bf16.msra.mxu0 %v13313_v10  ;;  %1594 = vmatpush1.bf16.msra.mxu1 %v13314_v11  ;;  %v13396_v10 = vld [vmem:[#allocation5 + $0x490] ss:$20 sps:$4 sm:$0xff]   ;;  %v13401_v11 = vld [vmem:[#allocation5 + $0x4b4] ss:$20 sps:$4 sm:$0xff]  }
  0xe2   :  { %1481 = vmatprep.subr.bf16.mxu0 %v13317_v12  ;;  %1604 = vmatprep.subr.bf16.mxu1 %v13320_v13  ;;  %v13404_v12 = vld [vmem:[#allocation5 + $0x4bc] ss:$20 sps:$4 sm:$0xff]  }
  0xe3   :  { %v13399_v13 = vld [vmem:[#allocation5 + $0x4b0] ss:$20 sps:$4 sm:$0xff]  }
  0xe4   :  { %1473 = vmatmul.mubr.bf16.vlgmr.msra.gmra.mrb[0].mxu0 %v15388_v16  ;;  %1596 = vmatmul.mubr.bf16.vlgmr.msra.gmra.mrb[0].mxu1 %v15388_v16 }
  0xe5   :  { %1482 = vmatpush1.bf16.msra.mxu0 %v13315_v15  ;;  %1605 = vmatpush1.bf16.msra.mxu1 %v13318_v17  ;;  %v13407_v15 = vld [vmem:[#allocation5 + $0x4dc] ss:$20 sps:$4 sm:$0xff]   ;;  %v13410_v17 = vld [vmem:[#allocation5 + $0x4e4] ss:$20 sps:$4 sm:$0xff]  }
  0xe6   :  { %1483 = vmatprep.subr.bf16.mxu0 %v13323_v18  ;;  %1606 = vmatprep.subr.bf16.mxu1 %v13326_v19  ;;  %v13405_v18 = vld [vmem:[#allocation5 + $0x4d8] ss:$20 sps:$4 sm:$0xff]   ;;  %v13408_v19 = vld [vmem:[#allocation5 + $0x4e0] ss:$20 sps:$4 sm:$0xff]  }
  0xe7   :  { %1513 = vmatprep.mubr.bf16.mxu0 %v15390_v20  ;;  %1636 = vmatprep.mubr.bf16.mxu1 %v15390_v20 }
  0xe9   :  { %1484 = vmatpush1.bf16.msra.mxu0 %v13321_v21  ;;  %1607 = vmatpush1.bf16.msra.mxu1 %v13324_v22  ;;  %v13414_v21 = vld [vmem:[#allocation5 + $0x504] ss:$20 sps:$4 sm:$0xff]   ;;  %v13417_v22 = vld [vmem:[#allocation5 + $0x50c] ss:$20 sps:$4 sm:$0xff]  }
  0xea   :  { %1485 = vmatprep.subr.bf16.mxu0 %v13329_v23  ;;  %1608 = vmatprep.subr.bf16.mxu1 %v13332_v24  ;;  %v13412_v23 = vld [vmem:[#allocation5 + $0x500] ss:$20 sps:$4 sm:$0xff]   ;;  %v13415_v24 = vld [vmem:[#allocation5 + $0x508] ss:$20 sps:$4 sm:$0xff]  }
  0xed   :  { %1486 = vmatpush1.bf16.msra.mxu0 %v13327_v25  ;;  %1609 = vmatpush1.bf16.msra.mxu1 %v13330_v26  ;;  %v15398_v25 = vpack.c.bf16 %v15384_v9, %v15384_v9  ;;  %v13420_v26 = vld [vmem:[#allocation5 + $0x52c] ss:$20 sps:$4 sm:$0xff]   ;;  %v13424_v9 = vld [vmem:[#allocation5 + $0x550] ss:$20 sps:$4 sm:$0xff]  }
  0xee   :  { %1487 = vmatprep.subr.bf16.mxu0 %v13335_v27  ;;  %1610 = vmatprep.subr.bf16.mxu1 %v13338_v28  ;;  %v13423_v27 = vld [vmem:[#allocation5 + $0x534] ss:$20 sps:$4 sm:$0xff]  }
  0xef   :  { %v13418_v28 = vld [vmem:[#allocation5 + $0x528] ss:$20 sps:$4 sm:$0xff]  }
  0xf1   :  { %1488 = vmatpush1.bf16.msra.mxu0 %v13333_v29  ;;  %1611 = vmatpush1.bf16.msra.mxu1 %v13336_v30  ;;  %v13421_v29 = vld [vmem:[#allocation5 + $0x530] ss:$20 sps:$4 sm:$0xff]   ;;  %v13426_v30 = vld [vmem:[#allocation5 + $0x554] ss:$20 sps:$4 sm:$0xff]  }
  0xf2   :  { %1489 = vmatprep.subr.bf16.mxu0 %v13341_v31  ;;  %1612 = vmatprep.subr.bf16.mxu1 %v13344_v32  ;;  %v13429_v31 = vld [vmem:[#allocation5 + $0x55c] ss:$20 sps:$4 sm:$0xff]   ;;  %v15169_v32 = vmov 0  }
  0xf5   :  { %1490 = vmatpush1.bf16.msra.mxu0 %v13339_v33  ;;  %1613 = vmatpush1.bf16.msra.mxu1 %v13342_v34  ;;  %v13427_v33 = vld [vmem:[#allocation5 + $0x558] ss:$20 sps:$4 sm:$0xff]   ;;  %v13432_v34 = vld [vmem:[#allocation5 + $0x57c] ss:$20 sps:$4 sm:$0xff]  }
  0xf6   :  { %1491 = vmatprep.subr.bf16.mxu0 %v13347_v35  ;;  %1614 = vmatprep.subr.bf16.mxu1 %v13350_v36  ;;  %v13435_v35 = vld [vmem:[#allocation5 + $0x584] ss:$20 sps:$4 sm:$0xff]  }
  0xf7   :  { %v13430_v36 = vld [vmem:[#allocation5 + $0x578] ss:$20 sps:$4 sm:$0xff]  }
  0xf9   :  { %1492 = vmatpush1.bf16.msra.mxu0 %v13345_v37  ;;  %1615 = vmatpush1.bf16.msra.mxu1 %v13348_v38  ;;  %v13433_v37 = vld [vmem:[#allocation5 + $0x580] ss:$20 sps:$4 sm:$0xff]   ;;  %v13438_v38 = vld [vmem:[#allocation5 + $0x5a4] ss:$20 sps:$4 sm:$0xff]  }
  0xfa   :  { %1493 = vmatprep.subr.bf16.mxu0 %v13353_v39  ;;  %1616 = vmatprep.subr.bf16.mxu1 %v13356_v40  ;;  %v13441_v39 = vld [vmem:[#allocation5 + $0x5ac] ss:$20 sps:$4 sm:$0xff]  }
  0xfb   :  { %v377_v40 = vld [vmem:[#allocation5 + $0x5c8] sm:$0xff] }
  0xfd   :  { %1494 = vmatpush1.bf16.msra.mxu0 %v13351_v41  ;;  %1617 = vmatpush1.bf16.msra.mxu1 %v13354_v42  ;;  %v378_v41 = vld [vmem:[#allocation5 + $0x5d0] sm:$0xff] }
  0xfe   :  { %1495 = vmatprep.subr.bf16.mxu0 %v13359_v44  ;;  %1618 = vmatprep.subr.bf16.mxu1 %v13362_v45  ;;  %v13436_v42 = vld [vmem:[#allocation5 + $0x5a0] ss:$20 sps:$4 sm:$0xff]   ;;  %v13439_v44 = vld [vmem:[#allocation5 + $0x5a8] ss:$20 sps:$4 sm:$0xff]   ;;  %v11469_v45 = vcombine.high %v377_v40, %v377_v40 }
 0x101   :  { %1496 = vmatpush1.bf16.msra.mxu0 %v13357_v46  ;;  %1619 = vmatpush1.bf16.msra.mxu1 %v13360_v47  ;;  %v11471_v46 = vcombine.high %v378_v41, %v378_v41  ;;  %v11468_v47 = vcombine.low %v377_v40, %v377_v40  ;;  %v13516_v40 = vld [vmem:[#allocation5 + $0x6a8] ss:$20 sps:$4 sm:$0xff]  }
 0x102   :  { %1497 = vmatprep.subr.bf16.mxu0 %v13365_v48  ;;  %1620 = vmatprep.subr.bf16.mxu1 %v13368_v50  ;;  %v11470_v48 = vcombine.low %v378_v41, %v378_v41  ;;  %v11282_v50 = vld.sshfl [vmem:[#allocation2 + $0x8] sm:$0x3 pattern:$0x76325410] }
 0x103   :  { %v13489_v41 = vld [vmem:[#allocation5 + $0x5e8] ss:$20 sps:$4 sm:$0xff]  }
 0x105   :  { %1498 = vmatpush1.bf16.msra.mxu0 %v13363_v51  ;;  %1621 = vmatpush1.bf16.msra.mxu1 %v13366_v52  ;;  %v13446_v51 = vld [vmem:[#allocation5 + $0x150] ss:$20 sps:$4 sm:$0xff]   ;;  %v1426_v52 = vsel %vm1424_vm0, %v11468_v47, 0 }
 0x106   :  { %1499 = vmatprep.subr.bf16.mxu0 %v13371_v53  ;;  %1622 = vmatprep.subr.bf16.mxu1 %v13374_v54  ;;  %v1432_v53 = vsel %vm1424_vm0, %v11470_v48, 0  ;;  %v13456_v54 = vld [vmem:[#allocation5 + $0x3d0] ss:$20 sps:$4 sm:$0xff]   ;;  %v13520_v48 = vld [vmem:[#allocation5 + $0x6cc] ss:$20 sps:$4 sm:$0xff]  }
 0x107   :  { %v13495_v47 = vld [vmem:[#allocation5 + $0x610] ss:$20 sps:$4 sm:$0xff]  }
 0x109   :  { %1500 = vmatpush1.bf16.msra.mxu0 %v13369_v55  ;;  %1623 = vmatpush1.bf16.msra.mxu1 %v13372_v56  ;;  %v15408_v55 = vpack.c.bf16 %v11282_v50, %v11282_v50  ;;  %v13447_v56 = vld [vmem:[#allocation5 + $0x10] ss:$20 sps:$4 sm:$0xff]   ;;  %v13528_v50 = vld [vmem:[#allocation5 + $0x6f8] ss:$20 sps:$4 sm:$0xff]  }
 0x10a   :  { %1501 = vmatprep.subr.bf16.mxu0 %v13377_v57  ;;  %1624 = vmatprep.subr.bf16.mxu1 %v13380_v58  ;;  %v13458_v57 = vld [vmem:[#allocation5 + $0x290] ss:$20 sps:$4 sm:$0xff]   ;;  %v13448_v58 = vld [vmem:[#allocation5 + $0x178] ss:$20 sps:$4 sm:$0xff]  }
 0x10d   :  { %1502 = vmatpush1.bf16.msra.mxu0 %v13375_v59  ;;  %1625 = vmatpush1.bf16.msra.mxu1 %v13378_v61  ;;  %v13460_v59 = vld [vmem:[#allocation5 + $0x3f8] ss:$20 sps:$4 sm:$0xff]  }
 0x10e   :  { %1503 = vmatprep.subr.bf16.mxu0 %v13383_v62  ;;  %1626 = vmatprep.subr.bf16.mxu1 %v13386_v63  ;;  %v13449_v61 = vld [vmem:[#allocation5 + $0x38] ss:$20 sps:$4 sm:$0xff]   ;;  %v13450_v63 = vld [vmem:[#allocation5 + $0x1a0] ss:$20 sps:$4 sm:$0xff]  }
 0x10f   :  { %v13462_v62 = vld [vmem:[#allocation5 + $0x2b8] ss:$20 sps:$4 sm:$0xff]  }
 0x111   :  { %1504 = vmatpush1.bf16.msra.mxu0 %v13381_v0  ;;  %1627 = vmatpush1.bf16.msra.mxu1 %v13384_v1  ;;  %v13464_v0 = vld [vmem:[#allocation5 + $0x420] ss:$20 sps:$4 sm:$0xff]  }
 0x112   :  { %1505 = vmatprep.subr.bf16.mxu0 %v13389_v2  ;;  %1628 = vmatprep.subr.bf16.mxu1 %v13392_v3  ;;  %v13451_v1 = vld [vmem:[#allocation5 + $0x60] ss:$20 sps:$4 sm:$0xff]   ;;  %v13452_v3 = vld [vmem:[#allocation5 + $0x1c8] ss:$20 sps:$4 sm:$0xff]  }
 0x113   :  { %v13466_v2 = vld [vmem:[#allocation5 + $0x2e0] ss:$20 sps:$4 sm:$0xff]  }
 0x115   :  { %1506 = vmatpush1.bf16.msra.mxu0 %v13387_v4  ;;  %1629 = vmatpush1.bf16.msra.mxu1 %v13390_v5  ;;  %v13468_v4 = vld [vmem:[#allocation5 + $0x448] ss:$20 sps:$4 sm:$0xff]  }
 0x116   :  { %1507 = vmatprep.subr.bf16.mxu0 %v13395_v6  ;;  %1630 = vmatprep.subr.bf16.mxu1 %v13398_v7  ;;  %v13453_v5 = vld [vmem:[#allocation5 + $0x88] ss:$20 sps:$4 sm:$0xff]   ;;  %v13454_v7 = vld [vmem:[#allocation5 + $0x1f0] ss:$20 sps:$4 sm:$0xff]  }
 0x117   :  { %v13469_v6 = vld [vmem:[#allocation5 + $0x308] ss:$20 sps:$4 sm:$0xff]  }
 0x119   :  { %1508 = vmatpush1.bf16.msra.mxu0 %v13393_v8  ;;  %1631 = vmatpush1.bf16.msra.mxu1 %v13396_v10  ;;  %v13471_v8 = vld [vmem:[#allocation5 + $0x470] ss:$20 sps:$4 sm:$0xff]  }
 0x11a   :  { %1509 = vmatprep.subr.bf16.mxu0 %v13401_v11  ;;  %1632 = vmatprep.subr.bf16.mxu1 %v13404_v12  ;;  %v13455_v10 = vld [vmem:[#allocation5 + $0xb0] ss:$20 sps:$4 sm:$0xff]   ;;  %v13474_v11 = vld [vmem:[#allocation5 + $0x498] ss:$20 sps:$4 sm:$0xff]  }
 0x11b   :  { %v13459_v12 = vld [vmem:[#allocation5 + $0xd8] ss:$20 sps:$4 sm:$0xff]  }
 0x11d   :  { %1510 = vmatpush1.bf16.msra.mxu0 %v13399_v13  ;;  %1633 = vmatpush1.bf16.msra.mxu1 %v13402_v14  ;;  %v13461_v13 = vld [vmem:[#allocation5 + $0x240] ss:$20 sps:$4 sm:$0xff]   ;;  %v13475_v14 = vld [vmem:[#allocation5 + $0x358] ss:$20 sps:$4 sm:$0xff]  }
 0x11e   :  { %1511 = vmatprep.subr.bf16.mxu0 %v13407_v15  ;;  %1634 = vmatprep.subr.bf16.mxu1 %v13410_v17  ;;  %v13477_v15 = vld [vmem:[#allocation5 + $0x4c0] ss:$20 sps:$4 sm:$0xff]  }
 0x11f   :  { %v13463_v17 = vld [vmem:[#allocation5 + $0x100] ss:$20 sps:$4 sm:$0xff]  }
 0x121   :  { %1512 = vmatpush1.bf16.msra.mxu0 %v13405_v18  ;;  %1635 = vmatpush1.bf16.msra.mxu1 %v13408_v19  ;;  %v13478_v18 = vld [vmem:[#allocation5 + $0x380] ss:$20 sps:$4 sm:$0xff]   ;;  %v13465_v19 = vld [vmem:[#allocation5 + $0x268] ss:$20 sps:$4 sm:$0xff]  }
 0x122   :  { %1522 = vmatprep.subr.bf16.mxu0 %v13414_v21  ;;  %1645 = vmatprep.subr.bf16.mxu1 %v13417_v22  ;;  %v13480_v21 = vld [vmem:[#allocation5 + $0x4e8] ss:$20 sps:$4 sm:$0xff]  }
 0x123   :  { %v13467_v22 = vld [vmem:[#allocation5 + $0x128] ss:$20 sps:$4 sm:$0xff]  }
 0x124   :  { %1514 = vmatmul.mubr.bf16.vlgmr.msra.gmra.mrb[0].mxu0 %v15398_v25  ;;  %1637 = vmatmul.mubr.bf16.vlgmr.msra.gmra.mrb[0].mxu1 %v15398_v25 }
 0x125   :  { %1523 = vmatpush1.bf16.msra.mxu0 %v13412_v23  ;;  %1646 = vmatpush1.bf16.msra.mxu1 %v13415_v24  ;;  %v13481_v23 = vld [vmem:[#allocation5 + $0x3a8] ss:$20 sps:$4 sm:$0xff]   ;;  %v13486_v24 = vld [vmem:[#allocation5 + $0x5e0] ss:$20 sps:$4 sm:$0xff]  }
 0x126   :  { %1524 = vmatprep.subr.bf16.mxu0 %v13420_v26  ;;  %1647 = vmatprep.subr.bf16.mxu1 %v13423_v27  ;;  %v13470_v26 = vld [vmem:[#allocation5 + $0x510] ss:$20 sps:$4 sm:$0xff]  }
 0x127   :  { %1554 = vmatprep.mubr.bf16.mxu0 %v15169_v32  ;;  %1677 = vmatprep.mubr.bf16.mxu1 %v15169_v32  ;;  %v13484_v27 = vld [vmem:[#allocation5 + $0x5dc] ss:$20 sps:$4 sm:$0xff]  }
 0x129   :  { %1525 = vmatpush1.bf16.msra.mxu0 %v13418_v28  ;;  %1648 = vmatpush1.bf16.msra.mxu1 %v13421_v29  ;;  %v13492_v28 = vld [vmem:[#allocation5 + $0x608] ss:$20 sps:$4 sm:$0xff]   ;;  %v15170_v29 = vmov 0.0  }
 0x12a   :  { %1526 = vmatprep.subr.bf16.mxu0 %v13426_v30  ;;  %1649 = vmatprep.subr.bf16.mxu1 %v13429_v31  ;;  %v13473_v30 = vld [vmem:[#allocation5 + $0x538] ss:$20 sps:$4 sm:$0xff]  }
 0x12b   :  { %v13490_v31 = vld [vmem:[#allocation5 + $0x604] ss:$20 sps:$4 sm:$0xff]  }
 0x12d   :  { %1527 = vmatpush1.bf16.msra.mxu0 %v13424_v9  ;;  %1650 = vmatpush1.bf16.msra.mxu1 %v13427_v33  ;;  %v13498_v9 = vld [vmem:[#allocation5 + $0x630] ss:$20 sps:$4 sm:$0xff]   ;;  %v13476_v33 = vld [vmem:[#allocation5 + $0x560] ss:$20 sps:$4 sm:$0xff]  }
 0x12e   :  { %1528 = vmatprep.subr.bf16.mxu0 %v13432_v34  ;;  %1651 = vmatprep.subr.bf16.mxu1 %v13435_v35  ;;  %v13496_v34 = vld [vmem:[#allocation5 + $0x62c] ss:$20 sps:$4 sm:$0xff]  }
 0x12f   :  { %v13504_v35 = vld [vmem:[#allocation5 + $0x658] ss:$20 sps:$4 sm:$0xff]  }
 0x131   :  { %1529 = vmatpush1.bf16.msra.mxu0 %v13430_v36  ;;  %1652 = vmatpush1.bf16.msra.mxu1 %v13433_v37  ;;  %v13510_v36 = vld [vmem:[#allocation5 + $0x680] ss:$20 sps:$4 sm:$0xff]   ;;  %v13482_v37 = vld [vmem:[#allocation5 + $0x5b0] ss:$20 sps:$4 sm:$0xff]  }
 0x132   :  { %1530 = vmatprep.subr.bf16.mxu0 %v13438_v38  ;;  %1653 = vmatprep.subr.bf16.mxu1 %v13441_v39  ;;  %v13483_v38 = vld [vmem:[#allocation5 + $0x5d8] ss:$0 sps:$4 sm:$0xff]   ;;  %v13508_v39 = vld [vmem:[#allocation5 + $0x67c] ss:$20 sps:$4 sm:$0xff]  }
 0x135   :  { %1531 = vmatpush1.bf16.msra.mxu0 %v13436_v42  ;;  %1654 = vmatpush1.bf16.msra.mxu1 %v13439_v44  ;;  %v13514_v42 = vld [vmem:[#allocation5 + $0x6a4] ss:$20 sps:$4 sm:$0xff]   ;;  %v1438_v44 = vsel %vm1424_vm0, %v13483_v38, 0  ;;  %v417_v38 = vld [vmem:[#allocation7] ss:$8 sm:$0x10] }
 0x136   :  { %11473 = vmatprep.subr.msk.bf16.mxu0 %vm1424_vm0, %v11469_v45  ;;  %11475 = vmatprep.subr.msk.bf16.mxu1 %vm1424_vm0, %v11471_v46  ;;  %v13522_v45 = vld [vmem:[#allocation5 + $0x6d0] ss:$20 sps:$4 sm:$0xff]  }
 0x137   :  { %v13487_v46 = vld [vmem:[#allocation5 + $0x5e4] ss:$20 sps:$4 sm:$0xff]  }
 0x139   :  { %1533 = vmatpush1.bf16.msra.mxu0 %v1426_v52  ;;  %1656 = vmatpush1.bf16.msra.mxu1 %v1432_v53  ;;  %v13501_v52 = vld [vmem:[#allocation5 + $0x638] ss:$20 sps:$4 sm:$0xff]   ;;  %v13526_v53 = vld [vmem:[#allocation5 + $0x6f4] ss:$20 sps:$4 sm:$0xff]  }
 0x13a   :  { %12549 = vmatprep.subr.bf16.mxu0 %v13446_v51  ;;  %12571 = vmatprep.subr.bf16.mxu1 %v13456_v54  ;;  %v13493_v51 = vld [vmem:[#allocation5 + $0x60c] ss:$20 sps:$4 sm:$0xff]  }
 0x13b   :  { %v13534_v54 = vld [vmem:[#allocation5 + $0x720] ss:$20 sps:$4 sm:$0xff]  }
 0x13c   :  { %11474 = vmatmul.mubr.msk.bf16.vlgmr.msra.gmra.mrb[0].mxu0 %vm1420_vm1, %v15408_v55  ;;  %11476 = vmatmul.mubr.msk.bf16.vlgmr.msra.gmra.mrb[0].mxu1 %vm1420_vm1, %v15408_v55 }
 0x13d   :  { %12550 = vmatpush3.bf16.msra.mxu0 %v13447_v56  ;;  %12572 = vmatpush3.bf16.msra.mxu1 %v13458_v57  ;;  %v13499_v56 = vld [vmem:[#allocation5 + $0x634] ss:$20 sps:$4 sm:$0xff]  }
 0x13e   :  { %12551 = vmatprep.subr.bf16.mxu0 %v13448_v58  ;;  %12573 = vmatprep.subr.bf16.mxu1 %v13460_v59  ;;  %v13507_v57 = vld [vmem:[#allocation5 + $0x660] ss:$20 sps:$4 sm:$0xff]   ;;  %v13532_v58 = vld [vmem:[#allocation5 + $0x71c] ss:$20 sps:$4 sm:$0xff]  }
 0x13f   :  { %1718 = vmatprep.mubr.bf16.mxu0 %v15379_v60  ;;  %1758 = vmatprep.mubr.bf16.mxu1 %v15390_v20  ;;  %v13472_v60 = vld [vmem:[#allocation5 + $0x330] ss:$20 sps:$4 sm:$0xff]   ;;  %v13457_v20 = vld [vmem:[#allocation5 + $0x218] ss:$20 sps:$4 sm:$0xff]   ;;  %v13540_v59 = vld [vmem:[#allocation5 + $0x748] ss:$20 sps:$4 sm:$0xff]  }
 0x141   :  { %12552 = vmatpush3.bf16.msra.mxu0 %v13449_v61  ;;  %12574 = vmatpush3.bf16.msra.mxu1 %v13462_v62  ;;  %v13505_v61 = vld [vmem:[#allocation5 + $0x65c] ss:$20 sps:$4 sm:$0xff]  }
 0x142   :  { %12553 = vmatprep.subr.bf16.mxu0 %v13450_v63  ;;  %12575 = vmatprep.subr.bf16.mxu1 %v13464_v0  ;;  %v13513_v62 = vld [vmem:[#allocation5 + $0x688] ss:$20 sps:$4 sm:$0xff]   ;;  %v13538_v63 = vld [vmem:[#allocation5 + $0x744] ss:$20 sps:$4 sm:$0xff]  }
 0x143   :  { %v13511_v0 = vld [vmem:[#allocation5 + $0x684] ss:$20 sps:$4 sm:$0xff]  }
 0x145   :  { %12554 = vmatpush3.bf16.msra.mxu0 %v13451_v1  ;;  %12576 = vmatpush3.bf16.msra.mxu1 %v13466_v2  ;;  %v13519_v1 = vld [vmem:[#allocation5 + $0x6b0] ss:$20 sps:$4 sm:$0xff]   ;;  %v13544_v2 = vld [vmem:[#allocation5 + $0x76c] ss:$20 sps:$4 sm:$0xff]  }
 0x146   :  { %12555 = vmatprep.subr.bf16.mxu0 %v13452_v3  ;;  %12577 = vmatprep.subr.bf16.mxu1 %v13468_v4  ;;  %v13552_v3 = vld [vmem:[#allocation5 + $0x798] ss:$20 sps:$4 sm:$0xff]  }
 0x147   :  { %v13517_v4 = vld [vmem:[#allocation5 + $0x6ac] ss:$20 sps:$4 sm:$0xff]  }
 0x149   :  { %12556 = vmatpush3.bf16.msra.mxu0 %v13453_v5  ;;  %12578 = vmatpush3.bf16.msra.mxu1 %v13469_v6  ;;  %v13525_v5 = vld [vmem:[#allocation5 + $0x6d8] ss:$20 sps:$4 sm:$0xff]   ;;  %v13550_v6 = vld [vmem:[#allocation5 + $0x794] ss:$20 sps:$4 sm:$0xff]  }
 0x14a   :  { %12557 = vmatprep.subr.bf16.mxu0 %v13454_v7  ;;  %12579 = vmatprep.subr.bf16.mxu1 %v13471_v8  ;;  %v13558_v7 = vld [vmem:[#allocation5 + $0x7c0] ss:$20 sps:$4 sm:$0xff]  }
 0x14b   :  { %v13523_v8 = vld [vmem:[#allocation5 + $0x6d4] ss:$20 sps:$4 sm:$0xff]  }
 0x14d   :  { %12558 = vmatpush3.bf16.msra.mxu0 %v13455_v10  ;;  %12580 = vmatpush3.bf16.msra.mxu1 %v13472_v60  ;;  %v13531_v10 = vld [vmem:[#allocation5 + $0x700] ss:$20 sps:$4 sm:$0xff]   ;;  %v13556_v60 = vld [vmem:[#allocation5 + $0x7bc] ss:$20 sps:$4 sm:$0xff]  }
 0x14e   :  { %12559 = vmatprep.subr.bf16.mxu0 %v13457_v20  ;;  %12581 = vmatprep.subr.bf16.mxu1 %v13474_v11  ;;  %v13529_v20 = vld [vmem:[#allocation5 + $0x6fc] ss:$20 sps:$4 sm:$0xff]  }
 0x14f   :  { %v13564_v11 = vld [vmem:[#allocation5 + $0x7e8] ss:$20 sps:$4 sm:$0xff]  }
 0x151   :  { %12560 = vmatpush3.bf16.msra.mxu0 %v13459_v12  ;;  %12582 = vmatpush3.bf16.msra.mxu1 %v13475_v14  ;;  %v13537_v12 = vld [vmem:[#allocation5 + $0x728] ss:$20 sps:$4 sm:$0xff]   ;;  %v13535_v14 = vld [vmem:[#allocation5 + $0x724] ss:$20 sps:$4 sm:$0xff]  }
 0x152   :  { %12561 = vmatprep.subr.bf16.mxu0 %v13461_v13  ;;  %12583 = vmatprep.subr.bf16.mxu1 %v13477_v15  ;;  %v13562_v13 = vld [vmem:[#allocation5 + $0x7e4] ss:$20 sps:$4 sm:$0xff]  }
 0x153   :  { %v13543_v15 = vld [vmem:[#allocation5 + $0x750] ss:$20 sps:$4 sm:$0xff]  }
 0x155   :  { %12562 = vmatpush3.bf16.msra.mxu0 %v13463_v17  ;;  %12584 = vmatpush3.bf16.msra.mxu1 %v13478_v18  ;;  %v13568_v17 = vld [vmem:[#allocation5 + $0x80c] ss:$20 sps:$4 sm:$0xff]   ;;  %v13570_v18 = vld [vmem:[#allocation5 + $0x810] ss:$20 sps:$4 sm:$0xff]  }
 0x156   :  { %12563 = vmatprep.subr.bf16.mxu0 %v13465_v19  ;;  %12585 = vmatprep.subr.bf16.mxu1 %v13480_v21  ;;  %v13541_v19 = vld [vmem:[#allocation5 + $0x74c] ss:$20 sps:$4 sm:$0xff]  }
 0x157   :  { %v13576_v21 = vld [vmem:[#allocation5 + $0x838] ss:$20 sps:$4 sm:$0xff]  }
 0x159   :  { %12564 = vmatpush3.bf16.msra.mxu0 %v13467_v22  ;;  %12586 = vmatpush3.bf16.msra.mxu1 %v13481_v23  ;;  %v13549_v22 = vld [vmem:[#allocation5 + $0x778] ss:$20 sps:$4 sm:$0xff]   ;;  %v13574_v23 = vld [vmem:[#allocation5 + $0x834] ss:$20 sps:$4 sm:$0xff]  }
 0x15a   :  { %12924 = vmatprep.subr.bf16.mxu0 %v15170_v29  ;;  %3135 = vmatprep.subr.bf16.mxu1 %v13486_v24  ;;  %v13547_v24 = vld [vmem:[#allocation5 + $0x774] ss:$20 sps:$4 sm:$0xff]  }
 0x15c   :  { %1719 = vmatmul.mubr.bf16.vlgmr.msra.gmra.mrb[4].mxu0 %v15388_v16  ;;  %1759 = vmatmul.mubr.bf16.vlgmr.msra.gmra.mrb[4].mxu1 %v15398_v25  ;;  %v13479_v16 = vld [vmem:[#allocation5 + $0x588] ss:$20 sps:$4 sm:$0xff]  }
 0x15d   :  { %12925 = vmatpush3.bf16.msra.mxu0 %v13470_v26  ;;  %12936 = vmatprep.mubr.msk.bf16.mxu0 %vm15171_vm2, %v15170_v29  ;;  %v13502_v25 = vld [vmem:[#allocation5 + $0x654] ss:$20 sps:$4 sm:$0xff]  }
 0x15e   :  { %12926 = vmatprep.subr.bf16.mxu0 %v15170_v29  ;;  %3136 = vmatpush1.bf16.msra.mxu1 %v13484_v27  ;;  %v13582_v26 = vld [vmem:[#allocation5 + $0x860] ss:$20 sps:$4 sm:$0xff]  }
 0x15f   :  { %3137 = vmatprep.subr.bf16.mxu1 %v13492_v28  ;;  %v13555_v27 = vld [vmem:[#allocation5 + $0x7a0] ss:$20 sps:$4 sm:$0xff]   ;;  %v13553_v28 = vld [vmem:[#allocation5 + $0x79c] ss:$20 sps:$4 sm:$0xff]  }
 0x161   :  { %12927 = vmatpush3.bf16.msra.mxu0 %v13473_v30  ;;  %v13561_v30 = vld [vmem:[#allocation5 + $0x7c8] ss:$20 sps:$4 sm:$0xff]  }
 0x162   :  { %12928 = vmatprep.subr.bf16.mxu0 %v15170_v29  ;;  %3138 = vmatpush1.bf16.msra.mxu1 %v13490_v31  ;;  %v13559_v31 = vld [vmem:[#allocation5 + $0x7c4] ss:$20 sps:$4 sm:$0xff]  }
 0x163   :  { %3139 = vmatprep.subr.bf16.mxu1 %v13498_v9  ;;  %v13567_v9 = vld [vmem:[#allocation5 + $0x7f0] ss:$20 sps:$4 sm:$0xff]  }
 0x165   :  { %12929 = vmatpush3.bf16.msra.mxu0 %v13476_v33  ;;  %v13565_v33 = vld [vmem:[#allocation5 + $0x7ec] ss:$20 sps:$4 sm:$0xff]  }
 0x166   :  { %12930 = vmatprep.subr.bf16.mxu0 %v15170_v29  ;;  %3140 = vmatpush1.bf16.msra.mxu1 %v13496_v34  ;;  %v13573_v34 = vld [vmem:[#allocation5 + $0x818] ss:$20 sps:$4 sm:$0xff]  }
 0x167   :  { %3141 = vmatprep.subr.bf16.mxu1 %v13504_v35  ;;  %v13571_v35 = vld [vmem:[#allocation5 + $0x814] ss:$20 sps:$4 sm:$0xff]  }
 0x169   :  { %12931 = vmatpush3.bf16.msra.mxu0 %v13479_v16  ;;  %v13579_v16 = vld [vmem:[#allocation5 + $0x840] ss:$20 sps:$4 sm:$0xff]  }
 0x16a   :  { %12932 = vmatprep.subr.bf16.mxu0 %v15170_v29  ;;  %3142 = vmatpush1.bf16.msra.mxu1 %v13502_v25  ;;  %v13577_v25 = vld [vmem:[#allocation5 + $0x83c] ss:$20 sps:$4 sm:$0xff]  }
 0x16b   :  { %3143 = vmatprep.subr.bf16.mxu1 %v13510_v36  ;;  %v13585_v36 = vld [vmem:[#allocation5 + $0x868] ss:$20 sps:$4 sm:$0xff]  }
 0x16d   :  { %12933 = vmatpush3.bf16.msra.mxu0 %v13482_v37  ;;  %v416_v37 = vld [vmem:[#allocation7] ss:$8 sm:$0xf] }
 0x16e   :  { %12934 = vmatprep.subr.bf16.mxu0 %v15170_v29  ;;  %3144 = vmatpush1.bf16.msra.mxu1 %v13508_v39  ;;  %v15430_v39 = vsub.s32 0, %v15373_v43 }
 0x16f   :  { %3145 = vmatprep.subr.bf16.mxu1 %v13516_v40  ;;  %v1812_v40 = vld [vmem:[#allocation7 + $0x1] ss:$8 sm:$0xf] }
 0x171   :  { %12935 = vmatpush3.bf16.msra.mxu0 %v1438_v44  ;;  %v15436_v44 = vsub.s32 3, %v15373_v43 }
 0x172   :  { %3258 = vmatprep.subr.bf16.mxu0 %v13489_v41  ;;  %3146 = vmatpush1.bf16.msra.mxu1 %v13514_v42  ;;  %v1813_v41 = vld [vmem:[#allocation7 + $0x1] ss:$8 sm:$0x10]  ;;  %v15433_v42 = vsub.s32 1, %v15373_v43 }
 0x173   :  { %3147 = vmatprep.subr.bf16.mxu1 %v13522_v45  ;;  %v15438_v45 = vor.u32 %v417_v38, %v416_v37  ;;  %v13604_v37 = vld [vmem:[#allocation5 + $0x8fc] ss:$20 sps:$4 sm:$0xff]   ;;  %v13607_v38 = vld [vmem:[#allocation5 + $0x904] ss:$20 sps:$4 sm:$0xff]  }
 0x174   :  { %12937 = vmatmul.mubr.msk.bf16.vlgmr.msra.gmra.mrb[8].mxu0 %vm1420_vm1, %v15408_v55  ;;  %v13546_v55 = vld [vmem:[#allocation5 + $0x770] ss:$20 sps:$4 sm:$0xff]  }
 0x175   :  { %3259 = vmatpush1.bf16.msra.mxu0 %v13487_v46  ;;  %v1847_v46 = vld [vmem:[#allocation7 + $0x2] ss:$8 sm:$0xf] }
 0x176   :  { %3260 = vmatprep.subr.bf16.mxu0 %v13495_v47  ;;  %3148 = vmatpush1.bf16.msra.mxu1 %v13520_v48  ;;  %v1848_v47 = vld [vmem:[#allocation7 + $0x2] ss:$8 sm:$0x10]  ;;  %v423_v48 = vrot.slane %v15438_v45, %v15430_v39 }
 0x177   :  { %3149 = vmatprep.subr.bf16.mxu1 %v13528_v50  ;;  %v15442_v50 = vor.u32 %v1813_v41, %v1812_v40  ;;  %v15477_v40 = vsub.s32 4, %v15373_v43  ;;  %v13612_v41 = vld [vmem:[#allocation5 + $0x928] ss:$20 sps:$4 sm:$0xff]  }
 0x179   :  { %3261 = vmatpush1.bf16.msra.mxu0 %v13493_v51  ;;  %v427_v51 = vrot.slane %v15438_v45, %v15433_v42 }
 0x17a   :  { %3262 = vmatprep.subr.bf16.mxu0 %v13501_v52  ;;  %3150 = vmatpush1.bf16.msra.mxu1 %v13526_v53  ;;  %v435_v52 = vrot.slane %v15438_v45, %v15436_v44  ;;  %v15448_v53 = vor.u32 %v1848_v47, %v1847_v46  ;;  %v13615_v46 = vld [vmem:[#allocation5 + $0x930] ss:$20 sps:$4 sm:$0xff]  }
 0x17b   :  { %3151 = vmatprep.subr.bf16.mxu1 %v13534_v54  ;;  %v13610_v47 = vld [vmem:[#allocation5 + $0x924] ss:$20 sps:$4 sm:$0xff]  }
 0x17d   :  { %3263 = vmatpush1.bf16.msra.mxu0 %v13499_v56 }
 0x17e   :  { %3264 = vmatprep.subr.bf16.mxu0 %v13507_v57  ;;  %3152 = vmatpush1.bf16.msra.mxu1 %v13532_v58  ;;  %v1819_v58 = vrot.slane %v15442_v50, %v15430_v39 }
 0x17f   :  { %3153 = vmatprep.subr.bf16.mxu1 %v13540_v59 }
 0x181   :  { %3265 = vmatpush1.bf16.msra.mxu0 %v13505_v61 }
 0x182   :  { %3266 = vmatprep.subr.bf16.mxu0 %v13513_v62  ;;  %3154 = vmatpush1.bf16.msra.mxu1 %v13538_v63  ;;  %v1823_v63 = vrot.slane %v15442_v50, %v15433_v42 }
 0x183   :  { %3155 = vmatprep.subr.bf16.mxu1 %v13546_v55 }
 0x185   :  { %3267 = vmatpush1.bf16.msra.mxu0 %v13511_v0  ;;  %v1831_v0 = vrot.slane %v15442_v50, %v15436_v44 }
 0x186   :  { %3268 = vmatprep.subr.bf16.mxu0 %v13519_v1  ;;  %3156 = vmatpush1.bf16.msra.mxu1 %v13544_v2 }
 0x187   :  { %3157 = vmatprep.subr.bf16.mxu1 %v13552_v3 }
 0x189   :  { %3269 = vmatpush1.bf16.msra.mxu0 %v13517_v4  ;;  %v1854_v4 = vrot.slane %v15448_v53, %v15430_v39 }
 0x18a   :  { %3270 = vmatprep.subr.bf16.mxu0 %v13525_v5  ;;  %3158 = vmatpush1.bf16.msra.mxu1 %v13550_v6 }
 0x18b   :  { %3159 = vmatprep.subr.bf16.mxu1 %v13558_v7 }
 0x18d   :  { %3271 = vmatpush1.bf16.msra.mxu0 %v13523_v8 }
 0x18e   :  { %3272 = vmatprep.subr.bf16.mxu0 %v13531_v10  ;;  %3160 = vmatpush1.bf16.msra.mxu1 %v13556_v60  ;;  %v1858_v10 = vrot.slane %v15448_v53, %v15433_v42 }
 0x18f   :  { %3161 = vmatprep.subr.bf16.mxu1 %v13564_v11 }
 0x191   :  { %3273 = vmatpush1.bf16.msra.mxu0 %v13529_v20  ;;  %v1866_v20 = vrot.slane %v15448_v53, %v15436_v44 }
 0x192   :  { %3274 = vmatprep.subr.bf16.mxu0 %v13537_v12  ;;  %3162 = vmatpush1.bf16.msra.mxu1 %v13562_v13 }
 0x193   :  { %3163 = vmatprep.subr.bf16.mxu1 %v13570_v18 }
 0x195   :  { %3275 = vmatpush1.bf16.msra.mxu0 %v13535_v14 }
 0x196   :  { %3276 = vmatprep.subr.bf16.mxu0 %v13543_v15  ;;  %3164 = vmatpush1.bf16.msra.mxu1 %v13568_v17  ;;  %v13580_v15 = vld [vmem:[#allocation5 + $0x85c] ss:$20 sps:$4 sm:$0xff]   ;;  %v13583_v17 = vld [vmem:[#allocation5 + $0x864] ss:$20 sps:$4 sm:$0xff]  }
 0x197   :  { %3165 = vmatprep.subr.bf16.mxu1 %v13576_v21  ;;  %v13588_v21 = vld [vmem:[#allocation5 + $0x888] ss:$20 sps:$4 sm:$0xff]  }
 0x199   :  { %3277 = vmatpush1.bf16.msra.mxu0 %v13541_v19 }
 0x19a   :  { %3278 = vmatprep.subr.bf16.mxu0 %v13549_v22  ;;  %3166 = vmatpush1.bf16.msra.mxu1 %v13574_v23  ;;  %v13591_v23 = vld [vmem:[#allocation5 + $0x890] ss:$20 sps:$4 sm:$0xff]  }
 0x19b   :  { %3176 = vmatprep.subr.bf16.mxu1 %v13582_v26  ;;  %v13589_v26 = vld [vmem:[#allocation5 + $0x88c] ss:$20 sps:$4 sm:$0xff]  }
 0x19d   :  { %3279 = vmatpush1.bf16.msra.mxu0 %v13547_v24  ;;  %v13586_v24 = vld [vmem:[#allocation5 + $0x884] ss:$20 sps:$4 sm:$0xff]  }
 0x19e   :  { %3280 = vmatprep.subr.bf16.mxu0 %v13555_v27 }
 0x1a1   :  { %3281 = vmatpush1.bf16.msra.mxu0 %v13553_v28  ;;  %v13594_v28 = vld [vmem:[#allocation5 + $0x8b0] ss:$20 sps:$4 sm:$0xff]  }
 0x1a2   :  { %3282 = vmatprep.subr.bf16.mxu0 %v13561_v30  ;;  %v13597_v30 = vld [vmem:[#allocation5 + $0x8b8] ss:$20 sps:$4 sm:$0xff]  }
 0x1a5   :  { %3283 = vmatpush1.bf16.msra.mxu0 %v13559_v31  ;;  %v13592_v31 = vld [vmem:[#allocation5 + $0x8ac] ss:$20 sps:$4 sm:$0xff]  }
 0x1a6   :  { %3284 = vmatprep.subr.bf16.mxu0 %v13567_v9  ;;  %v13595_v9 = vld [vmem:[#allocation5 + $0x8b4] ss:$20 sps:$4 sm:$0xff]  }
 0x1a9   :  { %3285 = vmatpush1.bf16.msra.mxu0 %v13565_v33  ;;  %v13600_v33 = vld [vmem:[#allocation5 + $0x8d8] ss:$20 sps:$4 sm:$0xff]  }
 0x1aa   :  { %3286 = vmatprep.subr.bf16.mxu0 %v13573_v34  ;;  %v13603_v34 = vld [vmem:[#allocation5 + $0x8e0] ss:$20 sps:$4 sm:$0xff]  }
 0x1ad   :  { %3287 = vmatpush1.bf16.msra.mxu0 %v13571_v35  ;;  %v13598_v35 = vld [vmem:[#allocation5 + $0x8d4] ss:$20 sps:$4 sm:$0xff]  }
 0x1ae   :  { %3288 = vmatprep.subr.bf16.mxu0 %v13579_v16  ;;  %v13601_v16 = vld [vmem:[#allocation5 + $0x8dc] ss:$20 sps:$4 sm:$0xff]  }
 0x1b1   :  { %3289 = vmatpush1.bf16.msra.mxu0 %v13577_v25  ;;  %v13606_v25 = vld [vmem:[#allocation5 + $0x900] ss:$20 sps:$4 sm:$0xff]  }
 0x1b2   :  { %3299 = vmatprep.subr.bf16.mxu0 %v13585_v36  ;;  %v13609_v36 = vld [vmem:[#allocation5 + $0x908] ss:$20 sps:$4 sm:$0xff]  }
 0x20f   :  { %v1556_v54 = vpop.f32.mrb[0].mxu0  ;;  %v15450_v56 = vpop.f32.mrb[0].mxu1 }
 0x210   :  { %v13078_v57 = vadd.f32 %v1556_v54, %v423_v48  ;;  %v1558_v59 = vpop.f32.mrb[1].mxu0  ;;  %v1681_v61 = vpop.f32.mrb[1].mxu1  ;;  %v13613_v48 = vld [vmem:[#allocation5 + $0x92c] ss:$20 sps:$4 sm:$0xff]  }
 0x211   :  { %v13079_v62 = vadd.f32 %v1558_v59, %v427_v51  ;;  %v13081_v55 = vadd.f32 %v1681_v61, %v435_v52  ;;  %v1560_v1 = vpop.f32.mrb[2].mxu0  ;;  %v1683_v2 = vpop.f32.mrb[2].mxu1  ;;  %v13618_v51 = vld [vmem:[#allocation5 + $0x950] ss:$20 sps:$4 sm:$0xff]   ;;  %v13621_v52 = vld [vmem:[#allocation5 + $0x958] ss:$20 sps:$4 sm:$0xff]  }
 0x212   :  { %v1806_v3 = vmax.f32 %v13078_v57, 0.0  ;;  %v1561_v5 = vpop.f32.mrb[3].mxu0  ;;  %v1684_v6 = vpop.f32.mrb[3].mxu1  ;;  %v439_v57 = vrot.slane %v15438_v45, %v15477_v40 }
 0x213   :  { %v1807_v7 = vmax.f32 %v13079_v62, 0.0  ;;  %v1809_v8 = vmax.f32 %v13081_v55, 0.0  ;;  %v13616_v62 = vld [vmem:[#allocation5 + $0x94c] ss:$20 sps:$4 sm:$0xff]  }
 0x214   :  { %v1841_v60 = vmul.f32 %v1819_v58, %v1806_v3  ;;  %v13624_v3 = vld [vmem:[#allocation5 + $0x978] ss:$20 sps:$4 sm:$0xff]  }
 0x215   :  { %v1842_v11 = vmul.f32 %v1823_v63, %v1807_v7  ;;  %v1844_v12 = vmul.f32 %v1831_v0, %v1809_v8  ;;  %v13619_v63 = vld [vmem:[#allocation5 + $0x954] ss:$20 sps:$4 sm:$0xff]  }
 0x216   :  { %v1876_v13 = vadd.f32 %v1854_v4, %v1841_v60  ;;  %v13627_v4 = vld [vmem:[#allocation5 + $0x980] ss:$20 sps:$4 sm:$0xff]  }
 0x217   :  { %v1877_v14 = vadd.f32 %v1858_v10, %v1842_v11  ;;  %v1879_v18 = vadd.f32 %v1866_v20, %v1844_v12  ;;  %v13622_v8 = vld [vmem:[#allocation5 + $0x974] ss:$20 sps:$4 sm:$0xff]   ;;  %v13625_v10 = vld [vmem:[#allocation5 + $0x97c] ss:$20 sps:$4 sm:$0xff]  }
 0x218   :  { %v15466_v22 = vpack.c.bf16 %v1876_v13, %v1876_v13  ;;  %v13630_v60 = vld [vmem:[#allocation5 + $0x9a0] ss:$20 sps:$4 sm:$0xff]   ;;  %v13633_v11 = vld [vmem:[#allocation5 + $0x9a8] ss:$20 sps:$4 sm:$0xff]   ;;  %v13631_v13 = vld [vmem:[#allocation5 + $0x9a4] ss:$20 sps:$4 sm:$0xff]  }
 0x219   :  { %v15464_v19 = vpack.c.bf16 %v1877_v14, %v1877_v14  ;;  %v15472_v27 = vpack.c.bf16 %v1879_v18, %v1879_v18  ;;  %v13628_v12 = vld [vmem:[#allocation5 + $0x99c] ss:$20 sps:$4 sm:$0xff]   ;;  %v13637_v18 = vld [vmem:[#allocation5 + $0x9cc] ss:$20 sps:$4 sm:$0xff]  }
 0x21a   :  { %v13636_v14 = vld [vmem:[#allocation5 + $0x9c8] ss:$20 sps:$4 sm:$0xff]  }
 0x21b   :  { %3167 = vmatprep.mubr.bf16.mxu1 %v15464_v19  ;;  %3290 = vmatprep.mubr.bf16.mxu0 %v15464_v19 }
 0x21c   :  { %3168 = vmatmul.mubr.bf16.vlgmr.msra.gmra.mrb[8].mxu1 %v15466_v22  ;;  %3291 = vmatmul.mubr.bf16.vlgmr.msra.gmra.mrb[12].mxu0 %v15466_v22 }
 0x21d   :  { %3177 = vmatpush1.bf16.msra.mxu1 %v13580_v15  ;;  %3300 = vmatpush1.bf16.msra.mxu0 %v13583_v17  ;;  %v13639_v15 = vld [vmem:[#allocation5 + $0x9d0] ss:$20 sps:$4 sm:$0xff]  }
 0x21e   :  { %3208 = vmatprep.mubr.bf16.mxu1 %v15472_v27  ;;  %3331 = vmatprep.mubr.bf16.mxu0 %v15472_v27  ;;  %v13634_v17 = vld [vmem:[#allocation5 + $0x9c4] ss:$20 sps:$4 sm:$0xff]  }
 0x21f   :  { %3178 = vmatprep.subr.bf16.mxu1 %v13588_v21  ;;  %3301 = vmatprep.subr.bf16.mxu0 %v13591_v23  ;;  %v13642_v21 = vld [vmem:[#allocation5 + $0x9f0] ss:$20 sps:$4 sm:$0xff]   ;;  %v13645_v23 = vld [vmem:[#allocation5 + $0x9f8] ss:$20 sps:$4 sm:$0xff]  }
 0x221   :  { %3179 = vmatpush1.bf16.msra.mxu1 %v13586_v24  ;;  %3302 = vmatpush1.bf16.msra.mxu0 %v13589_v26  ;;  %v13640_v24 = vld [vmem:[#allocation5 + $0x9ec] ss:$20 sps:$4 sm:$0xff]   ;;  %v13643_v26 = vld [vmem:[#allocation5 + $0x9f4] ss:$20 sps:$4 sm:$0xff]  }
 0x222   :  { %3180 = vmatprep.subr.bf16.mxu1 %v13594_v28  ;;  %3303 = vmatprep.subr.bf16.mxu0 %v13597_v30  ;;  %v13648_v28 = vld [vmem:[#allocation5 + $0xa18] ss:$20 sps:$4 sm:$0xff]   ;;  %v15482_v30 = vsub.s32 2, %v15373_v43  ;;  %v13652_v43 = vld [vmem:[#allocation5 + $0xa3c] ss:$20 sps:$4 sm:$0xff]  }
 0x225   :  { %3181 = vmatpush1.bf16.msra.mxu1 %v13592_v31  ;;  %3304 = vmatpush1.bf16.msra.mxu0 %v13595_v9  ;;  %v13651_v31 = vld [vmem:[#allocation5 + $0xa20] ss:$20 sps:$4 sm:$0xff]  }
 0x226   :  { %3182 = vmatprep.subr.bf16.mxu1 %v13600_v33  ;;  %3305 = vmatprep.subr.bf16.mxu0 %v13603_v34  ;;  %v13646_v9 = vld [vmem:[#allocation5 + $0xa14] ss:$20 sps:$4 sm:$0xff]   ;;  %v13649_v33 = vld [vmem:[#allocation5 + $0xa1c] ss:$20 sps:$4 sm:$0xff]  }
 0x227   :  { %v13654_v34 = vld [vmem:[#allocation5 + $0xa40] ss:$20 sps:$4 sm:$0xff]  }
 0x229   :  { %3183 = vmatpush1.bf16.msra.mxu1 %v13598_v35  ;;  %3306 = vmatpush1.bf16.msra.mxu0 %v13601_v16  ;;  %v431_v35 = vrot.slane %v15438_v45, %v15482_v30  ;;  %v13657_v16 = vld [vmem:[#allocation5 + $0xa48] ss:$20 sps:$4 sm:$0xff]   ;;  %v13658_v45 = vld [vmem:[#allocation5 + $0xa64] ss:$20 sps:$4 sm:$0xff]  }
 0x22a   :  { %3184 = vmatprep.subr.bf16.mxu1 %v13606_v25  ;;  %3307 = vmatprep.subr.bf16.mxu0 %v13609_v36 }
 0x22d   :  { %3185 = vmatpush1.bf16.msra.mxu1 %v13604_v37  ;;  %3308 = vmatpush1.bf16.msra.mxu0 %v13607_v38  ;;  %v13655_v38 = vld [vmem:[#allocation5 + $0xa44] ss:$20 sps:$4 sm:$0xff]  }
 0x22e   :  { %3186 = vmatprep.subr.bf16.mxu1 %v13612_v41  ;;  %3309 = vmatprep.subr.bf16.mxu0 %v13615_v46  ;;  %v13080_v46 = vadd.f32 %v15450_v56, %v431_v35  ;;  %v13664_v56 = vld [vmem:[#allocation5 + $0xa8c] ss:$20 sps:$4 sm:$0xff]   ;;  %v13703_v35 = vld [vmem:[#allocation5 + $0xb84] ss:$20 sps:$4 sm:$0xff]  }
 0x22f   :  { %v12565_v54 = vpop.f32.mrb[4].mxu0  ;;  %v12587_v58 = vpop.f32.mrb[4].mxu1 }
 0x230   :  { %v12566_v59 = vpop.f32.mrb[5].mxu0  ;;  %v12588_v61 = vpop.f32.mrb[5].mxu1 }
 0x231   :  { %3187 = vmatpush1.bf16.msra.mxu1 %v13610_v47  ;;  %3310 = vmatpush1.bf16.msra.mxu0 %v13613_v48  ;;  %v12567_v55 = vadd.f32 %v12566_v59, %v12565_v54  ;;  %v12568_v0 = vpop.f32.mrb[6].mxu0  ;;  %v12589_v1 = vadd.f32 %v12588_v61, %v12587_v58  ;;  %v12590_v2 = vpop.f32.mrb[6].mxu1  ;;  %v13660_v47 = vld [vmem:[#allocation5 + $0xa68] ss:$20 sps:$4 sm:$0xff]   ;;  %v13663_v48 = vld [vmem:[#allocation5 + $0xa70] ss:$20 sps:$4 sm:$0xff]   ;;  %v1827_v58 = vrot.slane %v15442_v50, %v15482_v30 }
 0x232   :  { %3188 = vmatprep.subr.bf16.mxu1 %v13618_v51  ;;  %3311 = vmatprep.subr.bf16.mxu0 %v13621_v52  ;;  %v12569_v5 = vpop.f32.mrb[7].mxu0  ;;  %v12591_v6 = vpop.f32.mrb[7].mxu1  ;;  %v13661_v52 = vld [vmem:[#allocation5 + $0xa6c] ss:$20 sps:$4 sm:$0xff]   ;;  %v13666_v54 = vld [vmem:[#allocation5 + $0xa90] ss:$20 sps:$4 sm:$0xff]  }
 0x233   :  { %v1721_v7 = vadd.f32 %v12567_v55, %v439_v57  ;;  %v1808_v57 = vmax.f32 %v13080_v46, 0.0  ;;  %v13669_v59 = vld [vmem:[#allocation5 + $0xa98] ss:$20 sps:$4 sm:$0xff]   ;;  %v13667_v61 = vld [vmem:[#allocation5 + $0xa94] ss:$20 sps:$4 sm:$0xff]   ;;  %v1862_v55 = vrot.slane %v15448_v53, %v15482_v30 }
 0x234   :  { %v13675_v0 = vld [vmem:[#allocation5 + $0xac0] ss:$20 sps:$4 sm:$0xff]   ;;  %v13673_v2 = vld [vmem:[#allocation5 + $0xabc] ss:$20 sps:$4 sm:$0xff]  }
 0x235   :  { %3189 = vmatpush1.bf16.msra.mxu1 %v13616_v62  ;;  %3312 = vmatpush1.bf16.msra.mxu0 %v13619_v63  ;;  %v1761_v20 = vadd.f32 %v12589_v1, %v1721_v7  ;;  %v13672_v62 = vld [vmem:[#allocation5 + $0xab8] ss:$20 sps:$4 sm:$0xff]   ;;  %v1843_v63 = vmul.f32 %v1827_v58, %v1808_v57  ;;  %v13670_v1 = vld [vmem:[#allocation5 + $0xab4] ss:$20 sps:$4 sm:$0xff]   ;;  %v13676_v6 = vld [vmem:[#allocation5 + $0xadc] ss:$20 sps:$4 sm:$0xff]  }
 0x236   :  { %3190 = vmatprep.subr.bf16.mxu1 %v13624_v3  ;;  %3313 = vmatprep.subr.bf16.mxu0 %v13627_v4  ;;  %v13678_v3 = vld [vmem:[#allocation5 + $0xae0] ss:$20 sps:$4 sm:$0xff]   ;;  %v13681_v5 = vld [vmem:[#allocation5 + $0xae8] ss:$20 sps:$4 sm:$0xff]   ;;  %v13679_v7 = vld [vmem:[#allocation5 + $0xae4] ss:$20 sps:$4 sm:$0xff]  }
 0x237   :  { %v1878_v4 = vadd.f32 %v1862_v55, %v1843_v63  ;;  %v13711_v46 = vld [vmem:[#allocation5 + $0x9ac] ss:$20 sps:$4 sm:$0xff]   ;;  %v13716_v57 = vld [vmem:[#allocation5 + $0x614] ss:$20 sps:$4 sm:$0xff]   ;;  %v13722_v63 = vld [vmem:[#allocation5 + $0x7a4] ss:$20 sps:$4 sm:$0xff]  }
 0x238   :  { %v13717_v58 = vld [vmem:[#allocation5 + $0x894] ss:$20 sps:$4 sm:$0xff]   ;;  %v13723_v55 = vld [vmem:[#allocation5 + $0xa24] ss:$20 sps:$4 sm:$0xff]  }
 0x239   :  { %3191 = vmatpush1.bf16.msra.mxu1 %v13622_v8  ;;  %3314 = vmatpush1.bf16.msra.mxu0 %v13625_v10  ;;  %v13684_v8 = vld [vmem:[#allocation5 + $0xb08] ss:$20 sps:$4 sm:$0xff]   ;;  %v15493_v10 = vpack.c.bf16 %v1878_v4, %v1878_v4 }
 0x23a   :  { %3192 = vmatprep.subr.bf16.mxu1 %v13630_v60  ;;  %3315 = vmatprep.subr.bf16.mxu0 %v13633_v11  ;;  %v13687_v60 = vld [vmem:[#allocation5 + $0xb10] ss:$20 sps:$4 sm:$0xff]   ;;  %v13685_v11 = vld [vmem:[#allocation5 + $0xb0c] ss:$20 sps:$4 sm:$0xff]   ;;  %v13730_v4 = vld [vmem:[#allocation5 + $0x7f4] ss:$20 sps:$4 sm:$0xff]  }
 0x23d   :  { %3193 = vmatpush1.bf16.msra.mxu1 %v13628_v12  ;;  %3316 = vmatpush1.bf16.msra.mxu0 %v13631_v13  ;;  %v13690_v12 = vld [vmem:[#allocation5 + $0xb30] ss:$20 sps:$4 sm:$0xff]   ;;  %v13693_v13 = vld [vmem:[#allocation5 + $0xb38] ss:$20 sps:$4 sm:$0xff]  }
 0x23e   :  { %3194 = vmatprep.subr.bf16.mxu1 %v13636_v14  ;;  %3317 = vmatprep.subr.bf16.mxu0 %v13639_v15  ;;  %v13688_v14 = vld [vmem:[#allocation5 + $0xb2c] ss:$20 sps:$4 sm:$0xff]   ;;  %v13691_v15 = vld [vmem:[#allocation5 + $0xb34] ss:$20 sps:$4 sm:$0xff]  }
 0x241   :  { %3195 = vmatpush1.bf16.msra.mxu1 %v13634_v17  ;;  %3318 = vmatpush1.bf16.msra.mxu0 %v13637_v18  ;;  %v13696_v17 = vld [vmem:[#allocation5 + $0xb58] ss:$20 sps:$4 sm:$0xff]   ;;  %v13699_v18 = vld [vmem:[#allocation5 + $0xb60] ss:$20 sps:$4 sm:$0xff]  }
 0x242   :  { %3196 = vmatprep.subr.bf16.mxu1 %v13642_v21  ;;  %3319 = vmatprep.subr.bf16.mxu0 %v13645_v23  ;;  %v13694_v21 = vld [vmem:[#allocation5 + $0xb54] ss:$20 sps:$4 sm:$0xff]   ;;  %v13697_v23 = vld [vmem:[#allocation5 + $0xb5c] ss:$20 sps:$4 sm:$0xff]  }
 0x245   :  { %3197 = vmatpush1.bf16.msra.mxu1 %v13640_v24  ;;  %3320 = vmatpush1.bf16.msra.mxu0 %v13643_v26  ;;  %v13702_v24 = vld [vmem:[#allocation5 + $0xb80] ss:$20 sps:$4 sm:$0xff]   ;;  %v13705_v26 = vld [vmem:[#allocation5 + $0xb88] ss:$20 sps:$4 sm:$0xff]  }
 0x246   :  { %3198 = vmatprep.subr.bf16.mxu1 %v13648_v28  ;;  %3321 = vmatprep.subr.bf16.mxu0 %v13651_v31  ;;  %v2104_v28 = vld [vmem:[#allocation5 + $0xba4] sm:$0xff]  ;;  %v2105_v31 = vld [vmem:[#allocation5 + $0xbac] sm:$0xff] }
 0x247   :  { %v1800_v25 = vpop.f32.mrb[8].mxu0 }
 0x248   :  { %v15486_v36 = vadd.f32 %v1800_v25, %v1761_v20  ;;  %v12938_v37 = vpop.f32.mrb[9].mxu0  ;;  %v13682_v20 = vld [vmem:[#allocation5 + $0xb04] ss:$20 sps:$4 sm:$0xff]   ;;  %v11664_v25 = vcombine.high %v2104_v28, %v2104_v28 }
 0x249   :  { %3199 = vmatpush1.bf16.msra.mxu1 %v13646_v9  ;;  %3322 = vmatpush1.bf16.msra.mxu0 %v13649_v33  ;;  %v1803_v41 = vpop.f32.mrb[10].mxu0  ;;  %v1835_v33 = vrot.slane %v15442_v50, %v15477_v40  ;;  %v11666_v37 = vcombine.high %v2105_v31, %v2105_v31 }
 0x24a   :  { %3200 = vmatprep.subr.bf16.mxu1 %v13654_v34  ;;  %3323 = vmatprep.subr.bf16.mxu0 %v13657_v16  ;;  %v12939_v51 = vpop.f32.mrb[11].mxu0  ;;  %v1810_v9 = vmax.f32 %v15486_v36, 0.0  ;;  %v13700_v34 = vld [vmem:[#allocation5 + $0xb7c] ss:$20 sps:$4 sm:$0xff]   ;;  %v1870_v16 = vrot.slane %v15448_v53, %v15477_v40  ;;  %v11665_v41 = vcombine.low %v2105_v31, %v2105_v31  ;;  %v13710_v36 = vld [vmem:[#allocation5 + $0x72c] ss:$20 sps:$4 sm:$0xff]  }
 0x24b   :  { %v13713_v51 = vld [vmem:[#allocation5 + $0x86c] ss:$20 sps:$4 sm:$0xff]   ;;  %v13744_v31 = vld [vmem:[#allocation5 + $0xb3c] ss:$20 sps:$4 sm:$0xff]  }
 0x24d   :  { %3201 = vmatpush1.bf16.msra.mxu1 %v13652_v43  ;;  %3324 = vmatpush1.bf16.msra.mxu0 %v13655_v38  ;;  %v1845_v43 = vmul.f32 %v1835_v33, %v1810_v9  ;;  %v11663_v38 = vcombine.low %v2104_v28, %v2104_v28  ;;  %v13762_v28 = vld [vmem:[#allocation5 + $0xc0c] ss:$20 sps:$4 sm:$0xff]   ;;  %v13760_v9 = vld [vmem:[#allocation5 + $0xc08] ss:$20 sps:$4 sm:$0xff]  }
 0x24e   :  { %3202 = vmatprep.subr.bf16.mxu1 %v13660_v47  ;;  %3325 = vmatprep.subr.bf16.mxu0 %v13663_v48  ;;  %v3127_v47 = vsel %vm1424_vm0, %v11665_v41, 0  ;;  %v13712_v48 = vld [vmem:[#allocation5 + $0x5ec] ss:$20 sps:$4 sm:$0xff]   ;;  %v13768_v33 = vld [vmem:[#allocation5 + $0xc34] ss:$20 sps:$4 sm:$0xff]  }
 0x24f   :  { %v1880_v50 = vadd.f32 %v1870_v16, %v1845_v43  ;;  %v3121_v53 = vsel %vm1424_vm0, %v11663_v38, 0  ;;  %v13747_v16 = vld [vmem:[#allocation5 + $0xbb4] ss:$0 sps:$4 sm:$0xff]   ;;  %v13753_v43 = vld [vmem:[#allocation5 + $0xbc4] ss:$20 sps:$4 sm:$0xff]  }
 0x250   :  { %v13778_v38 = vld [vmem:[#allocation5 + $0xc80] ss:$20 sps:$4 sm:$0xff]   ;;  %v3133_v41 = vsel %vm1424_vm0, %v13747_v16, 0  ;;  %v13843_v16 = vld [vmem:[#allocation5 + $0xe1c] ss:$20 sps:$4 sm:$0xff]  }
 0x251   :  { %3203 = vmatpush1.bf16.msra.mxu1 %v13658_v45  ;;  %3326 = vmatpush1.bf16.msra.mxu0 %v13661_v52  ;;  %v13714_v45 = vld [vmem:[#allocation5 + $0x754] ss:$20 sps:$4 sm:$0xff]  }
 0x252   :  { %3204 = vmatprep.subr.bf16.mxu1 %v13666_v54  ;;  %3327 = vmatprep.subr.bf16.mxu0 %v13669_v59  ;;  %v13715_v52 = vld [vmem:[#allocation5 + $0x9d4] ss:$20 sps:$4 sm:$0xff]   ;;  %v15508_v54 = vpack.c.bf16 %v1880_v50, %v1880_v50  ;;  %v13718_v59 = vld [vmem:[#allocation5 + $0x77c] ss:$20 sps:$4 sm:$0xff]   ;;  %v13759_v50 = vld [vmem:[#allocation5 + $0xbec] ss:$20 sps:$4 sm:$0xff]  }
 0x255   :  { %3205 = vmatpush1.bf16.msra.mxu1 %v13664_v56  ;;  %3328 = vmatpush1.bf16.msra.mxu0 %v13667_v61  ;;  %v13719_v56 = vld [vmem:[#allocation5 + $0x9fc] ss:$20 sps:$4 sm:$0xff]  }
 0x256   :  { %3206 = vmatprep.subr.bf16.mxu1 %v13672_v62  ;;  %3329 = vmatprep.subr.bf16.mxu0 %v13675_v0  ;;  %v13720_v61 = vld [vmem:[#allocation5 + $0x63c] ss:$20 sps:$4 sm:$0xff]   ;;  %v13724_v0 = vld [vmem:[#allocation5 + $0x664] ss:$20 sps:$4 sm:$0xff]  }
 0x257   :  { %v13721_v62 = vld [vmem:[#allocation5 + $0x8bc] ss:$20 sps:$4 sm:$0xff]  }
 0x259   :  { %3207 = vmatpush1.bf16.msra.mxu1 %v13670_v1  ;;  %3330 = vmatpush1.bf16.msra.mxu0 %v13673_v2  ;;  %v13725_v1 = vld [vmem:[#allocation5 + $0x8e4] ss:$20 sps:$4 sm:$0xff]   ;;  %v13726_v2 = vld [vmem:[#allocation5 + $0x7cc] ss:$20 sps:$4 sm:$0xff]  }
 0x25a   :  { %3217 = vmatprep.subr.bf16.mxu1 %v13678_v3  ;;  %3340 = vmatprep.subr.bf16.mxu0 %v13681_v5  ;;  %v13727_v3 = vld [vmem:[#allocation5 + $0xa4c] ss:$20 sps:$4 sm:$0xff]   ;;  %v13731_v5 = vld [vmem:[#allocation5 + $0xa74] ss:$20 sps:$4 sm:$0xff]  }
 0x25c   :  { %3209 = vmatmul.mubr.bf16.vlgmr.msra.gmra.mrb[8].mxu1 %v15493_v10  ;;  %3332 = vmatmul.mubr.bf16.vlgmr.msra.gmra.mrb[12].mxu0 %v15493_v10 }
 0x25d   :  { %3218 = vmatpush1.bf16.msra.mxu1 %v13676_v6  ;;  %3341 = vmatpush1.bf16.msra.mxu0 %v13679_v7  ;;  %v13732_v6 = vld [vmem:[#allocation5 + $0x6b4] ss:$20 sps:$4 sm:$0xff]  }
 0x25e   :  { %3219 = vmatprep.subr.bf16.mxu1 %v13684_v8  ;;  %3342 = vmatprep.subr.bf16.mxu0 %v13687_v60  ;;  %v13733_v7 = vld [vmem:[#allocation5 + $0x934] ss:$20 sps:$4 sm:$0xff]   ;;  %v13734_v8 = vld [vmem:[#allocation5 + $0x81c] ss:$20 sps:$4 sm:$0xff]  }
 0x25f   :  { %3249 = vmatprep.mubr.bf16.mxu1 %v15169_v32  ;;  %3372 = vmatprep.mubr.bf16.mxu0 %v15169_v32  ;;  %v13735_v60 = vld [vmem:[#allocation5 + $0xa9c] ss:$20 sps:$4 sm:$0xff]  }
 0x261   :  { %3220 = vmatpush1.bf16.msra.mxu1 %v13682_v20  ;;  %3343 = vmatpush1.bf16.msra.mxu0 %v13685_v11  ;;  %v13736_v20 = vld [vmem:[#allocation5 + $0x6dc] ss:$20 sps:$4 sm:$0xff]  }
 0x262   :  { %3221 = vmatprep.subr.bf16.mxu1 %v13690_v12  ;;  %3344 = vmatprep.subr.bf16.mxu0 %v13693_v13  ;;  %v13737_v11 = vld [vmem:[#allocation5 + $0x95c] ss:$20 sps:$4 sm:$0xff]   ;;  %v13738_v12 = vld [vmem:[#allocation5 + $0x844] ss:$20 sps:$4 sm:$0xff]  }
 0x263   :  { %v13739_v13 = vld [vmem:[#allocation5 + $0xac4] ss:$20 sps:$4 sm:$0xff]  }
 0x265   :  { %3222 = vmatpush1.bf16.msra.mxu1 %v13688_v14  ;;  %3345 = vmatpush1.bf16.msra.mxu0 %v13691_v15  ;;  %v13740_v14 = vld [vmem:[#allocation5 + $0x704] ss:$20 sps:$4 sm:$0xff]  }
 0x266   :  { %3223 = vmatprep.subr.bf16.mxu1 %v13696_v17  ;;  %3346 = vmatprep.subr.bf16.mxu0 %v13699_v18  ;;  %v13741_v15 = vld [vmem:[#allocation5 + $0x984] ss:$20 sps:$4 sm:$0xff]   ;;  %v13750_v17 = vld [vmem:[#allocation5 + $0xbbc] ss:$20 sps:$4 sm:$0xff]   ;;  %v13742_v18 = vld [vmem:[#allocation5 + $0xaec] ss:$20 sps:$4 sm:$0xff]  }
 0x269   :  { %3224 = vmatpush1.bf16.msra.mxu1 %v13694_v21  ;;  %3347 = vmatpush1.bf16.msra.mxu0 %v13697_v23  ;;  %v13748_v21 = vld [vmem:[#allocation5 + $0xbb8] ss:$20 sps:$4 sm:$0xff]  }
 0x26a   :  { %3225 = vmatprep.subr.bf16.mxu1 %v13702_v24  ;;  %3348 = vmatprep.subr.bf16.mxu0 %v13705_v26  ;;  %v13756_v23 = vld [vmem:[#allocation5 + $0xbe4] ss:$20 sps:$4 sm:$0xff]   ;;  %v13743_v24 = vld [vmem:[#allocation5 + $0xb14] ss:$20 sps:$4 sm:$0xff]  }
 0x26b   :  { %v13754_v26 = vld [vmem:[#allocation5 + $0xbe0] ss:$20 sps:$4 sm:$0xff]  }
 0x26d   :  { %3226 = vmatpush1.bf16.msra.mxu1 %v13700_v34  ;;  %3349 = vmatpush1.bf16.msra.mxu0 %v13703_v35  ;;  %v13745_v34 = vld [vmem:[#allocation5 + $0xb64] ss:$20 sps:$4 sm:$0xff]   ;;  %v13746_v35 = vld [vmem:[#allocation5 + $0xb8c] ss:$20 sps:$4 sm:$0xff]  }
 0x26e   :  { %11668 = vmatprep.subr.msk.bf16.mxu1 %vm1424_vm0, %v11664_v25  ;;  %11670 = vmatprep.subr.msk.bf16.mxu0 %vm1424_vm0, %v11666_v37  ;;  %v13772_v25 = vld [vmem:[#allocation5 + $0xc58] ss:$20 sps:$4 sm:$0xff]  }
 0x26f   :  { %v13780_v37 = vld [vmem:[#allocation5 + $0xc84] ss:$20 sps:$4 sm:$0xff]  }
 0x271   :  { %3228 = vmatpush1.bf16.msra.mxu1 %v3121_v53  ;;  %3351 = vmatpush1.bf16.msra.mxu0 %v3127_v47  ;;  %v13784_v53 = vld [vmem:[#allocation5 + $0xca8] ss:$20 sps:$4 sm:$0xff]  }
 0x272   :  { %12600 = vmatprep.subr.bf16.mxu1 %v13710_v36  ;;  %12622 = vmatprep.subr.bf16.mxu0 %v13711_v46  ;;  %v13786_v36 = vld [vmem:[#allocation5 + $0xcac] ss:$20 sps:$4 sm:$0xff]   ;;  %v13792_v47 = vld [vmem:[#allocation5 + $0xcd4] ss:$20 sps:$4 sm:$0xff]  }
 0x273   :  { %v13751_v46 = vld [vmem:[#allocation5 + $0xbc0] ss:$20 sps:$4 sm:$0xff]  }
 0x274   :  { %11669 = vmatmul.mubr.msk.bf16.vlgmr.msra.gmra.mrb[8].mxu1 %vm1420_vm1, %v15508_v54  ;;  %11671 = vmatmul.mubr.msk.bf16.vlgmr.msra.gmra.mrb[12].mxu0 %vm1420_vm1, %v15508_v54 }
 0x275   :  { %12601 = vmatpush3.bf16.msra.mxu1 %v13712_v48  ;;  %3413 = vmatprep.mubr.bf16.mxu1 %v15464_v19  ;;  %v13728_v19 = vld [vmem:[#allocation5 + $0x68c] ss:$20 sps:$4 sm:$0xff]   ;;  %v13757_v48 = vld [vmem:[#allocation5 + $0xbe8] ss:$20 sps:$4 sm:$0xff]  }
 0x276   :  { %12623 = vmatpush3.bf16.msra.mxu0 %v13713_v51  ;;  %3453 = vmatprep.mubr.bf16.mxu0 %v15472_v27  ;;  %v13729_v27 = vld [vmem:[#allocation5 + $0x90c] ss:$20 sps:$4 sm:$0xff]   ;;  %v13765_v51 = vld [vmem:[#allocation5 + $0xc14] ss:$20 sps:$4 sm:$0xff]  }
 0x277   :  { %12602 = vmatprep.subr.bf16.mxu1 %v13714_v45  ;;  %12624 = vmatprep.subr.bf16.mxu0 %v13715_v52  ;;  %v13790_v45 = vld [vmem:[#allocation5 + $0xcd0] ss:$20 sps:$4 sm:$0xff]  }
 0x278   :  { %v13798_v52 = vld [vmem:[#allocation5 + $0xcfc] ss:$20 sps:$4 sm:$0xff]  }
 0x279   :  { %12603 = vmatpush3.bf16.msra.mxu1 %v13716_v57  ;;  %v13763_v57 = vld [vmem:[#allocation5 + $0xc10] ss:$20 sps:$4 sm:$0xff]  }
 0x27a   :  { %12625 = vmatpush3.bf16.msra.mxu0 %v13717_v58  ;;  %12604 = vmatprep.subr.bf16.mxu1 %v13718_v59  ;;  %v13771_v58 = vld [vmem:[#allocation5 + $0xc3c] ss:$20 sps:$4 sm:$0xff]   ;;  %v13796_v59 = vld [vmem:[#allocation5 + $0xcf8] ss:$20 sps:$4 sm:$0xff]  }
 0x27b   :  { %12626 = vmatprep.subr.bf16.mxu0 %v13719_v56  ;;  %v13804_v56 = vld [vmem:[#allocation5 + $0xd24] ss:$20 sps:$4 sm:$0xff]  }
 0x27d   :  { %12605 = vmatpush3.bf16.msra.mxu1 %v13720_v61  ;;  %v13769_v61 = vld [vmem:[#allocation5 + $0xc38] ss:$20 sps:$4 sm:$0xff]  }
 0x27e   :  { %12627 = vmatpush3.bf16.msra.mxu0 %v13721_v62  ;;  %12606 = vmatprep.subr.bf16.mxu1 %v13722_v63  ;;  %v13777_v62 = vld [vmem:[#allocation5 + $0xc64] ss:$20 sps:$4 sm:$0xff]   ;;  %v13810_v63 = vld [vmem:[#allocation5 + $0xd4c] ss:$20 sps:$4 sm:$0xff]  }
 0x27f   :  { %12628 = vmatprep.subr.bf16.mxu0 %v13723_v55  ;;  %v13775_v55 = vld [vmem:[#allocation5 + $0xc60] ss:$20 sps:$4 sm:$0xff]  }
 0x281   :  { %12607 = vmatpush3.bf16.msra.mxu1 %v13724_v0  ;;  %v13783_v0 = vld [vmem:[#allocation5 + $0xc8c] ss:$20 sps:$4 sm:$0xff]  }
 0x282   :  { %12629 = vmatpush3.bf16.msra.mxu0 %v13725_v1  ;;  %12608 = vmatprep.subr.bf16.mxu1 %v13726_v2  ;;  %v13808_v1 = vld [vmem:[#allocation5 + $0xd48] ss:$20 sps:$4 sm:$0xff]  }
 0x283   :  { %12630 = vmatprep.subr.bf16.mxu0 %v13727_v3  ;;  %v13816_v2 = vld [vmem:[#allocation5 + $0xd74] ss:$20 sps:$4 sm:$0xff]  }
 0x284   :  { %v13781_v3 = vld [vmem:[#allocation5 + $0xc88] ss:$20 sps:$4 sm:$0xff]  }
 0x285   :  { %12609 = vmatpush3.bf16.msra.mxu1 %v13728_v19  ;;  %v13789_v19 = vld [vmem:[#allocation5 + $0xcb4] ss:$20 sps:$4 sm:$0xff]  }
 0x286   :  { %12631 = vmatpush3.bf16.msra.mxu0 %v13729_v27  ;;  %12610 = vmatprep.subr.bf16.mxu1 %v13730_v4  ;;  %v13814_v27 = vld [vmem:[#allocation5 + $0xd70] ss:$20 sps:$4 sm:$0xff]  }
 0x287   :  { %12632 = vmatprep.subr.bf16.mxu0 %v13731_v5  ;;  %v13822_v4 = vld [vmem:[#allocation5 + $0xd9c] ss:$20 sps:$4 sm:$0xff]  }
 0x288   :  { %v13787_v5 = vld [vmem:[#allocation5 + $0xcb0] ss:$20 sps:$4 sm:$0xff]  }
 0x289   :  { %12611 = vmatpush3.bf16.msra.mxu1 %v13732_v6  ;;  %v13795_v6 = vld [vmem:[#allocation5 + $0xcdc] ss:$20 sps:$4 sm:$0xff]  }
 0x28a   :  { %12633 = vmatpush3.bf16.msra.mxu0 %v13733_v7  ;;  %12612 = vmatprep.subr.bf16.mxu1 %v13734_v8  ;;  %v13820_v7 = vld [vmem:[#allocation5 + $0xd98] ss:$20 sps:$4 sm:$0xff]  }
 0x28b   :  { %12634 = vmatprep.subr.bf16.mxu0 %v13735_v60  ;;  %v13793_v8 = vld [vmem:[#allocation5 + $0xcd8] ss:$20 sps:$4 sm:$0xff]  }
 0x28c   :  { %v13801_v60 = vld [vmem:[#allocation5 + $0xd04] ss:$20 sps:$4 sm:$0xff]  }
 0x28d   :  { %12613 = vmatpush3.bf16.msra.mxu1 %v13736_v20  ;;  %v13828_v20 = vld [vmem:[#allocation5 + $0xdc4] ss:$20 sps:$4 sm:$0xff]  }
 0x28e   :  { %12635 = vmatpush3.bf16.msra.mxu0 %v13737_v11  ;;  %12614 = vmatprep.subr.bf16.mxu1 %v13738_v12  ;;  %v13826_v11 = vld [vmem:[#allocation5 + $0xdc0] ss:$20 sps:$4 sm:$0xff]  }
 0x28f   :  { %12636 = vmatprep.subr.bf16.mxu0 %v13739_v13  ;;  %v13799_v12 = vld [vmem:[#allocation5 + $0xd00] ss:$20 sps:$4 sm:$0xff]  }
 0x290   :  { %v13807_v13 = vld [vmem:[#allocation5 + $0xd2c] ss:$20 sps:$4 sm:$0xff]  }
 0x291   :  { %12615 = vmatpush3.bf16.msra.mxu1 %v13740_v14  ;;  %v13832_v14 = vld [vmem:[#allocation5 + $0xde8] ss:$20 sps:$4 sm:$0xff]  }
 0x292   :  { %12637 = vmatpush3.bf16.msra.mxu0 %v13741_v15  ;;  %12940 = vmatprep.subr.bf16.mxu1 %v15170_v29  ;;  %v13834_v15 = vld [vmem:[#allocation5 + $0xdec] ss:$20 sps:$4 sm:$0xff]  }
 0x293   :  { %4830 = vmatprep.subr.bf16.mxu0 %v13750_v17  ;;  %v13805_v17 = vld [vmem:[#allocation5 + $0xd28] ss:$20 sps:$4 sm:$0xff]  }
 0x294   :  { %3414 = vmatmul.mubr.bf16.vlgmr.msra.gmra.mrb[12].mxu1 %v15466_v22  ;;  %v13766_v22 = vld [vmem:[#allocation5 + $0xc30] ss:$20 sps:$4 sm:$0xff]  }
 0x295   :  { %3454 = vmatmul.mubr.bf16.vlgmr.msra.gmra.mrb[16].mxu0 %v15493_v10  ;;  %12941 = vmatpush3.bf16.msra.mxu1 %v13742_v18  ;;  %v13774_v10 = vld [vmem:[#allocation5 + $0xc5c] ss:$20 sps:$4 sm:$0xff]   ;;  %v13813_v18 = vld [vmem:[#allocation5 + $0xd54] ss:$20 sps:$4 sm:$0xff]  }
 0x296   :  { %12942 = vmatprep.subr.bf16.mxu1 %v15170_v29  ;;  %12952 = vmatprep.mubr.msk.bf16.mxu1 %vm15171_vm2, %v15170_v29 }
 0x297   :  { %4831 = vmatpush1.bf16.msra.mxu0 %v13748_v21  ;;  %v13840_v21 = vld [vmem:[#allocation5 + $0xe14] ss:$20 sps:$4 sm:$0xff]  }
 0x298   :  { %4832 = vmatprep.subr.bf16.mxu0 %v13756_v23  ;;  %v13811_v23 = vld [vmem:[#allocation5 + $0xd50] ss:$20 sps:$4 sm:$0xff]  }
 0x299   :  { %12943 = vmatpush3.bf16.msra.mxu1 %v13743_v24  ;;  %v13838_v24 = vld [vmem:[#allocation5 + $0xe10] ss:$20 sps:$4 sm:$0xff]  }
 0x29a   :  { %12944 = vmatprep.subr.bf16.mxu1 %v15170_v29 }
 0x29b   :  { %4833 = vmatpush1.bf16.msra.mxu0 %v13754_v26  ;;  %v13819_v26 = vld [vmem:[#allocation5 + $0xd7c] ss:$20 sps:$4 sm:$0xff]  }
 0x29c   :  { %4834 = vmatprep.subr.bf16.mxu0 %v13762_v28  ;;  %v13846_v28 = vld [vmem:[#allocation5 + $0xe3c] ss:$20 sps:$4 sm:$0xff]  }
 0x29d   :  { %12945 = vmatpush3.bf16.msra.mxu1 %v13744_v31  ;;  %v13817_v31 = vld [vmem:[#allocation5 + $0xd78] ss:$20 sps:$4 sm:$0xff]  }
 0x29e   :  { %12946 = vmatprep.subr.bf16.mxu1 %v15170_v29 }
 0x29f   :  { %4835 = vmatpush1.bf16.msra.mxu0 %v13760_v9  ;;  %v13825_v9 = vld [vmem:[#allocation5 + $0xda4] ss:$20 sps:$4 sm:$0xff]  }
 0x2a0   :  { %4836 = vmatprep.subr.bf16.mxu0 %v13768_v33  ;;  %v13823_v33 = vld [vmem:[#allocation5 + $0xda0] ss:$20 sps:$4 sm:$0xff]  }
 0x2a1   :  { %12947 = vmatpush3.bf16.msra.mxu1 %v13745_v34  ;;  %v13831_v34 = vld [vmem:[#allocation5 + $0xdcc] ss:$20 sps:$4 sm:$0xff]  }
 0x2a2   :  { %12948 = vmatprep.subr.bf16.mxu1 %v15170_v29 }
 0x2a3   :  { %4837 = vmatpush1.bf16.msra.mxu0 %v13766_v22  ;;  %v13829_v22 = vld [vmem:[#allocation5 + $0xdc8] ss:$20 sps:$4 sm:$0xff]  }
 0x2a4   :  { %4838 = vmatprep.subr.bf16.mxu0 %v13774_v10  ;;  %v13837_v10 = vld [vmem:[#allocation5 + $0xdf4] ss:$20 sps:$4 sm:$0xff]  }
 0x2a5   :  { %12949 = vmatpush3.bf16.msra.mxu1 %v13746_v35  ;;  %v13835_v35 = vld [vmem:[#allocation5 + $0xdf0] ss:$20 sps:$4 sm:$0xff]  }
 0x2a6   :  { %12950 = vmatprep.subr.bf16.mxu1 %v15170_v29 }
 0x2a7   :  { %4839 = vmatpush1.bf16.msra.mxu0 %v13772_v25  ;;  %v13841_v25 = vld [vmem:[#allocation5 + $0xe18] ss:$20 sps:$4 sm:$0xff]  }
 0x2a8   :  { %4840 = vmatprep.subr.bf16.mxu0 %v13780_v37  ;;  %v13849_v37 = vld [vmem:[#allocation5 + $0xe44] ss:$20 sps:$4 sm:$0xff]  }
 0x2a9   :  { %12951 = vmatpush3.bf16.msra.mxu1 %v3133_v41  ;;  %v3507_v41 = vld [vmem:[#allocation7 + $0x4] ss:$8 sm:$0xf] }
 0x2aa   :  { %4953 = vmatprep.subr.bf16.mxu1 %v13753_v43  ;;  %v2113_v43 = vld [vmem:[#allocation7 + $0x3] ss:$8 sm:$0xf] }
 0x2ab   :  { %4841 = vmatpush1.bf16.msra.mxu0 %v13778_v38  ;;  %v2114_v38 = vld [vmem:[#allocation7 + $0x3] ss:$8 sm:$0x10] }
 0x2ac   :  { %12953 = vmatmul.mubr.msk.bf16.vlgmr.msra.gmra.mrb[16].mxu1 %vm1420_vm1, %v15508_v54  ;;  %4842 = vmatprep.subr.bf16.mxu0 %v13786_v36  ;;  %v13802_v54 = vld [vmem:[#allocation5 + $0xd20] ss:$20 sps:$4 sm:$0xff]   ;;  %v3508_v36 = vld [vmem:[#allocation7 + $0x4] ss:$8 sm:$0x10] }
 0x2ad   :  { %4954 = vmatpush1.bf16.msra.mxu1 %v13751_v46  ;;  %v15529_v46 = vor.u32 %v2114_v38, %v2113_v43  ;;  %v13856_v43 = vld [vmem:[#allocation5 + $0xe88] ss:$20 sps:$4 sm:$0xff]   ;;  %v13859_v38 = vld [vmem:[#allocation5 + $0xe90] ss:$20 sps:$4 sm:$0xff]  }
 0x2ae   :  { %4955 = vmatprep.subr.bf16.mxu1 %v13759_v50  ;;  %v3542_v50 = vld [vmem:[#allocation7 + $0x5] ss:$8 sm:$0xf] }
 0x2af   :  { %4843 = vmatpush1.bf16.msra.mxu0 %v13784_v53  ;;  %v3543_v53 = vld [vmem:[#allocation7 + $0x5] ss:$8 sm:$0x10] }
 0x2b0   :  { %4844 = vmatprep.subr.bf16.mxu0 %v13792_v47  ;;  %v2120_v47 = vrot.slane %v15529_v46, %v15430_v39 }
 0x2b1   :  { %4956 = vmatpush1.bf16.msra.mxu1 %v13757_v48  ;;  %v15533_v48 = vor.u32 %v3508_v36, %v3507_v41  ;;  %v13864_v41 = vld [vmem:[#allocation5 + $0xeb4] ss:$20 sps:$4 sm:$0xff]   ;;  %v13867_v36 = vld [vmem:[#allocation5 + $0xebc] ss:$20 sps:$4 sm:$0xff]  }
 0x2b2   :  { %4957 = vmatprep.subr.bf16.mxu1 %v13765_v51  ;;  %v2128_v51 = vrot.slane %v15529_v46, %v15482_v30 }
 0x2b3   :  { %4845 = vmatpush1.bf16.msra.mxu0 %v13790_v45  ;;  %v2124_v45 = vrot.slane %v15529_v46, %v15433_v42 }
 0x2b4   :  { %4846 = vmatprep.subr.bf16.mxu0 %v13798_v52  ;;  %v2132_v52 = vrot.slane %v15529_v46, %v15436_v44 }
 0x2b5   :  { %4958 = vmatpush1.bf16.msra.mxu1 %v13763_v57  ;;  %v15541_v57 = vor.u32 %v3543_v53, %v3542_v50  ;;  %v13862_v50 = vld [vmem:[#allocation5 + $0xeb0] ss:$20 sps:$4 sm:$0xff]   ;;  %v13865_v53 = vld [vmem:[#allocation5 + $0xeb8] ss:$20 sps:$4 sm:$0xff]  }
 0x2b6   :  { %4959 = vmatprep.subr.bf16.mxu1 %v13771_v58 }
 0x2b7   :  { %4847 = vmatpush1.bf16.msra.mxu0 %v13796_v59 }
 0x2b8   :  { %4848 = vmatprep.subr.bf16.mxu0 %v13804_v56 }
 0x2b9   :  { %4960 = vmatpush1.bf16.msra.mxu1 %v13769_v61  ;;  %v3514_v61 = vrot.slane %v15533_v48, %v15430_v39 }
 0x2ba   :  { %4961 = vmatprep.subr.bf16.mxu1 %v13777_v62 }
 0x2bb   :  { %4849 = vmatpush1.bf16.msra.mxu0 %v13802_v54  ;;  %v3522_v54 = vrot.slane %v15533_v48, %v15482_v30 }
 0x2bc   :  { %4850 = vmatprep.subr.bf16.mxu0 %v13810_v63 }
 0x2bd   :  { %4962 = vmatpush1.bf16.msra.mxu1 %v13775_v55 }
 0x2be   :  { %4963 = vmatprep.subr.bf16.mxu1 %v13783_v0 }
 0x2bf   :  { %4851 = vmatpush1.bf16.msra.mxu0 %v13808_v1  ;;  %v3518_v1 = vrot.slane %v15533_v48, %v15433_v42 }
 0x2c0   :  { %4852 = vmatprep.subr.bf16.mxu0 %v13816_v2 }
 0x2c1   :  { %4964 = vmatpush1.bf16.msra.mxu1 %v13781_v3  ;;  %v3526_v3 = vrot.slane %v15533_v48, %v15436_v44 }
 0x2c2   :  { %4965 = vmatprep.subr.bf16.mxu1 %v13789_v19 }
 0x2c3   :  { %4853 = vmatpush1.bf16.msra.mxu0 %v13814_v27 }
 0x2c4   :  { %4854 = vmatprep.subr.bf16.mxu0 %v13822_v4 }
 0x2c5   :  { %4966 = vmatpush1.bf16.msra.mxu1 %v13787_v5  ;;  %v3549_v5 = vrot.slane %v15541_v57, %v15430_v39 }
 0x2c6   :  { %4967 = vmatprep.subr.bf16.mxu1 %v13795_v6 }
 0x2c7   :  { %4855 = vmatpush1.bf16.msra.mxu0 %v13820_v7  ;;  %v3557_v7 = vrot.slane %v15541_v57, %v15482_v30 }
 0x2c8   :  { %4856 = vmatprep.subr.bf16.mxu0 %v13828_v20 }
 0x2c9   :  { %4968 = vmatpush1.bf16.msra.mxu1 %v13793_v8 }
 0x2ca   :  { %4969 = vmatprep.subr.bf16.mxu1 %v13801_v60 }
 0x2cb   :  { %4857 = vmatpush1.bf16.msra.mxu0 %v13826_v11 }
 0x2cc   :  { %4858 = vmatprep.subr.bf16.mxu0 %v13834_v15  ;;  %v3561_v15 = vrot.slane %v15541_v57, %v15436_v44 }
 0x2cd   :  { %4970 = vmatpush1.bf16.msra.mxu1 %v13799_v12  ;;  %v3553_v12 = vrot.slane %v15541_v57, %v15433_v42 }
 0x2ce   :  { %4971 = vmatprep.subr.bf16.mxu1 %v13807_v13 }
 0x2cf   :  { %4859 = vmatpush1.bf16.msra.mxu0 %v13832_v14 }
 0x2d0   :  { %4860 = vmatprep.subr.bf16.mxu0 %v13840_v21 }
 0x2d1   :  { %4972 = vmatpush1.bf16.msra.mxu1 %v13805_v17 }
 0x2d2   :  { %4973 = vmatprep.subr.bf16.mxu1 %v13813_v18 }
 0x2d3   :  { %4861 = vmatpush1.bf16.msra.mxu0 %v13838_v24 }
 0x2d4   :  { %4871 = vmatprep.subr.bf16.mxu0 %v13846_v28 }
 0x2d5   :  { %4974 = vmatpush1.bf16.msra.mxu1 %v13811_v23 }
 0x2d6   :  { %4975 = vmatprep.subr.bf16.mxu1 %v13819_v26 }
 0x2d9   :  { %4976 = vmatpush1.bf16.msra.mxu1 %v13817_v31  ;;  %v13844_v31 = vld [vmem:[#allocation5 + $0xe38] ss:$20 sps:$4 sm:$0xff]  }
 0x2da   :  { %4977 = vmatprep.subr.bf16.mxu1 %v13825_v9  ;;  %v13847_v9 = vld [vmem:[#allocation5 + $0xe40] ss:$20 sps:$4 sm:$0xff]  }
 0x2dd   :  { %4978 = vmatpush1.bf16.msra.mxu1 %v13823_v33 }
 0x2de   :  { %4979 = vmatprep.subr.bf16.mxu1 %v13831_v34  ;;  %v13852_v34 = vld [vmem:[#allocation5 + $0xe64] ss:$20 sps:$4 sm:$0xff]  }
 0x2e1   :  { %4980 = vmatpush1.bf16.msra.mxu1 %v13829_v22  ;;  %v13855_v22 = vld [vmem:[#allocation5 + $0xe6c] ss:$20 sps:$4 sm:$0xff]  }
 0x2e2   :  { %4981 = vmatprep.subr.bf16.mxu1 %v13837_v10 }
 0x2e5   :  { %4982 = vmatpush1.bf16.msra.mxu1 %v13835_v35  ;;  %v13850_v35 = vld [vmem:[#allocation5 + $0xe60] ss:$20 sps:$4 sm:$0xff]  }
 0x2e6   :  { %4983 = vmatprep.subr.bf16.mxu1 %v13843_v16  ;;  %v13853_v16 = vld [vmem:[#allocation5 + $0xe68] ss:$20 sps:$4 sm:$0xff]  }
 0x2e9   :  { %4984 = vmatpush1.bf16.msra.mxu1 %v13841_v25  ;;  %v13858_v25 = vld [vmem:[#allocation5 + $0xe8c] ss:$20 sps:$4 sm:$0xff]  }
 0x2ea   :  { %4994 = vmatprep.subr.bf16.mxu1 %v13849_v37  ;;  %v13861_v37 = vld [vmem:[#allocation5 + $0xe94] ss:$20 sps:$4 sm:$0xff]  }
 0x347   :  { %v3251_v58 = vpop.f32.mrb[8].mxu1  ;;  %v3374_v59 = vpop.f32.mrb[12].mxu0 }
 0x348   :  { %v13082_v56 = vadd.f32 %v3251_v58, %v2120_v47  ;;  %v13084_v62 = vadd.f32 %v3374_v59, %v2128_v51  ;;  %v3253_v63 = vpop.f32.mrb[9].mxu1  ;;  %v3376_v55 = vpop.f32.mrb[13].mxu0  ;;  %v13870_v47 = vld [vmem:[#allocation5 + $0xedc] ss:$20 sps:$4 sm:$0xff]   ;;  %v13873_v51 = vld [vmem:[#allocation5 + $0xee4] ss:$20 sps:$4 sm:$0xff]  }
 0x349   :  { %v13083_v0 = vadd.f32 %v3253_v63, %v2124_v45  ;;  %v13085_v2 = vadd.f32 %v3376_v55, %v2132_v52  ;;  %v3255_v19 = vpop.f32.mrb[10].mxu1  ;;  %v3378_v27 = vpop.f32.mrb[14].mxu0  ;;  %v13868_v45 = vld [vmem:[#allocation5 + $0xed8] ss:$20 sps:$4 sm:$0xff]   ;;  %v13871_v52 = vld [vmem:[#allocation5 + $0xee0] ss:$20 sps:$4 sm:$0xff]   ;;  %v2136_v55 = vrot.slane %v15529_v46, %v15477_v40 }
 0x34a   :  { %v3501_v4 = vmax.f32 %v13082_v56, 0.0  ;;  %v3503_v6 = vmax.f32 %v13084_v62, 0.0  ;;  %v3256_v8 = vpop.f32.mrb[11].mxu1  ;;  %v3379_v60 = vpop.f32.mrb[15].mxu0  ;;  %v13876_v58 = vld [vmem:[#allocation5 + $0xf04] ss:$20 sps:$4 sm:$0xff]  }
 0x34b   :  { %v3502_v20 = vmax.f32 %v13083_v0, 0.0  ;;  %v3504_v11 = vmax.f32 %v13085_v2, 0.0  ;;  %v13879_v59 = vld [vmem:[#allocation5 + $0xf0c] ss:$20 sps:$4 sm:$0xff]   ;;  %v13880_v27 = vld [vmem:[#allocation5 + $0xf28] ss:$20 sps:$4 sm:$0xff]  }
 0x34c   :  { %v3536_v13 = vmul.f32 %v3514_v61, %v3501_v4  ;;  %v3538_v14 = vmul.f32 %v3522_v54, %v3503_v6  ;;  %v13874_v56 = vld [vmem:[#allocation5 + $0xf00] ss:$20 sps:$4 sm:$0xff]   ;;  %v13877_v61 = vld [vmem:[#allocation5 + $0xf08] ss:$20 sps:$4 sm:$0xff]   ;;  %v13883_v4 = vld [vmem:[#allocation5 + $0xf30] ss:$20 sps:$4 sm:$0xff]  }
 0x34d   :  { %v3537_v17 = vmul.f32 %v3518_v1, %v3502_v20  ;;  %v3539_v18 = vmul.f32 %v3526_v3, %v3504_v11  ;;  %v13882_v62 = vld [vmem:[#allocation5 + $0xf2c] ss:$20 sps:$4 sm:$0xff]   ;;  %v13885_v54 = vld [vmem:[#allocation5 + $0xf34] ss:$20 sps:$4 sm:$0xff]   ;;  %v13891_v60 = vld [vmem:[#allocation5 + $0xf5c] ss:$20 sps:$4 sm:$0xff]  }
 0x34e   :  { %v3571_v21 = vadd.f32 %v3549_v5, %v3536_v13  ;;  %v15559_v23 = vadd.f32 %v3557_v7, %v3538_v14  ;;  %v13888_v8 = vld [vmem:[#allocation5 + $0xf54] ss:$20 sps:$4 sm:$0xff]   ;;  %v13886_v46 = vld [vmem:[#allocation5 + $0xf50] ss:$20 sps:$4 sm:$0xff]  }
 0x34f   :  { %v3572_v24 = vadd.f32 %v3553_v12, %v3537_v17  ;;  %v3574_v26 = vadd.f32 %v3561_v15, %v3539_v18  ;;  %v13889_v12 = vld [vmem:[#allocation5 + $0xf58] ss:$20 sps:$4 sm:$0xff]   ;;  %v13894_v14 = vld [vmem:[#allocation5 + $0xf7c] ss:$20 sps:$4 sm:$0xff]   ;;  %v13895_v18 = vld [vmem:[#allocation5 + $0xf80] ss:$20 sps:$4 sm:$0xff]  }
 0x350   :  { %v15563_v33 = vpack.c.bf16 %v3571_v21, %v3571_v21  ;;  %v13897_v15 = vld [vmem:[#allocation5 + $0xf84] ss:$20 sps:$4 sm:$0xff]  }
 0x351   :  { %v15561_v28 = vpack.c.bf16 %v3572_v24, %v3572_v24  ;;  %v15569_v10 = vpack.c.bf16 %v3574_v26, %v3574_v26  ;;  %v13892_v17 = vld [vmem:[#allocation5 + $0xf78] ss:$20 sps:$4 sm:$0xff]   ;;  %v13898_v26 = vld [vmem:[#allocation5 + $0xfa0] ss:$20 sps:$4 sm:$0xff]  }
 0x352   :  { %v13900_v21 = vld [vmem:[#allocation5 + $0xfa4] ss:$20 sps:$4 sm:$0xff]   ;;  %v13903_v24 = vld [vmem:[#allocation5 + $0xfac] ss:$20 sps:$4 sm:$0xff]  }
 0x353   :  { %4862 = vmatprep.mubr.bf16.mxu0 %v15561_v28  ;;  %4985 = vmatprep.mubr.bf16.mxu1 %v15561_v28 }
 0x354   :  { %4863 = vmatmul.mubr.bf16.vlgmr.msra.gmra.mrb[20].mxu0 %v15563_v33  ;;  %4986 = vmatmul.mubr.bf16.vlgmr.msra.gmra.mrb[20].mxu1 %v15563_v33 }
 0x355   :  { %4872 = vmatpush1.bf16.msra.mxu0 %v13844_v31  ;;  %4995 = vmatpush1.bf16.msra.mxu1 %v13847_v9  ;;  %v13901_v31 = vld [vmem:[#allocation5 + $0xfa8] ss:$20 sps:$4 sm:$0xff]   ;;  %v13906_v9 = vld [vmem:[#allocation5 + $0xfcc] ss:$20 sps:$4 sm:$0xff]  }
 0x356   :  { %4903 = vmatprep.mubr.bf16.mxu0 %v15569_v10  ;;  %5026 = vmatprep.mubr.bf16.mxu1 %v15569_v10 }
 0x357   :  { %4873 = vmatprep.subr.bf16.mxu0 %v13852_v34  ;;  %4996 = vmatprep.subr.bf16.mxu1 %v13855_v22  ;;  %v13909_v34 = vld [vmem:[#allocation5 + $0xfd4] ss:$20 sps:$4 sm:$0xff]  }
 0x358   :  { %v13904_v22 = vld [vmem:[#allocation5 + $0xfc8] ss:$20 sps:$4 sm:$0xff]  }
 0x359   :  { %4874 = vmatpush1.bf16.msra.mxu0 %v13850_v35  ;;  %4997 = vmatpush1.bf16.msra.mxu1 %v13853_v16  ;;  %v13907_v35 = vld [vmem:[#allocation5 + $0xfd0] ss:$20 sps:$4 sm:$0xff]   ;;  %v13912_v16 = vld [vmem:[#allocation5 + $0xff4] ss:$20 sps:$4 sm:$0xff]  }
 0x35a   :  { %4875 = vmatprep.subr.bf16.mxu0 %v13858_v25  ;;  %4998 = vmatprep.subr.bf16.mxu1 %v13861_v37  ;;  %v13915_v25 = vld [vmem:[#allocation5 + $0xffc] ss:$20 sps:$4 sm:$0xff]  }
 0x35b   :  { %v13910_v37 = vld [vmem:[#allocation5 + $0xff0] ss:$20 sps:$4 sm:$0xff]  }
 0x35d   :  { %4876 = vmatpush1.bf16.msra.mxu0 %v13856_v43  ;;  %4999 = vmatpush1.bf16.msra.mxu1 %v13859_v38  ;;  %v13913_v43 = vld [vmem:[#allocation5 + $0xff8] ss:$20 sps:$4 sm:$0xff]   ;;  %v13918_v38 = vld [vmem:[#allocation5 + $0x101c] ss:$20 sps:$4 sm:$0xff]  }
 0x35e   :  { %4877 = vmatprep.subr.bf16.mxu0 %v13864_v41  ;;  %5000 = vmatprep.subr.bf16.mxu1 %v13867_v36  ;;  %v13921_v41 = vld [vmem:[#allocation5 + $0x1024] ss:$20 sps:$4 sm:$0xff]  }
 0x361   :  { %4878 = vmatpush1.bf16.msra.mxu0 %v13862_v50  ;;  %5001 = vmatpush1.bf16.msra.mxu1 %v13865_v53  ;;  %v3530_v53 = vrot.slane %v15533_v48, %v15477_v40  ;;  %v13925_v48 = vld [vmem:[#allocation5 + $0x1048] ss:$20 sps:$4 sm:$0xff]  }
 0x362   :  { %4879 = vmatprep.subr.bf16.mxu0 %v13870_v47  ;;  %5002 = vmatprep.subr.bf16.mxu1 %v13873_v51 }
 0x365   :  { %4880 = vmatpush1.bf16.msra.mxu0 %v13868_v45  ;;  %5003 = vmatpush1.bf16.msra.mxu1 %v13871_v52  ;;  %v13916_v45 = vld [vmem:[#allocation5 + $0x1018] ss:$20 sps:$4 sm:$0xff]   ;;  %v13919_v52 = vld [vmem:[#allocation5 + $0x1020] ss:$20 sps:$4 sm:$0xff]  }
 0x366   :  { %4881 = vmatprep.subr.bf16.mxu0 %v13876_v58  ;;  %5004 = vmatprep.subr.bf16.mxu1 %v13879_v59  ;;  %v3565_v59 = vrot.slane %v15541_v57, %v15477_v40  ;;  %v13931_v57 = vld [vmem:[#allocation5 + $0x1070] ss:$20 sps:$4 sm:$0xff]  }
 0x367   :  { %v12616_v63 = vpop.f32.mrb[12].mxu1 }
 0x368   :  { %v12638_v0 = vpop.f32.mrb[16].mxu0  ;;  %v12617_v1 = vpop.f32.mrb[13].mxu1 }
 0x369   :  { %v12618_v2 = vadd.f32 %v12617_v1, %v12616_v63  ;;  %v12639_v3 = vpop.f32.mrb[17].mxu0  ;;  %4882 = vmatpush1.bf16.msra.mxu0 %v13874_v56  ;;  %5005 = vmatpush1.bf16.msra.mxu1 %v13877_v61  ;;  %v12619_v19 = vpop.f32.mrb[14].mxu1  ;;  %v13924_v61 = vld [vmem:[#allocation5 + $0x1044] ss:$20 sps:$4 sm:$0xff]   ;;  %v13922_v63 = vld [vmem:[#allocation5 + $0x1040] ss:$20 sps:$4 sm:$0xff]  }
 0x36a   :  { %v12640_v5 = vadd.f32 %v12639_v3, %v12638_v0  ;;  %v12641_v6 = vpop.f32.mrb[18].mxu0  ;;  %v12620_v7 = vpop.f32.mrb[15].mxu1  ;;  %4883 = vmatprep.subr.bf16.mxu0 %v13882_v62  ;;  %5006 = vmatprep.subr.bf16.mxu1 %v13885_v54  ;;  %v13927_v62 = vld [vmem:[#allocation5 + $0x104c] ss:$20 sps:$4 sm:$0xff]   ;;  %v13933_v1 = vld [vmem:[#allocation5 + $0x1074] ss:$20 sps:$4 sm:$0xff]  }
 0x36b   :  { %v3416_v20 = vadd.f32 %v12618_v2, %v2136_v55  ;;  %v12642_v11 = vpop.f32.mrb[19].mxu0  ;;  %v13930_v0 = vld [vmem:[#allocation5 + $0x106c] ss:$20 sps:$4 sm:$0xff]   ;;  %v13928_v2 = vld [vmem:[#allocation5 + $0x1068] ss:$20 sps:$4 sm:$0xff]  }
 0x36c   :  { %v13936_v3 = vld [vmem:[#allocation5 + $0x1094] ss:$20 sps:$4 sm:$0xff]   ;;  %v13939_v19 = vld [vmem:[#allocation5 + $0x109c] ss:$20 sps:$4 sm:$0xff]   ;;  %v13945_v6 = vld [vmem:[#allocation5 + $0x10c4] ss:$20 sps:$4 sm:$0xff]  }
 0x36d   :  { %4884 = vmatpush1.bf16.msra.mxu0 %v13880_v27  ;;  %5007 = vmatpush1.bf16.msra.mxu1 %v13883_v4  ;;  %v3456_v13 = vadd.f32 %v12640_v5, %v3416_v20  ;;  %v13934_v27 = vld [vmem:[#allocation5 + $0x1090] ss:$20 sps:$4 sm:$0xff]   ;;  %v13937_v4 = vld [vmem:[#allocation5 + $0x1098] ss:$20 sps:$4 sm:$0xff]  }
 0x36e   :  { %4885 = vmatprep.subr.bf16.mxu0 %v13888_v8  ;;  %5008 = vmatprep.subr.bf16.mxu1 %v13891_v60  ;;  %v13942_v5 = vld [vmem:[#allocation5 + $0x10bc] ss:$20 sps:$4 sm:$0xff]   ;;  %v13940_v7 = vld [vmem:[#allocation5 + $0x10b8] ss:$20 sps:$4 sm:$0xff]   ;;  %v13943_v8 = vld [vmem:[#allocation5 + $0x10c0] ss:$20 sps:$4 sm:$0xff]   ;;  %v15583_v60 = vpack.c.bf16 %v15559_v23, %v15559_v23 }
 0x36f   :  { %v13948_v20 = vld [vmem:[#allocation5 + $0x10e4] ss:$20 sps:$4 sm:$0xff]   ;;  %v13951_v11 = vld [vmem:[#allocation5 + $0x10ec] ss:$20 sps:$4 sm:$0xff]   ;;  %v13952_v23 = vld [vmem:[#allocation5 + $0x1108] ss:$20 sps:$4 sm:$0xff]  }
 0x371   :  { %4886 = vmatpush1.bf16.msra.mxu0 %v13886_v46  ;;  %5009 = vmatpush1.bf16.msra.mxu1 %v13889_v12  ;;  %v13946_v46 = vld [vmem:[#allocation5 + $0x10e0] ss:$20 sps:$4 sm:$0xff]   ;;  %v13949_v12 = vld [vmem:[#allocation5 + $0x10e8] ss:$20 sps:$4 sm:$0xff]  }
 0x372   :  { %4887 = vmatprep.subr.bf16.mxu0 %v13894_v14  ;;  %5010 = vmatprep.subr.bf16.mxu1 %v13897_v15  ;;  %v13957_v14 = vld [vmem:[#allocation5 + $0x1114] ss:$20 sps:$4 sm:$0xff]   ;;  %v13955_v15 = vld [vmem:[#allocation5 + $0x1110] ss:$20 sps:$4 sm:$0xff]  }
 0x375   :  { %4888 = vmatpush1.bf16.msra.mxu0 %v13892_v17  ;;  %5011 = vmatpush1.bf16.msra.mxu1 %v13895_v18  ;;  %v13960_v17 = vld [vmem:[#allocation5 + $0x1134] ss:$20 sps:$4 sm:$0xff]   ;;  %v13963_v18 = vld [vmem:[#allocation5 + $0x113c] ss:$20 sps:$4 sm:$0xff]  }
 0x376   :  { %4889 = vmatprep.subr.bf16.mxu0 %v13900_v21  ;;  %5012 = vmatprep.subr.bf16.mxu1 %v13903_v24  ;;  %v13958_v21 = vld [vmem:[#allocation5 + $0x1130] ss:$20 sps:$4 sm:$0xff]   ;;  %v13961_v24 = vld [vmem:[#allocation5 + $0x1138] ss:$20 sps:$4 sm:$0xff]  }
 0x379   :  { %4890 = vmatpush1.bf16.msra.mxu0 %v13898_v26  ;;  %5013 = vmatpush1.bf16.msra.mxu1 %v13901_v31  ;;  %v13966_v26 = vld [vmem:[#allocation5 + $0x115c] ss:$20 sps:$4 sm:$0xff]   ;;  %v13969_v31 = vld [vmem:[#allocation5 + $0x1164] ss:$20 sps:$4 sm:$0xff]  }
 0x37a   :  { %4891 = vmatprep.subr.bf16.mxu0 %v13906_v9  ;;  %5014 = vmatprep.subr.bf16.mxu1 %v13909_v34  ;;  %v3799_v9 = vld [vmem:[#allocation5 + $0x1180] sm:$0xff]  ;;  %v3800_v34 = vld [vmem:[#allocation5 + $0x1188] sm:$0xff] }
 0x37d   :  { %4892 = vmatpush1.bf16.msra.mxu0 %v13904_v22  ;;  %5015 = vmatpush1.bf16.msra.mxu1 %v13907_v35  ;;  %v13964_v22 = vld [vmem:[#allocation5 + $0x1158] ss:$20 sps:$4 sm:$0xff]   ;;  %v13967_v35 = vld [vmem:[#allocation5 + $0x1160] ss:$20 sps:$4 sm:$0xff]  }
 0x37e   :  { %4893 = vmatprep.subr.bf16.mxu0 %v13912_v16  ;;  %5016 = vmatprep.subr.bf16.mxu1 %v13915_v25  ;;  %v11859_v16 = vcombine.high %v3799_v9, %v3799_v9  ;;  %v11861_v25 = vcombine.high %v3800_v34, %v3800_v34 }
 0x37f   :  { %v3495_v36 = vpop.f32.mrb[16].mxu1 }
 0x380   :  { %v3496_v50 = vadd.f32 %v3495_v36, %v3456_v13  ;;  %v12954_v47 = vpop.f32.mrb[17].mxu1  ;;  %v13954_v13 = vld [vmem:[#allocation5 + $0x110c] ss:$20 sps:$4 sm:$0xff]   ;;  %v13974_v36 = vld [vmem:[#allocation5 + $0xd08] ss:$20 sps:$4 sm:$0xff]  }
 0x381   :  { %4894 = vmatpush1.bf16.msra.mxu0 %v13910_v37  ;;  %5017 = vmatpush1.bf16.msra.mxu1 %v13913_v43  ;;  %v3498_v51 = vpop.f32.mrb[18].mxu1  ;;  %v11858_v37 = vcombine.low %v3799_v9, %v3799_v9  ;;  %v11860_v43 = vcombine.low %v3800_v34, %v3800_v34  ;;  %v14010_v9 = vld [vmem:[#allocation5 + $0x1168] ss:$20 sps:$4 sm:$0xff]   ;;  %v14011_v34 = vld [vmem:[#allocation5 + $0x1190] ss:$0 sps:$4 sm:$0xff]  }
 0x382   :  { %v3505_v58 = vmax.f32 %v3496_v50, 0.0  ;;  %v12955_v56 = vpop.f32.mrb[19].mxu1  ;;  %4895 = vmatprep.subr.bf16.mxu0 %v13918_v38  ;;  %5018 = vmatprep.subr.bf16.mxu1 %v13921_v41  ;;  %v13975_v50 = vld [vmem:[#allocation5 + $0xf88] ss:$20 sps:$4 sm:$0xff]  }
 0x383   :  { %v4816_v38 = vsel %vm1424_vm0, %v11858_v37, 0  ;;  %v4822_v41 = vsel %vm1424_vm0, %v11860_v43, 0  ;;  %v13977_v51 = vld [vmem:[#allocation5 + $0xe48] ss:$20 sps:$4 sm:$0xff]   ;;  %v13982_v56 = vld [vmem:[#allocation5 + $0xd58] ss:$20 sps:$4 sm:$0xff]  }
 0x384   :  { %v3540_v54 = vmul.f32 %v3530_v53, %v3505_v58  ;;  %v13976_v53 = vld [vmem:[#allocation5 + $0xbc8] ss:$20 sps:$4 sm:$0xff]   ;;  %v13980_v58 = vld [vmem:[#allocation5 + $0xbf0] ss:$20 sps:$4 sm:$0xff]  }
 0x385   :  { %4896 = vmatpush1.bf16.msra.mxu0 %v13916_v45  ;;  %5019 = vmatpush1.bf16.msra.mxu1 %v13919_v52  ;;  %v13978_v45 = vld [vmem:[#allocation5 + $0xd30] ss:$20 sps:$4 sm:$0xff]  }
 0x386   :  { %v15579_v55 = vadd.f32 %v3565_v59, %v3540_v54  ;;  %4897 = vmatprep.subr.bf16.mxu0 %v13924_v61  ;;  %5020 = vmatprep.subr.bf16.mxu1 %v13927_v62  ;;  %v13979_v52 = vld [vmem:[#allocation5 + $0xfb0] ss:$20 sps:$4 sm:$0xff]   ;;  %v13983_v61 = vld [vmem:[#allocation5 + $0xfd8] ss:$20 sps:$4 sm:$0xff]  }
 0x387   :  { %v13981_v59 = vld [vmem:[#allocation5 + $0xe70] ss:$20 sps:$4 sm:$0xff]   ;;  %v13984_v62 = vld [vmem:[#allocation5 + $0xc18] ss:$20 sps:$4 sm:$0xff]  }
 0x388   :  { %v15595_v47 = vpack.c.bf16 %v15579_v55, %v15579_v55  ;;  %v13985_v54 = vld [vmem:[#allocation5 + $0xe98] ss:$20 sps:$4 sm:$0xff]   ;;  %v13988_v55 = vld [vmem:[#allocation5 + $0xc40] ss:$20 sps:$4 sm:$0xff]  }
 0x389   :  { %4898 = vmatpush1.bf16.msra.mxu0 %v13922_v63  ;;  %5021 = vmatpush1.bf16.msra.mxu1 %v13925_v48  ;;  %v13986_v63 = vld [vmem:[#allocation5 + $0xd80] ss:$20 sps:$4 sm:$0xff]  }
 0x38a   :  { %4899 = vmatprep.subr.bf16.mxu0 %v13930_v0  ;;  %5022 = vmatprep.subr.bf16.mxu1 %v13933_v1  ;;  %v13987_v48 = vld [vmem:[#allocation5 + $0x1000] ss:$20 sps:$4 sm:$0xff]   ;;  %v13990_v0 = vld [vmem:[#allocation5 + $0xda8] ss:$20 sps:$4 sm:$0xff]  }
 0x38b   :  { %v13992_v1 = vld [vmem:[#allocation5 + $0xc68] ss:$20 sps:$4 sm:$0xff]   ;;  %v14017_v37 = vld [vmem:[#allocation8 + $0xc8] sm:$0xff]  }
 0x38c   :  { %v14019_v43 = vld [vmem:[#allocation8 + $0x88] sm:$0xff]  }
 0x38d   :  { %4900 = vmatpush1.bf16.msra.mxu0 %v13928_v2  ;;  %5023 = vmatpush1.bf16.msra.mxu1 %v13931_v57  ;;  %v13993_v2 = vld [vmem:[#allocation5 + $0xee8] ss:$20 sps:$4 sm:$0xff]   ;;  %v13994_v57 = vld [vmem:[#allocation5 + $0xdd0] ss:$20 sps:$4 sm:$0xff]  }
 0x38e   :  { %4901 = vmatprep.subr.bf16.mxu0 %v13936_v3  ;;  %5024 = vmatprep.subr.bf16.mxu1 %v13939_v19  ;;  %v13995_v3 = vld [vmem:[#allocation5 + $0x1050] ss:$20 sps:$4 sm:$0xff]  }
 0x38f   :  { %v13996_v19 = vld [vmem:[#allocation5 + $0xc90] ss:$20 sps:$4 sm:$0xff]  }
 0x391   :  { %4902 = vmatpush1.bf16.msra.mxu0 %v13934_v27  ;;  %5025 = vmatpush1.bf16.msra.mxu1 %v13937_v4  ;;  %v13997_v27 = vld [vmem:[#allocation5 + $0xf10] ss:$20 sps:$4 sm:$0xff]   ;;  %v13998_v4 = vld [vmem:[#allocation5 + $0xdf8] ss:$20 sps:$4 sm:$0xff]  }
 0x392   :  { %4912 = vmatprep.subr.bf16.mxu0 %v13942_v5  ;;  %5035 = vmatprep.subr.bf16.mxu1 %v13945_v6  ;;  %v13999_v5 = vld [vmem:[#allocation5 + $0x1078] ss:$20 sps:$4 sm:$0xff]  }
 0x393   :  { %v14000_v6 = vld [vmem:[#allocation5 + $0xcb8] ss:$20 sps:$4 sm:$0xff]  }
 0x394   :  { %4904 = vmatmul.mubr.bf16.vlgmr.msra.gmra.mrb[20].mxu0 %v15583_v60  ;;  %5027 = vmatmul.mubr.bf16.vlgmr.msra.gmra.mrb[20].mxu1 %v15583_v60 }
 0x395   :  { %4913 = vmatpush1.bf16.msra.mxu0 %v13940_v7  ;;  %5036 = vmatpush1.bf16.msra.mxu1 %v13943_v8  ;;  %v14001_v7 = vld [vmem:[#allocation5 + $0xf38] ss:$20 sps:$4 sm:$0xff]   ;;  %v14002_v8 = vld [vmem:[#allocation5 + $0xe20] ss:$20 sps:$4 sm:$0xff]  }
 0x396   :  { %4914 = vmatprep.subr.bf16.mxu0 %v13948_v20  ;;  %5037 = vmatprep.subr.bf16.mxu1 %v13951_v11  ;;  %v14003_v20 = vld [vmem:[#allocation5 + $0x10a0] ss:$20 sps:$4 sm:$0xff]  }
 0x397   :  { %4944 = vmatprep.mubr.bf16.mxu0 %v15169_v32  ;;  %5067 = vmatprep.mubr.bf16.mxu1 %v15169_v32  ;;  %v14004_v11 = vld [vmem:[#allocation5 + $0xce0] ss:$20 sps:$4 sm:$0xff]  }
 0x399   :  { %4915 = vmatpush1.bf16.msra.mxu0 %v13946_v46  ;;  %5038 = vmatpush1.bf16.msra.mxu1 %v13949_v12  ;;  %v14005_v46 = vld [vmem:[#allocation5 + $0xf60] ss:$20 sps:$4 sm:$0xff]   ;;  %v14012_v12 = vld [vmem:[#allocation8 + $0x40] sm:$0xff]  }
 0x39a   :  { %4916 = vmatprep.subr.bf16.mxu0 %v13954_v13  ;;  %5039 = vmatprep.subr.bf16.mxu1 %v13957_v14  ;;  %v14006_v13 = vld [vmem:[#allocation5 + $0x10c8] ss:$20 sps:$4 sm:$0xff]  }
 0x39b   :  { %v14014_v14 = vld [vmem:[#allocation8] sm:$0xff]  }
 0x39d   :  { %4917 = vmatpush1.bf16.msra.mxu0 %v13952_v23  ;;  %5040 = vmatpush1.bf16.msra.mxu1 %v13955_v15  ;;  %v14016_v23 = vld [vmem:[#allocation8 + $0x48] sm:$0xff]  }
 0x39e   :  { %4918 = vmatprep.subr.bf16.mxu0 %v13960_v17  ;;  %5041 = vmatprep.subr.bf16.mxu1 %v13963_v18  ;;  %v14007_v15 = vld [vmem:[#allocation5 + $0x10f0] ss:$20 sps:$4 sm:$0xff]   ;;  %v14020_v18 = vld [vmem:[#allocation8 + $0x50] sm:$0xff]  }
 0x39f   :  { %v14018_v17 = vld [vmem:[#allocation8 + $0x8] sm:$0xff]  }
 0x3a1   :  { %4919 = vmatpush1.bf16.msra.mxu0 %v13958_v21  ;;  %5042 = vmatpush1.bf16.msra.mxu1 %v13961_v24  ;;  %v14008_v21 = vld [vmem:[#allocation5 + $0x1118] ss:$20 sps:$4 sm:$0xff]   ;;  %v14024_v24 = vld [vmem:[#allocation8 + $0x58] sm:$0xff]  }
 0x3a2   :  { %4920 = vmatprep.subr.bf16.mxu0 %v13966_v26  ;;  %5043 = vmatprep.subr.bf16.mxu1 %v13969_v31  ;;  %v14026_v26 = vld [vmem:[#allocation8 + $0x18] sm:$0xff]   ;;  %v14028_v31 = vld [vmem:[#allocation8 + $0x60] sm:$0xff]  }
 0x3a5   :  { %4921 = vmatpush1.bf16.msra.mxu0 %v13964_v22  ;;  %5044 = vmatpush1.bf16.msra.mxu1 %v13967_v35  ;;  %v14030_v22 = vld [vmem:[#allocation8 + $0x20] sm:$0xff]   ;;  %v4828_v35 = vsel %vm1424_vm0, %v14011_v34, 0 }
 0x3a6   :  { %11863 = vmatprep.subr.msk.bf16.mxu0 %vm1424_vm0, %v11859_v16  ;;  %11865 = vmatprep.subr.msk.bf16.mxu1 %vm1424_vm0, %v11861_v25  ;;  %v14013_v16 = vld [vmem:[#allocation8 + $0xc0] sm:$0xff]  }
 0x3a7   :  { %v14015_v25 = vld [vmem:[#allocation8 + $0x80] sm:$0xff]  }
 0x3a9   :  { %4923 = vmatpush1.bf16.msra.mxu0 %v4816_v38  ;;  %5046 = vmatpush1.bf16.msra.mxu1 %v4822_v41  ;;  %v14021_v38 = vld [vmem:[#allocation8 + $0xd0] sm:$0xff]  }
 0x3aa   :  { %12651 = vmatprep.subr.bf16.mxu0 %v13974_v36  ;;  %12673 = vmatprep.subr.bf16.mxu1 %v13975_v50  ;;  %v14023_v41 = vld [vmem:[#allocation8 + $0x90] sm:$0xff]   ;;  %v14025_v36 = vld [vmem:[#allocation8 + $0xd8] sm:$0xff]  }
 0x3ab   :  { %v14027_v50 = vld [vmem:[#allocation8 + $0x98] sm:$0xff]  }
 0x3ac   :  { %11864 = vmatmul.mubr.msk.bf16.vlgmr.msra.gmra.mrb[20].mxu0 %vm1420_vm1, %v15595_v47  ;;  %11866 = vmatmul.mubr.msk.bf16.vlgmr.msra.gmra.mrb[20].mxu1 %vm1420_vm1, %v15595_v47 }
 0x3ad   :  { %12652 = vmatpush3.bf16.msra.mxu0 %v13976_v53  ;;  %5108 = vmatprep.mubr.bf16.mxu0 %v15561_v28  ;;  %v13989_v28 = vld [vmem:[#allocation5 + $0xec0] ss:$20 sps:$4 sm:$0xff]   ;;  %v14029_v53 = vld [vmem:[#allocation8 + $0xe0] sm:$0xff]  }
 0x3ae   :  { %12674 = vmatpush3.bf16.msra.mxu1 %v13977_v51  ;;  %5148 = vmatprep.mubr.bf16.mxu1 %v15569_v10  ;;  %v13991_v10 = vld [vmem:[#allocation5 + $0x1028] ss:$20 sps:$4 sm:$0xff]  }
 0x3af   :  { %12653 = vmatprep.subr.bf16.mxu0 %v13978_v45  ;;  %12675 = vmatprep.subr.bf16.mxu1 %v13979_v52  ;;  %v14031_v51 = vld [vmem:[#allocation8 + $0xa0] sm:$0xff]   ;;  %v14032_v45 = vld [vmem:[#allocation8 + $0x68] sm:$0xff]  }
 0x3b0   :  { %v14033_v52 = vld [vmem:[#allocation8 + $0xe8] sm:$0xff]  }
 0x3b1   :  { %12654 = vmatpush3.bf16.msra.mxu0 %v13980_v58  ;;  %v14035_v58 = vld [vmem:[#allocation8 + $0xa8] sm:$0xff]  }
 0x3b2   :  { %12676 = vmatpush3.bf16.msra.mxu1 %v13981_v59  ;;  %12655 = vmatprep.subr.bf16.mxu0 %v13982_v56  ;;  %v14036_v59 = vld [vmem:[#allocation8 + $0x70] sm:$0xff]  }
 0x3b3   :  { %12677 = vmatprep.subr.bf16.mxu1 %v13983_v61  ;;  %v14037_v56 = vld [vmem:[#allocation8 + $0xf0] sm:$0xff]  }
 0x3b4   :  { %v14038_v61 = vld [vmem:[#allocation8 + $0x30] sm:$0xff]  }
 0x3b5   :  { %12656 = vmatpush3.bf16.msra.mxu0 %v13984_v62  ;;  %v14039_v62 = vld [vmem:[#allocation8 + $0xb0] sm:$0xff]  }
 0x3b6   :  { %12678 = vmatpush3.bf16.msra.mxu1 %v13985_v54  ;;  %12657 = vmatprep.subr.bf16.mxu0 %v13986_v63  ;;  %v14040_v54 = vld [vmem:[#allocation8 + $0x78] sm:$0xff]  }
 0x3b7   :  { %12679 = vmatprep.subr.bf16.mxu1 %v13987_v48  ;;  %v14041_v63 = vld [vmem:[#allocation8 + $0xf8] sm:$0xff]  }
 0x3b8   :  { %v14042_v48 = vld [vmem:[#allocation8 + $0x38] sm:$0xff]  }
 0x3b9   :  { %12658 = vmatpush3.bf16.msra.mxu0 %v13988_v55  ;;  %v14043_v55 = vld [vmem:[#allocation8 + $0xb8] sm:$0xff]  }
 0x3ba   :  { %12680 = vmatpush3.bf16.msra.mxu1 %v13989_v28  ;;  %12659 = vmatprep.subr.bf16.mxu0 %v13990_v0  ;;  %v3808_v28 = vld [vmem:[#allocation7 + $0x6] ss:$8 sm:$0xf] }
 0x3bb   :  { %12681 = vmatprep.subr.bf16.mxu1 %v13991_v10  ;;  %v3809_v0 = vld [vmem:[#allocation7 + $0x6] ss:$8 sm:$0x10] }
 0x3bc   :  { %v15618_v10 = vor.u32 %v3809_v0, %v3808_v28 }
 0x3bd   :  { %12660 = vmatpush3.bf16.msra.mxu0 %v13992_v1  ;;  %v5202_v1 = vld [vmem:[#allocation7 + $0x7] ss:$8 sm:$0xf] }
 0x3be   :  { %12682 = vmatpush3.bf16.msra.mxu1 %v13993_v2  ;;  %12661 = vmatprep.subr.bf16.mxu0 %v13994_v57  ;;  %v5203_v2 = vld [vmem:[#allocation7 + $0x7] ss:$8 sm:$0x10]  ;;  %v5237_v57 = vld [vmem:[#allocation7 + $0x28] ss:$8 sm:$0xf]  ;;  %v3831_v0 = vrot.slane %v15618_v10, %v15477_v40 }
 0x3bf   :  { %12683 = vmatprep.subr.bf16.mxu1 %v13995_v3  ;;  %v5238_v3 = vld [vmem:[#allocation7 + $0x28] ss:$8 sm:$0x10] }
 0x3c1   :  { %12662 = vmatpush3.bf16.msra.mxu0 %v13996_v19  ;;  %v3815_v19 = vrot.slane %v15618_v10, %v15430_v39 }
 0x3c2   :  { %12684 = vmatpush3.bf16.msra.mxu1 %v13997_v27  ;;  %12663 = vmatprep.subr.bf16.mxu0 %v13998_v4  ;;  %v15622_v27 = vor.u32 %v5203_v2, %v5202_v1  ;;  %v3823_v4 = vrot.slane %v15618_v10, %v15482_v30 }
 0x3c3   :  { %12685 = vmatprep.subr.bf16.mxu1 %v13999_v5  ;;  %v3819_v5 = vrot.slane %v15618_v10, %v15433_v42 }
 0x3c5   :  { %12664 = vmatpush3.bf16.msra.mxu0 %v14000_v6  ;;  %v3827_v6 = vrot.slane %v15618_v10, %v15436_v44 }
 0x3c6   :  { %12686 = vmatpush3.bf16.msra.mxu1 %v14001_v7  ;;  %12665 = vmatprep.subr.bf16.mxu0 %v14002_v8  ;;  %v15630_v7 = vor.u32 %v5238_v3, %v5237_v57 }
 0x3c7   :  { %12687 = vmatprep.subr.bf16.mxu1 %v14003_v20 }
 0x3c9   :  { %12666 = vmatpush3.bf16.msra.mxu0 %v14004_v11 }
 0x3ca   :  { %12688 = vmatpush3.bf16.msra.mxu1 %v14005_v46  ;;  %12956 = vmatprep.subr.bf16.mxu0 %v15170_v29  ;;  %v5209_v46 = vrot.slane %v15622_v27, %v15430_v39 }
 0x3cb   :  { %12702 = vmatprep.subr.bf16.mxu1 %v14012_v12 }
 0x3cc   :  { %5109 = vmatmul.mubr.bf16.vlgmr.msra.gmra.mrb[24].mxu0 %v15563_v33  ;;  %v14022_v33 = vld [vmem:[#allocation8 + $0x10] sm:$0xff]  }
 0x3cd   :  { %5149 = vmatmul.mubr.bf16.vlgmr.msra.gmra.mrb[24].mxu1 %v15583_v60  ;;  %12957 = vmatpush3.bf16.msra.mxu0 %v14006_v13  ;;  %v14009_v60 = vld [vmem:[#allocation5 + $0x1140] ss:$20 sps:$4 sm:$0xff]   ;;  %v5217_v13 = vrot.slane %v15622_v27, %v15482_v30 }
 0x3ce   :  { %12958 = vmatprep.subr.bf16.mxu0 %v15170_v29  ;;  %12968 = vmatprep.mubr.msk.bf16.mxu0 %vm15171_vm2, %v15170_v29 }
 0x3cf   :  { %12703 = vmatpush3.bf16.msra.mxu1 %v14014_v14 }
 0x3d0   :  { %12704 = vmatprep.subr.bf16.mxu1 %v14016_v23 }
 0x3d1   :  { %12959 = vmatpush3.bf16.msra.mxu0 %v14007_v15 }
 0x3d2   :  { %12960 = vmatprep.subr.bf16.mxu0 %v15170_v29 }
 0x3d3   :  { %12705 = vmatpush3.bf16.msra.mxu1 %v14018_v17  ;;  %v5213_v17 = vrot.slane %v15622_v27, %v15433_v42 }
 0x3d4   :  { %12706 = vmatprep.subr.bf16.mxu1 %v14020_v18 }
 0x3d5   :  { %12961 = vmatpush3.bf16.msra.mxu0 %v14008_v21  ;;  %v5221_v21 = vrot.slane %v15622_v27, %v15436_v44 }
 0x3d6   :  { %12962 = vmatprep.subr.bf16.mxu0 %v15170_v29 }
 0x3d7   :  { %12707 = vmatpush3.bf16.msra.mxu1 %v14022_v33 }
 0x3d8   :  { %12708 = vmatprep.subr.bf16.mxu1 %v14024_v24 }
 0x3d9   :  { %12963 = vmatpush3.bf16.msra.mxu0 %v14009_v60 }
 0x3da   :  { %12964 = vmatprep.subr.bf16.mxu0 %v15170_v29 }
 0x3db   :  { %12709 = vmatpush3.bf16.msra.mxu1 %v14026_v26  ;;  %v5244_v26 = vrot.slane %v15630_v7, %v15430_v39 }
 0x3dc   :  { %12710 = vmatprep.subr.bf16.mxu1 %v14028_v31 }
 0x3dd   :  { %12965 = vmatpush3.bf16.msra.mxu0 %v14010_v9  ;;  %v5252_v9 = vrot.slane %v15630_v7, %v15482_v30 }
 0x3de   :  { %12966 = vmatprep.subr.bf16.mxu0 %v15170_v29 }
 0x3df   :  { %12711 = vmatpush3.bf16.msra.mxu1 %v14030_v22 }
 0x3e0   :  { %12712 = vmatprep.subr.bf16.mxu1 %v14032_v45 }
 0x3e1   :  { %12967 = vmatpush3.bf16.msra.mxu0 %v4828_v35 }
 0x3e2   :  { %12724 = vmatprep.subr.bf16.mxu0 %v14013_v16 }
 0x3e4   :  { %12969 = vmatmul.mubr.msk.bf16.vlgmr.msra.gmra.mrb[28].mxu0 %vm1420_vm1, %v15595_v47  ;;  %v14034_v47 = vld [vmem:[#allocation8 + $0x28] sm:$0xff]  }
 0x3e5   :  { %12725 = vmatpush3.bf16.msra.mxu0 %v14015_v25  ;;  %12713 = vmatpush3.bf16.msra.mxu1 %v14034_v47  ;;  %v5248_v25 = vrot.slane %v15630_v7, %v15433_v42 }
 0x3e6   :  { %12726 = vmatprep.subr.bf16.mxu0 %v14017_v37  ;;  %12714 = vmatprep.subr.bf16.mxu1 %v14036_v59  ;;  %v5256_v37 = vrot.slane %v15630_v7, %v15436_v44 }
 0x3e9   :  { %12727 = vmatpush3.bf16.msra.mxu0 %v14019_v43  ;;  %12715 = vmatpush3.bf16.msra.mxu1 %v14038_v61  ;;  %v14045_v61 = vld [vmem:[#allocation8 + $0x108] sm:$0xff]  }
 0x3ea   :  { %12728 = vmatprep.subr.bf16.mxu0 %v14021_v38  ;;  %12716 = vmatprep.subr.bf16.mxu1 %v14040_v54  ;;  %v14047_v54 = vld [vmem:[#allocation8 + $0x118] sm:$0xff]  }
 0x3ed   :  { %12729 = vmatpush3.bf16.msra.mxu0 %v14023_v41  ;;  %12717 = vmatpush3.bf16.msra.mxu1 %v14042_v48  ;;  %v14049_v48 = vld [vmem:[#allocation8 + $0x128] ss:$0 sps:$4 sm:$0xff]  }
 0x3ee   :  { %12730 = vmatprep.subr.bf16.mxu0 %v14025_v36  ;;  %12972 = vmatprep.subr.bf16.mxu1 %v15170_v29 }
 0x3f1   :  { %12731 = vmatpush3.bf16.msra.mxu0 %v14027_v50 }
 0x3f2   :  { %12732 = vmatprep.subr.bf16.mxu0 %v14029_v53 }
 0x3f5   :  { %12733 = vmatpush3.bf16.msra.mxu0 %v14031_v51 }
 0x3f6   :  { %12734 = vmatprep.subr.bf16.mxu0 %v14033_v52 }
 0x3f9   :  { %12735 = vmatpush3.bf16.msra.mxu0 %v14035_v58  ;;  %v14044_v58 = vld [vmem:[#allocation8 + $0x100] sm:$0xff]  }
 0x3fa   :  { %12736 = vmatprep.subr.bf16.mxu0 %v14037_v56 }
 0x3fd   :  { %12737 = vmatpush3.bf16.msra.mxu0 %v14039_v62  ;;  %v14046_v62 = vld [vmem:[#allocation8 + $0x110] sm:$0xff]  }
 0x3fe   :  { %12738 = vmatprep.subr.bf16.mxu0 %v14041_v63  ;;  %v14048_v63 = vld [vmem:[#allocation8 + $0x120] sm:$0xff]  }
 0x401   :  { %12739 = vmatpush3.bf16.msra.mxu0 %v14043_v55  ;;  %v5585_v55 = vsel %vm1424_vm0, %v14049_v48, 0 }
 0x402   :  { %12988 = vmatprep.subr.bf16.mxu0 %v15170_v29 }
 0x47f   :  { %v4946_v8 = vpop.f32.mrb[20].mxu0  ;;  %v5069_v20 = vpop.f32.mrb[20].mxu1 }
 0x480   :  { %v13086_v11 = vadd.f32 %v4946_v8, %v3815_v19  ;;  %v13088_v12 = vadd.f32 %v5069_v20, %v3823_v4  ;;  %v4948_v14 = vpop.f32.mrb[21].mxu0  ;;  %v5071_v23 = vpop.f32.mrb[21].mxu1 }
 0x481   :  { %v13087_v15 = vadd.f32 %v4948_v14, %v3819_v5  ;;  %v13089_v18 = vadd.f32 %v5071_v23, %v3827_v6  ;;  %v4950_v33 = vpop.f32.mrb[22].mxu0  ;;  %v5073_v24 = vpop.f32.mrb[22].mxu1 }
 0x482   :  { %v5196_v60 = vmax.f32 %v13086_v11, 0.0  ;;  %v5198_v31 = vmax.f32 %v13088_v12, 0.0  ;;  %v4951_v34 = vpop.f32.mrb[23].mxu0  ;;  %v5074_v22 = vpop.f32.mrb[23].mxu1  ;;  %v14050_v24 = vld [vmem:[#allocation10] sm:$0xff]  }
 0x483   :  { %v5197_v35 = vmax.f32 %v13087_v15, 0.0  ;;  %v5199_v16 = vmax.f32 %v13089_v18, 0.0  ;;  %v5260_v15 = vrot.slane %v15630_v7, %v15477_v40  ;;  %v14053_v7 = vld [vmem:[#allocation10 + $0x18] sm:$0xff]  }
 0x484   :  { %v5231_v43 = vmul.f32 %v5209_v46, %v5196_v60  ;;  %v5233_v38 = vmul.f32 %v5217_v13, %v5198_v31  ;;  %v5225_v13 = vrot.slane %v15622_v27, %v15477_v40  ;;  %v14051_v60 = vld [vmem:[#allocation10 + $0x8] sm:$0xff]   ;;  %v14052_v27 = vld [vmem:[#allocation10 + $0x10] sm:$0xff]  }
 0x485   :  { %v5232_v41 = vmul.f32 %v5213_v17, %v5197_v35  ;;  %v5234_v36 = vmul.f32 %v5221_v21, %v5199_v16  ;;  %v14055_v31 = vld [vmem:[#allocation10 + $0x28] sm:$0xff]   ;;  %v14057_v22 = vld [vmem:[#allocation13] sm:$0xff]  }
 0x486   :  { %v5266_v50 = vadd.f32 %v5244_v26, %v5231_v43  ;;  %v5268_v53 = vadd.f32 %v5252_v9, %v5233_v38  ;;  %v14054_v26 = vld [vmem:[#allocation10 + $0x20] sm:$0xff]   ;;  %v14056_v9 = vld [vmem:[#allocation10 + $0x30] ss:$0 sps:$4 sm:$0x33]  }
 0x487   :  { %v5267_v51 = vadd.f32 %v5248_v25, %v5232_v41  ;;  %v5269_v45 = vadd.f32 %v5256_v37, %v5234_v36  ;;  %v5786_v34 = vsel %vm5784_vm3, %v14056_v9, 0  ;;  %v11868_v25 = vld [vmem:[#allocation16] ss:$0 sm:$0xff]  ;;  %v14093_v9 = vld [vmem:[#allocation14 + $0xd4] ss:$20 sps:$4 sm:$0xff]  }
 0x488   :  { %v5346_v59 = vpack.c.bf16 %v5266_v50, %v5266_v50  ;;  %v5348_v56 = vpack.c.bf16 %v5268_v53, %v5268_v53 }
 0x489   :  { %v5347_v52 = vpack.c.bf16 %v5267_v51, %v5267_v51  ;;  %v5349_v47 = vpack.c.bf16 %v5269_v45, %v5269_v45 }
 0x48b   :  { %5619 = vmatprep.mubr.bf16.mxu1 %v5347_v52  ;;  %5659 = vmatprep.mubr.bf16.mxu0 %v5349_v47 }
 0x48c   :  { %5620 = vmatmul.mubr.bf16.vlgmr.msra.gmra.mrb[28].mxu1 %v5346_v59  ;;  %5660 = vmatmul.mubr.bf16.vlgmr.msra.gmra.mrb[32].mxu0 %v5348_v56  ;;  %v11908_v56 = vld [vmem:[#allocation16 + $0x1] ss:$0 sm:$0xff] }
 0x48d   :  { %12973 = vmatpush3.bf16.msra.mxu1 %v14044_v58  ;;  %12984 = vmatprep.mubr.msk.bf16.mxu1 %vm15171_vm2, %v15170_v29 }
 0x48e   :  { %12974 = vmatprep.subr.bf16.mxu1 %v15170_v29  ;;  %13002 = vmatprep.mubr.msk.bf16.mxu0 %vm15171_vm2, %v15170_v29 }
 0x48f   :  { %12989 = vmatpush3.bf16.msra.mxu0 %v14050_v24  ;;  %v14078_v24 = vld [vmem:[#allocation14 + $0x7c] ss:$20 sps:$4 sm:$0xff]  }
 0x490   :  { %12990 = vmatprep.subr.bf16.mxu0 %v15170_v29 }
 0x491   :  { %12975 = vmatpush3.bf16.msra.mxu1 %v14045_v61 }
 0x492   :  { %12976 = vmatprep.subr.bf16.mxu1 %v15170_v29 }
 0x493   :  { %12991 = vmatpush3.bf16.msra.mxu0 %v14051_v60  ;;  %v14076_v60 = vld [vmem:[#allocation14 + $0x78] ss:$20 sps:$4 sm:$0xff]  }
 0x494   :  { %12992 = vmatprep.subr.bf16.mxu0 %v15170_v29 }
 0x495   :  { %12977 = vmatpush3.bf16.msra.mxu1 %v14046_v62 }
 0x496   :  { %12978 = vmatprep.subr.bf16.mxu1 %v15170_v29 }
 0x497   :  { %12993 = vmatpush3.bf16.msra.mxu0 %v14052_v27  ;;  %v14084_v27 = vld [vmem:[#allocation14 + $0xa4] ss:$20 sps:$4 sm:$0xff]  }
 0x498   :  { %12994 = vmatprep.subr.bf16.mxu0 %v15170_v29 }
 0x499   :  { %12979 = vmatpush3.bf16.msra.mxu1 %v14047_v54 }
 0x49a   :  { %12980 = vmatprep.subr.bf16.mxu1 %v15170_v29 }
 0x49b   :  { %12995 = vmatpush3.bf16.msra.mxu0 %v14053_v7  ;;  %v14082_v7 = vld [vmem:[#allocation14 + $0xa0] ss:$20 sps:$4 sm:$0xff]  }
 0x49c   :  { %12996 = vmatprep.subr.bf16.mxu0 %v15170_v29 }
 0x49d   :  { %12981 = vmatpush3.bf16.msra.mxu1 %v14048_v63  ;;  %v11909_v63 = vld [vmem:[#allocation16 + $0x2] ss:$0 sm:$0xff] }
 0x49e   :  { %12982 = vmatprep.subr.bf16.mxu1 %v15170_v29 }
 0x49f   :  { %v12667_v28 = vpop.f32.mrb[24].mxu0  ;;  %12997 = vmatpush3.bf16.msra.mxu0 %v14054_v26  ;;  %v14090_v26 = vld [vmem:[#allocation14 + $0xcc] ss:$20 sps:$4 sm:$0xff]  }
 0x4a0   :  { %v12689_v1 = vpop.f32.mrb[24].mxu1  ;;  %v12668_v2 = vpop.f32.mrb[25].mxu0  ;;  %12998 = vmatprep.subr.bf16.mxu0 %v15170_v29 }
 0x4a1   :  { %v12669_v57 = vadd.f32 %v12668_v2, %v12667_v28  ;;  %v12690_v3 = vpop.f32.mrb[25].mxu1  ;;  %v12670_v19 = vpop.f32.mrb[26].mxu0  ;;  %12983 = vmatpush3.bf16.msra.mxu1 %v5585_v55  ;;  %v14063_v2 = vld [vmem:[#allocation14 + $0xc] ss:$20 sps:$4 sm:$0xff]  }
 0x4a2   :  { %v12691_v4 = vadd.f32 %v12690_v3, %v12689_v1  ;;  %v12692_v5 = vpop.f32.mrb[26].mxu1  ;;  %v12671_v6 = vpop.f32.mrb[27].mxu0  ;;  %13006 = vmatprep.subr.bf16.mxu1 %v15170_v29  ;;  %v14061_v1 = vld [vmem:[#allocation14 + $0x8] ss:$20 sps:$4 sm:$0xff]   ;;  %v14073_v19 = vld [vmem:[#allocation14 + $0x58] ss:$20 sps:$4 sm:$0xff]  }
 0x4a3   :  { %v5111_v8 = vadd.f32 %v12669_v57, %v3831_v0  ;;  %v12693_v20 = vpop.f32.mrb[27].mxu1  ;;  %12999 = vmatpush3.bf16.msra.mxu0 %v14055_v31  ;;  %v14060_v0 = vld [vmem:[#allocation14 + $0x4] ss:$20 sps:$4 sm:$0xff]   ;;  %v14069_v3 = vld [vmem:[#allocation14 + $0x34] ss:$20 sps:$4 sm:$0xff]  }
 0x4a4   :  { %13000 = vmatprep.subr.bf16.mxu0 %v15170_v29  ;;  %v14067_v57 = vld [vmem:[#allocation14 + $0x30] ss:$20 sps:$4 sm:$0xff]   ;;  %v14079_v5 = vld [vmem:[#allocation14 + $0x80] ss:$20 sps:$4 sm:$0xff]   ;;  %v14088_v31 = vld [vmem:[#allocation14 + $0xc8] ss:$20 sps:$4 sm:$0xff]  }
 0x4a5   :  { %v5151_v11 = vadd.f32 %v12691_v4, %v5111_v8  ;;  %v14075_v4 = vld [vmem:[#allocation14 + $0x5c] ss:$20 sps:$4 sm:$0xff]   ;;  %v14081_v6 = vld [vmem:[#allocation14 + $0x84] ss:$20 sps:$4 sm:$0xff]   ;;  %v14087_v20 = vld [vmem:[#allocation14 + $0xac] ss:$20 sps:$4 sm:$0xff]  }
 0x4a6   :  { %v14085_v8 = vld [vmem:[#allocation14 + $0xa8] ss:$20 sps:$4 sm:$0xff]  }
 0x4a7   :  { %13001 = vmatpush3.bf16.msra.mxu0 %v5786_v34  ;;  %v14091_v34 = vld [vmem:[#allocation14 + $0xd0] ss:$20 sps:$4 sm:$0xff]  }
 0x4a8   :  { %6199 = vmatprep.subr.bf16.mxu0 %v14063_v2  ;;  %v14100_v2 = vld [vmem:[#allocation14 + $0x60] ss:$20 sps:$4 sm:$0xff]  }
 0x4b7   :  { %v5190_v46 = vpop.f32.mrb[28].mxu0 }
 0x4b8   :  { %v5191_v12 = vadd.f32 %v5190_v46, %v5151_v11  ;;  %v12970_v10 = vpop.f32.mrb[29].mxu0  ;;  %v11910_v11 = vld [vmem:[#allocation11] ss:$0 sm:$0xff] }
 0x4b9   :  { %v5193_v14 = vpop.f32.mrb[30].mxu0 }
 0x4ba   :  { %v5200_v23 = vmax.f32 %v5191_v12, 0.0  ;;  %v12971_v17 = vpop.f32.mrb[31].mxu0  ;;  %v14058_v14 = vld [vmem:[#allocation14] ss:$20 sps:$4 sm:$0xff]  }
 0x4bb   :  { %v14066_v17 = vld [vmem:[#allocation14 + $0x2c] ss:$20 sps:$4 sm:$0xff]  }
 0x4bc   :  { %v5235_v18 = vmul.f32 %v5225_v13, %v5200_v23 }
 0x4be   :  { %v5270_v21 = vadd.f32 %v5260_v15, %v5235_v18  ;;  %v14064_v18 = vld [vmem:[#allocation14 + $0x28] ss:$20 sps:$4 sm:$0xff]  }
 0x4c0   :  { %v5350_v33 = vpack.c.bf16 %v5270_v21, %v5270_v21  ;;  %v14072_v21 = vld [vmem:[#allocation14 + $0x54] ss:$20 sps:$4 sm:$0xff]  }
 0x4c2   :  { %12985 = vmatmul.mubr.msk.bf16.vlgmr.msra.gmra.mrb[32].mxu1 %vm1420_vm1, %v5350_v33  ;;  %v14070_v33 = vld [vmem:[#allocation14 + $0x50] ss:$20 sps:$4 sm:$0xff]  }
 0x4c3   :  { %13008 = vmatprep.mubr.msk.bf16.mxu1 %vm15171_vm2, %v15170_v29  ;;  %13007 = vmatpush3.bf16.msra.mxu1 %v14057_v22  ;;  %v5937_v22 = vld [vmem:[#allocation14 + $0xf0] sm:$0x33] }
 0x4c4   :  { %6158 = vmatprep.subr.bf16.mxu1 %v14060_v0  ;;  %v14111_v0 = vld [vmem:[#allocation5 + $0x11bc] ss:$20 sps:$4 sm:$0xff]  }
 0x55f   :  { %v12718_v35 = vpop.f32.mrb[28].mxu1  ;;  %v12740_v16 = vpop.f32.mrb[32].mxu0 }
 0x560   :  { %v12719_v37 = vpop.f32.mrb[29].mxu1  ;;  %v12741_v43 = vpop.f32.mrb[33].mxu0 }
 0x561   :  { %v12720_v38 = vadd.f32 %v12719_v37, %v12718_v35  ;;  %v12742_v41 = vadd.f32 %v12741_v43, %v12740_v16  ;;  %v12721_v36 = vpop.f32.mrb[30].mxu1  ;;  %v12743_v50 = vpop.f32.mrb[34].mxu0  ;;  %v11955_v35 = vcombine.high %v5937_v22, %v5937_v22  ;;  %v11954_v16 = vcombine.low %v5937_v22, %v5937_v22  ;;  %v14126_v22 = vld [vmem:[#allocation5 + $0x1214] ss:$20 sps:$4 sm:$0xff]  }
 0x562   :  { %v12722_v53 = vpop.f32.mrb[31].mxu1  ;;  %v12744_v51 = vpop.f32.mrb[35].mxu0  ;;  %v14107_v36 = vld [vmem:[#allocation5 + $0x1198] ss:$20 sps:$4 sm:$0xff]   ;;  %v11919_v50 = vld [vmem:[#allocation16 + $0x3] ss:$0 sm:$0xff] }
 0x563   :  { %v5622_v45 = vadd.f32 %v12720_v38, %v11868_v25  ;;  %v5938_v25 = vld [vmem:[#allocation14 + $0xf8] sm:$0x33]  ;;  %v6144_v38 = vsel %vm5784_vm3, %v11954_v16, 0 }
 0x564   :  { %v11957_v37 = vcombine.high %v5938_v25, %v5938_v25  ;;  %v11956_v43 = vcombine.low %v5938_v25, %v5938_v25  ;;  %v14165_v16 = vld [vmem:[#allocation5 + $0x1324] ss:$20 sps:$4 sm:$0xff]  }
 0x565   :  { %v5662_v52 = vadd.f32 %v12742_v41, %v5622_v45  ;;  %v14173_v25 = vld [vmem:[#allocation5 + $0x1350] ss:$20 sps:$4 sm:$0xff]  }
 0x566   :  { %v6150_v41 = vsel %vm5784_vm3, %v11956_v43, 0  ;;  %v14140_v43 = vld [vmem:[#allocation5 + $0x1268] ss:$20 sps:$4 sm:$0xff]  }
 0x595   :  { %v5701_v47 = vpop.f32.mrb[32].mxu1 }
 0x596   :  { %v5702_v58 = vadd.f32 %v5701_v47, %v5662_v52  ;;  %v12986_v59 = vpop.f32.mrb[33].mxu1  ;;  %v11922_v52 = vld [vmem:[#allocation16 + $0x4] ss:$0 sm:$0xff] }
 0x597   :  { %v5704_v61 = vpop.f32.mrb[34].mxu1 }
 0x598   :  { %v5707_v62 = vmax.f32 %v5702_v58, 0.0  ;;  %v12987_v54 = vpop.f32.mrb[35].mxu1 }
 0x599   :  { %v14098_v54 = vld [vmem:[#allocation14 + $0x10] ss:$20 sps:$4 sm:$0xff]  }
 0x59a   :  { %v5713_v48 = vmul.f32 %v11908_v56, %v5707_v62  ;;  %v11923_v56 = vld [vmem:[#allocation16 + $0x5] ss:$0 sm:$0xff] }
 0x59c   :  { %v5719_v55 = vadd.f32 %v11909_v63, %v5713_v48  ;;  %v14105_v48 = vld [vmem:[#allocation5 + $0x1194] ss:$20 sps:$4 sm:$0xff]  }
 0x59e   :  { %v5733_v28 = vpack.c.bf16 %v5719_v55, %v5719_v55  ;;  %v14113_v55 = vld [vmem:[#allocation5 + $0x11c0] ss:$20 sps:$4 sm:$0xff]  }
 0x5a0   :  { %13003 = vmatmul.mubr.msk.bf16.vlgmr.msra.gmra.mrb[36].mxu0 %vm5780_vm4, %v5733_v28  ;;  %v14099_v28 = vld [vmem:[#allocation14 + $0x38] ss:$20 sps:$4 sm:$0xff]  }
 0x5a1   :  { %6231 = vmatprep.mubr.bf16.mxu0 %v15169_v32  ;;  %6200 = vmatpush1.bf16.msra.mxu0 %v14061_v1  ;;  %v14119_v1 = vld [vmem:[#allocation5 + $0x11e8] ss:$20 sps:$4 sm:$0xff]  }
 0x5a2   :  { %6201 = vmatprep.subr.bf16.mxu0 %v14069_v3  ;;  %v14125_v3 = vld [vmem:[#allocation5 + $0x1210] ss:$20 sps:$4 sm:$0xff]  }
 0x5a5   :  { %6202 = vmatpush1.bf16.msra.mxu0 %v14067_v57  ;;  %v14117_v57 = vld [vmem:[#allocation5 + $0x11e4] ss:$20 sps:$4 sm:$0xff]  }
 0x5a6   :  { %6203 = vmatprep.subr.bf16.mxu0 %v14075_v4  ;;  %v14123_v4 = vld [vmem:[#allocation5 + $0x120c] ss:$20 sps:$4 sm:$0xff]  }
 0x5a9   :  { %6204 = vmatpush1.bf16.msra.mxu0 %v14073_v19  ;;  %v14101_v19 = vld [vmem:[#allocation14 + $0x88] ss:$20 sps:$4 sm:$0xff]  }
 0x5aa   :  { %6205 = vmatprep.subr.bf16.mxu0 %v14081_v6  ;;  %v14102_v6 = vld [vmem:[#allocation14 + $0xb0] ss:$20 sps:$4 sm:$0xff]  }
 0x5ad   :  { %6206 = vmatpush1.bf16.msra.mxu0 %v14079_v5  ;;  %v14131_v5 = vld [vmem:[#allocation5 + $0x1238] ss:$20 sps:$4 sm:$0xff]  }
 0x5ae   :  { %6207 = vmatprep.subr.bf16.mxu0 %v14087_v20  ;;  %v14137_v20 = vld [vmem:[#allocation5 + $0x1260] ss:$20 sps:$4 sm:$0xff]  }
 0x5b1   :  { %6208 = vmatpush1.bf16.msra.mxu0 %v14085_v8  ;;  %v14129_v8 = vld [vmem:[#allocation5 + $0x1234] ss:$20 sps:$4 sm:$0xff]  }
 0x5b2   :  { %6209 = vmatprep.subr.bf16.mxu0 %v14093_v9  ;;  %v14159_v9 = vld [vmem:[#allocation5 + $0x12fc] ss:$20 sps:$4 sm:$0xff]  }
 0x5b5   :  { %6210 = vmatpush1.bf16.msra.mxu0 %v14091_v34  ;;  %v14167_v34 = vld [vmem:[#allocation5 + $0x1328] ss:$20 sps:$4 sm:$0xff]  }
 0x5b6   :  { %11961 = vmatprep.subr.msk.bf16.mxu0 %vm5784_vm3, %v11957_v37  ;;  %v14132_v37 = vld [vmem:[#allocation5 + $0x123c] ss:$20 sps:$4 sm:$0xff]  }
 0x5b9   :  { %6212 = vmatpush1.bf16.msra.mxu0 %v6150_v41  ;;  %v14179_v41 = vld [vmem:[#allocation5 + $0x1378] ss:$20 sps:$4 sm:$0xff]  }
 0x5ba   :  { %7609 = vmatprep.subr.bf16.mxu0 %v14107_v36  ;;  %v14138_v36 = vld [vmem:[#allocation5 + $0x1264] ss:$20 sps:$4 sm:$0xff]  }
 0x673   :  { %v5822_v46 = vpop.f32.mrb[36].mxu0 }
 0x674   :  { %v5823_v12 = vadd.f32 %v11910_v11, %v5822_v46  ;;  %v13004_v13 = vpop.f32.mrb[37].mxu0  ;;  %v14103_v11 = vld [vmem:[#allocation14 + $0xd8] ss:$20 sps:$4 sm:$0xff]   ;;  %v14104_v46 = vld [vmem:[#allocation14 + $0x100] ss:$0 sps:$4 sm:$0x33]  }
 0x675   :  { %v5825_v10 = vpop.f32.mrb[38].mxu0  ;;  %v14143_v13 = vld [vmem:[#allocation5 + $0x1288] ss:$20 sps:$4 sm:$0xff]  }
 0x676   :  { %v5832_v23 = vpack.c.bf16 %v5823_v12, %v5823_v12  ;;  %v13005_v15 = vpop.f32.mrb[39].mxu0  ;;  %5829 = vst.msk [vmem:[#allocation18] sm:$0x3] %vm5828_vm5, %v5823_v12  ;;  %v14135_v12 = vld [vmem:[#allocation5 + $0x125c] ss:$20 sps:$4 sm:$0xff]   ;;  %v6156_v10 = vsel %vm5784_vm3, %v14104_v46, 0 }
 0x677   :  { %v14149_v15 = vld [vmem:[#allocation5 + $0x12b0] ss:$20 sps:$4 sm:$0xff]   ;;  %v14206_v46 = vld [vmem:[#allocation5 + $0x1420] ss:$20 sps:$4 sm:$0xff]  }
 0x678   :  { %13009 = vmatmul.mubr.msk.bf16.vlgmr.msra.gmra.mrb[36].mxu1 %vm5844_vm6, %v5832_v23  ;;  %v14141_v23 = vld [vmem:[#allocation5 + $0x1284] ss:$20 sps:$4 sm:$0xff]  }
 0x679   :  { %6159 = vmatpush1.bf16.msra.mxu1 %v14058_v14  ;;  %6190 = vmatprep.mubr.bf16.mxu1 %v15169_v32  ;;  %v14110_v14 = vld [vmem:[#allocation5 + $0x11a0] ss:$20 sps:$4 sm:$0xff]  }
 0x67a   :  { %6160 = vmatprep.subr.bf16.mxu1 %v14066_v17  ;;  %v14108_v17 = vld [vmem:[#allocation5 + $0x119c] ss:$20 sps:$4 sm:$0xff]  }
 0x67d   :  { %6161 = vmatpush1.bf16.msra.mxu1 %v14064_v18  ;;  %v14116_v18 = vld [vmem:[#allocation5 + $0x11c8] ss:$20 sps:$4 sm:$0xff]  }
 0x67e   :  { %6162 = vmatprep.subr.bf16.mxu1 %v14072_v21  ;;  %v14147_v21 = vld [vmem:[#allocation5 + $0x12ac] ss:$20 sps:$4 sm:$0xff]  }
 0x681   :  { %6163 = vmatpush1.bf16.msra.mxu1 %v14070_v33  ;;  %v14155_v33 = vld [vmem:[#allocation5 + $0x12d8] ss:$20 sps:$4 sm:$0xff]  }
 0x682   :  { %6164 = vmatprep.subr.bf16.mxu1 %v14078_v24  ;;  %v14114_v24 = vld [vmem:[#allocation5 + $0x11c4] ss:$20 sps:$4 sm:$0xff]  }
 0x685   :  { %6165 = vmatpush1.bf16.msra.mxu1 %v14076_v60  ;;  %v14122_v60 = vld [vmem:[#allocation5 + $0x11f0] ss:$20 sps:$4 sm:$0xff]  }
 0x686   :  { %6166 = vmatprep.subr.bf16.mxu1 %v14084_v27  ;;  %v14153_v27 = vld [vmem:[#allocation5 + $0x12d4] ss:$20 sps:$4 sm:$0xff]  }
 0x689   :  { %6167 = vmatpush1.bf16.msra.mxu1 %v14082_v7  ;;  %v14161_v7 = vld [vmem:[#allocation5 + $0x1300] ss:$20 sps:$4 sm:$0xff]  }
 0x68a   :  { %6168 = vmatprep.subr.bf16.mxu1 %v14090_v26  ;;  %v14120_v26 = vld [vmem:[#allocation5 + $0x11ec] ss:$20 sps:$4 sm:$0xff]  }
 0x68d   :  { %6169 = vmatpush1.bf16.msra.mxu1 %v14088_v31  ;;  %v14128_v31 = vld [vmem:[#allocation5 + $0x1218] ss:$20 sps:$4 sm:$0xff]  }
 0x68e   :  { %11959 = vmatprep.subr.msk.bf16.mxu1 %vm5784_vm3, %v11955_v35  ;;  %v14134_v35 = vld [vmem:[#allocation5 + $0x1240] ss:$20 sps:$4 sm:$0xff]  }
 0x691   :  { %6171 = vmatpush1.bf16.msra.mxu1 %v6144_v38  ;;  %v14171_v38 = vld [vmem:[#allocation5 + $0x134c] ss:$20 sps:$4 sm:$0xff]  }
 0x692   :  { %13012 = vmatprep.subr.bf16.mxu1 %v15170_v29 }
 0x74b   :  { %v5882_v53 = vpop.f32.mrb[36].mxu1 }
 0x74c   :  { %v5883_v51 = vadd.f32 %v11919_v50, %v5882_v53  ;;  %v13010_v45 = vpop.f32.mrb[37].mxu1  ;;  %v14146_v50 = vld [vmem:[#allocation5 + $0x1290] ss:$20 sps:$4 sm:$0xff]   ;;  %v14177_v53 = vld [vmem:[#allocation5 + $0x1374] ss:$20 sps:$4 sm:$0xff]  }
 0x74d   :  { %v5885_v47 = vpop.f32.mrb[38].mxu1  ;;  %v14152_v45 = vld [vmem:[#allocation5 + $0x12b8] ss:$20 sps:$4 sm:$0xff]  }
 0x74e   :  { %v5888_v58 = vmax.f32 %v5883_v51, 0.0  ;;  %v13011_v59 = vpop.f32.mrb[39].mxu1  ;;  %v14144_v51 = vld [vmem:[#allocation5 + $0x128c] ss:$20 sps:$4 sm:$0xff]  }
 0x74f   :  { %v14158_v47 = vld [vmem:[#allocation5 + $0x12e0] ss:$20 sps:$4 sm:$0xff]   ;;  %v14164_v59 = vld [vmem:[#allocation5 + $0x1308] ss:$20 sps:$4 sm:$0xff]  }
 0x750   :  { %v5894_v61 = vmul.f32 %v11922_v52, %v5888_v58  ;;  %v14150_v52 = vld [vmem:[#allocation5 + $0x12b4] ss:$20 sps:$4 sm:$0xff]   ;;  %v14156_v58 = vld [vmem:[#allocation5 + $0x12dc] ss:$20 sps:$4 sm:$0xff]  }
 0x752   :  { %v5900_v62 = vadd.f32 %v11923_v56, %v5894_v61  ;;  %v14162_v56 = vld [vmem:[#allocation5 + $0x1304] ss:$20 sps:$4 sm:$0xff]  }
 0x753   :  { %v14170_v61 = vld [vmem:[#allocation5 + $0x1330] ss:$20 sps:$4 sm:$0xff]  }
 0x754   :  { %v5940_v63 = vpack.c.bf16 %v5900_v62, %v5900_v62  ;;  %v14168_v62 = vld [vmem:[#allocation5 + $0x132c] ss:$20 sps:$4 sm:$0xff]  }
 0x756   :  { %11960 = vmatmul.mubr.msk.bf16.vlgmr.msra.gmra.mrb[40].mxu1 %vm5780_vm4, %v5940_v63  ;;  %11962 = vmatmul.mubr.msk.bf16.vlgmr.msra.gmra.mrb[40].mxu0 %vm5780_vm4, %v5940_v63 }
 0x757   :  { %13013 = vmatpush3.bf16.msra.mxu1 %v14098_v54  ;;  %13026 = vmatprep.mubr.msk.bf16.mxu1 %vm15171_vm2, %v15170_v29  ;;  %v14176_v54 = vld [vmem:[#allocation5 + $0x1358] ss:$20 sps:$4 sm:$0xff]  }
 0x758   :  { %13014 = vmatprep.subr.bf16.mxu1 %v15170_v29  ;;  %7610 = vmatpush1.bf16.msra.mxu0 %v14105_v48  ;;  %v14182_v48 = vld [vmem:[#allocation5 + $0x1380] ss:$20 sps:$4 sm:$0xff]  }
 0x759   :  { %7611 = vmatprep.subr.bf16.mxu0 %v14113_v55  ;;  %v14180_v55 = vld [vmem:[#allocation5 + $0x137c] ss:$20 sps:$4 sm:$0xff]  }
 0x75b   :  { %13015 = vmatpush3.bf16.msra.mxu1 %v14099_v28  ;;  %v14185_v28 = vld [vmem:[#allocation5 + $0x13a0] ss:$20 sps:$4 sm:$0xff]  }
 0x75c   :  { %13016 = vmatprep.subr.bf16.mxu1 %v15170_v29  ;;  %7612 = vmatpush1.bf16.msra.mxu0 %v14111_v0  ;;  %v14188_v0 = vld [vmem:[#allocation5 + $0x13a8] ss:$20 sps:$4 sm:$0xff]  }
 0x75d   :  { %7613 = vmatprep.subr.bf16.mxu0 %v14119_v1  ;;  %v14183_v1 = vld [vmem:[#allocation5 + $0x139c] ss:$20 sps:$4 sm:$0xff]  }
 0x75f   :  { %13017 = vmatpush3.bf16.msra.mxu1 %v14100_v2  ;;  %v14186_v2 = vld [vmem:[#allocation5 + $0x13a4] ss:$20 sps:$4 sm:$0xff]  }
 0x760   :  { %13018 = vmatprep.subr.bf16.mxu1 %v15170_v29  ;;  %7614 = vmatpush1.bf16.msra.mxu0 %v14117_v57  ;;  %v14189_v57 = vld [vmem:[#allocation5 + $0x13c4] ss:$20 sps:$4 sm:$0xff]  }
 0x761   :  { %7615 = vmatprep.subr.bf16.mxu0 %v14125_v3  ;;  %v14191_v3 = vld [vmem:[#allocation5 + $0x13c8] ss:$20 sps:$4 sm:$0xff]  }
 0x763   :  { %13019 = vmatpush3.bf16.msra.mxu1 %v14101_v19  ;;  %v14192_v19 = vld [vmem:[#allocation5 + $0x13cc] ss:$20 sps:$4 sm:$0xff]  }
 0x764   :  { %13020 = vmatprep.subr.bf16.mxu1 %v15170_v29  ;;  %7616 = vmatpush1.bf16.msra.mxu0 %v14123_v4  ;;  %v14194_v4 = vld [vmem:[#allocation5 + $0x13d0] ss:$20 sps:$4 sm:$0xff]  }
 0x765   :  { %7617 = vmatprep.subr.bf16.mxu0 %v14131_v5  ;;  %v14197_v5 = vld [vmem:[#allocation5 + $0x13f0] ss:$20 sps:$4 sm:$0xff]  }
 0x767   :  { %13021 = vmatpush3.bf16.msra.mxu1 %v14102_v6  ;;  %v14200_v6 = vld [vmem:[#allocation5 + $0x13f8] ss:$20 sps:$4 sm:$0xff]  }
 0x768   :  { %13022 = vmatprep.subr.bf16.mxu1 %v15170_v29  ;;  %7618 = vmatpush1.bf16.msra.mxu0 %v14129_v8  ;;  %v14195_v8 = vld [vmem:[#allocation5 + $0x13ec] ss:$20 sps:$4 sm:$0xff]  }
 0x769   :  { %7619 = vmatprep.subr.bf16.mxu0 %v14137_v20  ;;  %v14198_v20 = vld [vmem:[#allocation5 + $0x13f4] ss:$20 sps:$4 sm:$0xff]  }
 0x76b   :  { %13023 = vmatpush3.bf16.msra.mxu1 %v14103_v11  ;;  %v14203_v11 = vld [vmem:[#allocation5 + $0x1418] ss:$20 sps:$4 sm:$0xff]  }
 0x76c   :  { %13024 = vmatprep.subr.bf16.mxu1 %v15170_v29  ;;  %7620 = vmatpush1.bf16.msra.mxu0 %v14135_v12  ;;  %v5942_v12 = vld [vmem:[#allocation7 + $0x29] ss:$8 sm:$0xf] }
 0x76d   :  { %7621 = vmatprep.subr.bf16.mxu0 %v14143_v13  ;;  %v5943_v13 = vld [vmem:[#allocation7 + $0x29] ss:$8 sm:$0x10] }
 0x76f   :  { %13025 = vmatpush3.bf16.msra.mxu1 %v6156_v10  ;;  %v15695_v10 = vor.u32 %v5943_v13, %v5942_v12  ;;  %v14213_v12 = vld [vmem:[#allocation5 + $0x1464] ss:$20 sps:$4 sm:$0xff]   ;;  %v14216_v13 = vld [vmem:[#allocation5 + $0x146c] ss:$20 sps:$4 sm:$0xff]  }
 0x770   :  { %7732 = vmatprep.subr.bf16.mxu1 %v14110_v14  ;;  %7622 = vmatpush1.bf16.msra.mxu0 %v14141_v23  ;;  %v6286_v14 = vld [vmem:[#allocation7 + $0x2a] ss:$8 sm:$0xf] }
 0x771   :  { %7623 = vmatprep.subr.bf16.mxu0 %v14149_v15  ;;  %v6287_v23 = vld [vmem:[#allocation7 + $0x2a] ss:$8 sm:$0x10]  ;;  %v6321_v15 = vld [vmem:[#allocation7 + $0x2b] ss:$8 sm:$0xf] }
 0x772   :  { %13027 = vmatmul.mubr.msk.bf16.vlgmr.msra.gmra.mrb[44].mxu1 %vm5780_vm4, %v5940_v63  ;;  %v14174_v63 = vld [vmem:[#allocation5 + $0x1354] ss:$20 sps:$4 sm:$0xff]  }
 0x773   :  { %7733 = vmatpush1.bf16.msra.mxu1 %v14108_v17  ;;  %v6322_v17 = vld [vmem:[#allocation7 + $0x2b] ss:$8 sm:$0x10] }
 0x774   :  { %7734 = vmatprep.subr.bf16.mxu1 %v14116_v18  ;;  %7624 = vmatpush1.bf16.msra.mxu0 %v14147_v21  ;;  %v5949_v18 = vrot.slane %v15695_v10, %v15430_v39  ;;  %v15699_v21 = vor.u32 %v6287_v23, %v6286_v14  ;;  %v14221_v14 = vld [vmem:[#allocation5 + $0x1490] ss:$20 sps:$4 sm:$0xff]   ;;  %v14224_v23 = vld [vmem:[#allocation5 + $0x1498] ss:$20 sps:$4 sm:$0xff]  }
 0x775   :  { %7625 = vmatprep.subr.bf16.mxu0 %v14155_v33  ;;  %v5957_v33 = vrot.slane %v15695_v10, %v15482_v30 }
 0x777   :  { %7735 = vmatpush1.bf16.msra.mxu1 %v14114_v24  ;;  %v5953_v24 = vrot.slane %v15695_v10, %v15433_v42 }
 0x778   :  { %7736 = vmatprep.subr.bf16.mxu1 %v14122_v60  ;;  %7626 = vmatpush1.bf16.msra.mxu0 %v14153_v27  ;;  %v5961_v60 = vrot.slane %v15695_v10, %v15436_v44  ;;  %v15707_v27 = vor.u32 %v6322_v17, %v6321_v15  ;;  %v14219_v15 = vld [vmem:[#allocation5 + $0x148c] ss:$20 sps:$4 sm:$0xff]   ;;  %v14222_v17 = vld [vmem:[#allocation5 + $0x1494] ss:$20 sps:$4 sm:$0xff]  }
 0x779   :  { %7627 = vmatprep.subr.bf16.mxu0 %v14161_v7 }
 0x77b   :  { %7737 = vmatpush1.bf16.msra.mxu1 %v14120_v26 }
 0x77c   :  { %7738 = vmatprep.subr.bf16.mxu1 %v14128_v31  ;;  %7628 = vmatpush1.bf16.msra.mxu0 %v14159_v9  ;;  %v6293_v9 = vrot.slane %v15699_v21, %v15430_v39 }
 0x77d   :  { %7629 = vmatprep.subr.bf16.mxu0 %v14167_v34 }
 0x77f   :  { %7739 = vmatpush1.bf16.msra.mxu1 %v14126_v22  ;;  %v6301_v22 = vrot.slane %v15699_v21, %v15482_v30 }
 0x780   :  { %7740 = vmatprep.subr.bf16.mxu1 %v14134_v35  ;;  %7630 = vmatpush1.bf16.msra.mxu0 %v14165_v16 }
 0x781   :  { %7631 = vmatprep.subr.bf16.mxu0 %v14173_v25 }
 0x783   :  { %7741 = vmatpush1.bf16.msra.mxu1 %v14132_v37  ;;  %v6297_v37 = vrot.slane %v15699_v21, %v15433_v42 }
 0x784   :  { %7742 = vmatprep.subr.bf16.mxu1 %v14140_v43  ;;  %7632 = vmatpush1.bf16.msra.mxu0 %v14171_v38  ;;  %v6305_v38 = vrot.slane %v15699_v21, %v15436_v44 }
 0x785   :  { %7633 = vmatprep.subr.bf16.mxu0 %v14179_v41 }
 0x787   :  { %7743 = vmatpush1.bf16.msra.mxu1 %v14138_v36 }
 0x788   :  { %7744 = vmatprep.subr.bf16.mxu1 %v14146_v50  ;;  %7634 = vmatpush1.bf16.msra.mxu0 %v14177_v53  ;;  %v6328_v53 = vrot.slane %v15707_v27, %v15430_v39 }
 0x789   :  { %7635 = vmatprep.subr.bf16.mxu0 %v14185_v28 }
 0x78b   :  { %7745 = vmatpush1.bf16.msra.mxu1 %v14144_v51 }
 0x78c   :  { %7746 = vmatprep.subr.bf16.mxu1 %v14152_v45  ;;  %7636 = vmatpush1.bf16.msra.mxu0 %v14183_v1  ;;  %v6336_v45 = vrot.slane %v15707_v27, %v15482_v30 }
 0x78d   :  { %7637 = vmatprep.subr.bf16.mxu0 %v14191_v3  ;;  %v14204_v3 = vld [vmem:[#allocation5 + $0x141c] ss:$20 sps:$4 sm:$0xff]  }
 0x78f   :  { %7747 = vmatpush1.bf16.msra.mxu1 %v14150_v52 }
 0x790   :  { %7748 = vmatprep.subr.bf16.mxu1 %v14158_v47  ;;  %7638 = vmatpush1.bf16.msra.mxu0 %v14189_v57  ;;  %v14201_v57 = vld [vmem:[#allocation5 + $0x1414] ss:$20 sps:$4 sm:$0xff]  }
 0x791   :  { %7639 = vmatprep.subr.bf16.mxu0 %v14197_v5  ;;  %v14212_v5 = vld [vmem:[#allocation5 + $0x1448] ss:$20 sps:$4 sm:$0xff]  }
 0x793   :  { %7749 = vmatpush1.bf16.msra.mxu1 %v14156_v58 }
 0x794   :  { %7750 = vmatprep.subr.bf16.mxu1 %v14164_v59  ;;  %7640 = vmatpush1.bf16.msra.mxu0 %v14195_v8  ;;  %v14207_v8 = vld [vmem:[#allocation5 + $0x143c] ss:$20 sps:$4 sm:$0xff]  }
 0x795   :  { %7650 = vmatprep.subr.bf16.mxu0 %v14203_v11  ;;  %v14215_v11 = vld [vmem:[#allocation5 + $0x1468] ss:$20 sps:$4 sm:$0xff]  }
 0x797   :  { %7751 = vmatpush1.bf16.msra.mxu1 %v14162_v56  ;;  %v6332_v56 = vrot.slane %v15707_v27, %v15433_v42 }
 0x798   :  { %7752 = vmatprep.subr.bf16.mxu1 %v14170_v61 }
 0x79b   :  { %7753 = vmatpush1.bf16.msra.mxu1 %v14168_v62 }
 0x79c   :  { %7754 = vmatprep.subr.bf16.mxu1 %v14176_v54  ;;  %v6340_v54 = vrot.slane %v15707_v27, %v15436_v44 }
 0x79f   :  { %7755 = vmatpush1.bf16.msra.mxu1 %v14174_v63 }
 0x7a0   :  { %7756 = vmatprep.subr.bf16.mxu1 %v14182_v48 }
 0x7a3   :  { %7757 = vmatpush1.bf16.msra.mxu1 %v14180_v55 }
 0x7a4   :  { %7758 = vmatprep.subr.bf16.mxu1 %v14188_v0 }
 0x7a7   :  { %7759 = vmatpush1.bf16.msra.mxu1 %v14186_v2 }
 0x7a8   :  { %7760 = vmatprep.subr.bf16.mxu1 %v14194_v4  ;;  %v14209_v4 = vld [vmem:[#allocation5 + $0x1440] ss:$20 sps:$4 sm:$0xff]  }
 0x7ab   :  { %7761 = vmatpush1.bf16.msra.mxu1 %v14192_v19 }
 0x7ac   :  { %7762 = vmatprep.subr.bf16.mxu1 %v14200_v6 }
 0x7af   :  { %7763 = vmatpush1.bf16.msra.mxu1 %v14198_v20  ;;  %v14210_v20 = vld [vmem:[#allocation5 + $0x1444] ss:$20 sps:$4 sm:$0xff]  }
 0x7b0   :  { %7773 = vmatprep.subr.bf16.mxu1 %v14206_v46  ;;  %v14218_v46 = vld [vmem:[#allocation5 + $0x1470] ss:$20 sps:$4 sm:$0xff]  }
 0x829   :  { %v6192_v7 = vpop.f32.mrb[40].mxu1  ;;  %v6233_v26 = vpop.f32.mrb[40].mxu0 }
 0x82a   :  { %v6193_v31 = vadd.f32 %v6192_v7, %v5949_v18  ;;  %v6234_v34 = vadd.f32 %v6233_v26, %v5957_v33  ;;  %v6194_v35 = vpop.f32.mrb[41].mxu1  ;;  %v6235_v16 = vpop.f32.mrb[41].mxu0  ;;  %v14227_v18 = vld [vmem:[#allocation5 + $0x14b8] ss:$20 sps:$4 sm:$0xff]   ;;  %v14230_v33 = vld [vmem:[#allocation5 + $0x14c0] ss:$20 sps:$4 sm:$0xff]  }
 0x82b   :  { %v6195_v25 = vadd.f32 %v6194_v35, %v5953_v24  ;;  %v6236_v43 = vadd.f32 %v6235_v16, %v5961_v60  ;;  %v6196_v41 = vpop.f32.mrb[42].mxu1  ;;  %v6237_v36 = vpop.f32.mrb[42].mxu0  ;;  %v5965_v24 = vrot.slane %v15695_v10, %v15477_v40  ;;  %v14225_v60 = vld [vmem:[#allocation5 + $0x14b4] ss:$20 sps:$4 sm:$0xff]   ;;  %v14228_v7 = vld [vmem:[#allocation5 + $0x14bc] ss:$20 sps:$4 sm:$0xff]  }
 0x82c   :  { %v6280_v50 = vmax.f32 %v6193_v31, 0.0  ;;  %v6282_v51 = vmax.f32 %v6234_v34, 0.0  ;;  %v6197_v52 = vpop.f32.mrb[43].mxu1  ;;  %v6238_v47 = vpop.f32.mrb[43].mxu0  ;;  %v14233_v26 = vld [vmem:[#allocation5 + $0x14e0] ss:$20 sps:$4 sm:$0xff]  }
 0x82d   :  { %v6281_v58 = vmax.f32 %v6195_v25, 0.0  ;;  %v6283_v59 = vmax.f32 %v6236_v43, 0.0  ;;  %v14236_v31 = vld [vmem:[#allocation5 + $0x14e8] ss:$20 sps:$4 sm:$0xff]   ;;  %v6344_v43 = vrot.slane %v15707_v27, %v15477_v40  ;;  %v14242_v36 = vld [vmem:[#allocation5 + $0x1510] ss:$20 sps:$4 sm:$0xff]  }
 0x82e   :  { %v6315_v61 = vmul.f32 %v6293_v9, %v6280_v50  ;;  %v6317_v62 = vmul.f32 %v6301_v22, %v6282_v51  ;;  %v6309_v22 = vrot.slane %v15699_v21, %v15477_v40  ;;  %v14231_v25 = vld [vmem:[#allocation5 + $0x14dc] ss:$20 sps:$4 sm:$0xff]   ;;  %v14240_v21 = vld [vmem:[#allocation5 + $0x150c] ss:$20 sps:$4 sm:$0xff]   ;;  %v14246_v27 = vld [vmem:[#allocation5 + $0x1534] ss:$20 sps:$4 sm:$0xff]  }
 0x82f   :  { %v6316_v63 = vmul.f32 %v6297_v37, %v6281_v58  ;;  %v6318_v48 = vmul.f32 %v6305_v38, %v6283_v59  ;;  %v14234_v37 = vld [vmem:[#allocation5 + $0x14e4] ss:$20 sps:$4 sm:$0xff]   ;;  %v14239_v41 = vld [vmem:[#allocation5 + $0x1508] ss:$20 sps:$4 sm:$0xff]   ;;  %v14243_v47 = vld [vmem:[#allocation5 + $0x152c] ss:$20 sps:$4 sm:$0xff]  }
 0x830   :  { %v6350_v55 = vadd.f32 %v6328_v53, %v6315_v61  ;;  %v15725_v28 = vadd.f32 %v6336_v45, %v6317_v62  ;;  %v14237_v53 = vld [vmem:[#allocation5 + $0x1504] ss:$20 sps:$4 sm:$0xff]   ;;  %v14254_v59 = vld [vmem:[#allocation5 + $0x1560] ss:$20 sps:$4 sm:$0xff]   ;;  %v14252_v61 = vld [vmem:[#allocation5 + $0x155c] ss:$20 sps:$4 sm:$0xff]  }
 0x831   :  { %v6351_v0 = vadd.f32 %v6332_v56, %v6316_v63  ;;  %v6353_v1 = vadd.f32 %v6340_v54, %v6318_v48  ;;  %v14245_v45 = vld [vmem:[#allocation5 + $0x1530] ss:$20 sps:$4 sm:$0xff]   ;;  %v14248_v52 = vld [vmem:[#allocation5 + $0x1538] ss:$20 sps:$4 sm:$0xff]   ;;  %v14249_v56 = vld [vmem:[#allocation5 + $0x1554] ss:$20 sps:$4 sm:$0xff]  }
 0x832   :  { %v15729_v19 = vpack.c.bf16 %v6350_v55, %v6350_v55  ;;  %v14251_v58 = vld [vmem:[#allocation5 + $0x1558] ss:$20 sps:$4 sm:$0xff]   ;;  %v14257_v62 = vld [vmem:[#allocation5 + $0x1580] ss:$20 sps:$4 sm:$0xff]   ;;  %v14260_v54 = vld [vmem:[#allocation5 + $0x1588] ss:$20 sps:$4 sm:$0xff]  }
 0x833   :  { %v15727_v2 = vpack.c.bf16 %v6351_v0, %v6351_v0  ;;  %v15735_v6 = vpack.c.bf16 %v6353_v1, %v6353_v1  ;;  %v14255_v63 = vld [vmem:[#allocation5 + $0x157c] ss:$20 sps:$4 sm:$0xff]   ;;  %v14258_v48 = vld [vmem:[#allocation5 + $0x1584] ss:$20 sps:$4 sm:$0xff]  }
 0x834   :  { %v14263_v55 = vld [vmem:[#allocation5 + $0x15a8] ss:$20 sps:$4 sm:$0xff]   ;;  %v14266_v0 = vld [vmem:[#allocation5 + $0x15b0] ss:$20 sps:$4 sm:$0xff]  }
 0x835   :  { %7641 = vmatprep.mubr.bf16.mxu0 %v15727_v2  ;;  %7764 = vmatprep.mubr.bf16.mxu1 %v15727_v2  ;;  %v14261_v1 = vld [vmem:[#allocation5 + $0x15a4] ss:$20 sps:$4 sm:$0xff]  }
 0x836   :  { %7642 = vmatmul.mubr.bf16.vlgmr.msra.gmra.mrb[44].mxu0 %v15729_v19  ;;  %7765 = vmatmul.mubr.bf16.vlgmr.msra.gmra.mrb[48].mxu1 %v15729_v19 }
 0x837   :  { %7651 = vmatpush1.bf16.msra.mxu0 %v14201_v57  ;;  %7774 = vmatpush1.bf16.msra.mxu1 %v14204_v3  ;;  %v14264_v57 = vld [vmem:[#allocation5 + $0x15ac] ss:$20 sps:$4 sm:$0xff]   ;;  %v14269_v3 = vld [vmem:[#allocation5 + $0x15d0] ss:$20 sps:$4 sm:$0xff]  }
 0x838   :  { %7682 = vmatprep.mubr.bf16.mxu0 %v15735_v6  ;;  %7805 = vmatprep.mubr.bf16.mxu1 %v15735_v6 }
 0x839   :  { %7652 = vmatprep.subr.bf16.mxu0 %v14209_v4  ;;  %7775 = vmatprep.subr.bf16.mxu1 %v14212_v5  ;;  %v14272_v4 = vld [vmem:[#allocation5 + $0x15d8] ss:$20 sps:$4 sm:$0xff]  }
 0x83a   :  { %v14267_v5 = vld [vmem:[#allocation5 + $0x15cc] ss:$20 sps:$4 sm:$0xff]  }
 0x83b   :  { %7653 = vmatpush1.bf16.msra.mxu0 %v14207_v8  ;;  %7776 = vmatpush1.bf16.msra.mxu1 %v14210_v20  ;;  %v14270_v8 = vld [vmem:[#allocation5 + $0x15d4] ss:$20 sps:$4 sm:$0xff]   ;;  %v14275_v20 = vld [vmem:[#allocation5 + $0x15f8] ss:$20 sps:$4 sm:$0xff]  }
 0x83c   :  { %7654 = vmatprep.subr.bf16.mxu0 %v14215_v11  ;;  %7777 = vmatprep.subr.bf16.mxu1 %v14218_v46  ;;  %v14278_v11 = vld [vmem:[#allocation5 + $0x1600] ss:$20 sps:$4 sm:$0xff]  }
 0x83d   :  { %v14273_v46 = vld [vmem:[#allocation5 + $0x15f4] ss:$20 sps:$4 sm:$0xff]  }
 0x83f   :  { %7655 = vmatpush1.bf16.msra.mxu0 %v14213_v12  ;;  %7778 = vmatpush1.bf16.msra.mxu1 %v14216_v13  ;;  %v14276_v12 = vld [vmem:[#allocation5 + $0x15fc] ss:$20 sps:$4 sm:$0xff]   ;;  %v14281_v13 = vld [vmem:[#allocation5 + $0x1620] ss:$20 sps:$4 sm:$0xff]  }
 0x840   :  { %7656 = vmatprep.subr.bf16.mxu0 %v14221_v14  ;;  %7779 = vmatprep.subr.bf16.mxu1 %v14224_v23  ;;  %v14284_v14 = vld [vmem:[#allocation5 + $0x1628] ss:$20 sps:$4 sm:$0xff]  }
 0x841   :  { %v14279_v23 = vld [vmem:[#allocation5 + $0x161c] ss:$20 sps:$4 sm:$0xff]  }
 0x843   :  { %7657 = vmatpush1.bf16.msra.mxu0 %v14219_v15  ;;  %7780 = vmatpush1.bf16.msra.mxu1 %v14222_v17  ;;  %v14282_v15 = vld [vmem:[#allocation5 + $0x1624] ss:$20 sps:$4 sm:$0xff]   ;;  %v14287_v17 = vld [vmem:[#allocation5 + $0x1648] ss:$20 sps:$4 sm:$0xff]  }
 0x844   :  { %7658 = vmatprep.subr.bf16.mxu0 %v14227_v18  ;;  %7781 = vmatprep.subr.bf16.mxu1 %v14230_v33  ;;  %v14290_v18 = vld [vmem:[#allocation5 + $0x1650] ss:$20 sps:$4 sm:$0xff]  }
 0x845   :  { %v6274_v9 = vpop.f32.mrb[44].mxu1  ;;  %v14285_v33 = vld [vmem:[#allocation5 + $0x1644] ss:$20 sps:$4 sm:$0xff]  }
 0x846   :  { %v6275_v34 = vadd.f32 %v6274_v9, %v5965_v24  ;;  %v13028_v35 = vpop.f32.mrb[45].mxu1  ;;  %v14288_v24 = vld [vmem:[#allocation5 + $0x164c] ss:$20 sps:$4 sm:$0xff]  }
 0x847   :  { %v6277_v16 = vpop.f32.mrb[46].mxu1  ;;  %7659 = vmatpush1.bf16.msra.mxu0 %v14225_v60  ;;  %7782 = vmatpush1.bf16.msra.mxu1 %v14228_v7  ;;  %v14293_v60 = vld [vmem:[#allocation5 + $0x1670] ss:$20 sps:$4 sm:$0xff]   ;;  %v14296_v7 = vld [vmem:[#allocation5 + $0x1678] ss:$20 sps:$4 sm:$0xff]  }
 0x848   :  { %v6284_v10 = vmax.f32 %v6275_v34, 0.0  ;;  %v13029_v38 = vpop.f32.mrb[47].mxu1  ;;  %7660 = vmatprep.subr.bf16.mxu0 %v14233_v26  ;;  %7783 = vmatprep.subr.bf16.mxu1 %v14236_v31  ;;  %v14291_v26 = vld [vmem:[#allocation5 + $0x166c] ss:$20 sps:$4 sm:$0xff]   ;;  %v14294_v31 = vld [vmem:[#allocation5 + $0x1674] ss:$20 sps:$4 sm:$0xff]   ;;  %v15749_v16 = vpack.c.bf16 %v15725_v28, %v15725_v28 }
 0x849   :  { %v14299_v9 = vld [vmem:[#allocation5 + $0x1698] ss:$20 sps:$4 sm:$0xff]   ;;  %v14302_v34 = vld [vmem:[#allocation5 + $0x16a0] ss:$20 sps:$4 sm:$0xff]   ;;  %v14300_v35 = vld [vmem:[#allocation5 + $0x169c] ss:$20 sps:$4 sm:$0xff]  }
 0x84a   :  { %v6319_v50 = vmul.f32 %v6309_v22, %v6284_v10  ;;  %v14297_v22 = vld [vmem:[#allocation5 + $0x1694] ss:$20 sps:$4 sm:$0xff]   ;;  %v14303_v10 = vld [vmem:[#allocation5 + $0x16bc] ss:$20 sps:$4 sm:$0xff]   ;;  %v14309_v28 = vld [vmem:[#allocation5 + $0x16e4] ss:$20 sps:$4 sm:$0xff]  }
 0x84b   :  { %7661 = vmatpush1.bf16.msra.mxu0 %v14231_v25  ;;  %7784 = vmatpush1.bf16.msra.mxu1 %v14234_v37  ;;  %v14305_v25 = vld [vmem:[#allocation5 + $0x16c0] ss:$20 sps:$4 sm:$0xff]   ;;  %v14308_v37 = vld [vmem:[#allocation5 + $0x16c8] ss:$20 sps:$4 sm:$0xff]  }
 0x84c   :  { %v15745_v51 = vadd.f32 %v6344_v43, %v6319_v50  ;;  %7662 = vmatprep.subr.bf16.mxu0 %v14239_v41  ;;  %7785 = vmatprep.subr.bf16.mxu1 %v14242_v36  ;;  %v14306_v43 = vld [vmem:[#allocation5 + $0x16c4] ss:$20 sps:$4 sm:$0xff]   ;;  %v14311_v38 = vld [vmem:[#allocation5 + $0x16e8] ss:$20 sps:$4 sm:$0xff]   ;;  %v14312_v36 = vld [vmem:[#allocation5 + $0x16ec] ss:$20 sps:$4 sm:$0xff]  }
 0x84d   :  { %v14314_v41 = vld [vmem:[#allocation5 + $0x16f0] ss:$20 sps:$4 sm:$0xff]  }
 0x84e   :  { %v14317_v50 = vld [vmem:[#allocation5 + $0x1710] ss:$20 sps:$4 sm:$0xff]  }
 0x84f   :  { %7663 = vmatpush1.bf16.msra.mxu0 %v14237_v53  ;;  %7786 = vmatpush1.bf16.msra.mxu1 %v14240_v21  ;;  %v14320_v53 = vld [vmem:[#allocation5 + $0x1718] ss:$20 sps:$4 sm:$0xff]  }
 0x850   :  { %7664 = vmatprep.subr.bf16.mxu0 %v14245_v45  ;;  %7787 = vmatprep.subr.bf16.mxu1 %v14248_v52  ;;  %v14315_v21 = vld [vmem:[#allocation5 + $0x170c] ss:$20 sps:$4 sm:$0xff]   ;;  %v14318_v45 = vld [vmem:[#allocation5 + $0x1714] ss:$20 sps:$4 sm:$0xff]  }
 0x851   :  { %v14323_v52 = vld [vmem:[#allocation5 + $0x1738] ss:$20 sps:$4 sm:$0xff]  }
 0x853   :  { %7665 = vmatpush1.bf16.msra.mxu0 %v14243_v47  ;;  %7788 = vmatpush1.bf16.msra.mxu1 %v14246_v27  ;;  %v14326_v47 = vld [vmem:[#allocation5 + $0x1740] ss:$20 sps:$4 sm:$0xff]  }
 0x854   :  { %7666 = vmatprep.subr.bf16.mxu0 %v14251_v58  ;;  %7789 = vmatprep.subr.bf16.mxu1 %v14254_v59  ;;  %v6578_v27 = vld [vmem:[#allocation5 + $0x175c] sm:$0xff]  ;;  %v6579_v58 = vld [vmem:[#allocation5 + $0x1764] sm:$0xff] }
 0x855   :  { %v14321_v59 = vld [vmem:[#allocation5 + $0x1734] ss:$20 sps:$4 sm:$0xff]  }
 0x857   :  { %7667 = vmatpush1.bf16.msra.mxu0 %v14249_v56  ;;  %7790 = vmatpush1.bf16.msra.mxu1 %v14252_v61  ;;  %v14324_v56 = vld [vmem:[#allocation5 + $0x173c] ss:$20 sps:$4 sm:$0xff]   ;;  %v12150_v61 = vcombine.high %v6578_v27, %v6578_v27 }
 0x858   :  { %7668 = vmatprep.subr.bf16.mxu0 %v14257_v62  ;;  %7791 = vmatprep.subr.bf16.mxu1 %v14260_v54  ;;  %v12152_v62 = vcombine.high %v6579_v58, %v6579_v58  ;;  %v12149_v54 = vcombine.low %v6578_v27, %v6578_v27  ;;  %v14367_v27 = vld [vmem:[#allocation5 + $0x1744] ss:$20 sps:$4 sm:$0xff]  }
 0x85b   :  { %7669 = vmatpush1.bf16.msra.mxu0 %v14255_v63  ;;  %7792 = vmatpush1.bf16.msra.mxu1 %v14258_v48  ;;  %v12151_v63 = vcombine.low %v6579_v58, %v6579_v58  ;;  %v7595_v48 = vsel %vm1424_vm0, %v12149_v54, 0  ;;  %v14368_v58 = vld [vmem:[#allocation5 + $0x176c] ss:$0 sps:$4 sm:$0xff]  }
 0x85c   :  { %7670 = vmatprep.subr.bf16.mxu0 %v14263_v55  ;;  %7793 = vmatprep.subr.bf16.mxu1 %v14266_v0  ;;  %v14331_v0 = vld [vmem:[#allocation5 + $0x12e4] ss:$20 sps:$4 sm:$0xff]  }
 0x85d   :  { %v7601_v55 = vsel %vm1424_vm0, %v12151_v63, 0  ;;  %v14399_v54 = vld [vmem:[#allocation5 + $0x1838] ss:$20 sps:$4 sm:$0xff]  }
 0x85e   :  { %v14407_v63 = vld [vmem:[#allocation5 + $0x1864] ss:$20 sps:$4 sm:$0xff]  }
 0x85f   :  { %7671 = vmatpush1.bf16.msra.mxu0 %v14261_v1  ;;  %7794 = vmatpush1.bf16.msra.mxu1 %v14264_v57  ;;  %v14332_v1 = vld [vmem:[#allocation5 + $0x1564] ss:$20 sps:$4 sm:$0xff]  }
 0x860   :  { %7672 = vmatprep.subr.bf16.mxu0 %v14269_v3  ;;  %7795 = vmatprep.subr.bf16.mxu1 %v14272_v4  ;;  %v14333_v57 = vld [vmem:[#allocation5 + $0x11a4] ss:$20 sps:$4 sm:$0xff]   ;;  %v15761_v3 = vpack.c.bf16 %v15745_v51, %v15745_v51  ;;  %v14338_v51 = vld [vmem:[#allocation5 + $0x144c] ss:$20 sps:$4 sm:$0xff]  }
 0x861   :  { %v14334_v4 = vld [vmem:[#allocation5 + $0x1424] ss:$20 sps:$4 sm:$0xff]  }
 0x863   :  { %7673 = vmatpush1.bf16.msra.mxu0 %v14267_v5  ;;  %7796 = vmatpush1.bf16.msra.mxu1 %v14270_v8  ;;  %v14335_v5 = vld [vmem:[#allocation5 + $0x130c] ss:$20 sps:$4 sm:$0xff]  }
 0x864   :  { %7674 = vmatprep.subr.bf16.mxu0 %v14275_v20  ;;  %7797 = vmatprep.subr.bf16.mxu1 %v14278_v11  ;;  %v14336_v8 = vld [vmem:[#allocation5 + $0x158c] ss:$20 sps:$4 sm:$0xff]   ;;  %v14339_v11 = vld [vmem:[#allocation5 + $0x1334] ss:$20 sps:$4 sm:$0xff]  }
 0x865   :  { %v14337_v20 = vld [vmem:[#allocation5 + $0x11cc] ss:$20 sps:$4 sm:$0xff]  }
 0x867   :  { %7675 = vmatpush1.bf16.msra.mxu0 %v14273_v46  ;;  %7798 = vmatpush1.bf16.msra.mxu1 %v14276_v12  ;;  %v14340_v46 = vld [vmem:[#allocation5 + $0x15b4] ss:$20 sps:$4 sm:$0xff]  }
 0x868   :  { %7676 = vmatprep.subr.bf16.mxu0 %v14281_v13  ;;  %7799 = vmatprep.subr.bf16.mxu1 %v14284_v14  ;;  %v14341_v12 = vld [vmem:[#allocation5 + $0x11f4] ss:$20 sps:$4 sm:$0xff]   ;;  %v14343_v14 = vld [vmem:[#allocation5 + $0x135c] ss:$20 sps:$4 sm:$0xff]  }
 0x869   :  { %v14342_v13 = vld [vmem:[#allocation5 + $0x1474] ss:$20 sps:$4 sm:$0xff]  }
 0x86b   :  { %7677 = vmatpush1.bf16.msra.mxu0 %v14279_v23  ;;  %7800 = vmatpush1.bf16.msra.mxu1 %v14282_v15  ;;  %v14344_v23 = vld [vmem:[#allocation5 + $0x15dc] ss:$20 sps:$4 sm:$0xff]  }
 0x86c   :  { %7678 = vmatprep.subr.bf16.mxu0 %v14287_v17  ;;  %7801 = vmatprep.subr.bf16.mxu1 %v14290_v18  ;;  %v14345_v15 = vld [vmem:[#allocation5 + $0x121c] ss:$20 sps:$4 sm:$0xff]   ;;  %v14347_v17 = vld [vmem:[#allocation5 + $0x1384] ss:$20 sps:$4 sm:$0xff]  }
 0x86d   :  { %v14349_v18 = vld [vmem:[#allocation5 + $0x1244] ss:$20 sps:$4 sm:$0xff]  }
 0x86f   :  { %7679 = vmatpush1.bf16.msra.mxu0 %v14285_v33  ;;  %7802 = vmatpush1.bf16.msra.mxu1 %v14288_v24  ;;  %v14350_v33 = vld [vmem:[#allocation5 + $0x14c4] ss:$20 sps:$4 sm:$0xff]   ;;  %v14351_v24 = vld [vmem:[#allocation5 + $0x13ac] ss:$20 sps:$4 sm:$0xff]  }
 0x870   :  { %7680 = vmatprep.subr.bf16.mxu0 %v14293_v60  ;;  %7803 = vmatprep.subr.bf16.mxu1 %v14296_v7  ;;  %v14352_v60 = vld [vmem:[#allocation5 + $0x162c] ss:$20 sps:$4 sm:$0xff]  }
 0x871   :  { %v14353_v7 = vld [vmem:[#allocation5 + $0x126c] ss:$20 sps:$4 sm:$0xff]  }
 0x873   :  { %7681 = vmatpush1.bf16.msra.mxu0 %v14291_v26  ;;  %7804 = vmatpush1.bf16.msra.mxu1 %v14294_v31  ;;  %v14354_v26 = vld [vmem:[#allocation5 + $0x14ec] ss:$20 sps:$4 sm:$0xff]   ;;  %v14355_v31 = vld [vmem:[#allocation5 + $0x13d4] ss:$20 sps:$4 sm:$0xff]  }
 0x874   :  { %7691 = vmatprep.subr.bf16.mxu0 %v14299_v9  ;;  %7814 = vmatprep.subr.bf16.mxu1 %v14302_v34  ;;  %v14356_v9 = vld [vmem:[#allocation5 + $0x1654] ss:$20 sps:$4 sm:$0xff]  }
 0x875   :  { %v14357_v34 = vld [vmem:[#allocation5 + $0x1294] ss:$20 sps:$4 sm:$0xff]  }
 0x876   :  { %7683 = vmatmul.mubr.bf16.vlgmr.msra.gmra.mrb[44].mxu0 %v15749_v16  ;;  %7806 = vmatmul.mubr.bf16.vlgmr.msra.gmra.mrb[48].mxu1 %v15749_v16 }
 0x877   :  { %7692 = vmatpush1.bf16.msra.mxu0 %v14297_v22  ;;  %7815 = vmatpush1.bf16.msra.mxu1 %v14300_v35  ;;  %v14358_v22 = vld [vmem:[#allocation5 + $0x1514] ss:$20 sps:$4 sm:$0xff]   ;;  %v14359_v35 = vld [vmem:[#allocation5 + $0x13fc] ss:$20 sps:$4 sm:$0xff]  }
 0x878   :  { %7693 = vmatprep.subr.bf16.mxu0 %v14305_v25  ;;  %7816 = vmatprep.subr.bf16.mxu1 %v14308_v37  ;;  %v14360_v25 = vld [vmem:[#allocation5 + $0x167c] ss:$20 sps:$4 sm:$0xff]  }
 0x879   :  { %7723 = vmatprep.mubr.bf16.mxu0 %v15169_v32  ;;  %7846 = vmatprep.mubr.bf16.mxu1 %v15169_v32  ;;  %v14361_v37 = vld [vmem:[#allocation5 + $0x12bc] ss:$20 sps:$4 sm:$0xff]  }
 0x87b   :  { %7694 = vmatpush1.bf16.msra.mxu0 %v14303_v10  ;;  %7817 = vmatpush1.bf16.msra.mxu1 %v14306_v43  ;;  %v14362_v10 = vld [vmem:[#allocation5 + $0x153c] ss:$20 sps:$4 sm:$0xff]   ;;  %v14371_v43 = vld [vmem:[#allocation5 + $0x1774] ss:$20 sps:$4 sm:$0xff]  }
 0x87c   :  { %7695 = vmatprep.subr.bf16.mxu0 %v14311_v38  ;;  %7818 = vmatprep.subr.bf16.mxu1 %v14314_v41  ;;  %v14363_v38 = vld [vmem:[#allocation5 + $0x16a4] ss:$20 sps:$4 sm:$0xff]  }
 0x87d   :  { %v14369_v41 = vld [vmem:[#allocation5 + $0x1770] ss:$20 sps:$4 sm:$0xff]  }
 0x87f   :  { %7696 = vmatpush1.bf16.msra.mxu0 %v14309_v28  ;;  %7819 = vmatpush1.bf16.msra.mxu1 %v14312_v36  ;;  %v14377_v28 = vld [vmem:[#allocation5 + $0x179c] ss:$20 sps:$4 sm:$0xff]   ;;  %v14364_v36 = vld [vmem:[#allocation5 + $0x16cc] ss:$20 sps:$4 sm:$0xff]  }
 0x880   :  { %7697 = vmatprep.subr.bf16.mxu0 %v14317_v50  ;;  %7820 = vmatprep.subr.bf16.mxu1 %v14320_v53  ;;  %v14375_v50 = vld [vmem:[#allocation5 + $0x1798] ss:$20 sps:$4 sm:$0xff]  }
 0x881   :  { %v14383_v53 = vld [vmem:[#allocation5 + $0x17c4] ss:$20 sps:$4 sm:$0xff]  }
 0x883   :  { %7698 = vmatpush1.bf16.msra.mxu0 %v14315_v21  ;;  %7821 = vmatpush1.bf16.msra.mxu1 %v14318_v45  ;;  %v14365_v21 = vld [vmem:[#allocation5 + $0x16f4] ss:$20 sps:$4 sm:$0xff]   ;;  %v14389_v45 = vld [vmem:[#allocation5 + $0x17ec] ss:$20 sps:$4 sm:$0xff]  }
 0x884   :  { %7699 = vmatprep.subr.bf16.mxu0 %v14323_v52  ;;  %7822 = vmatprep.subr.bf16.mxu1 %v14326_v47  ;;  %v14387_v52 = vld [vmem:[#allocation5 + $0x17e8] ss:$20 sps:$4 sm:$0xff]  }
 0x885   :  { %v14395_v47 = vld [vmem:[#allocation5 + $0x1814] ss:$20 sps:$4 sm:$0xff]  }
 0x887   :  { %7700 = vmatpush1.bf16.msra.mxu0 %v14321_v59  ;;  %7823 = vmatpush1.bf16.msra.mxu1 %v14324_v56  ;;  %v14393_v59 = vld [vmem:[#allocation5 + $0x1810] ss:$20 sps:$4 sm:$0xff]  }
 0x888   :  { %12154 = vmatprep.subr.msk.bf16.mxu0 %vm1424_vm0, %v12150_v61  ;;  %12156 = vmatprep.subr.msk.bf16.mxu1 %vm1424_vm0, %v12152_v62  ;;  %v14401_v56 = vld [vmem:[#allocation5 + $0x183c] ss:$20 sps:$4 sm:$0xff]   ;;  %v7607_v61 = vsel %vm1424_vm0, %v14368_v58, 0  ;;  %v14464_v58 = vld [vmem:[#allocation5 + $0x19d4] ss:$20 sps:$4 sm:$0xff]  }
 0x889   :  { %v14374_v62 = vld [vmem:[#allocation5 + $0x177c] ss:$20 sps:$4 sm:$0xff]  }
 0x88b   :  { %7702 = vmatpush1.bf16.msra.mxu0 %v7595_v48  ;;  %7825 = vmatpush1.bf16.msra.mxu1 %v7601_v55  ;;  %v14372_v48 = vld [vmem:[#allocation5 + $0x1778] ss:$20 sps:$4 sm:$0xff]  }
 0x88c   :  { %12771 = vmatprep.subr.bf16.mxu0 %v14331_v0  ;;  %12793 = vmatprep.subr.bf16.mxu1 %v14332_v1  ;;  %v14380_v55 = vld [vmem:[#allocation5 + $0x17a4] ss:$20 sps:$4 sm:$0xff]   ;;  %v14405_v0 = vld [vmem:[#allocation5 + $0x1860] ss:$20 sps:$4 sm:$0xff]  }
 0x88d   :  { %v14413_v1 = vld [vmem:[#allocation5 + $0x188c] ss:$20 sps:$4 sm:$0xff]  }
 0x88e   :  { %12155 = vmatmul.mubr.msk.bf16.vlgmr.msra.gmra.mrb[44].mxu0 %vm1420_vm1, %v15761_v3  ;;  %12157 = vmatmul.mubr.msk.bf16.vlgmr.msra.gmra.mrb[48].mxu1 %vm1420_vm1, %v15761_v3 }
 0x88f   :  { %12772 = vmatpush3.bf16.msra.mxu0 %v14333_v57  ;;  %7887 = vmatprep.mubr.bf16.mxu0 %v15727_v2  ;;  %v14346_v2 = vld [vmem:[#allocation5 + $0x149c] ss:$20 sps:$4 sm:$0xff]   ;;  %v14378_v57 = vld [vmem:[#allocation5 + $0x17a0] ss:$20 sps:$4 sm:$0xff]  }
 0x890   :  { %12794 = vmatpush3.bf16.msra.mxu1 %v14334_v4  ;;  %7927 = vmatprep.mubr.bf16.mxu1 %v15735_v6  ;;  %v14348_v6 = vld [vmem:[#allocation5 + $0x1604] ss:$20 sps:$4 sm:$0xff]   ;;  %v14386_v4 = vld [vmem:[#allocation5 + $0x17cc] ss:$20 sps:$4 sm:$0xff]  }
 0x891   :  { %12773 = vmatprep.subr.bf16.mxu0 %v14335_v5  ;;  %12795 = vmatprep.subr.bf16.mxu1 %v14336_v8  ;;  %v14411_v5 = vld [vmem:[#allocation5 + $0x1888] ss:$20 sps:$4 sm:$0xff]  }
 0x892   :  { %v14419_v8 = vld [vmem:[#allocation5 + $0x18b4] ss:$20 sps:$4 sm:$0xff]  }
 0x893   :  { %12774 = vmatpush3.bf16.msra.mxu0 %v14337_v20  ;;  %v14384_v20 = vld [vmem:[#allocation5 + $0x17c8] ss:$20 sps:$4 sm:$0xff]  }
 0x894   :  { %12796 = vmatpush3.bf16.msra.mxu1 %v14338_v51  ;;  %12775 = vmatprep.subr.bf16.mxu0 %v14339_v11  ;;  %v14392_v51 = vld [vmem:[#allocation5 + $0x17f4] ss:$20 sps:$4 sm:$0xff]   ;;  %v14417_v11 = vld [vmem:[#allocation5 + $0x18b0] ss:$20 sps:$4 sm:$0xff]  }
 0x895   :  { %12797 = vmatprep.subr.bf16.mxu1 %v14340_v46  ;;  %v14425_v46 = vld [vmem:[#allocation5 + $0x18dc] ss:$20 sps:$4 sm:$0xff]  }
 0x897   :  { %12776 = vmatpush3.bf16.msra.mxu0 %v14341_v12  ;;  %v14398_v12 = vld [vmem:[#allocation5 + $0x181c] ss:$20 sps:$4 sm:$0xff]  }
 0x898   :  { %12798 = vmatpush3.bf16.msra.mxu1 %v14342_v13  ;;  %12777 = vmatprep.subr.bf16.mxu0 %v14343_v14  ;;  %v14423_v13 = vld [vmem:[#allocation5 + $0x18d8] ss:$20 sps:$4 sm:$0xff]  }
 0x899   :  { %12799 = vmatprep.subr.bf16.mxu1 %v14344_v23  ;;  %v14431_v14 = vld [vmem:[#allocation5 + $0x1904] ss:$20 sps:$4 sm:$0xff]  }
 0x89a   :  { %v14396_v23 = vld [vmem:[#allocation5 + $0x1818] ss:$20 sps:$4 sm:$0xff]  }
 0x89b   :  { %12778 = vmatpush3.bf16.msra.mxu0 %v14345_v15  ;;  %v14404_v15 = vld [vmem:[#allocation5 + $0x1844] ss:$20 sps:$4 sm:$0xff]  }
 0x89c   :  { %12800 = vmatpush3.bf16.msra.mxu1 %v14346_v2  ;;  %12779 = vmatprep.subr.bf16.mxu0 %v14347_v17  ;;  %v14429_v2 = vld [vmem:[#allocation5 + $0x1900] ss:$20 sps:$4 sm:$0xff]  }
 0x89d   :  { %12801 = vmatprep.subr.bf16.mxu1 %v14348_v6  ;;  %v14437_v17 = vld [vmem:[#allocation5 + $0x192c] ss:$20 sps:$4 sm:$0xff]  }
 0x89e   :  { %v14402_v6 = vld [vmem:[#allocation5 + $0x1840] ss:$20 sps:$4 sm:$0xff]  }
 0x89f   :  { %12780 = vmatpush3.bf16.msra.mxu0 %v14349_v18  ;;  %v14410_v18 = vld [vmem:[#allocation5 + $0x186c] ss:$20 sps:$4 sm:$0xff]  }
 0x8a0   :  { %12802 = vmatpush3.bf16.msra.mxu1 %v14350_v33  ;;  %12781 = vmatprep.subr.bf16.mxu0 %v14351_v24  ;;  %v14435_v33 = vld [vmem:[#allocation5 + $0x1928] ss:$20 sps:$4 sm:$0xff]  }
 0x8a1   :  { %12803 = vmatprep.subr.bf16.mxu1 %v14352_v60  ;;  %v14443_v24 = vld [vmem:[#allocation5 + $0x1954] ss:$20 sps:$4 sm:$0xff]  }
 0x8a2   :  { %v14408_v60 = vld [vmem:[#allocation5 + $0x1868] ss:$20 sps:$4 sm:$0xff]  }
 0x8a3   :  { %12782 = vmatpush3.bf16.msra.mxu0 %v14353_v7  ;;  %v14416_v7 = vld [vmem:[#allocation5 + $0x1894] ss:$20 sps:$4 sm:$0xff]  }
 0x8a4   :  { %12804 = vmatpush3.bf16.msra.mxu1 %v14354_v26  ;;  %12783 = vmatprep.subr.bf16.mxu0 %v14355_v31  ;;  %v14441_v26 = vld [vmem:[#allocation5 + $0x1950] ss:$20 sps:$4 sm:$0xff]  }
 0x8a5   :  { %12805 = vmatprep.subr.bf16.mxu1 %v14356_v9  ;;  %v14449_v31 = vld [vmem:[#allocation5 + $0x197c] ss:$20 sps:$4 sm:$0xff]  }
 0x8a6   :  { %v14414_v9 = vld [vmem:[#allocation5 + $0x1890] ss:$20 sps:$4 sm:$0xff]  }
 0x8a7   :  { %12784 = vmatpush3.bf16.msra.mxu0 %v14357_v34  ;;  %v14422_v34 = vld [vmem:[#allocation5 + $0x18bc] ss:$20 sps:$4 sm:$0xff]  }
 0x8a8   :  { %12806 = vmatpush3.bf16.msra.mxu1 %v14358_v22  ;;  %12785 = vmatprep.subr.bf16.mxu0 %v14359_v35  ;;  %v14447_v22 = vld [vmem:[#allocation5 + $0x1978] ss:$20 sps:$4 sm:$0xff]  }
 0x8a9   :  { %12807 = vmatprep.subr.bf16.mxu1 %v14360_v25  ;;  %v14455_v35 = vld [vmem:[#allocation5 + $0x19a4] ss:$20 sps:$4 sm:$0xff]  }
 0x8aa   :  { %v14420_v25 = vld [vmem:[#allocation5 + $0x18b8] ss:$20 sps:$4 sm:$0xff]  }
 0x8ab   :  { %12786 = vmatpush3.bf16.msra.mxu0 %v14361_v37  ;;  %v14428_v37 = vld [vmem:[#allocation5 + $0x18e4] ss:$20 sps:$4 sm:$0xff]  }
 0x8ac   :  { %12808 = vmatpush3.bf16.msra.mxu1 %v14362_v10  ;;  %13030 = vmatprep.subr.bf16.mxu0 %v15170_v29  ;;  %v14453_v10 = vld [vmem:[#allocation5 + $0x19a0] ss:$20 sps:$4 sm:$0xff]  }
 0x8ad   :  { %9229 = vmatprep.subr.bf16.mxu1 %v14371_v43  ;;  %v14461_v43 = vld [vmem:[#allocation5 + $0x19cc] ss:$20 sps:$4 sm:$0xff]  }
 0x8ae   :  { %7888 = vmatmul.mubr.bf16.vlgmr.msra.gmra.mrb[48].mxu0 %v15729_v19  ;;  %v14381_v19 = vld [vmem:[#allocation5 + $0x17c0] ss:$20 sps:$4 sm:$0xff]  }
 0x8af   :  { %7928 = vmatmul.mubr.bf16.vlgmr.msra.gmra.mrb[52].mxu1 %v15749_v16  ;;  %13031 = vmatpush3.bf16.msra.mxu0 %v14363_v38  ;;  %v14366_v16 = vld [vmem:[#allocation5 + $0x171c] ss:$20 sps:$4 sm:$0xff]   ;;  %v14426_v38 = vld [vmem:[#allocation5 + $0x18e0] ss:$20 sps:$4 sm:$0xff]  }
 0x8b0   :  { %13032 = vmatprep.subr.bf16.mxu0 %v15170_v29  ;;  %13042 = vmatprep.mubr.msk.bf16.mxu0 %vm15171_vm2, %v15170_v29 }
 0x8b1   :  { %9230 = vmatpush1.bf16.msra.mxu1 %v14369_v41  ;;  %v14434_v41 = vld [vmem:[#allocation5 + $0x190c] ss:$20 sps:$4 sm:$0xff]  }
 0x8b2   :  { %9231 = vmatprep.subr.bf16.mxu1 %v14377_v28  ;;  %v14459_v28 = vld [vmem:[#allocation5 + $0x19c8] ss:$20 sps:$4 sm:$0xff]  }
 0x8b3   :  { %13033 = vmatpush3.bf16.msra.mxu0 %v14364_v36  ;;  %v14467_v36 = vld [vmem:[#allocation5 + $0x19f4] ss:$20 sps:$4 sm:$0xff]  }
 0x8b4   :  { %13034 = vmatprep.subr.bf16.mxu0 %v15170_v29 }
 0x8b5   :  { %9232 = vmatpush1.bf16.msra.mxu1 %v14375_v50  ;;  %v14432_v50 = vld [vmem:[#allocation5 + $0x1908] ss:$20 sps:$4 sm:$0xff]  }
 0x8b6   :  { %9233 = vmatprep.subr.bf16.mxu1 %v14383_v53  ;;  %v14440_v53 = vld [vmem:[#allocation5 + $0x1934] ss:$20 sps:$4 sm:$0xff]  }
 0x8b7   :  { %13035 = vmatpush3.bf16.msra.mxu0 %v14365_v21  ;;  %v14438_v21 = vld [vmem:[#allocation5 + $0x1930] ss:$20 sps:$4 sm:$0xff]  }
 0x8b8   :  { %13036 = vmatprep.subr.bf16.mxu0 %v15170_v29 }
 0x8b9   :  { %9234 = vmatpush1.bf16.msra.mxu1 %v14381_v19  ;;  %v14446_v19 = vld [vmem:[#allocation5 + $0x195c] ss:$20 sps:$4 sm:$0xff]  }
 0x8ba   :  { %9235 = vmatprep.subr.bf16.mxu1 %v14389_v45  ;;  %v14444_v45 = vld [vmem:[#allocation5 + $0x1958] ss:$20 sps:$4 sm:$0xff]  }
 0x8bb   :  { %13037 = vmatpush3.bf16.msra.mxu0 %v14366_v16  ;;  %v14452_v16 = vld [vmem:[#allocation5 + $0x1984] ss:$20 sps:$4 sm:$0xff]  }
 0x8bc   :  { %13038 = vmatprep.subr.bf16.mxu0 %v15170_v29 }
 0x8bd   :  { %9236 = vmatpush1.bf16.msra.mxu1 %v14387_v52  ;;  %v14450_v52 = vld [vmem:[#allocation5 + $0x1980] ss:$20 sps:$4 sm:$0xff]  }
 0x8be   :  { %9237 = vmatprep.subr.bf16.mxu1 %v14395_v47  ;;  %v14458_v47 = vld [vmem:[#allocation5 + $0x19ac] ss:$20 sps:$4 sm:$0xff]  }
 0x8bf   :  { %13039 = vmatpush3.bf16.msra.mxu0 %v14367_v27  ;;  %v14456_v27 = vld [vmem:[#allocation5 + $0x19a8] ss:$20 sps:$4 sm:$0xff]  }
 0x8c0   :  { %13040 = vmatprep.subr.bf16.mxu0 %v15170_v29 }
 0x8c1   :  { %9238 = vmatpush1.bf16.msra.mxu1 %v14393_v59  ;;  %v14462_v59 = vld [vmem:[#allocation5 + $0x19d0] ss:$20 sps:$4 sm:$0xff]  }
 0x8c2   :  { %9239 = vmatprep.subr.bf16.mxu1 %v14401_v56  ;;  %v14470_v56 = vld [vmem:[#allocation5 + $0x19fc] ss:$20 sps:$4 sm:$0xff]  }
 0x8c3   :  { %13041 = vmatpush3.bf16.msra.mxu0 %v7607_v61  ;;  %v6587_v61 = vld [vmem:[#allocation7 + $0x2c] ss:$8 sm:$0xf] }
 0x8c4   :  { %9352 = vmatprep.subr.bf16.mxu0 %v14374_v62  ;;  %v6588_v62 = vld [vmem:[#allocation7 + $0x2c] ss:$8 sm:$0x10] }
 0x8c5   :  { %9240 = vmatpush1.bf16.msra.mxu1 %v14399_v54  ;;  %v15782_v54 = vor.u32 %v6588_v62, %v6587_v61 }
 0x8c6   :  { %13043 = vmatmul.mubr.msk.bf16.vlgmr.msra.gmra.mrb[52].mxu0 %vm1420_vm1, %v15761_v3  ;;  %9241 = vmatprep.subr.bf16.mxu1 %v14407_v63  ;;  %v14390_v3 = vld [vmem:[#allocation5 + $0x17f0] ss:$20 sps:$4 sm:$0xff]  }
 0x8c7   :  { %9353 = vmatpush1.bf16.msra.mxu0 %v14372_v48  ;;  %v6594_v63 = vrot.slane %v15782_v54, %v15430_v39  ;;  %v6598_v48 = vrot.slane %v15782_v54, %v15433_v42 }
 0x8c8   :  { %9354 = vmatprep.subr.bf16.mxu0 %v14380_v55  ;;  %v6606_v55 = vrot.slane %v15782_v54, %v15436_v44 }
 0x8c9   :  { %9242 = vmatpush1.bf16.msra.mxu1 %v14405_v0 }
 0x8ca   :  { %9243 = vmatprep.subr.bf16.mxu1 %v14413_v1 }
 0x8cb   :  { %9355 = vmatpush1.bf16.msra.mxu0 %v14378_v57 }
 0x8cc   :  { %9356 = vmatprep.subr.bf16.mxu0 %v14386_v4 }
 0x8cd   :  { %9244 = vmatpush1.bf16.msra.mxu1 %v14411_v5 }
 0x8ce   :  { %9245 = vmatprep.subr.bf16.mxu1 %v14419_v8 }
 0x8cf   :  { %9357 = vmatpush1.bf16.msra.mxu0 %v14384_v20 }
 0x8d0   :  { %9358 = vmatprep.subr.bf16.mxu0 %v14392_v51 }
 0x8d1   :  { %9246 = vmatpush1.bf16.msra.mxu1 %v14417_v11 }
 0x8d2   :  { %9247 = vmatprep.subr.bf16.mxu1 %v14425_v46 }
 0x8d3   :  { %9359 = vmatpush1.bf16.msra.mxu0 %v14390_v3 }
 0x8d4   :  { %9360 = vmatprep.subr.bf16.mxu0 %v14398_v12 }
 0x8d5   :  { %9248 = vmatpush1.bf16.msra.mxu1 %v14423_v13  ;;  %v14465_v13 = vld [vmem:[#allocation5 + $0x19f0] ss:$20 sps:$4 sm:$0xff]  }
 0x8d6   :  { %9249 = vmatprep.subr.bf16.mxu1 %v14431_v14  ;;  %v14468_v14 = vld [vmem:[#allocation5 + $0x19f8] ss:$20 sps:$4 sm:$0xff]  }
 0x8d7   :  { %9361 = vmatpush1.bf16.msra.mxu0 %v14396_v23 }
 0x8d8   :  { %9362 = vmatprep.subr.bf16.mxu0 %v14404_v15  ;;  %v14473_v15 = vld [vmem:[#allocation5 + $0x1a1c] ss:$20 sps:$4 sm:$0xff]  }
 0x8d9   :  { %9250 = vmatpush1.bf16.msra.mxu1 %v14429_v2  ;;  %v14476_v2 = vld [vmem:[#allocation5 + $0x1a24] ss:$20 sps:$4 sm:$0xff]  }
 0x8da   :  { %9251 = vmatprep.subr.bf16.mxu1 %v14437_v17 }
 0x8db   :  { %9363 = vmatpush1.bf16.msra.mxu0 %v14402_v6  ;;  %v14471_v6 = vld [vmem:[#allocation5 + $0x1a18] ss:$20 sps:$4 sm:$0xff]  }
 0x8dc   :  { %9364 = vmatprep.subr.bf16.mxu0 %v14410_v18  ;;  %v14474_v18 = vld [vmem:[#allocation5 + $0x1a20] ss:$20 sps:$4 sm:$0xff]  }
 0x8dd   :  { %9252 = vmatpush1.bf16.msra.mxu1 %v14435_v33  ;;  %v14479_v33 = vld [vmem:[#allocation5 + $0x1a44] ss:$20 sps:$4 sm:$0xff]  }
 0x8de   :  { %9253 = vmatprep.subr.bf16.mxu1 %v14443_v24  ;;  %v14482_v24 = vld [vmem:[#allocation5 + $0x1a4c] ss:$20 sps:$4 sm:$0xff]  }
 0x8df   :  { %9365 = vmatpush1.bf16.msra.mxu0 %v14408_v60  ;;  %v14477_v60 = vld [vmem:[#allocation5 + $0x1a40] ss:$20 sps:$4 sm:$0xff]  }
 0x8e0   :  { %9366 = vmatprep.subr.bf16.mxu0 %v14416_v7  ;;  %v14480_v7 = vld [vmem:[#allocation5 + $0x1a48] ss:$20 sps:$4 sm:$0xff]  }
 0x8e1   :  { %9254 = vmatpush1.bf16.msra.mxu1 %v14441_v26  ;;  %v14485_v26 = vld [vmem:[#allocation5 + $0x1a6c] ss:$20 sps:$4 sm:$0xff]  }
 0x8e2   :  { %9255 = vmatprep.subr.bf16.mxu1 %v14449_v31  ;;  %v14488_v31 = vld [vmem:[#allocation5 + $0x1a74] ss:$20 sps:$4 sm:$0xff]  }
 0x8e3   :  { %9367 = vmatpush1.bf16.msra.mxu0 %v14414_v9  ;;  %v14483_v9 = vld [vmem:[#allocation5 + $0x1a68] ss:$20 sps:$4 sm:$0xff]  }
 0x8e4   :  { %9368 = vmatprep.subr.bf16.mxu0 %v14422_v34  ;;  %v14486_v34 = vld [vmem:[#allocation5 + $0x1a70] ss:$20 sps:$4 sm:$0xff]  }
 0x8e5   :  { %9256 = vmatpush1.bf16.msra.mxu1 %v14447_v22  ;;  %v14491_v22 = vld [vmem:[#allocation5 + $0x1a94] ss:$20 sps:$4 sm:$0xff]  }
 0x8e6   :  { %9257 = vmatprep.subr.bf16.mxu1 %v14455_v35  ;;  %v14494_v35 = vld [vmem:[#allocation5 + $0x1a9c] ss:$20 sps:$4 sm:$0xff]  }
 0x8e7   :  { %9369 = vmatpush1.bf16.msra.mxu0 %v14420_v25  ;;  %v14489_v25 = vld [vmem:[#allocation5 + $0x1a90] ss:$20 sps:$4 sm:$0xff]  }
 0x8e8   :  { %9370 = vmatprep.subr.bf16.mxu0 %v14428_v37  ;;  %v14492_v37 = vld [vmem:[#allocation5 + $0x1a98] ss:$20 sps:$4 sm:$0xff]  }
 0x8e9   :  { %9258 = vmatpush1.bf16.msra.mxu1 %v14453_v10  ;;  %v14497_v10 = vld [vmem:[#allocation5 + $0x1abc] ss:$20 sps:$4 sm:$0xff]  }
 0x8ea   :  { %9259 = vmatprep.subr.bf16.mxu1 %v14461_v43  ;;  %v14500_v43 = vld [vmem:[#allocation5 + $0x1ac4] ss:$20 sps:$4 sm:$0xff]  }
 0x8eb   :  { %9371 = vmatpush1.bf16.msra.mxu0 %v14426_v38  ;;  %v14495_v38 = vld [vmem:[#allocation5 + $0x1ab8] ss:$20 sps:$4 sm:$0xff]  }
 0x8ec   :  { %9372 = vmatprep.subr.bf16.mxu0 %v14434_v41  ;;  %v14498_v41 = vld [vmem:[#allocation5 + $0x1ac0] ss:$20 sps:$4 sm:$0xff]  }
 0x8ed   :  { %9260 = vmatpush1.bf16.msra.mxu1 %v14459_v28  ;;  %v14503_v28 = vld [vmem:[#allocation5 + $0x1ae4] ss:$20 sps:$4 sm:$0xff]  }
 0x8ee   :  { %9270 = vmatprep.subr.bf16.mxu1 %v14467_v36  ;;  %v14506_v36 = vld [vmem:[#allocation5 + $0x1aec] ss:$20 sps:$4 sm:$0xff]  }
 0x8ef   :  { %9373 = vmatpush1.bf16.msra.mxu0 %v14432_v50  ;;  %v14501_v50 = vld [vmem:[#allocation5 + $0x1ae0] ss:$20 sps:$4 sm:$0xff]  }
 0x8f0   :  { %9374 = vmatprep.subr.bf16.mxu0 %v14440_v53  ;;  %v14504_v53 = vld [vmem:[#allocation5 + $0x1ae8] ss:$20 sps:$4 sm:$0xff]  }
 0x8f3   :  { %9375 = vmatpush1.bf16.msra.mxu0 %v14438_v21  ;;  %v14509_v21 = vld [vmem:[#allocation5 + $0x1b0c] ss:$20 sps:$4 sm:$0xff]  }
 0x8f4   :  { %9376 = vmatprep.subr.bf16.mxu0 %v14446_v19  ;;  %v14512_v19 = vld [vmem:[#allocation5 + $0x1b14] ss:$20 sps:$4 sm:$0xff]  }
 0x8f7   :  { %9377 = vmatpush1.bf16.msra.mxu0 %v14444_v45 }
 0x8f8   :  { %9378 = vmatprep.subr.bf16.mxu0 %v14452_v16  ;;  %v6610_v16 = vrot.slane %v15782_v54, %v15477_v40 }
 0x8fb   :  { %9379 = vmatpush1.bf16.msra.mxu0 %v14450_v52  ;;  %v14507_v52 = vld [vmem:[#allocation5 + $0x1b08] ss:$20 sps:$4 sm:$0xff]  }
 0x8fc   :  { %9380 = vmatprep.subr.bf16.mxu0 %v14458_v47  ;;  %v14510_v47 = vld [vmem:[#allocation5 + $0x1b10] ss:$20 sps:$4 sm:$0xff]  }
 0x8ff   :  { %9381 = vmatpush1.bf16.msra.mxu0 %v14456_v27 }
 0x900   :  { %9382 = vmatprep.subr.bf16.mxu0 %v14464_v58 }
 0x903   :  { %9383 = vmatpush1.bf16.msra.mxu0 %v14462_v59  ;;  %v14515_v59 = vld [vmem:[#allocation5 + $0x1b34] ss:$20 sps:$4 sm:$0xff]  }
 0x904   :  { %9393 = vmatprep.subr.bf16.mxu0 %v14470_v56  ;;  %v14518_v56 = vld [vmem:[#allocation5 + $0x1b3c] ss:$20 sps:$4 sm:$0xff]  }
 0x961   :  { %v7725_v0 = vpop.f32.mrb[44].mxu0  ;;  %v15790_v1 = vpop.f32.mrb[48].mxu1 }
 0x962   :  { %v13090_v57 = vadd.f32 %v7725_v0, %v6594_v63  ;;  %v7727_v4 = vpop.f32.mrb[45].mxu0  ;;  %v7850_v5 = vpop.f32.mrb[49].mxu1 }
 0x963   :  { %v13091_v8 = vadd.f32 %v7727_v4, %v6598_v48  ;;  %v7729_v20 = vpop.f32.mrb[46].mxu0  ;;  %v7852_v51 = vpop.f32.mrb[50].mxu1  ;;  %v13093_v11 = vadd.f32 %v7850_v5, %v6606_v55  ;;  %v14513_v5 = vld [vmem:[#allocation5 + $0x1b30] ss:$20 sps:$4 sm:$0xff]  }
 0x964   :  { %v7730_v46 = vpop.f32.mrb[47].mxu0  ;;  %v7853_v3 = vpop.f32.mrb[51].mxu1  ;;  %v15794_v23 = vpack.c.bf16 %v13090_v57, %v13090_v57  ;;  %v14521_v20 = vld [vmem:[#allocation5 + $0x1b5c] ss:$20 sps:$4 sm:$0xff]   ;;  %v14524_v51 = vld [vmem:[#allocation5 + $0x1b64] ss:$20 sps:$4 sm:$0xff]  }
 0x965   :  { %v15792_v12 = vpack.c.bf16 %v13091_v8, %v13091_v8  ;;  %v15798_v17 = vpack.c.bf16 %v13093_v11, %v13093_v11  ;;  %v14516_v8 = vld [vmem:[#allocation5 + $0x1b38] ss:$20 sps:$4 sm:$0xff]   ;;  %v14522_v3 = vld [vmem:[#allocation5 + $0x1b60] ss:$20 sps:$4 sm:$0xff]  }
 0x966   :  { %v14519_v46 = vld [vmem:[#allocation5 + $0x1b58] ss:$20 sps:$4 sm:$0xff]  }
 0x967   :  { %9261 = vmatprep.mubr.bf16.mxu1 %v15792_v12  ;;  %9384 = vmatprep.mubr.bf16.mxu0 %v15792_v12 }
 0x968   :  { %9262 = vmatmul.mubr.bf16.vlgmr.msra.gmra.mrb[56].mxu1 %v15794_v23  ;;  %9385 = vmatmul.mubr.bf16.vlgmr.msra.gmra.mrb[56].mxu0 %v15794_v23 }
 0x969   :  { %9271 = vmatpush1.bf16.msra.mxu1 %v14465_v13  ;;  %9394 = vmatpush1.bf16.msra.mxu0 %v14468_v14  ;;  %v14527_v13 = vld [vmem:[#allocation5 + $0x1b84] ss:$20 sps:$4 sm:$0xff]   ;;  %v14530_v14 = vld [vmem:[#allocation5 + $0x1b8c] ss:$20 sps:$4 sm:$0xff]  }
 0x96a   :  { %9302 = vmatprep.mubr.bf16.mxu1 %v15798_v17  ;;  %9425 = vmatprep.mubr.bf16.mxu0 %v15798_v17 }
 0x96b   :  { %9272 = vmatprep.subr.bf16.mxu1 %v14473_v15  ;;  %9395 = vmatprep.subr.bf16.mxu0 %v14476_v2  ;;  %v14525_v15 = vld [vmem:[#allocation5 + $0x1b80] ss:$20 sps:$4 sm:$0xff]   ;;  %v14528_v2 = vld [vmem:[#allocation5 + $0x1b88] ss:$20 sps:$4 sm:$0xff]  }
 0x96d   :  { %9273 = vmatpush1.bf16.msra.mxu1 %v14471_v6  ;;  %9396 = vmatpush1.bf16.msra.mxu0 %v14474_v18  ;;  %v14533_v6 = vld [vmem:[#allocation5 + $0x1bac] ss:$20 sps:$4 sm:$0xff]   ;;  %v14536_v18 = vld [vmem:[#allocation5 + $0x1bb4] ss:$20 sps:$4 sm:$0xff]  }
 0x96e   :  { %9274 = vmatprep.subr.bf16.mxu1 %v14479_v33  ;;  %9397 = vmatprep.subr.bf16.mxu0 %v14482_v24  ;;  %v14531_v33 = vld [vmem:[#allocation5 + $0x1ba8] ss:$20 sps:$4 sm:$0xff]   ;;  %v14534_v24 = vld [vmem:[#allocation5 + $0x1bb0] ss:$20 sps:$4 sm:$0xff]  }
 0x971   :  { %9275 = vmatpush1.bf16.msra.mxu1 %v14477_v60  ;;  %9398 = vmatpush1.bf16.msra.mxu0 %v14480_v7  ;;  %v14539_v60 = vld [vmem:[#allocation5 + $0x1bd4] ss:$20 sps:$4 sm:$0xff]   ;;  %v14542_v7 = vld [vmem:[#allocation5 + $0x1bdc] ss:$20 sps:$4 sm:$0xff]  }
 0x972   :  { %9276 = vmatprep.subr.bf16.mxu1 %v14485_v26  ;;  %9399 = vmatprep.subr.bf16.mxu0 %v14488_v31  ;;  %v14537_v26 = vld [vmem:[#allocation5 + $0x1bd0] ss:$20 sps:$4 sm:$0xff]   ;;  %v14540_v31 = vld [vmem:[#allocation5 + $0x1bd8] ss:$20 sps:$4 sm:$0xff]  }
 0x975   :  { %9277 = vmatpush1.bf16.msra.mxu1 %v14483_v9  ;;  %9400 = vmatpush1.bf16.msra.mxu0 %v14486_v34  ;;  %v14545_v9 = vld [vmem:[#allocation5 + $0x1bfc] ss:$20 sps:$4 sm:$0xff]   ;;  %v14548_v34 = vld [vmem:[#allocation5 + $0x1c04] ss:$20 sps:$4 sm:$0xff]  }
 0x976   :  { %9278 = vmatprep.subr.bf16.mxu1 %v14491_v22  ;;  %9401 = vmatprep.subr.bf16.mxu0 %v14494_v35  ;;  %v14543_v35 = vld [vmem:[#allocation5 + $0x1bf8] ss:$20 sps:$4 sm:$0xff]  }
 0x979   :  { %9279 = vmatpush1.bf16.msra.mxu1 %v14489_v25  ;;  %9402 = vmatpush1.bf16.msra.mxu0 %v14492_v37  ;;  %v14546_v25 = vld [vmem:[#allocation5 + $0x1c00] ss:$20 sps:$4 sm:$0xff]  }
 0x97a   :  { %9280 = vmatprep.subr.bf16.mxu1 %v14497_v10  ;;  %9403 = vmatprep.subr.bf16.mxu0 %v14500_v43  ;;  %v14551_v43 = vld [vmem:[#allocation5 + $0x1c24] ss:$20 sps:$4 sm:$0xff]  }
 0x97d   :  { %9281 = vmatpush1.bf16.msra.mxu1 %v14495_v38  ;;  %9404 = vmatpush1.bf16.msra.mxu0 %v14498_v41  ;;  %v14554_v38 = vld [vmem:[#allocation5 + $0x1c2c] ss:$20 sps:$4 sm:$0xff]  }
 0x97e   :  { %9282 = vmatprep.subr.bf16.mxu1 %v14503_v28  ;;  %9405 = vmatprep.subr.bf16.mxu0 %v14506_v36  ;;  %v14549_v36 = vld [vmem:[#allocation5 + $0x1c20] ss:$20 sps:$4 sm:$0xff]  }
 0x981   :  { %9283 = vmatpush1.bf16.msra.mxu1 %v14501_v50  ;;  %9406 = vmatpush1.bf16.msra.mxu0 %v14504_v53  ;;  %v12787_v45 = vpop.f32.mrb[48].mxu0  ;;  %v14552_v50 = vld [vmem:[#allocation5 + $0x1c28] ss:$20 sps:$4 sm:$0xff]   ;;  %v6602_v53 = vrot.slane %v15782_v54, %v15482_v30 }
 0x982   :  { %v12809_v27 = vpop.f32.mrb[52].mxu1  ;;  %v12788_v58 = vpop.f32.mrb[49].mxu0  ;;  %9284 = vmatprep.subr.bf16.mxu1 %v14509_v21  ;;  %9407 = vmatprep.subr.bf16.mxu0 %v14512_v19  ;;  %v14557_v21 = vld [vmem:[#allocation5 + $0x1c4c] ss:$20 sps:$4 sm:$0xff]   ;;  %v14560_v19 = vld [vmem:[#allocation5 + $0x1c54] ss:$20 sps:$4 sm:$0xff]  }
 0x983   :  { %v12789_v61 = vadd.f32 %v12788_v58, %v12787_v45  ;;  %v12810_v62 = vpop.f32.mrb[53].mxu1  ;;  %v12790_v63 = vpop.f32.mrb[50].mxu0  ;;  %v14555_v45 = vld [vmem:[#allocation5 + $0x1c48] ss:$20 sps:$4 sm:$0xff]   ;;  %v14561_v58 = vld [vmem:[#allocation5 + $0x1c70] ss:$20 sps:$4 sm:$0xff]  }
 0x984   :  { %v12811_v48 = vadd.f32 %v12810_v62, %v12809_v27  ;;  %v12812_v55 = vpop.f32.mrb[54].mxu1  ;;  %v12791_v0 = vpop.f32.mrb[51].mxu0  ;;  %v14566_v27 = vld [vmem:[#allocation5 + $0x1c7c] ss:$20 sps:$4 sm:$0xff]   ;;  %v14570_v62 = vld [vmem:[#allocation5 + $0x1ca0] ss:$20 sps:$4 sm:$0xff]  }
 0x985   :  { %v7890_v57 = vadd.f32 %v12789_v61, %v6610_v16  ;;  %v12813_v4 = vpop.f32.mrb[55].mxu1  ;;  %9285 = vmatpush1.bf16.msra.mxu1 %v14507_v52  ;;  %9408 = vmatpush1.bf16.msra.mxu0 %v14510_v47  ;;  %v14558_v16 = vld [vmem:[#allocation5 + $0x1c50] ss:$20 sps:$4 sm:$0xff]   ;;  %v13092_v52 = vadd.f32 %v15790_v1, %v6602_v53  ;;  %v14563_v47 = vld [vmem:[#allocation5 + $0x1c74] ss:$20 sps:$4 sm:$0xff]  }
 0x986   :  { %9286 = vmatprep.subr.bf16.mxu1 %v14515_v59  ;;  %9409 = vmatprep.subr.bf16.mxu0 %v14518_v56  ;;  %v14564_v59 = vld [vmem:[#allocation5 + $0x1c78] ss:$20 sps:$4 sm:$0xff]   ;;  %v14569_v54 = vld [vmem:[#allocation5 + $0x1c9c] ss:$20 sps:$4 sm:$0xff]   ;;  %v14573_v55 = vld [vmem:[#allocation5 + $0x1cc0] ss:$20 sps:$4 sm:$0xff]  }
 0x987   :  { %v7930_v11 = vadd.f32 %v12811_v48, %v7890_v57  ;;  %v15811_v56 = vpack.c.bf16 %v13092_v52, %v13092_v52  ;;  %v14572_v61 = vld [vmem:[#allocation5 + $0x1ca4] ss:$20 sps:$4 sm:$0xff]   ;;  %v14578_v48 = vld [vmem:[#allocation5 + $0x1ccc] ss:$20 sps:$4 sm:$0xff]   ;;  %v14576_v0 = vld [vmem:[#allocation5 + $0x1cc8] ss:$20 sps:$4 sm:$0xff]  }
 0x988   :  { %v14567_v1 = vld [vmem:[#allocation5 + $0x1c98] ss:$20 sps:$4 sm:$0xff]   ;;  %v14584_v4 = vld [vmem:[#allocation5 + $0x1cf4] ss:$20 sps:$4 sm:$0xff]   ;;  %v14619_v52 = vld [vmem:[#allocation5 + $0x19b0] ss:$20 sps:$4 sm:$0xff]  }
 0x989   :  { %9287 = vmatpush1.bf16.msra.mxu1 %v14513_v5  ;;  %9410 = vmatpush1.bf16.msra.mxu0 %v14516_v8  ;;  %v14575_v63 = vld [vmem:[#allocation5 + $0x1cc4] ss:$20 sps:$4 sm:$0xff]   ;;  %v14581_v57 = vld [vmem:[#allocation5 + $0x1cec] ss:$20 sps:$4 sm:$0xff]   ;;  %v14579_v5 = vld [vmem:[#allocation5 + $0x1ce8] ss:$20 sps:$4 sm:$0xff]  }
 0x98a   :  { %9288 = vmatprep.subr.bf16.mxu1 %v14521_v20  ;;  %9411 = vmatprep.subr.bf16.mxu0 %v14524_v51  ;;  %v14582_v8 = vld [vmem:[#allocation5 + $0x1cf0] ss:$20 sps:$4 sm:$0xff]   ;;  %v14587_v20 = vld [vmem:[#allocation5 + $0x1d14] ss:$20 sps:$4 sm:$0xff]  }
 0x98b   :  { %v14590_v51 = vld [vmem:[#allocation5 + $0x1d1c] ss:$20 sps:$4 sm:$0xff]   ;;  %v14614_v53 = vld [vmem:[#allocation5 + $0x1aa0] ss:$20 sps:$4 sm:$0xff]  }
 0x98d   :  { %9289 = vmatpush1.bf16.msra.mxu1 %v14519_v46  ;;  %9412 = vmatpush1.bf16.msra.mxu0 %v14522_v3  ;;  %v8199_v46 = vld [vmem:[#allocation5 + $0x1d40] sm:$0xff] }
 0x98e   :  { %9290 = vmatprep.subr.bf16.mxu1 %v14527_v13  ;;  %9413 = vmatprep.subr.bf16.mxu0 %v14530_v14  ;;  %v14585_v3 = vld [vmem:[#allocation5 + $0x1d10] ss:$20 sps:$4 sm:$0xff]   ;;  %v14588_v13 = vld [vmem:[#allocation5 + $0x1d18] ss:$20 sps:$4 sm:$0xff]  }
 0x991   :  { %9291 = vmatpush1.bf16.msra.mxu1 %v14525_v15  ;;  %9414 = vmatpush1.bf16.msra.mxu0 %v14528_v2  ;;  %v12347_v15 = vcombine.high %v8199_v46, %v8199_v46 }
 0x992   :  { %9292 = vmatprep.subr.bf16.mxu1 %v14533_v6  ;;  %9415 = vmatprep.subr.bf16.mxu0 %v14536_v18  ;;  %v12346_v6 = vcombine.low %v8199_v46, %v8199_v46  ;;  %v14632_v46 = vld [vmem:[#allocation5 + $0x1d48] ss:$0 sps:$4 sm:$0xff]  }
 0x995   :  { %9293 = vmatpush1.bf16.msra.mxu1 %v14531_v33  ;;  %9416 = vmatpush1.bf16.msra.mxu0 %v14534_v24  ;;  %v9221_v33 = vsel %vm1424_vm0, %v12346_v6, 0  ;;  %v14595_v24 = vld [vmem:[#allocation5 + $0x18c0] ss:$20 sps:$4 sm:$0xff]  }
 0x996   :  { %9294 = vmatprep.subr.bf16.mxu1 %v14539_v60  ;;  %9417 = vmatprep.subr.bf16.mxu0 %v14542_v7  ;;  %v14596_v60 = vld [vmem:[#allocation5 + $0x1b40] ss:$20 sps:$4 sm:$0xff]  }
 0x997   :  { %v14597_v7 = vld [vmem:[#allocation5 + $0x1780] ss:$20 sps:$4 sm:$0xff]  }
 0x998   :  { %v14671_v6 = vld [vmem:[#allocation5 + $0x1e40] ss:$20 sps:$4 sm:$0xff]  }
 0x999   :  { %9295 = vmatpush1.bf16.msra.mxu1 %v14537_v26  ;;  %9418 = vmatpush1.bf16.msra.mxu0 %v14540_v31  ;;  %v7969_v22 = vpop.f32.mrb[52].mxu0  ;;  %v14598_v31 = vld [vmem:[#allocation5 + $0x1a00] ss:$20 sps:$4 sm:$0xff]  }
 0x99a   :  { %v15806_v37 = vadd.f32 %v7969_v22, %v7930_v11  ;;  %v13044_v10 = vpop.f32.mrb[53].mxu0  ;;  %9296 = vmatprep.subr.bf16.mxu1 %v14545_v9  ;;  %9419 = vmatprep.subr.bf16.mxu0 %v14548_v34  ;;  %v8198_v11 = vld [vmem:[#allocation5 + $0x1d38] sm:$0xff] }
 0x99b   :  { %v7972_v41 = vpop.f32.mrb[54].mxu0  ;;  %v12345_v14 = vcombine.high %v8198_v11, %v8198_v11  ;;  %v12344_v2 = vcombine.low %v8198_v11, %v8198_v11  ;;  %v14599_v9 = vld [vmem:[#allocation5 + $0x18e8] ss:$20 sps:$4 sm:$0xff]   ;;  %v14605_v10 = vld [vmem:[#allocation5 + $0x17d0] ss:$20 sps:$4 sm:$0xff]  }
 0x99c   :  { %v13045_v28 = vpop.f32.mrb[55].mxu0  ;;  %v15823_v26 = vpack.c.bf16 %v15806_v37, %v15806_v37  ;;  %v14600_v34 = vld [vmem:[#allocation5 + $0x1b68] ss:$20 sps:$4 sm:$0xff]   ;;  %v14604_v37 = vld [vmem:[#allocation5 + $0x1b90] ss:$20 sps:$4 sm:$0xff]  }
 0x99d   :  { %9297 = vmatpush1.bf16.msra.mxu1 %v14543_v35  ;;  %9420 = vmatpush1.bf16.msra.mxu0 %v14546_v25  ;;  %v9215_v18 = vsel %vm1424_vm0, %v12344_v2, 0  ;;  %v14601_v22 = vld [vmem:[#allocation5 + $0x17a8] ss:$20 sps:$4 sm:$0xff]   ;;  %v14603_v25 = vld [vmem:[#allocation5 + $0x1910] ss:$20 sps:$4 sm:$0xff]  }
 0x99e   :  { %9298 = vmatprep.subr.bf16.mxu1 %v14551_v43  ;;  %9421 = vmatprep.subr.bf16.mxu0 %v14554_v38  ;;  %v14602_v35 = vld [vmem:[#allocation5 + $0x1a28] ss:$20 sps:$4 sm:$0xff]   ;;  %v14606_v43 = vld [vmem:[#allocation5 + $0x1a50] ss:$20 sps:$4 sm:$0xff]   ;;  %v14607_v38 = vld [vmem:[#allocation5 + $0x1938] ss:$20 sps:$4 sm:$0xff]  }
 0x99f   :  { %v14608_v41 = vld [vmem:[#allocation5 + $0x1bb8] ss:$20 sps:$4 sm:$0xff]   ;;  %v14631_v11 = vld [vmem:[#allocation5 + $0x1d20] ss:$20 sps:$4 sm:$0xff]  }
 0x9a0   :  { %v14609_v28 = vld [vmem:[#allocation5 + $0x17f8] ss:$20 sps:$4 sm:$0xff]   ;;  %v14663_v2 = vld [vmem:[#allocation5 + $0x1e14] ss:$20 sps:$4 sm:$0xff]  }
 0x9a1   :  { %9299 = vmatpush1.bf16.msra.mxu1 %v14549_v36  ;;  %9422 = vmatpush1.bf16.msra.mxu0 %v14552_v50  ;;  %v14611_v36 = vld [vmem:[#allocation5 + $0x1960] ss:$20 sps:$4 sm:$0xff]  }
 0x9a2   :  { %9300 = vmatprep.subr.bf16.mxu1 %v14557_v21  ;;  %9423 = vmatprep.subr.bf16.mxu0 %v14560_v19  ;;  %v14613_v50 = vld [vmem:[#allocation5 + $0x1820] ss:$20 sps:$4 sm:$0xff]   ;;  %v14615_v21 = vld [vmem:[#allocation5 + $0x1988] ss:$20 sps:$4 sm:$0xff]  }
 0x9a3   :  { %v14616_v19 = vld [vmem:[#allocation5 + $0x1c08] ss:$20 sps:$4 sm:$0xff]  }
 0x9a5   :  { %9301 = vmatpush1.bf16.msra.mxu1 %v14555_v45  ;;  %9424 = vmatpush1.bf16.msra.mxu0 %v14558_v16  ;;  %v14617_v45 = vld [vmem:[#allocation5 + $0x1848] ss:$20 sps:$4 sm:$0xff]  }
 0x9a6   :  { %9311 = vmatprep.subr.bf16.mxu1 %v14563_v47  ;;  %9434 = vmatprep.subr.bf16.mxu0 %v14566_v27  ;;  %v14618_v16 = vld [vmem:[#allocation5 + $0x1ac8] ss:$20 sps:$4 sm:$0xff]   ;;  %v14620_v47 = vld [vmem:[#allocation5 + $0x1c30] ss:$20 sps:$4 sm:$0xff]  }
 0x9a7   :  { %v14621_v27 = vld [vmem:[#allocation5 + $0x1870] ss:$20 sps:$4 sm:$0xff]  }
 0x9a8   :  { %9303 = vmatmul.mubr.bf16.vlgmr.msra.gmra.mrb[56].mxu1 %v15811_v56  ;;  %9426 = vmatmul.mubr.bf16.vlgmr.msra.gmra.mrb[56].mxu0 %v15811_v56 }
 0x9a9   :  { %9312 = vmatpush1.bf16.msra.mxu1 %v14561_v58  ;;  %9435 = vmatpush1.bf16.msra.mxu0 %v14564_v59  ;;  %v14622_v58 = vld [vmem:[#allocation5 + $0x1af0] ss:$20 sps:$4 sm:$0xff]   ;;  %v14623_v59 = vld [vmem:[#allocation5 + $0x19d8] ss:$20 sps:$4 sm:$0xff]  }
 0x9aa   :  { %9313 = vmatprep.subr.bf16.mxu1 %v14569_v54  ;;  %9436 = vmatprep.subr.bf16.mxu0 %v14572_v61  ;;  %v14624_v54 = vld [vmem:[#allocation5 + $0x1c58] ss:$20 sps:$4 sm:$0xff]  }
 0x9ab   :  { %9343 = vmatprep.mubr.bf16.mxu1 %v15169_v32  ;;  %9466 = vmatprep.mubr.bf16.mxu0 %v15169_v32  ;;  %v14625_v61 = vld [vmem:[#allocation5 + $0x1898] ss:$20 sps:$4 sm:$0xff]  }
 0x9ad   :  { %9314 = vmatpush1.bf16.msra.mxu1 %v14567_v1  ;;  %9437 = vmatpush1.bf16.msra.mxu0 %v14570_v62  ;;  %v14626_v1 = vld [vmem:[#allocation5 + $0x1b18] ss:$20 sps:$4 sm:$0xff]   ;;  %v14635_v62 = vld [vmem:[#allocation5 + $0x1d50] ss:$20 sps:$4 sm:$0xff]  }
 0x9ae   :  { %9315 = vmatprep.subr.bf16.mxu1 %v14575_v63  ;;  %9438 = vmatprep.subr.bf16.mxu0 %v14578_v48  ;;  %v14627_v63 = vld [vmem:[#allocation5 + $0x1c80] ss:$20 sps:$4 sm:$0xff]  }
 0x9af   :  { %v14633_v48 = vld [vmem:[#allocation5 + $0x1d4c] ss:$20 sps:$4 sm:$0xff]  }
 0x9b1   :  { %9316 = vmatpush1.bf16.msra.mxu1 %v14573_v55  ;;  %9439 = vmatpush1.bf16.msra.mxu0 %v14576_v0  ;;  %v14641_v55 = vld [vmem:[#allocation5 + $0x1d78] ss:$20 sps:$4 sm:$0xff]   ;;  %v14628_v0 = vld [vmem:[#allocation5 + $0x1ca8] ss:$20 sps:$4 sm:$0xff]  }
 0x9b2   :  { %9317 = vmatprep.subr.bf16.mxu1 %v14581_v57  ;;  %9440 = vmatprep.subr.bf16.mxu0 %v14584_v4  ;;  %v14639_v57 = vld [vmem:[#allocation5 + $0x1d74] ss:$20 sps:$4 sm:$0xff]  }
 0x9b3   :  { %v14647_v4 = vld [vmem:[#allocation5 + $0x1da0] ss:$20 sps:$4 sm:$0xff]  }
 0x9b5   :  { %9318 = vmatpush1.bf16.msra.mxu1 %v14579_v5  ;;  %9441 = vmatpush1.bf16.msra.mxu0 %v14582_v8  ;;  %v14629_v5 = vld [vmem:[#allocation5 + $0x1cd0] ss:$20 sps:$4 sm:$0xff]   ;;  %v14653_v8 = vld [vmem:[#allocation5 + $0x1dc8] ss:$20 sps:$4 sm:$0xff]  }
 0x9b6   :  { %9319 = vmatprep.subr.bf16.mxu1 %v14587_v20  ;;  %9442 = vmatprep.subr.bf16.mxu0 %v14590_v51  ;;  %v14651_v20 = vld [vmem:[#allocation5 + $0x1dc4] ss:$20 sps:$4 sm:$0xff]  }
 0x9b7   :  { %v14659_v51 = vld [vmem:[#allocation5 + $0x1df0] ss:$20 sps:$4 sm:$0xff]  }
 0x9b9   :  { %9320 = vmatpush1.bf16.msra.mxu1 %v14585_v3  ;;  %9443 = vmatpush1.bf16.msra.mxu0 %v14588_v13  ;;  %v14657_v3 = vld [vmem:[#allocation5 + $0x1dec] ss:$20 sps:$4 sm:$0xff]  }
 0x9ba   :  { %12349 = vmatprep.subr.msk.bf16.mxu1 %vm1424_vm0, %v12345_v14  ;;  %12351 = vmatprep.subr.msk.bf16.mxu0 %vm1424_vm0, %v12347_v15  ;;  %v14665_v13 = vld [vmem:[#allocation5 + $0x1e18] ss:$20 sps:$4 sm:$0xff]   ;;  %v9227_v14 = vsel %vm1424_vm0, %v14632_v46, 0  ;;  %v14728_v46 = vld [vmem:[#allocation5 + $0x1fb0] ss:$20 sps:$4 sm:$0xff]  }
 0x9bb   :  { %v14638_v15 = vld [vmem:[#allocation5 + $0x1d58] ss:$20 sps:$4 sm:$0xff]  }
 0x9bd   :  { %9322 = vmatpush1.bf16.msra.mxu1 %v9215_v18  ;;  %9445 = vmatpush1.bf16.msra.mxu0 %v9221_v33  ;;  %v14636_v18 = vld [vmem:[#allocation5 + $0x1d54] ss:$20 sps:$4 sm:$0xff]  }
 0x9be   :  { %12822 = vmatprep.subr.bf16.mxu1 %v14595_v24  ;;  %12844 = vmatprep.subr.bf16.mxu0 %v14596_v60  ;;  %v14644_v33 = vld [vmem:[#allocation5 + $0x1d80] ss:$20 sps:$4 sm:$0xff]   ;;  %v14669_v24 = vld [vmem:[#allocation5 + $0x1e3c] ss:$20 sps:$4 sm:$0xff]  }
 0x9bf   :  { %v14677_v60 = vld [vmem:[#allocation5 + $0x1e68] ss:$20 sps:$4 sm:$0xff]  }
 0x9c0   :  { %12350 = vmatmul.mubr.msk.bf16.vlgmr.msra.gmra.mrb[56].mxu1 %vm1420_vm1, %v15823_v26  ;;  %12352 = vmatmul.mubr.msk.bf16.vlgmr.msra.gmra.mrb[56].mxu0 %vm1420_vm1, %v15823_v26 }
 0x9c1   :  { %12823 = vmatpush3.bf16.msra.mxu1 %v14597_v7  ;;  %9507 = vmatprep.mubr.bf16.mxu1 %v15792_v12  ;;  %v14610_v12 = vld [vmem:[#allocation5 + $0x1a78] ss:$20 sps:$4 sm:$0xff]   ;;  %v14642_v7 = vld [vmem:[#allocation5 + $0x1d7c] ss:$20 sps:$4 sm:$0xff]  }
 0x9c2   :  { %12845 = vmatpush3.bf16.msra.mxu0 %v14598_v31  ;;  %9547 = vmatprep.mubr.bf16.mxu0 %v15798_v17  ;;  %v14612_v17 = vld [vmem:[#allocation5 + $0x1be0] ss:$20 sps:$4 sm:$0xff]   ;;  %v14650_v31 = vld [vmem:[#allocation5 + $0x1da8] ss:$20 sps:$4 sm:$0xff]  }
 0x9c3   :  { %12824 = vmatprep.subr.bf16.mxu1 %v14599_v9  ;;  %12846 = vmatprep.subr.bf16.mxu0 %v14600_v34  ;;  %v14675_v9 = vld [vmem:[#allocation5 + $0x1e64] ss:$20 sps:$4 sm:$0xff]  }
 0x9c4   :  { %v14683_v34 = vld [vmem:[#allocation5 + $0x1e90] ss:$20 sps:$4 sm:$0xff]  }
 0x9c5   :  { %12825 = vmatpush3.bf16.msra.mxu1 %v14601_v22  ;;  %v14648_v22 = vld [vmem:[#allocation5 + $0x1da4] ss:$20 sps:$4 sm:$0xff]  }
 0x9c6   :  { %12847 = vmatpush3.bf16.msra.mxu0 %v14602_v35  ;;  %12826 = vmatprep.subr.bf16.mxu1 %v14603_v25  ;;  %v14656_v35 = vld [vmem:[#allocation5 + $0x1dd0] ss:$20 sps:$4 sm:$0xff]   ;;  %v14681_v25 = vld [vmem:[#allocation5 + $0x1e8c] ss:$20 sps:$4 sm:$0xff]  }
 0x9c7   :  { %12848 = vmatprep.subr.bf16.mxu0 %v14604_v37  ;;  %v14689_v37 = vld [vmem:[#allocation5 + $0x1eb8] ss:$20 sps:$4 sm:$0xff]  }
 0x9c9   :  { %12827 = vmatpush3.bf16.msra.mxu1 %v14605_v10  ;;  %v14662_v10 = vld [vmem:[#allocation5 + $0x1df8] ss:$20 sps:$4 sm:$0xff]  }
 0x9ca   :  { %12849 = vmatpush3.bf16.msra.mxu0 %v14606_v43  ;;  %12828 = vmatprep.subr.bf16.mxu1 %v14607_v38  ;;  %v14687_v43 = vld [vmem:[#allocation5 + $0x1eb4] ss:$20 sps:$4 sm:$0xff]  }
 0x9cb   :  { %12850 = vmatprep.subr.bf16.mxu0 %v14608_v41  ;;  %v14695_v38 = vld [vmem:[#allocation5 + $0x1ee0] ss:$20 sps:$4 sm:$0xff]  }
 0x9cc   :  { %v14660_v41 = vld [vmem:[#allocation5 + $0x1df4] ss:$20 sps:$4 sm:$0xff]  }
 0x9cd   :  { %12829 = vmatpush3.bf16.msra.mxu1 %v14609_v28  ;;  %v14668_v28 = vld [vmem:[#allocation5 + $0x1e20] ss:$20 sps:$4 sm:$0xff]  }
 0x9ce   :  { %12851 = vmatpush3.bf16.msra.mxu0 %v14610_v12  ;;  %12830 = vmatprep.subr.bf16.mxu1 %v14611_v36  ;;  %v14693_v12 = vld [vmem:[#allocation5 + $0x1edc] ss:$20 sps:$4 sm:$0xff]  }
 0x9cf   :  { %12852 = vmatprep.subr.bf16.mxu0 %v14612_v17  ;;  %v14701_v36 = vld [vmem:[#allocation5 + $0x1f08] ss:$20 sps:$4 sm:$0xff]  }
 0x9d0   :  { %v14666_v17 = vld [vmem:[#allocation5 + $0x1e1c] ss:$20 sps:$4 sm:$0xff]  }
 0x9d1   :  { %12831 = vmatpush3.bf16.msra.mxu1 %v14613_v50  ;;  %v14674_v50 = vld [vmem:[#allocation5 + $0x1e48] ss:$20 sps:$4 sm:$0xff]  }
 0x9d2   :  { %12853 = vmatpush3.bf16.msra.mxu0 %v14614_v53  ;;  %12832 = vmatprep.subr.bf16.mxu1 %v14615_v21  ;;  %v14699_v53 = vld [vmem:[#allocation5 + $0x1f04] ss:$20 sps:$4 sm:$0xff]  }
 0x9d3   :  { %12854 = vmatprep.subr.bf16.mxu0 %v14616_v19  ;;  %v14707_v21 = vld [vmem:[#allocation5 + $0x1f30] ss:$20 sps:$4 sm:$0xff]  }
 0x9d4   :  { %v14672_v19 = vld [vmem:[#allocation5 + $0x1e44] ss:$20 sps:$4 sm:$0xff]  }
 0x9d5   :  { %12833 = vmatpush3.bf16.msra.mxu1 %v14617_v45  ;;  %v14680_v45 = vld [vmem:[#allocation5 + $0x1e70] ss:$20 sps:$4 sm:$0xff]  }
 0x9d6   :  { %12855 = vmatpush3.bf16.msra.mxu0 %v14618_v16  ;;  %12834 = vmatprep.subr.bf16.mxu1 %v14619_v52  ;;  %v14705_v16 = vld [vmem:[#allocation5 + $0x1f2c] ss:$20 sps:$4 sm:$0xff]  }
 0x9d7   :  { %12856 = vmatprep.subr.bf16.mxu0 %v14620_v47  ;;  %v14713_v52 = vld [vmem:[#allocation5 + $0x1f58] ss:$20 sps:$4 sm:$0xff]  }
 0x9d8   :  { %v14678_v47 = vld [vmem:[#allocation5 + $0x1e6c] ss:$20 sps:$4 sm:$0xff]  }
 0x9d9   :  { %12835 = vmatpush3.bf16.msra.mxu1 %v14621_v27  ;;  %v14686_v27 = vld [vmem:[#allocation5 + $0x1e98] ss:$20 sps:$4 sm:$0xff]  }
 0x9da   :  { %12857 = vmatpush3.bf16.msra.mxu0 %v14622_v58  ;;  %12836 = vmatprep.subr.bf16.mxu1 %v14623_v59  ;;  %v14711_v58 = vld [vmem:[#allocation5 + $0x1f54] ss:$20 sps:$4 sm:$0xff]  }
 0x9db   :  { %12858 = vmatprep.subr.bf16.mxu0 %v14624_v54  ;;  %v14719_v59 = vld [vmem:[#allocation5 + $0x1f80] ss:$20 sps:$4 sm:$0xff]  }
 0x9dc   :  { %v14684_v54 = vld [vmem:[#allocation5 + $0x1e94] ss:$20 sps:$4 sm:$0xff]  }
 0x9dd   :  { %12837 = vmatpush3.bf16.msra.mxu1 %v14625_v61  ;;  %v14692_v61 = vld [vmem:[#allocation5 + $0x1ec0] ss:$20 sps:$4 sm:$0xff]  }
 0x9de   :  { %12859 = vmatpush3.bf16.msra.mxu0 %v14626_v1  ;;  %13046 = vmatprep.subr.bf16.mxu1 %v15170_v29  ;;  %v14717_v1 = vld [vmem:[#allocation5 + $0x1f7c] ss:$20 sps:$4 sm:$0xff]  }
 0x9df   :  { %10849 = vmatprep.subr.bf16.mxu0 %v14635_v62  ;;  %v14725_v62 = vld [vmem:[#allocation5 + $0x1fa8] ss:$20 sps:$4 sm:$0xff]  }
 0x9e0   :  { %9508 = vmatmul.mubr.bf16.vlgmr.msra.gmra.mrb[60].mxu1 %v15794_v23  ;;  %v14645_v23 = vld [vmem:[#allocation5 + $0x1d9c] ss:$20 sps:$4 sm:$0xff]  }
 0x9e1   :  { %9548 = vmatmul.mubr.bf16.vlgmr.msra.gmra.mrb[60].mxu0 %v15811_v56  ;;  %13047 = vmatpush3.bf16.msra.mxu1 %v14627_v63  ;;  %v14630_v56 = vld [vmem:[#allocation5 + $0x1cf8] ss:$20 sps:$4 sm:$0xff]   ;;  %v14690_v63 = vld [vmem:[#allocation5 + $0x1ebc] ss:$20 sps:$4 sm:$0xff]  }
 0x9e2   :  { %13048 = vmatprep.subr.bf16.mxu1 %v15170_v29  ;;  %13058 = vmatprep.mubr.msk.bf16.mxu1 %vm15171_vm2, %v15170_v29 }
 0x9e3   :  { %10850 = vmatpush1.bf16.msra.mxu0 %v14633_v48  ;;  %v14698_v48 = vld [vmem:[#allocation5 + $0x1ee8] ss:$20 sps:$4 sm:$0xff]  }
 0x9e4   :  { %10851 = vmatprep.subr.bf16.mxu0 %v14641_v55  ;;  %v14723_v55 = vld [vmem:[#allocation5 + $0x1fa4] ss:$20 sps:$4 sm:$0xff]  }
 0x9e5   :  { %13049 = vmatpush3.bf16.msra.mxu1 %v14628_v0  ;;  %v14731_v0 = vld [vmem:[#allocation5 + $0x1fd0] ss:$20 sps:$4 sm:$0xff]  }
 0x9e6   :  { %13050 = vmatprep.subr.bf16.mxu1 %v15170_v29 }
 0x9e7   :  { %10852 = vmatpush1.bf16.msra.mxu0 %v14639_v57  ;;  %v14696_v57 = vld [vmem:[#allocation5 + $0x1ee4] ss:$20 sps:$4 sm:$0xff]  }
 0x9e8   :  { %10853 = vmatprep.subr.bf16.mxu0 %v14647_v4  ;;  %v14704_v4 = vld [vmem:[#allocation5 + $0x1f10] ss:$20 sps:$4 sm:$0xff]  }
 0x9e9   :  { %13051 = vmatpush3.bf16.msra.mxu1 %v14629_v5  ;;  %v14702_v5 = vld [vmem:[#allocation5 + $0x1f0c] ss:$20 sps:$4 sm:$0xff]  }
 0x9ea   :  { %13052 = vmatprep.subr.bf16.mxu1 %v15170_v29 }
 0x9eb   :  { %10854 = vmatpush1.bf16.msra.mxu0 %v14645_v23  ;;  %v14710_v23 = vld [vmem:[#allocation5 + $0x1f38] ss:$20 sps:$4 sm:$0xff]  }
 0x9ec   :  { %10855 = vmatprep.subr.bf16.mxu0 %v14653_v8  ;;  %v14708_v8 = vld [vmem:[#allocation5 + $0x1f34] ss:$20 sps:$4 sm:$0xff]  }
 0x9ed   :  { %13053 = vmatpush3.bf16.msra.mxu1 %v14630_v56  ;;  %v14716_v56 = vld [vmem:[#allocation5 + $0x1f60] ss:$20 sps:$4 sm:$0xff]  }
 0x9ee   :  { %13054 = vmatprep.subr.bf16.mxu1 %v15170_v29 }
 0x9ef   :  { %10856 = vmatpush1.bf16.msra.mxu0 %v14651_v20  ;;  %v14714_v20 = vld [vmem:[#allocation5 + $0x1f5c] ss:$20 sps:$4 sm:$0xff]  }
 0x9f0   :  { %10857 = vmatprep.subr.bf16.mxu0 %v14659_v51  ;;  %v14722_v51 = vld [vmem:[#allocation5 + $0x1f88] ss:$20 sps:$4 sm:$0xff]  }
 0x9f1   :  { %13055 = vmatpush3.bf16.msra.mxu1 %v14631_v11  ;;  %v14720_v11 = vld [vmem:[#allocation5 + $0x1f84] ss:$20 sps:$4 sm:$0xff]  }
 0x9f2   :  { %13056 = vmatprep.subr.bf16.mxu1 %v15170_v29 }
 0x9f3   :  { %10858 = vmatpush1.bf16.msra.mxu0 %v14657_v3  ;;  %v14726_v3 = vld [vmem:[#allocation5 + $0x1fac] ss:$20 sps:$4 sm:$0xff]  }
 0x9f4   :  { %10859 = vmatprep.subr.bf16.mxu0 %v14665_v13  ;;  %v14734_v13 = vld [vmem:[#allocation5 + $0x1fd8] ss:$20 sps:$4 sm:$0xff]  }
 0x9f5   :  { %13057 = vmatpush3.bf16.msra.mxu1 %v9227_v14  ;;  %v8207_v14 = vld [vmem:[#allocation7 + $0x2d] ss:$8 sm:$0xf] }
 0x9f6   :  { %10972 = vmatprep.subr.bf16.mxu1 %v14638_v15  ;;  %v8208_v15 = vld [vmem:[#allocation7 + $0x2d] ss:$8 sm:$0x10] }
 0x9f7   :  { %10860 = vmatpush1.bf16.msra.mxu0 %v14663_v2  ;;  %v15844_v2 = vor.u32 %v8208_v15, %v8207_v14 }
 0x9f8   :  { %13059 = vmatmul.mubr.msk.bf16.vlgmr.msra.gmra.mrb[64].mxu1 %vm1420_vm1, %v15823_v26  ;;  %10861 = vmatprep.subr.bf16.mxu0 %v14671_v6  ;;  %v14654_v26 = vld [vmem:[#allocation5 + $0x1dcc] ss:$20 sps:$4 sm:$0xff]  }
 0x9f9   :  { %10973 = vmatpush1.bf16.msra.mxu1 %v14636_v18  ;;  %v8214_v6 = vrot.slane %v15844_v2, %v15430_v39  ;;  %v8218_v18 = vrot.slane %v15844_v2, %v15433_v42 }
 0x9fa   :  { %10974 = vmatprep.subr.bf16.mxu1 %v14644_v33  ;;  %v8226_v33 = vrot.slane %v15844_v2, %v15436_v44 }
 0x9fb   :  { %10862 = vmatpush1.bf16.msra.mxu0 %v14669_v24 }
 0x9fc   :  { %10863 = vmatprep.subr.bf16.mxu0 %v14677_v60 }
 0x9fd   :  { %10975 = vmatpush1.bf16.msra.mxu1 %v14642_v7 }
 0x9fe   :  { %10976 = vmatprep.subr.bf16.mxu1 %v14650_v31 }
 0x9ff   :  { %10864 = vmatpush1.bf16.msra.mxu0 %v14675_v9 }
 0xa00   :  { %10865 = vmatprep.subr.bf16.mxu0 %v14683_v34 }
 0xa01   :  { %10977 = vmatpush1.bf16.msra.mxu1 %v14648_v22 }
 0xa02   :  { %10978 = vmatprep.subr.bf16.mxu1 %v14656_v35 }
 0xa03   :  { %10866 = vmatpush1.bf16.msra.mxu0 %v14681_v25 }
 0xa04   :  { %10867 = vmatprep.subr.bf16.mxu0 %v14689_v37 }
 0xa05   :  { %10979 = vmatpush1.bf16.msra.mxu1 %v14654_v26 }
 0xa06   :  { %10980 = vmatprep.subr.bf16.mxu1 %v14662_v10 }
 0xa07   :  { %10868 = vmatpush1.bf16.msra.mxu0 %v14687_v43  ;;  %v14729_v43 = vld [vmem:[#allocation5 + $0x1fcc] ss:$20 sps:$4 sm:$0xff]  }
 0xa08   :  { %10869 = vmatprep.subr.bf16.mxu0 %v14695_v38  ;;  %v14732_v38 = vld [vmem:[#allocation5 + $0x1fd4] ss:$20 sps:$4 sm:$0xff]  }
 0xa09   :  { %10981 = vmatpush1.bf16.msra.mxu1 %v14660_v41 }
 0xa0a   :  { %10982 = vmatprep.subr.bf16.mxu1 %v14668_v28  ;;  %v14737_v28 = vld [vmem:[#allocation5 + $0x1ff8] ss:$20 sps:$4 sm:$0xff]  }
 0xa0b   :  { %10870 = vmatpush1.bf16.msra.mxu0 %v14693_v12  ;;  %v14740_v12 = vld [vmem:[#allocation5 + $0x2000] ss:$20 sps:$4 sm:$0xff]  }
 0xa0c   :  { %10871 = vmatprep.subr.bf16.mxu0 %v14701_v36 }
 0xa0d   :  { %10983 = vmatpush1.bf16.msra.mxu1 %v14666_v17  ;;  %v14735_v17 = vld [vmem:[#allocation5 + $0x1ff4] ss:$20 sps:$4 sm:$0xff]  }
 0xa0e   :  { %10984 = vmatprep.subr.bf16.mxu1 %v14674_v50  ;;  %v14738_v50 = vld [vmem:[#allocation5 + $0x1ffc] ss:$20 sps:$4 sm:$0xff]  }
 0xa0f   :  { %10872 = vmatpush1.bf16.msra.mxu0 %v14699_v53  ;;  %v14743_v53 = vld [vmem:[#allocation5 + $0x2020] ss:$20 sps:$4 sm:$0xff]  }
 0xa10   :  { %10873 = vmatprep.subr.bf16.mxu0 %v14707_v21  ;;  %v14746_v21 = vld [vmem:[#allocation5 + $0x2028] ss:$20 sps:$4 sm:$0xff]  }
 0xa11   :  { %10985 = vmatpush1.bf16.msra.mxu1 %v14672_v19  ;;  %v14741_v19 = vld [vmem:[#allocation5 + $0x201c] ss:$20 sps:$4 sm:$0xff]  }
 0xa12   :  { %10986 = vmatprep.subr.bf16.mxu1 %v14680_v45  ;;  %v14744_v45 = vld [vmem:[#allocation5 + $0x2024] ss:$20 sps:$4 sm:$0xff]  }
 0xa13   :  { %10874 = vmatpush1.bf16.msra.mxu0 %v14705_v16  ;;  %v14749_v16 = vld [vmem:[#allocation5 + $0x2048] ss:$20 sps:$4 sm:$0xff]  }
 0xa14   :  { %10875 = vmatprep.subr.bf16.mxu0 %v14713_v52  ;;  %v14752_v52 = vld [vmem:[#allocation5 + $0x2050] ss:$20 sps:$4 sm:$0xff]  }
 0xa15   :  { %10987 = vmatpush1.bf16.msra.mxu1 %v14678_v47  ;;  %v14747_v47 = vld [vmem:[#allocation5 + $0x2044] ss:$20 sps:$4 sm:$0xff]  }
 0xa16   :  { %10988 = vmatprep.subr.bf16.mxu1 %v14686_v27  ;;  %v14750_v27 = vld [vmem:[#allocation5 + $0x204c] ss:$20 sps:$4 sm:$0xff]  }
 0xa17   :  { %10876 = vmatpush1.bf16.msra.mxu0 %v14711_v58  ;;  %v14755_v58 = vld [vmem:[#allocation5 + $0x2070] ss:$20 sps:$4 sm:$0xff]  }
 0xa18   :  { %10877 = vmatprep.subr.bf16.mxu0 %v14719_v59  ;;  %v14758_v59 = vld [vmem:[#allocation5 + $0x2078] ss:$20 sps:$4 sm:$0xff]  }
 0xa19   :  { %10989 = vmatpush1.bf16.msra.mxu1 %v14684_v54  ;;  %v14753_v54 = vld [vmem:[#allocation5 + $0x206c] ss:$20 sps:$4 sm:$0xff]  }
 0xa1a   :  { %10990 = vmatprep.subr.bf16.mxu1 %v14692_v61  ;;  %v14756_v61 = vld [vmem:[#allocation5 + $0x2074] ss:$20 sps:$4 sm:$0xff]  }
 0xa1b   :  { %10878 = vmatpush1.bf16.msra.mxu0 %v14717_v1  ;;  %v14761_v1 = vld [vmem:[#allocation5 + $0x2098] ss:$20 sps:$4 sm:$0xff]  }
 0xa1c   :  { %10879 = vmatprep.subr.bf16.mxu0 %v14725_v62  ;;  %v14764_v62 = vld [vmem:[#allocation5 + $0x20a0] ss:$20 sps:$4 sm:$0xff]  }
 0xa1d   :  { %10991 = vmatpush1.bf16.msra.mxu1 %v14690_v63  ;;  %v14759_v63 = vld [vmem:[#allocation5 + $0x2094] ss:$20 sps:$4 sm:$0xff]  }
 0xa1e   :  { %10992 = vmatprep.subr.bf16.mxu1 %v14698_v48  ;;  %v14762_v48 = vld [vmem:[#allocation5 + $0x209c] ss:$20 sps:$4 sm:$0xff]  }
 0xa1f   :  { %10880 = vmatpush1.bf16.msra.mxu0 %v14723_v55  ;;  %v14767_v55 = vld [vmem:[#allocation5 + $0x20c0] ss:$20 sps:$4 sm:$0xff]  }
 0xa20   :  { %10890 = vmatprep.subr.bf16.mxu0 %v14731_v0  ;;  %v14770_v0 = vld [vmem:[#allocation5 + $0x20c8] ss:$20 sps:$4 sm:$0xff]  }
 0xa21   :  { %10993 = vmatpush1.bf16.msra.mxu1 %v14696_v57  ;;  %v14765_v57 = vld [vmem:[#allocation5 + $0x20bc] ss:$20 sps:$4 sm:$0xff]  }
 0xa22   :  { %10994 = vmatprep.subr.bf16.mxu1 %v14704_v4  ;;  %v14768_v4 = vld [vmem:[#allocation5 + $0x20c4] ss:$20 sps:$4 sm:$0xff]  }
 0xa25   :  { %10995 = vmatpush1.bf16.msra.mxu1 %v14702_v5  ;;  %v14773_v5 = vld [vmem:[#allocation5 + $0x20e8] ss:$20 sps:$4 sm:$0xff]  }
 0xa26   :  { %10996 = vmatprep.subr.bf16.mxu1 %v14710_v23  ;;  %v14776_v23 = vld [vmem:[#allocation5 + $0x20f0] ss:$20 sps:$4 sm:$0xff]  }
 0xa29   :  { %10997 = vmatpush1.bf16.msra.mxu1 %v14708_v8 }
 0xa2a   :  { %10998 = vmatprep.subr.bf16.mxu1 %v14716_v56  ;;  %v8230_v56 = vrot.slane %v15844_v2, %v15477_v40 }
 0xa2d   :  { %10999 = vmatpush1.bf16.msra.mxu1 %v14714_v20  ;;  %v14771_v20 = vld [vmem:[#allocation5 + $0x20e4] ss:$20 sps:$4 sm:$0xff]  }
 0xa2e   :  { %11000 = vmatprep.subr.bf16.mxu1 %v14722_v51  ;;  %v14774_v51 = vld [vmem:[#allocation5 + $0x20ec] ss:$20 sps:$4 sm:$0xff]  }
 0xa31   :  { %11001 = vmatpush1.bf16.msra.mxu1 %v14720_v11 }
 0xa32   :  { %11002 = vmatprep.subr.bf16.mxu1 %v14728_v46 }
 0xa35   :  { %11003 = vmatpush1.bf16.msra.mxu1 %v14726_v3  ;;  %v14779_v3 = vld [vmem:[#allocation5 + $0x2110] ss:$20 sps:$4 sm:$0xff]  }
 0xa36   :  { %11013 = vmatprep.subr.bf16.mxu1 %v14734_v13  ;;  %v14782_v13 = vld [vmem:[#allocation5 + $0x2118] ss:$20 sps:$4 sm:$0xff]  }
 0xa93   :  { %v9345_v24 = vpop.f32.mrb[56].mxu1  ;;  %v15852_v60 = vpop.f32.mrb[56].mxu0 }
 0xa94   :  { %v13094_v7 = vadd.f32 %v9345_v24, %v8214_v6  ;;  %v9347_v31 = vpop.f32.mrb[57].mxu1  ;;  %v9470_v9 = vpop.f32.mrb[57].mxu0 }
 0xa95   :  { %v13095_v34 = vadd.f32 %v9347_v31, %v8218_v18  ;;  %v9349_v22 = vpop.f32.mrb[58].mxu1  ;;  %v9472_v35 = vpop.f32.mrb[58].mxu0  ;;  %v13097_v25 = vadd.f32 %v9470_v9, %v8226_v33  ;;  %v14777_v9 = vld [vmem:[#allocation5 + $0x210c] ss:$20 sps:$4 sm:$0xff]  }
 0xa96   :  { %v9350_v37 = vpop.f32.mrb[59].mxu1  ;;  %v9473_v26 = vpop.f32.mrb[59].mxu0  ;;  %v15856_v41 = vpack.c.bf16 %v13094_v7, %v13094_v7  ;;  %v14785_v22 = vld [vmem:[#allocation5 + $0x2138] ss:$20 sps:$4 sm:$0xff]   ;;  %v14788_v35 = vld [vmem:[#allocation5 + $0x2140] ss:$20 sps:$4 sm:$0xff]  }
 0xa97   :  { %v15854_v10 = vpack.c.bf16 %v13095_v34, %v13095_v34  ;;  %v15860_v36 = vpack.c.bf16 %v13097_v25, %v13097_v25  ;;  %v14780_v34 = vld [vmem:[#allocation5 + $0x2114] ss:$20 sps:$4 sm:$0xff]   ;;  %v14786_v26 = vld [vmem:[#allocation5 + $0x213c] ss:$20 sps:$4 sm:$0xff]  }
 0xa98   :  { %v14783_v37 = vld [vmem:[#allocation5 + $0x2134] ss:$20 sps:$4 sm:$0xff]  }
 0xa99   :  { %10881 = vmatprep.mubr.bf16.mxu0 %v15854_v10  ;;  %11004 = vmatprep.mubr.bf16.mxu1 %v15854_v10 }
 0xa9a   :  { %10882 = vmatmul.mubr.bf16.vlgmr.msra.gmra.mrb[64].mxu0 %v15856_v41  ;;  %11005 = vmatmul.mubr.bf16.vlgmr.msra.gmra.mrb[68].mxu1 %v15856_v41 }
 0xa9b   :  { %10891 = vmatpush1.bf16.msra.mxu0 %v14729_v43  ;;  %11014 = vmatpush1.bf16.msra.mxu1 %v14732_v38  ;;  %v14791_v43 = vld [vmem:[#allocation5 + $0x2160] ss:$20 sps:$4 sm:$0xff]   ;;  %v14794_v38 = vld [vmem:[#allocation5 + $0x2168] ss:$20 sps:$4 sm:$0xff]  }
 0xa9c   :  { %10922 = vmatprep.mubr.bf16.mxu0 %v15860_v36  ;;  %11045 = vmatprep.mubr.bf16.mxu1 %v15860_v36 }
 0xa9d   :  { %10892 = vmatprep.subr.bf16.mxu0 %v14737_v28  ;;  %11015 = vmatprep.subr.bf16.mxu1 %v14740_v12  ;;  %v14789_v28 = vld [vmem:[#allocation5 + $0x215c] ss:$20 sps:$4 sm:$0xff]   ;;  %v14792_v12 = vld [vmem:[#allocation5 + $0x2164] ss:$20 sps:$4 sm:$0xff]  }
 0xa9f   :  { %10893 = vmatpush1.bf16.msra.mxu0 %v14735_v17  ;;  %11016 = vmatpush1.bf16.msra.mxu1 %v14738_v50  ;;  %v14797_v17 = vld [vmem:[#allocation5 + $0x2188] ss:$20 sps:$4 sm:$0xff]   ;;  %v14800_v50 = vld [vmem:[#allocation5 + $0x2190] ss:$20 sps:$4 sm:$0xff]  }
 0xaa0   :  { %10894 = vmatprep.subr.bf16.mxu0 %v14743_v53  ;;  %11017 = vmatprep.subr.bf16.mxu1 %v14746_v21  ;;  %v14795_v53 = vld [vmem:[#allocation5 + $0x2184] ss:$20 sps:$4 sm:$0xff]   ;;  %v14798_v21 = vld [vmem:[#allocation5 + $0x218c] ss:$20 sps:$4 sm:$0xff]  }
 0xaa3   :  { %10895 = vmatpush1.bf16.msra.mxu0 %v14741_v19  ;;  %11018 = vmatpush1.bf16.msra.mxu1 %v14744_v45  ;;  %v14803_v19 = vld [vmem:[#allocation5 + $0x21b0] ss:$20 sps:$4 sm:$0xff]   ;;  %v14806_v45 = vld [vmem:[#allocation5 + $0x21b8] ss:$20 sps:$4 sm:$0xff]  }
 0xaa4   :  { %10896 = vmatprep.subr.bf16.mxu0 %v14749_v16  ;;  %11019 = vmatprep.subr.bf16.mxu1 %v14752_v52  ;;  %v14801_v16 = vld [vmem:[#allocation5 + $0x21ac] ss:$20 sps:$4 sm:$0xff]   ;;  %v14804_v52 = vld [vmem:[#allocation5 + $0x21b4] ss:$20 sps:$4 sm:$0xff]  }
 0xaa7   :  { %10897 = vmatpush1.bf16.msra.mxu0 %v14747_v47  ;;  %11020 = vmatpush1.bf16.msra.mxu1 %v14750_v27  ;;  %v14809_v47 = vld [vmem:[#allocation5 + $0x21d8] ss:$20 sps:$4 sm:$0xff]   ;;  %v14812_v27 = vld [vmem:[#allocation5 + $0x21e0] ss:$20 sps:$4 sm:$0xff]  }
 0xaa8   :  { %10898 = vmatprep.subr.bf16.mxu0 %v14755_v58  ;;  %11021 = vmatprep.subr.bf16.mxu1 %v14758_v59  ;;  %v14807_v59 = vld [vmem:[#allocation5 + $0x21d4] ss:$20 sps:$4 sm:$0xff]  }
 0xaab   :  { %10899 = vmatpush1.bf16.msra.mxu0 %v14753_v54  ;;  %11022 = vmatpush1.bf16.msra.mxu1 %v14756_v61  ;;  %v14810_v54 = vld [vmem:[#allocation5 + $0x21dc] ss:$20 sps:$4 sm:$0xff]  }
 0xaac   :  { %10900 = vmatprep.subr.bf16.mxu0 %v14761_v1  ;;  %11023 = vmatprep.subr.bf16.mxu1 %v14764_v62  ;;  %v14815_v62 = vld [vmem:[#allocation5 + $0x2200] ss:$20 sps:$4 sm:$0xff]  }
 0xaaf   :  { %10901 = vmatpush1.bf16.msra.mxu0 %v14759_v63  ;;  %11024 = vmatpush1.bf16.msra.mxu1 %v14762_v48  ;;  %v14818_v63 = vld [vmem:[#allocation5 + $0x2208] ss:$20 sps:$4 sm:$0xff]  }
 0xab0   :  { %10902 = vmatprep.subr.bf16.mxu0 %v14767_v55  ;;  %11025 = vmatprep.subr.bf16.mxu1 %v14770_v0  ;;  %v14813_v0 = vld [vmem:[#allocation5 + $0x21fc] ss:$20 sps:$4 sm:$0xff]  }
 0xab3   :  { %10903 = vmatpush1.bf16.msra.mxu0 %v14765_v57  ;;  %11026 = vmatpush1.bf16.msra.mxu1 %v14768_v4  ;;  %v12838_v8 = vpop.f32.mrb[60].mxu1  ;;  %v14816_v57 = vld [vmem:[#allocation5 + $0x2204] ss:$20 sps:$4 sm:$0xff]   ;;  %v8222_v4 = vrot.slane %v15844_v2, %v15482_v30 }
 0xab4   :  { %v12860_v11 = vpop.f32.mrb[60].mxu0  ;;  %v12839_v46 = vpop.f32.mrb[61].mxu1  ;;  %10904 = vmatprep.subr.bf16.mxu0 %v14773_v5  ;;  %11027 = vmatprep.subr.bf16.mxu1 %v14776_v23  ;;  %v14821_v5 = vld [vmem:[#allocation5 + $0x2228] ss:$20 sps:$4 sm:$0xff]   ;;  %v14824_v23 = vld [vmem:[#allocation5 + $0x2230] ss:$20 sps:$4 sm:$0xff]  }
 0xab5   :  { %v12840_v14 = vadd.f32 %v12839_v46, %v12838_v8  ;;  %v12861_v15 = vpop.f32.mrb[61].mxu0  ;;  %v12841_v6 = vpop.f32.mrb[62].mxu1  ;;  %v14819_v8 = vld [vmem:[#allocation5 + $0x2224] ss:$20 sps:$4 sm:$0xff]   ;;  %v14825_v46 = vld [vmem:[#allocation5 + $0x224c] ss:$20 sps:$4 sm:$0xff]  }
 0xab6   :  { %v12862_v18 = vadd.f32 %v12861_v15, %v12860_v11  ;;  %v12863_v33 = vpop.f32.mrb[62].mxu0  ;;  %v12842_v24 = vpop.f32.mrb[63].mxu1  ;;  %v14830_v11 = vld [vmem:[#allocation5 + $0x2258] ss:$20 sps:$4 sm:$0xff]   ;;  %v14834_v15 = vld [vmem:[#allocation5 + $0x227c] ss:$20 sps:$4 sm:$0xff]  }
 0xab7   :  { %v9510_v7 = vadd.f32 %v12840_v14, %v8230_v56  ;;  %v12864_v31 = vpop.f32.mrb[63].mxu0  ;;  %10905 = vmatpush1.bf16.msra.mxu0 %v14771_v20  ;;  %11028 = vmatpush1.bf16.msra.mxu1 %v14774_v51  ;;  %v14822_v56 = vld [vmem:[#allocation5 + $0x222c] ss:$20 sps:$4 sm:$0xff]   ;;  %v13096_v20 = vadd.f32 %v15852_v60, %v8222_v4  ;;  %v14827_v51 = vld [vmem:[#allocation5 + $0x2250] ss:$20 sps:$4 sm:$0xff]  }
 0xab8   :  { %10906 = vmatprep.subr.bf16.mxu0 %v14779_v3  ;;  %11029 = vmatprep.subr.bf16.mxu1 %v14782_v13  ;;  %v14828_v3 = vld [vmem:[#allocation5 + $0x2254] ss:$20 sps:$4 sm:$0xff]   ;;  %v14833_v2 = vld [vmem:[#allocation5 + $0x2278] ss:$20 sps:$4 sm:$0xff]   ;;  %v14837_v33 = vld [vmem:[#allocation5 + $0x229c] ss:$20 sps:$4 sm:$0xff]  }
 0xab9   :  { %v9550_v25 = vadd.f32 %v12862_v18, %v9510_v7  ;;  %v15873_v13 = vpack.c.bf16 %v13096_v20, %v13096_v20  ;;  %v14836_v14 = vld [vmem:[#allocation5 + $0x2280] ss:$20 sps:$4 sm:$0xff]   ;;  %v14842_v18 = vld [vmem:[#allocation5 + $0x22a8] ss:$20 sps:$4 sm:$0xff]   ;;  %v14840_v24 = vld [vmem:[#allocation5 + $0x22a4] ss:$20 sps:$4 sm:$0xff]  }
 0xaba   :  { %v14831_v60 = vld [vmem:[#allocation5 + $0x2274] ss:$20 sps:$4 sm:$0xff]   ;;  %v14848_v31 = vld [vmem:[#allocation5 + $0x22d0] ss:$20 sps:$4 sm:$0xff]   ;;  %v14884_v20 = vld [vmem:[#allocation5 + $0x220c] ss:$20 sps:$4 sm:$0xff]  }
 0xabb   :  { %10907 = vmatpush1.bf16.msra.mxu0 %v14777_v9  ;;  %11030 = vmatpush1.bf16.msra.mxu1 %v14780_v34  ;;  %v14839_v6 = vld [vmem:[#allocation5 + $0x22a0] ss:$20 sps:$4 sm:$0xff]   ;;  %v14845_v7 = vld [vmem:[#allocation5 + $0x22c8] ss:$20 sps:$4 sm:$0xff]   ;;  %v14843_v9 = vld [vmem:[#allocation5 + $0x22c4] ss:$20 sps:$4 sm:$0xff]  }
 0xabc   :  { %10908 = vmatprep.subr.bf16.mxu0 %v14785_v22  ;;  %11031 = vmatprep.subr.bf16.mxu1 %v14788_v35  ;;  %v14846_v34 = vld [vmem:[#allocation5 + $0x22cc] ss:$20 sps:$4 sm:$0xff]   ;;  %v14851_v22 = vld [vmem:[#allocation5 + $0x22f0] ss:$20 sps:$4 sm:$0xff]  }
 0xabd   :  { %v14854_v35 = vld [vmem:[#allocation5 + $0x22f8] ss:$20 sps:$4 sm:$0xff]  }
 0xabe   :  { %v14879_v4 = vld [vmem:[#allocation5 + $0x1f64] ss:$20 sps:$4 sm:$0xff]  }
 0xabf   :  { %10909 = vmatpush1.bf16.msra.mxu0 %v14783_v37  ;;  %11032 = vmatpush1.bf16.msra.mxu1 %v14786_v26  ;;  %v9819_v37 = vld [vmem:[#allocation5 + $0x231c] sm:$0xff]  ;;  %v14852_v26 = vld [vmem:[#allocation5 + $0x22f4] ss:$20 sps:$4 sm:$0xff]  }
 0xac0   :  { %10910 = vmatprep.subr.bf16.mxu0 %v14791_v43  ;;  %11033 = vmatprep.subr.bf16.mxu1 %v14794_v38  ;;  %v12542_v38 = vcombine.high %v9819_v37, %v9819_v37 }
 0xac3   :  { %10911 = vmatpush1.bf16.msra.mxu0 %v14789_v28  ;;  %11034 = vmatpush1.bf16.msra.mxu1 %v14792_v12  ;;  %v12541_v12 = vcombine.low %v9819_v37, %v9819_v37 }
 0xac4   :  { %10912 = vmatprep.subr.bf16.mxu0 %v14797_v17  ;;  %11035 = vmatprep.subr.bf16.mxu1 %v14800_v50 }
 0xac5   :  { %v10841_v50 = vsel %vm1424_vm0, %v12541_v12, 0 }
 0xac7   :  { %10913 = vmatpush1.bf16.msra.mxu0 %v14795_v53  ;;  %11036 = vmatpush1.bf16.msra.mxu1 %v14798_v21  ;;  %v14859_v53 = vld [vmem:[#allocation5 + $0x1e9c] ss:$20 sps:$4 sm:$0xff]  }
 0xac8   :  { %10914 = vmatprep.subr.bf16.mxu0 %v14803_v19  ;;  %11037 = vmatprep.subr.bf16.mxu1 %v14806_v45  ;;  %v14860_v21 = vld [vmem:[#allocation5 + $0x211c] ss:$20 sps:$4 sm:$0xff]  }
 0xac9   :  { %v14861_v19 = vld [vmem:[#allocation5 + $0x1d5c] ss:$20 sps:$4 sm:$0xff]  }
 0xacb   :  { %10915 = vmatpush1.bf16.msra.mxu0 %v14801_v16  ;;  %11038 = vmatpush1.bf16.msra.mxu1 %v14804_v52  ;;  %v9589_v58 = vpop.f32.mrb[64].mxu1  ;;  %v14862_v16 = vld [vmem:[#allocation5 + $0x1fdc] ss:$20 sps:$4 sm:$0xff]   ;;  %v14863_v52 = vld [vmem:[#allocation5 + $0x1ec4] ss:$20 sps:$4 sm:$0xff]  }
 0xacc   :  { %v15868_v61 = vadd.f32 %v9589_v58, %v9550_v25  ;;  %v13060_v1 = vpop.f32.mrb[65].mxu1  ;;  %10916 = vmatprep.subr.bf16.mxu0 %v14809_v47  ;;  %11039 = vmatprep.subr.bf16.mxu1 %v14812_v27  ;;  %v9818_v25 = vld [vmem:[#allocation5 + $0x2314] sm:$0xff] }
 0xacd   :  { %v9592_v48 = vpop.f32.mrb[66].mxu1  ;;  %v12540_v43 = vcombine.high %v9818_v25, %v9818_v25  ;;  %v12539_v28 = vcombine.low %v9818_v25, %v9818_v25  ;;  %v14864_v47 = vld [vmem:[#allocation5 + $0x2144] ss:$20 sps:$4 sm:$0xff]   ;;  %v14870_v1 = vld [vmem:[#allocation5 + $0x202c] ss:$20 sps:$4 sm:$0xff]  }
 0xace   :  { %v13061_v55 = vpop.f32.mrb[67].mxu1  ;;  %v15885_v45 = vpack.c.bf16 %v15868_v61, %v15868_v61  ;;  %v14865_v27 = vld [vmem:[#allocation5 + $0x1d84] ss:$20 sps:$4 sm:$0xff]   ;;  %v14869_v61 = vld [vmem:[#allocation5 + $0x1dac] ss:$20 sps:$4 sm:$0xff]  }
 0xacf   :  { %10917 = vmatpush1.bf16.msra.mxu0 %v14807_v59  ;;  %11040 = vmatpush1.bf16.msra.mxu1 %v14810_v54  ;;  %v10835_v17 = vsel %vm1424_vm0, %v12539_v28, 0  ;;  %v14866_v58 = vld [vmem:[#allocation5 + $0x2004] ss:$20 sps:$4 sm:$0xff]   ;;  %v14867_v59 = vld [vmem:[#allocation5 + $0x1eec] ss:$20 sps:$4 sm:$0xff]  }
 0xad0   :  { %10918 = vmatprep.subr.bf16.mxu0 %v14815_v62  ;;  %11041 = vmatprep.subr.bf16.mxu1 %v14818_v63  ;;  %v14868_v54 = vld [vmem:[#allocation5 + $0x216c] ss:$20 sps:$4 sm:$0xff]   ;;  %v14871_v62 = vld [vmem:[#allocation5 + $0x1f14] ss:$20 sps:$4 sm:$0xff]   ;;  %v14875_v55 = vld [vmem:[#allocation5 + $0x1f3c] ss:$20 sps:$4 sm:$0xff]  }
 0xad1   :  { %v14872_v63 = vld [vmem:[#allocation5 + $0x2194] ss:$20 sps:$4 sm:$0xff]  }
 0xad2   :  { %v14873_v48 = vld [vmem:[#allocation5 + $0x1dd4] ss:$20 sps:$4 sm:$0xff]  }
 0xad3   :  { %10919 = vmatpush1.bf16.msra.mxu0 %v14813_v0  ;;  %11042 = vmatpush1.bf16.msra.mxu1 %v14816_v57  ;;  %v14877_v0 = vld [vmem:[#allocation5 + $0x1dfc] ss:$20 sps:$4 sm:$0xff]  }
 0xad4   :  { %10920 = vmatprep.subr.bf16.mxu0 %v14821_v5  ;;  %11043 = vmatprep.subr.bf16.mxu1 %v14824_v23  ;;  %v14878_v57 = vld [vmem:[#allocation5 + $0x207c] ss:$20 sps:$4 sm:$0xff]   ;;  %v14880_v5 = vld [vmem:[#allocation5 + $0x21e4] ss:$20 sps:$4 sm:$0xff]  }
 0xad5   :  { %v14881_v23 = vld [vmem:[#allocation5 + $0x1e24] ss:$20 sps:$4 sm:$0xff]  }
 0xad7   :  { %10921 = vmatpush1.bf16.msra.mxu0 %v14819_v8  ;;  %11044 = vmatpush1.bf16.msra.mxu1 %v14822_v56  ;;  %v14882_v8 = vld [vmem:[#allocation5 + $0x20a4] ss:$20 sps:$4 sm:$0xff]   ;;  %v14883_v56 = vld [vmem:[#allocation5 + $0x1f8c] ss:$20 sps:$4 sm:$0xff]  }
 0xad8   :  { %10931 = vmatprep.subr.bf16.mxu0 %v14827_v51  ;;  %11054 = vmatprep.subr.bf16.mxu1 %v14830_v11  ;;  %v14885_v51 = vld [vmem:[#allocation5 + $0x1e4c] ss:$20 sps:$4 sm:$0xff]  }
 0xad9   :  { %v14886_v11 = vld [vmem:[#allocation5 + $0x20cc] ss:$20 sps:$4 sm:$0xff]  }
 0xada   :  { %10923 = vmatmul.mubr.bf16.vlgmr.msra.gmra.mrb[64].mxu0 %v15873_v13  ;;  %11046 = vmatmul.mubr.bf16.vlgmr.msra.gmra.mrb[68].mxu1 %v15873_v13 }
 0xadb   :  { %10932 = vmatpush1.bf16.msra.mxu0 %v14825_v46  ;;  %11055 = vmatpush1.bf16.msra.mxu1 %v14828_v3  ;;  %v14887_v46 = vld [vmem:[#allocation5 + $0x1fb4] ss:$20 sps:$4 sm:$0xff]  }
 0xadc   :  { %10933 = vmatprep.subr.bf16.mxu0 %v14833_v2  ;;  %11056 = vmatprep.subr.bf16.mxu1 %v14836_v14  ;;  %v14888_v3 = vld [vmem:[#allocation5 + $0x2234] ss:$20 sps:$4 sm:$0xff]  }
 0xadd   :  { %10963 = vmatprep.mubr.bf16.mxu0 %v15169_v32  ;;  %11086 = vmatprep.mubr.bf16.mxu1 %v15169_v32  ;;  %v14849_v32 = vld [vmem:[#allocation5 + $0x22ec] ss:$20 sps:$4 sm:$0xff]   ;;  %v14889_v2 = vld [vmem:[#allocation5 + $0x1e74] ss:$20 sps:$4 sm:$0xff]  }
 0xade   :  { %v14890_v14 = vld [vmem:[#allocation5 + $0x20f4] ss:$20 sps:$4 sm:$0xff]  }
 0xadf   :  { %10934 = vmatpush1.bf16.msra.mxu0 %v14831_v60  ;;  %11057 = vmatpush1.bf16.msra.mxu1 %v14834_v15  ;;  %v14891_v60 = vld [vmem:[#allocation5 + $0x225c] ss:$20 sps:$4 sm:$0xff]   ;;  %v14892_v15 = vld [vmem:[#allocation5 + $0x2284] ss:$20 sps:$4 sm:$0xff]  }
 0xae0   :  { %10935 = vmatprep.subr.bf16.mxu0 %v14839_v6  ;;  %11058 = vmatprep.subr.bf16.mxu1 %v14842_v18  ;;  %v14893_v6 = vld [vmem:[#allocation5 + $0x22ac] ss:$20 sps:$4 sm:$0xff]   ;;  %v14894_v18 = vld [vmem:[#allocation5 + $0x22d4] ss:$20 sps:$4 sm:$0xff]  }
 0xae3   :  { %10936 = vmatpush1.bf16.msra.mxu0 %v14837_v33  ;;  %11059 = vmatpush1.bf16.msra.mxu1 %v14840_v24  ;;  %v14895_v33 = vld [vmem:[#allocation5 + $0x22fc] ss:$20 sps:$4 sm:$0xff]  }
 0xae4   :  { %10937 = vmatprep.subr.bf16.mxu0 %v14845_v7  ;;  %11060 = vmatprep.subr.bf16.mxu1 %v14848_v31 }
 0xae7   :  { %10938 = vmatpush1.bf16.msra.mxu0 %v14843_v9  ;;  %11061 = vmatpush1.bf16.msra.mxu1 %v14846_v34 }
 0xae8   :  { %10939 = vmatprep.subr.bf16.mxu0 %v14851_v22  ;;  %11062 = vmatprep.subr.bf16.mxu1 %v14854_v35 }
 0xaeb   :  { %10940 = vmatpush1.bf16.msra.mxu0 %v14849_v32  ;;  %11063 = vmatpush1.bf16.msra.mxu1 %v14852_v26 }
 0xaec   :  { %12544 = vmatprep.subr.msk.bf16.mxu0 %vm1424_vm0, %v12540_v43  ;;  %12546 = vmatprep.subr.msk.bf16.mxu1 %vm1424_vm0, %v12542_v38 }
 0xaef   :  { %10942 = vmatpush1.bf16.msra.mxu0 %v10835_v17  ;;  %11065 = vmatpush1.bf16.msra.mxu1 %v10841_v50 }
 0xaf0   :  { %12873 = vmatprep.subr.bf16.mxu0 %v14859_v53  ;;  %12895 = vmatprep.subr.bf16.mxu1 %v14860_v21 }
 0xaf2   :  { %12545 = vmatmul.mubr.msk.bf16.vlgmr.msra.gmra.mrb[64].mxu0 %vm1420_vm1, %v15885_v45  ;;  %12547 = vmatmul.mubr.msk.bf16.vlgmr.msra.gmra.mrb[68].mxu1 %vm1420_vm1, %v15885_v45 }
 0xaf3   :  { %12874 = vmatpush3.bf16.msra.mxu0 %v14861_v19  ;;  %11127 = vmatprep.mubr.bf16.mxu0 %v15854_v10  ;;  %v14874_v10 = vld [vmem:[#allocation5 + $0x2054] ss:$20 sps:$4 sm:$0xff]  }
 0xaf4   :  { %12896 = vmatpush3.bf16.msra.mxu1 %v14862_v16  ;;  %11167 = vmatprep.mubr.bf16.mxu1 %v15860_v36  ;;  %v14876_v36 = vld [vmem:[#allocation5 + $0x21bc] ss:$20 sps:$4 sm:$0xff]  }
 0xaf5   :  { %12875 = vmatprep.subr.bf16.mxu0 %v14863_v52  ;;  %12897 = vmatprep.subr.bf16.mxu1 %v14864_v47 }
 0xaf7   :  { %12876 = vmatpush3.bf16.msra.mxu0 %v14865_v27 }
 0xaf8   :  { %12898 = vmatpush3.bf16.msra.mxu1 %v14866_v58  ;;  %12877 = vmatprep.subr.bf16.mxu0 %v14867_v59 }
 0xaf9   :  { %12899 = vmatprep.subr.bf16.mxu1 %v14868_v54 }
 0xafb   :  { %12878 = vmatpush3.bf16.msra.mxu0 %v14869_v61 }
 0xafc   :  { %12900 = vmatpush3.bf16.msra.mxu1 %v14870_v1  ;;  %12879 = vmatprep.subr.bf16.mxu0 %v14871_v62 }
 0xafd   :  { %12901 = vmatprep.subr.bf16.mxu1 %v14872_v63 }
 0xaff   :  { %12880 = vmatpush3.bf16.msra.mxu0 %v14873_v48 }
 0xb00   :  { %12902 = vmatpush3.bf16.msra.mxu1 %v14874_v10  ;;  %12881 = vmatprep.subr.bf16.mxu0 %v14875_v55 }
 0xb01   :  { %12903 = vmatprep.subr.bf16.mxu1 %v14876_v36 }
 0xb03   :  { %12882 = vmatpush3.bf16.msra.mxu0 %v14877_v0 }
 0xb04   :  { %12904 = vmatpush3.bf16.msra.mxu1 %v14878_v57  ;;  %12883 = vmatprep.subr.bf16.mxu0 %v14879_v4 }
 0xb05   :  { %12905 = vmatprep.subr.bf16.mxu1 %v14880_v5 }
 0xb07   :  { %12884 = vmatpush3.bf16.msra.mxu0 %v14881_v23 }
 0xb08   :  { %12906 = vmatpush3.bf16.msra.mxu1 %v14882_v8  ;;  %12885 = vmatprep.subr.bf16.mxu0 %v14883_v56 }
 0xb09   :  { %12907 = vmatprep.subr.bf16.mxu1 %v14884_v20 }
 0xb0b   :  { %12886 = vmatpush3.bf16.msra.mxu0 %v14885_v51 }
 0xb0c   :  { %12908 = vmatpush3.bf16.msra.mxu1 %v14886_v11  ;;  %12887 = vmatprep.subr.bf16.mxu0 %v14887_v46 }
 0xb0d   :  { %12909 = vmatprep.subr.bf16.mxu1 %v14888_v3 }
 0xb0f   :  { %12888 = vmatpush3.bf16.msra.mxu0 %v14889_v2 }
 0xb10   :  { %12910 = vmatpush3.bf16.msra.mxu1 %v14890_v14  ;;  %13062 = vmatprep.subr.bf16.mxu0 %v15170_v29 }
 0xb12   :  { %11128 = vmatmul.mubr.bf16.vlgmr.msra.gmra.mrb[68].mxu0 %v15856_v41  ;;  %v14896_v41 = vld [vmem:[#allocation5 + $0x2324] ss:$0 sps:$4 sm:$0xff]  }
 0xb13   :  { %11168 = vmatmul.mubr.bf16.vlgmr.msra.gmra.mrb[72].mxu1 %v15873_v13  ;;  %13063 = vmatpush3.bf16.msra.mxu0 %v14891_v60  ;;  %v10847_v13 = vsel %vm1424_vm0, %v14896_v41, 0 }
 0xb14   :  { %13064 = vmatprep.subr.bf16.mxu0 %v15170_v29  ;;  %13074 = vmatprep.mubr.msk.bf16.mxu0 %vm15171_vm2, %v15170_v29 }
 0xb17   :  { %13065 = vmatpush3.bf16.msra.mxu0 %v14892_v15 }
 0xb18   :  { %13066 = vmatprep.subr.bf16.mxu0 %v15170_v29 }
 0xb1b   :  { %13067 = vmatpush3.bf16.msra.mxu0 %v14893_v6 }
 0xb1c   :  { %13068 = vmatprep.subr.bf16.mxu0 %v15170_v29 }
 0xb1f   :  { %13069 = vmatpush3.bf16.msra.mxu0 %v14894_v18 }
 0xb20   :  { %13070 = vmatprep.subr.bf16.mxu0 %v15170_v29 }
 0xb23   :  { %13071 = vmatpush3.bf16.msra.mxu0 %v14895_v33 }
 0xb24   :  { %13072 = vmatprep.subr.bf16.mxu0 %v15170_v29 }
 0xb27   :  { %13073 = vmatpush3.bf16.msra.mxu0 %v10847_v13 }
 0xb2a   :  { %13075 = vmatmul.mubr.msk.bf16.vlgmr.msra.gmra.mrb[72].mxu0 %vm1420_vm1, %v15885_v45 }
 0xb2b   :  { %15106 = shalt.err (!%p15103_p6)
}
 0xb2c   :  { %s15107_s13 = scalar_lea.hbm %s15948_s10, 32 }
 0xb2d   :  { %p15108_p7 = scmp.ne.s32.totalorder %s15948_s10, %s15107_s13  ;;  %p15111_p8 = scmp.lt.u32.totalorder %s15107_s13, %s15948_s10 }
 0xb2f   :  { %p15113_p9 = pnand %p15111_p8, %p15108_p7 }
 0xb31   :  { %15116 = shalt.err (!%p15113_p9)
}
 0xb32   :  { %11268 = dma.vmem_to_hbm [thread:$0]  %s11266_s14, 32, %s15948_s10, [#allocation19]   ;;  %v9827_v29 = vld [vmem:[#allocation7 + $0x2e] ss:$8 sm:$0xf]  ;;  %vm11247_vm7 = vcmask 713728  }
 0xb33   :  { %v9828_v24 = vld [vmem:[#allocation7 + $0x2e] ss:$8 sm:$0x10]  ;;  %s15173_s10 = smov [#allocation17]  }
 0xb34   :  { %v9829_v7 = vor.u32 %v9828_v24, %v9827_v29  ;;  %s11255_s21 = sshll.u32 %s15173_s10, 4  ;;  %s11256_s21 = int_to_ptr.vmem [resolvable:$true] %s11255_s21 }
 0xb35   :  { %s15117_s0 = scalar_lea.vmem %s11256_s21, 160  ;;  %p15122_p11 = scmp.lt.s32.totalorder %s11256_s21, %s11256_s21 }
 0xb36   :  { %v9834_v31 = vrot.slane %v9829_v7, %v15430_v39  ;;  %v9842_v9 = vrot.slane %v9829_v7, %v15482_v30  ;;  %v9838_v34 = vrot.slane %v9829_v7, %v15433_v42  ;;  %v9846_v22 = vrot.slane %v9829_v7, %v15436_v44  ;;  %p15118_p10 = scmp.ne.s32.totalorder %s11256_s21, %s15117_s0  ;;  %p15123_p12 = scmp.lt.s32.totalorder %s15117_s0, %s15117_s0 }
 0xb37   :  { %v9850_v45 = vrot.slane %v9829_v7, %v15477_v40 }
 0xb38   :  { %p15124_p13 = por %p15123_p12, %p15122_p11 }
 0xb3a   :  { %p15125_p0 = pnand %p15124_p13, %p15118_p10 }
 0xbc5   :  { %v10965_v35 = vpop.f32.mrb[64].mxu0  ;;  %v11088_v25 = vpop.f32.mrb[68].mxu1 }
 0xbc6   :  { %v13098_v37 = vadd.f32 %v10965_v35, %v9834_v31  ;;  %v13100_v32 = vadd.f32 %v11088_v25, %v9842_v9  ;;  %v10967_v26 = vpop.f32.mrb[65].mxu0  ;;  %v11090_v43 = vpop.f32.mrb[69].mxu1 }
 0xbc7   :  { %v13099_v38 = vadd.f32 %v10967_v26, %v9838_v34  ;;  %v13101_v28 = vadd.f32 %v11090_v43, %v9846_v22  ;;  %v10969_v12 = vpop.f32.mrb[66].mxu0  ;;  %v11092_v17 = vpop.f32.mrb[70].mxu1 }
 0xbc8   :  { %v10970_v50 = vpop.f32.mrb[67].mxu0  ;;  %v11093_v53 = vpop.f32.mrb[71].mxu1 }
 0xbc9   :  { %v11220_v21 = vcombine.low %v13098_v37, %v13099_v38  ;;  %v11221_v39 = vcombine.low %v13100_v32, %v13101_v28 }
 0xbcb   :  { %v11228_v30 = vrot.slane %v11220_v21, %v15376_v49  ;;  %v11235_v42 = vrot.slane %v11221_v39, %v15376_v49 }
 0xbcd   :  { %v11236_v19 = vcombine.low %v11228_v30, %v11235_v42 }
 0xbcf   :  { %11246 = vst [vmem:[#allocation17] sm:$0xff] %v11236_v19 }
 0xbe5   :  { %v12889_v44 = vpop.f32.mrb[68].mxu0 }
 0xbe6   :  { %v12911_v16 = vpop.f32.mrb[72].mxu1  ;;  %v12890_v52 = vpop.f32.mrb[69].mxu0 }
 0xbe7   :  { %v12891_v47 = vadd.f32 %v12890_v52, %v12889_v44  ;;  %v12912_v27 = vpop.f32.mrb[73].mxu1  ;;  %v12892_v58 = vpop.f32.mrb[70].mxu0 }
 0xbe8   :  { %v12913_v59 = vadd.f32 %v12912_v27, %v12911_v16  ;;  %v12914_v54 = vpop.f32.mrb[74].mxu1  ;;  %v12893_v61 = vpop.f32.mrb[71].mxu0 }
 0xbe9   :  { %v11130_v1 = vadd.f32 %v12891_v47, %v9850_v45  ;;  %v12915_v62 = vpop.f32.mrb[75].mxu1 }
 0xbeb   :  { %v11170_v63 = vadd.f32 %v12913_v59, %v11130_v1 }
 0xbfd   :  { %v11209_v48 = vpop.f32.mrb[72].mxu0 }
 0xbfe   :  { %v11210_v10 = vadd.f32 %v11209_v48, %v11170_v63  ;;  %v13076_v55 = vpop.f32.mrb[73].mxu0 }
 0xbff   :  { %v11212_v36 = vpop.f32.mrb[74].mxu0 }
 0xc00   :  { %v11243_v40 = vrot.slane %v11210_v10, %v15376_v49  ;;  %v13077_v0 = vpop.f32.mrb[75].mxu0 }
 0xc02   :  { %11248 = vst.msk [vmem:[#allocation17 + $0x8] sm:$0x3] %vm11247_vm7, %v11243_v40 }
 0xc03   :  { %15128 = shalt.err (!%p15125_p0)
}
 0xc04   :  { %s15129_s11 = scalar_lea.hbm %s15947_s9, 160 }
 0xc05   :  { %p15130_p1 = scmp.ne.s32.totalorder %s15947_s9, %s15129_s11  ;;  %p15133_p2 = scmp.lt.u32.totalorder %s15129_s11, %s15947_s9 }
 0xc07   :  { %p15135_p3 = pnand %p15133_p2, %p15130_p1 }
 0xc09   :  { %15138 = shalt.err (!%p15135_p3)
}
 0xc0a   :  { %11258 = dma.vmem_to_hbm [thread:$0]  %s11256_s21, 160, %s15947_s9, [#allocation4]  }
 0xc0b   :  { %15149 = dma.done.wait [#allocation4], 160  }
 0xc0c   :  { %15150 = vsyncadd [#allocation4], 4294967136 }
 0xc0d   :  { %15151 = dma.done.wait [#allocation19], 32  }
 0xc0e   :  { %15152 = vsyncadd [#allocation19], 4294967264 }
 0xc0f   :  { %11275 = vsyncpa [#allocation3], 1 }
 0xc10   :  { %11276 = vsyncpa [#allocation6], 1 }
 0xc11   :  { %11277 = vsyncpa [#allocation9], 1 }
 0xc12   :  { %11278 = vsyncpa [#allocation12], 1 }
 0xc13   :  { %11279 = vsyncpa [#allocation15], 1 }
 0xc14   :  { %11280 = vsyncpa [#allocation4], 1 }
 0xc15   :  { %11281 = vsyncpa [#allocation19], 1 }

</bundles_post_ra>
